<compile_context>
chip_gen: v5e
topology: v5e:2x2
jax: 0.10.0
libtpu: 0.0.40
codegen_flags: <defaults>
</compile_context>

<pallas_src>
import functools

import numpy as np

import jax
import jax.numpy as jnp
from jax.experimental import pallas as pl
from jax.experimental.pallas import tpu as pltpu


# ---------------------------------------------------------------------------
# Static row-gather tables (conv1 LHS row order == conv2's buffer layout)
# ---------------------------------------------------------------------------
# conv2 reads conv1's pooled output through a 28-slab buffer laid out as
#   [e_lo(7) | o_lo(7) | e_hi(7) | o_hi(7)]   (rows of the H-padded y1)
# so its three shift-matmuls are the contiguous views buf[0:14], buf[7:21],
# buf[14:28].  _R[k] = conv1 pooled row that must live at slab k.  Slabs 0 and
# 27 are conv2's H-padding rows and are zeroed in-kernel (dummy indices here).
_R = ([0] + list(range(1, 13, 2))           # e_lo : Z, 1, 3, ..., 11
      + list(range(0, 14, 2))               # o_lo : 0, 2, ..., 12
      + list(range(1, 15, 2))               # e_hi : 1, 3, ..., 13
      + list(range(2, 14, 2)) + [13])       # o_hi : 2, 4, ..., 12, Z
# conv1 LHS rows are 90-wide row-triple windows of the padded 30x30 input:
#   first 28 rows  -> conv rows 2r   (window start 2r)
#   last 28 rows   -> conv rows 2r+1 (window start 2r+1)
_RIDX = np.array([2 * r for r in _R] + [2 * r + 1 for r in _R], dtype=np.int32)


# ---------------------------------------------------------------------------
# Fully fused forward kernel (one batch tile of TB samples per grid step)
# ---------------------------------------------------------------------------
def _fused_forward_kernel(x_ref, w1_ref, b1_ref, w2_ref, b2_ref,
                          wf1_ref, bf1_ref, wf2_ref, bf2_ref,
                          out_ref, y1_ref, *, tb):
    """x_ref  : (56*tb, 90)   conv1 LHS windows, rows ordered (slab k, sample b)
       w1_ref : (90, 1024)    K-stacked banded conv1 weights (cols: par*512+j*32+co)
       b1_ref : (1, 1024)     conv1 bias tiled over output columns
       w2_ref : (3, 512, 1024) banded conv2 weights, one slab per ky
       b2_ref : (1, 1024)
       wf1_ref: (7, 512, 128) fc1 weights, one slab per pooled row h
       bf1_ref: (1, 128)
       wf2_ref: (128, 128)    fc2 weights lane-padded 10 -> 128
       bf2_ref: (1, 128)
       out_ref: (tb, 128)     logits (only [:, :10] meaningful)
       y1_ref : (28*tb, 512)  VMEM scratch: conv1 pooled rows in conv2 view order
    """
    f32 = jnp.float32
    bf16 = jnp.bfloat16

    # ---- conv1 (3x3, pad 1) + bias + ReLU + 2x2 maxpool : ONE MXU dot ----
    s1 = jnp.dot(x_ref[...], w1_ref[...], preferred_element_type=f32)   # (56*tb, 1024)
    m1 = 28 * tb
    a1 = jnp.maximum(jnp.maximum(s1[:m1], s1[m1:]) + b1_ref[...], 0.0)  # H-pool+bias+relu
    p1 = jnp.maximum(a1[:, :512], a1[:, 512:])                          # W-pool (28*tb, 512)
    y1_ref[...] = p1.astype(bf16)
    zeros_row = jnp.zeros((tb, 512), bf16)
    y1_ref[0:tb, :] = zeros_row                  # conv2 top H-padding slab
    y1_ref[27 * tb:28 * tb, :] = zeros_row       # conv2 bottom H-padding slab

    # ---- conv2 + bias + ReLU + maxpool : 3 shift-dots off contiguous views ----
    s2 = (jnp.dot(y1_ref[0:14 * tb, :], w2_ref[0], preferred_element_type=f32)
          + jnp.dot(y1_ref[7 * tb:21 * tb, :], w2_ref[1], preferred_element_type=f32)
          + jnp.dot(y1_ref[14 * tb:28 * tb, :], w2_ref[2], preferred_element_type=f32))
    m2 = 7 * tb
    a2 = jnp.maximum(jnp.maximum(s2[:m2], s2[m2:]) + b2_ref[...], 0.0)
    p2 = jnp.maximum(a2[:, :512], a2[:, 512:]).astype(bf16)             # (7*tb, 512)

    # ---- fc1 + ReLU : sum of 7 per-row dots (no flatten relayout needed) ----
    acc = jnp.zeros((tb, 128), f32)
    for h in range(7):
        acc = acc + jnp.dot(p2[h * tb:(h + 1) * tb, :], wf1_ref[h],
                            preferred_element_type=f32)
    hvec = jnp.maximum(acc + bf1_ref[...], 0.0).astype(bf16)            # (tb, 128)
    # TODO(synk): nn.Dropout() implemented as eval-mode identity (no masking/scaling).

    # ---- fc2 (lane-padded to 128 outputs so the store stays lane-dense) ----
    out_ref[...] = jnp.dot(hvec, wf2_ref[...], preferred_element_type=f32) + bf2_ref[...]


# ---------------------------------------------------------------------------
# Full forward (mirrors Model.forward)
# ---------------------------------------------------------------------------
def model_forward(x_nchw, prep):
    bf16 = jnp.bfloat16
    B0 = x_nchw.shape[0]
    tb = B0 if B0 <= 16 else 16                 # batch tile (folds into dot M)
    bp = ((B0 + tb - 1) // tb) * tb
    nt = bp // tb

    x = x_nchw.reshape(B0, 28, 28).astype(bf16)
    if bp != B0:
        x = jnp.pad(x, ((0, bp - B0), (0, 0), (0, 0)))
    xp = jnp.pad(x, ((0, 0), (1, 1), (1, 1)))                                # (bp, 30, 30)
    # 90-wide row-triple windows + static gather into the conv1 LHS row order.
    xw = jnp.concatenate([xp[:, 0:28], xp[:, 1:29], xp[:, 2:30]], axis=-1)   # (bp, 28, 90)
    x1 = xw[:, _RIDX, :]                                                     # (bp, 56, 90)
    # rows ordered (tile t, slab k, sample b) so each grid step gets one block
    x1 = x1.reshape(nt, tb, 56, 90).transpose(0, 2, 1, 3).reshape(nt * 56 * tb, 90)

    kernel = functools.partial(_fused_forward_kernel, tb=tb)
    out = pl.pallas_call(
        kernel,
        out_shape=jax.ShapeDtypeStruct((bp, 128), jnp.float32),
        grid=(nt,),
        in_specs=[
            pl.BlockSpec((56 * tb, 90), lambda t: (t, 0)),
            pl.BlockSpec((90, 1024), lambda t: (0, 0)),          # resident
            pl.BlockSpec((1, 1024), lambda t: (0, 0)),           # resident
            pl.BlockSpec((3, 512, 1024), lambda t: (0, 0, 0)),   # resident
            pl.BlockSpec((1, 1024), lambda t: (0, 0)),           # resident
            pl.BlockSpec((7, 512, 128), lambda t: (0, 0, 0)),    # resident
            pl.BlockSpec((1, 128), lambda t: (0, 0)),            # resident
            pl.BlockSpec((128, 128), lambda t: (0, 0)),          # resident
            pl.BlockSpec((1, 128), lambda t: (0, 0)),            # resident
        ],
        out_specs=pl.BlockSpec((tb, 128), lambda t: (t, 0)),
        scratch_shapes=[pltpu.VMEM((28 * tb, 512), bf16)],
        compiler_params=pltpu.CompilerParams(
            dimension_semantics=("parallel",),
            vmem_limit_bytes=48 * 1024 * 1024),
    )(x1, prep["w1band"], prep["b1t"], prep["w2band"], prep["b2t"],
      prep["wfc1"], prep["bfc1"], prep["wfc2"], prep["bfc2"])
    return out[:B0, :10]


# ---------------------------------------------------------------------------
# One-time weight re-layout (hoisted out of the per-call path)
# ---------------------------------------------------------------------------
def prepare_params(params):
    w1 = np.asarray(params["w1"], np.float32)    # (32, 1, 3, 3)  [O,I,kh,kw]
    b1 = np.asarray(params["b1"], np.float32)
    w2 = np.asarray(params["w2"], np.float32)    # (64, 32, 3, 3)
    b2 = np.asarray(params["b2"], np.float32)
    wl1 = np.asarray(params["wl1"], np.float32)  # (128, 3136)
    bl1 = np.asarray(params["bl1"], np.float32)
    wl2 = np.asarray(params["wl2"], np.float32)  # (10, 128)
    bl2 = np.asarray(params["bl2"], np.float32)

    C1, C2, P1, P2, HALF = 32, 64, 14, 7, 512

    # conv1: K-stacked banded weights.  LHS lane d*30+wc = padded input (row h+d,
    # col wc); output col par*512 + j*32 + co = pooled col j, col-parity par, ch co.
    w1band = np.zeros((90, 1024), np.float32)
    b1t = np.zeros((1, 1024), np.float32)
    for d in range(3):
        for j in range(P1):
            for par in range(2):
                col = par * HALF + j * C1
                for kx in range(3):
                    w1band[d * 30 + 2 * j + par + kx, col:col + C1] = w1[:, 0, d, kx]
    for j in range(P1):
        for par in range(2):
            col = par * HALF + j * C1
            b1t[0, col:col + C1] = b1

    # conv2 banded weights: slab d, row w_in*32+ci, col par*512 + j*64 + co.
    w2band = np.zeros((3, HALF, 1024), np.float32)
    b2t = np.zeros((1, 1024), np.float32)
    for d in range(3):
        for j in range(P2):
            for par in range(2):
                col = par * HALF + j * C2
                for kx in range(3):
                    w_in = 2 * j + par + kx - 1
                    if 0 <= w_in < P1:
                        w2band[d, w_in * C1:(w_in + 1) * C1,
                               col:col + C2] = w2[:, :, d, kx].T
    for j in range(P2):
        for par in range(2):
            col = par * HALF + j * C2
            b2t[0, col:col + C2] = b2

    # fc1 as 7 per-pooled-row slabs (h, 512, 128); lanes 448..511 stay zero to
    # match the zero-padded lanes of the conv2 output (PyTorch flatten order
    # is c*49 + h*7 + w; our lane order within a row is w*64 + c).
    blk = wl1.reshape(128, C2, 7, 7).transpose(2, 3, 1, 0)   # (h, w, c, out)
    wfc1 = np.zeros((7, HALF, 128), np.float32)
    wfc1[:, :7 * C2, :] = blk.reshape(7, 7 * C2, 128)
    bfc1 = bl1.reshape(1, 128)

    # fc2 lane-padded 10 -> 128 so the kernel's final store is lane-dense.
    wfc2 = np.zeros((128, 128), np.float32)
    wfc2[:, :10] = wl2.T
    bfc2 = np.zeros((1, 128), np.float32)
    bfc2[0, :10] = bl2

    bf16 = jnp.bfloat16
    return {
        "w1band": jnp.asarray(w1band, bf16), "b1t": jnp.asarray(b1t, jnp.float32),
        "w2band": jnp.asarray(w2band, bf16), "b2t": jnp.asarray(b2t, jnp.float32),
        "wfc1": jnp.asarray(wfc1, bf16), "bfc1": jnp.asarray(bfc1, jnp.float32),
        "wfc2": jnp.asarray(wfc2, bf16), "bfc2": jnp.asarray(bfc2, jnp.float32),
    }


# ---------------------------------------------------------------------------
# Deterministic parameter init (PyTorch-style fan-in uniform bounds)
# ---------------------------------------------------------------------------
def init_params(key):
    ks = jax.random.split(key, 8)

    def u(k, shape, fan_in):
        bound = 1.0 / jnp.sqrt(float(fan_in))
        return jax.random.uniform(k, shape, jnp.float32, -bound, bound)

    return {
        "w1": u(ks[0], (32, 1, 3, 3), 1 * 9),
        "b1": u(ks[1], (32,), 1 * 9),
        "w2": u(ks[2], (64, 32, 3, 3), 32 * 9),
        "b2": u(ks[3], (64,), 32 * 9),
        "wl1": u(ks[4], (128, 64 * 7 * 7), 64 * 7 * 7),
        "bl1": u(ks[5], (128,), 64 * 7 * 7),
        "wl2": u(ks[6], (10, 128), 128),
        "bl2": u(ks[7], (10,), 128),
    }


# ---------------------------------------------------------------------------
# Pure-JAX reference (same bf16 operand quantization points as the kernel)
# ---------------------------------------------------------------------------
def reference_forward(x_nchw, params):
    f32, bf = jnp.float32, jnp.bfloat16
    q = lambda a: a.astype(bf).astype(f32)

    def conv(x, w, b):
        y = jax.lax.conv_general_dilated(
            x, q(w.astype(f32)), window_strides=(1, 1),
            padding=((1, 1), (1, 1)),
            dimension_numbers=("NCHW", "OIHW", "NCHW"),
            preferred_element_type=f32)
        return y + b.astype(f32)[None, :, None, None]

    def pool(x):
        return jax.lax.reduce_window(x, -jnp.inf, jax.lax.max,
                                     (1, 1, 2, 2), (1, 1, 2, 2), "VALID")

    x = q(x_nchw.astype(f32))
    y = q(pool(jax.nn.relu(conv(x, params["w1"], params["b1"]))))
    y = q(pool(jax.nn.relu(conv(y, params["w2"], params["b2"]))))
    y = y.reshape(y.shape[0], -1)
    h = q(jax.nn.relu(y @ q(params["wl1"].astype(f32)).T
                      + params["bl1"].astype(f32)))
    return h @ q(params["wl2"].astype(f32)).T + params["bl2"].astype(f32)


if __name__ == "__main__":
    key = jax.random.PRNGKey(0)
    pkey, xkey = jax.random.split(key)
    params = init_params(pkey)
    prep = prepare_params(params)
    # forward implies 28x28 single-channel input (64*7*7 flatten after two pools)
    x = jax.random.normal(xkey, (2, 1, 28, 28), jnp.float32)

    fwd = jax.jit(model_forward)
    out = fwd(x, prep)
    jax.block_until_ready(out)
    assert out.shape == (2, 10) and out.dtype == jnp.float32

    ref = reference_forward(x, params)
    err = float(jnp.max(jnp.abs(out - ref)))
    assert err < 5e-2, f"mismatch vs reference: {err}"
    print("KERNEL_OK")
</pallas_src>

<mosaic_0001>
module attributes {stable_mosaic.version = 11 : i64} {
  func.func @_fused_forward_kernel(%arg0: i32, %arg1: memref<112x90xbf16, #tpu.memory_space<vmem>>, %arg2: memref<90x1024xbf16, #tpu.memory_space<vmem>>, %arg3: memref<1x1024xf32, #tpu.memory_space<vmem>>, %arg4: memref<3x512x1024xbf16, #tpu.memory_space<vmem>>, %arg5: memref<1x1024xf32, #tpu.memory_space<vmem>>, %arg6: memref<7x512x128xbf16, #tpu.memory_space<vmem>>, %arg7: memref<1x128xf32, #tpu.memory_space<vmem>>, %arg8: memref<128x128xbf16, #tpu.memory_space<vmem>>, %arg9: memref<1x128xf32, #tpu.memory_space<vmem>>, %arg10: memref<2x128xf32, #tpu.memory_space<vmem>>, %arg11: memref<56x512xbf16, #tpu.memory_space<vmem>>) attributes {dimension_semantics = [#tpu.dimension_semantics<parallel>], iteration_bounds = array<i64: 1>, scalar_prefetch = 0 : i64, scratch_operands = 1 : i64, tpu.core_type = #tpu.core_type<tc>, window_params = [{transform_indices = @transform_0, window_bounds = array<i64: 112, 90>}, {pipeline_mode = #tpu.pipeline_mode<synchronous>, transform_indices = @transform_1, window_bounds = array<i64: 90, 1024>}, {pipeline_mode = #tpu.pipeline_mode<synchronous>, transform_indices = @transform_2, window_bounds = array<i64: 1, 1024>}, {pipeline_mode = #tpu.pipeline_mode<synchronous>, transform_indices = @transform_3, window_bounds = array<i64: 3, 512, 1024>}, {pipeline_mode = #tpu.pipeline_mode<synchronous>, transform_indices = @transform_4, window_bounds = array<i64: 1, 1024>}, {pipeline_mode = #tpu.pipeline_mode<synchronous>, transform_indices = @transform_5, window_bounds = array<i64: 7, 512, 128>}, {pipeline_mode = #tpu.pipeline_mode<synchronous>, transform_indices = @transform_6, window_bounds = array<i64: 1, 128>}, {pipeline_mode = #tpu.pipeline_mode<synchronous>, transform_indices = @transform_7, window_bounds = array<i64: 128, 128>}, {pipeline_mode = #tpu.pipeline_mode<synchronous>, transform_indices = @transform_8, window_bounds = array<i64: 1, 128>}, {transform_indices = @transform_9, window_bounds = array<i64: 2, 128>}]} {
    %c0 = arith.constant 0 : index
    %c0_0 = arith.constant 0 : index
    %0 = vector.load %arg1[%c0, %c0_0] : memref<112x90xbf16, #tpu.memory_space<vmem>>, vector<112x90xbf16>
    %c0_1 = arith.constant 0 : index
    %c0_2 = arith.constant 0 : index
    %1 = vector.load %arg2[%c0_1, %c0_2] : memref<90x1024xbf16, #tpu.memory_space<vmem>>, vector<90x1024xbf16>
    %cst = arith.constant dense<0.000000e+00> : vector<112x1024xf32>
    %2 = tpu.matmul %0, %1, %cst {dimension_numbers = #tpu.dot_dimension_numbers<[1], [0], [0], [1], [0, 0, 1, 1], [], []>} : vector<112x90xbf16>, vector<90x1024xbf16>, vector<112x1024xf32> -> vector<112x1024xf32>
    %3 = vector.extract_strided_slice %2 {offsets = [0, 0], sizes = [56, 1024], strides = [1, 1]} : vector<112x1024xf32> to vector<56x1024xf32>
    %4 = vector.extract_strided_slice %2 {offsets = [56, 0], sizes = [56, 1024], strides = [1, 1]} : vector<112x1024xf32> to vector<56x1024xf32>
    %5 = arith.maximumf %3, %4 : vector<56x1024xf32>
    %c0_3 = arith.constant 0 : index
    %c0_4 = arith.constant 0 : index
    %6 = vector.load %arg3[%c0_3, %c0_4] : memref<1x1024xf32, #tpu.memory_space<vmem>>, vector<1x1024xf32>
    %7 = vector.broadcast %6 : vector<1x1024xf32> to vector<56x1024xf32>
    %8 = arith.addf %5, %7 : vector<56x1024xf32>
    %cst_5 = arith.constant 0.000000e+00 : f32
    %9 = vector.broadcast %cst_5 : f32 to vector<56x1024xf32>
    %10 = arith.maximumf %8, %9 : vector<56x1024xf32>
    %11 = vector.extract_strided_slice %10 {offsets = [0, 0], sizes = [56, 512], strides = [1, 1]} : vector<56x1024xf32> to vector<56x512xf32>
    %12 = vector.extract_strided_slice %10 {offsets = [0, 512], sizes = [56, 512], strides = [1, 1]} : vector<56x1024xf32> to vector<56x512xf32>
    %13 = arith.maximumf %11, %12 : vector<56x512xf32>
    %14 = arith.truncf %13 : vector<56x512xf32> to vector<56x512xbf16>
    %c0_6 = arith.constant 0 : index
    %c0_7 = arith.constant 0 : index
    %15 = vector.load %arg11[%c0_6, %c0_7] : memref<56x512xbf16, #tpu.memory_space<vmem>>, vector<56x512xbf16>
    tpu.vector_store %arg11[%c0_6, %c0_7], %14 {strides = array<i32>} : memref<56x512xbf16, #tpu.memory_space<vmem>>, vector<56x512xbf16>,
    %cst_8 = arith.constant 0.000000e+00 : bf16
    %16 = vector.broadcast %cst_8 : bf16 to vector<2x512xbf16>
    %c0_9 = arith.constant 0 : index
    %c0_10 = arith.constant 0 : index
    %17 = vector.load %arg11[%c0_9, %c0_10] : memref<56x512xbf16, #tpu.memory_space<vmem>>, vector<2x512xbf16>
    tpu.vector_store %arg11[%c0_9, %c0_10], %16 {strides = array<i32>} : memref<56x512xbf16, #tpu.memory_space<vmem>>, vector<2x512xbf16>,
    %c54 = arith.constant 54 : index
    %c0_11 = arith.constant 0 : index
    %18 = vector.load %arg11[%c54, %c0_11] : memref<56x512xbf16, #tpu.memory_space<vmem>>, vector<2x512xbf16>
    tpu.vector_store %arg11[%c54, %c0_11], %16 {strides = array<i32>} : memref<56x512xbf16, #tpu.memory_space<vmem>>, vector<2x512xbf16>,
    %c0_12 = arith.constant 0 : index
    %c0_13 = arith.constant 0 : index
    %19 = vector.load %arg11[%c0_12, %c0_13] : memref<56x512xbf16, #tpu.memory_space<vmem>>, vector<28x512xbf16>
    %c0_14 = arith.constant 0 : index
    %c0_15 = arith.constant 0 : index
    %c0_16 = arith.constant 0 : index
    %20 = vector.load %arg4[%c0_14, %c0_15, %c0_16] : memref<3x512x1024xbf16, #tpu.memory_space<vmem>>, vector<1x512x1024xbf16>
    %21 = vector.shape_cast %20 : vector<1x512x1024xbf16> to vector<512x1024xbf16>
    %cst_17 = arith.constant dense<0.000000e+00> : vector<28x1024xf32>
    %22 = tpu.matmul %19, %21, %cst_17 {dimension_numbers = #tpu.dot_dimension_numbers<[1], [0], [0], [1], [0, 0, 1, 1], [], []>} : vector<28x512xbf16>, vector<512x1024xbf16>, vector<28x1024xf32> -> vector<28x1024xf32>
    %c14 = arith.constant 14 : index
    %c0_18 = arith.constant 0 : index
    %23 = vector.load %arg11[%c14, %c0_18] : memref<56x512xbf16, #tpu.memory_space<vmem>>, vector<28x512xbf16>
    %c1 = arith.constant 1 : index
    %c0_19 = arith.constant 0 : index
    %c0_20 = arith.constant 0 : index
    %24 = vector.load %arg4[%c1, %c0_19, %c0_20] : memref<3x512x1024xbf16, #tpu.memory_space<vmem>>, vector<1x512x1024xbf16>
    %25 = vector.shape_cast %24 : vector<1x512x1024xbf16> to vector<512x1024xbf16>
    %cst_21 = arith.constant dense<0.000000e+00> : vector<28x1024xf32>
    %26 = tpu.matmul %23, %25, %cst_21 {dimension_numbers = #tpu.dot_dimension_numbers<[1], [0], [0], [1], [0, 0, 1, 1], [], []>} : vector<28x512xbf16>, vector<512x1024xbf16>, vector<28x1024xf32> -> vector<28x1024xf32>
    %27 = arith.addf %22, %26 : vector<28x1024xf32>
    %c28 = arith.constant 28 : index
    %c0_22 = arith.constant 0 : index
    %28 = vector.load %arg11[%c28, %c0_22] : memref<56x512xbf16, #tpu.memory_space<vmem>>, vector<28x512xbf16>
    %c2 = arith.constant 2 : index
    %c0_23 = arith.constant 0 : index
    %c0_24 = arith.constant 0 : index
    %29 = vector.load %arg4[%c2, %c0_23, %c0_24] : memref<3x512x1024xbf16, #tpu.memory_space<vmem>>, vector<1x512x1024xbf16>
    %30 = vector.shape_cast %29 : vector<1x512x1024xbf16> to vector<512x1024xbf16>
    %cst_25 = arith.constant dense<0.000000e+00> : vector<28x1024xf32>
    %31 = tpu.matmul %28, %30, %cst_25 {dimension_numbers = #tpu.dot_dimension_numbers<[1], [0], [0], [1], [0, 0, 1, 1], [], []>} : vector<28x512xbf16>, vector<512x1024xbf16>, vector<28x1024xf32> -> vector<28x1024xf32>
    %32 = arith.addf %27, %31 : vector<28x1024xf32>
    %33 = vector.extract_strided_slice %32 {offsets = [0, 0], sizes = [14, 1024], strides = [1, 1]} : vector<28x1024xf32> to vector<14x1024xf32>
    %34 = vector.extract_strided_slice %32 {offsets = [14, 0], sizes = [14, 1024], strides = [1, 1]} : vector<28x1024xf32> to vector<14x1024xf32>
    %35 = arith.maximumf %33, %34 : vector<14x1024xf32>
    %c0_26 = arith.constant 0 : index
    %c0_27 = arith.constant 0 : index
    %36 = vector.load %arg5[%c0_26, %c0_27] : memref<1x1024xf32, #tpu.memory_space<vmem>>, vector<1x1024xf32>
    %37 = vector.broadcast %36 : vector<1x1024xf32> to vector<14x1024xf32>
    %38 = arith.addf %35, %37 : vector<14x1024xf32>
    %cst_28 = arith.constant 0.000000e+00 : f32
    %39 = vector.broadcast %cst_28 : f32 to vector<14x1024xf32>
    %40 = arith.maximumf %38, %39 : vector<14x1024xf32>
    %41 = vector.extract_strided_slice %40 {offsets = [0, 0], sizes = [14, 512], strides = [1, 1]} : vector<14x1024xf32> to vector<14x512xf32>
    %42 = vector.extract_strided_slice %40 {offsets = [0, 512], sizes = [14, 512], strides = [1, 1]} : vector<14x1024xf32> to vector<14x512xf32>
    %43 = arith.maximumf %41, %42 : vector<14x512xf32>
    %44 = arith.truncf %43 : vector<14x512xf32> to vector<14x512xbf16>
    %cst_29 = arith.constant 0.000000e+00 : f32
    %45 = vector.broadcast %cst_29 : f32 to vector<2x128xf32>
    %46 = vector.extract_strided_slice %44 {offsets = [0, 0], sizes = [2, 512], strides = [1, 1]} : vector<14x512xbf16> to vector<2x512xbf16>
    %c0_30 = arith.constant 0 : index
    %c0_31 = arith.constant 0 : index
    %c0_32 = arith.constant 0 : index
    %47 = vector.load %arg6[%c0_30, %c0_31, %c0_32] : memref<7x512x128xbf16, #tpu.memory_space<vmem>>, vector<1x512x128xbf16>
    %48 = vector.shape_cast %47 : vector<1x512x128xbf16> to vector<512x128xbf16>
    %cst_33 = arith.constant dense<0.000000e+00> : vector<2x128xf32>
    %49 = tpu.matmul %46, %48, %cst_33 {dimension_numbers = #tpu.dot_dimension_numbers<[1], [0], [0], [1], [0, 0, 1, 1], [], []>} : vector<2x512xbf16>, vector<512x128xbf16>, vector<2x128xf32> -> vector<2x128xf32>
    %50 = arith.addf %45, %49 : vector<2x128xf32>
    %51 = vector.extract_strided_slice %44 {offsets = [2, 0], sizes = [2, 512], strides = [1, 1]} : vector<14x512xbf16> to vector<2x512xbf16>
    %c1_34 = arith.constant 1 : index
    %c0_35 = arith.constant 0 : index
    %c0_36 = arith.constant 0 : index
    %52 = vector.load %arg6[%c1_34, %c0_35, %c0_36] : memref<7x512x128xbf16, #tpu.memory_space<vmem>>, vector<1x512x128xbf16>
    %53 = vector.shape_cast %52 : vector<1x512x128xbf16> to vector<512x128xbf16>
    %cst_37 = arith.constant dense<0.000000e+00> : vector<2x128xf32>
    %54 = tpu.matmul %51, %53, %cst_37 {dimension_numbers = #tpu.dot_dimension_numbers<[1], [0], [0], [1], [0, 0, 1, 1], [], []>} : vector<2x512xbf16>, vector<512x128xbf16>, vector<2x128xf32> -> vector<2x128xf32>
    %55 = arith.addf %50, %54 : vector<2x128xf32>
    %56 = vector.extract_strided_slice %44 {offsets = [4, 0], sizes = [2, 512], strides = [1, 1]} : vector<14x512xbf16> to vector<2x512xbf16>
    %c2_38 = arith.constant 2 : index
    %c0_39 = arith.constant 0 : index
    %c0_40 = arith.constant 0 : index
    %57 = vector.load %arg6[%c2_38, %c0_39, %c0_40] : memref<7x512x128xbf16, #tpu.memory_space<vmem>>, vector<1x512x128xbf16>
    %58 = vector.shape_cast %57 : vector<1x512x128xbf16> to vector<512x128xbf16>
    %cst_41 = arith.constant dense<0.000000e+00> : vector<2x128xf32>
    %59 = tpu.matmul %56, %58, %cst_41 {dimension_numbers = #tpu.dot_dimension_numbers<[1], [0], [0], [1], [0, 0, 1, 1], [], []>} : vector<2x512xbf16>, vector<512x128xbf16>, vector<2x128xf32> -> vector<2x128xf32>
    %60 = arith.addf %55, %59 : vector<2x128xf32>
    %61 = vector.extract_strided_slice %44 {offsets = [6, 0], sizes = [2, 512], strides = [1, 1]} : vector<14x512xbf16> to vector<2x512xbf16>
    %c3 = arith.constant 3 : index
    %c0_42 = arith.constant 0 : index
    %c0_43 = arith.constant 0 : index
    %62 = vector.load %arg6[%c3, %c0_42, %c0_43] : memref<7x512x128xbf16, #tpu.memory_space<vmem>>, vector<1x512x128xbf16>
    %63 = vector.shape_cast %62 : vector<1x512x128xbf16> to vector<512x128xbf16>
    %cst_44 = arith.constant dense<0.000000e+00> : vector<2x128xf32>
    %64 = tpu.matmul %61, %63, %cst_44 {dimension_numbers = #tpu.dot_dimension_numbers<[1], [0], [0], [1], [0, 0, 1, 1], [], []>} : vector<2x512xbf16>, vector<512x128xbf16>, vector<2x128xf32> -> vector<2x128xf32>
    %65 = arith.addf %60, %64 : vector<2x128xf32>
    %66 = vector.extract_strided_slice %44 {offsets = [8, 0], sizes = [2, 512], strides = [1, 1]} : vector<14x512xbf16> to vector<2x512xbf16>
    %c4 = arith.constant 4 : index
    %c0_45 = arith.constant 0 : index
    %c0_46 = arith.constant 0 : index
    %67 = vector.load %arg6[%c4, %c0_45, %c0_46] : memref<7x512x128xbf16, #tpu.memory_space<vmem>>, vector<1x512x128xbf16>
    %68 = vector.shape_cast %67 : vector<1x512x128xbf16> to vector<512x128xbf16>
    %cst_47 = arith.constant dense<0.000000e+00> : vector<2x128xf32>
    %69 = tpu.matmul %66, %68, %cst_47 {dimension_numbers = #tpu.dot_dimension_numbers<[1], [0], [0], [1], [0, 0, 1, 1], [], []>} : vector<2x512xbf16>, vector<512x128xbf16>, vector<2x128xf32> -> vector<2x128xf32>
    %70 = arith.addf %65, %69 : vector<2x128xf32>
    %71 = vector.extract_strided_slice %44 {offsets = [10, 0], sizes = [2, 512], strides = [1, 1]} : vector<14x512xbf16> to vector<2x512xbf16>
    %c5 = arith.constant 5 : index
    %c0_48 = arith.constant 0 : index
    %c0_49 = arith.constant 0 : index
    %72 = vector.load %arg6[%c5, %c0_48, %c0_49] : memref<7x512x128xbf16, #tpu.memory_space<vmem>>, vector<1x512x128xbf16>
    %73 = vector.shape_cast %72 : vector<1x512x128xbf16> to vector<512x128xbf16>
    %cst_50 = arith.constant dense<0.000000e+00> : vector<2x128xf32>
    %74 = tpu.matmul %71, %73, %cst_50 {dimension_numbers = #tpu.dot_dimension_numbers<[1], [0], [0], [1], [0, 0, 1, 1], [], []>} : vector<2x512xbf16>, vector<512x128xbf16>, vector<2x128xf32> -> vector<2x128xf32>
    %75 = arith.addf %70, %74 : vector<2x128xf32>
    %76 = vector.extract_strided_slice %44 {offsets = [12, 0], sizes = [2, 512], strides = [1, 1]} : vector<14x512xbf16> to vector<2x512xbf16>
    %c6 = arith.constant 6 : index
    %c0_51 = arith.constant 0 : index
    %c0_52 = arith.constant 0 : index
    %77 = vector.load %arg6[%c6, %c0_51, %c0_52] : memref<7x512x128xbf16, #tpu.memory_space<vmem>>, vector<1x512x128xbf16>
    %78 = vector.shape_cast %77 : vector<1x512x128xbf16> to vector<512x128xbf16>
    %cst_53 = arith.constant dense<0.000000e+00> : vector<2x128xf32>
    %79 = tpu.matmul %76, %78, %cst_53 {dimension_numbers = #tpu.dot_dimension_numbers<[1], [0], [0], [1], [0, 0, 1, 1], [], []>} : vector<2x512xbf16>, vector<512x128xbf16>, vector<2x128xf32> -> vector<2x128xf32>
    %80 = arith.addf %75, %79 : vector<2x128xf32>
    %c0_54 = arith.constant 0 : index
    %c0_55 = arith.constant 0 : index
    %81 = vector.load %arg7[%c0_54, %c0_55] : memref<1x128xf32, #tpu.memory_space<vmem>>, vector<1x128xf32>
    %82 = vector.broadcast %81 : vector<1x128xf32> to vector<2x128xf32>
    %83 = arith.addf %80, %82 : vector<2x128xf32>
    %cst_56 = arith.constant 0.000000e+00 : f32
    %84 = vector.broadcast %cst_56 : f32 to vector<2x128xf32>
    %85 = arith.maximumf %83, %84 : vector<2x128xf32>
    %86 = arith.truncf %85 : vector<2x128xf32> to vector<2x128xbf16>
    %c0_57 = arith.constant 0 : index
    %c0_58 = arith.constant 0 : index
    %87 = vector.load %arg8[%c0_57, %c0_58] : memref<128x128xbf16, #tpu.memory_space<vmem>>, vector<128x128xbf16>
    %cst_59 = arith.constant dense<0.000000e+00> : vector<2x128xf32>
    %88 = tpu.matmul %86, %87, %cst_59 {dimension_numbers = #tpu.dot_dimension_numbers<[1], [0], [0], [1], [0, 0, 1, 1], [], []>} : vector<2x128xbf16>, vector<128x128xbf16>, vector<2x128xf32> -> vector<2x128xf32>
    %c0_60 = arith.constant 0 : index
    %c0_61 = arith.constant 0 : index
    %89 = vector.load %arg9[%c0_60, %c0_61] : memref<1x128xf32, #tpu.memory_space<vmem>>, vector<1x128xf32>
    %90 = vector.broadcast %89 : vector<1x128xf32> to vector<2x128xf32>
    %91 = arith.addf %88, %90 : vector<2x128xf32>
    %c0_62 = arith.constant 0 : index
    %c0_63 = arith.constant 0 : index
    %92 = vector.load %arg10[%c0_62, %c0_63] : memref<2x128xf32, #tpu.memory_space<vmem>>, vector<2x128xf32>
    tpu.vector_store %arg10[%c0_62, %c0_63], %91 {strides = array<i32>} : memref<2x128xf32, #tpu.memory_space<vmem>>, vector<2x128xf32>,
    return
  }
  func.func @transform_0(%arg0: i32) -> (i32, i32) {
    %c0_i32 = arith.constant 0 : i32
    %c0_i32_0 = arith.constant 0 : i32
    return %arg0, %c0_i32 : i32, i32
  }
  func.func @transform_1(%arg0: i32) -> (i32, i32) {
    %c0_i32 = arith.constant 0 : i32
    %c0_i32_0 = arith.constant 0 : i32
    %c0_i32_1 = arith.constant 0 : i32
    return %c0_i32, %c0_i32_0 : i32, i32
  }
  func.func @transform_2(%arg0: i32) -> (i32, i32) {
    %c0_i32 = arith.constant 0 : i32
    %c0_i32_0 = arith.constant 0 : i32
    %c0_i32_1 = arith.constant 0 : i32
    return %c0_i32, %c0_i32_0 : i32, i32
  }
  func.func @transform_3(%arg0: i32) -> (i32, i32, i32) {
    %c0_i32 = arith.constant 0 : i32
    %c0_i32_0 = arith.constant 0 : i32
    %c0_i32_1 = arith.constant 0 : i32
    %c0_i32_2 = arith.constant 0 : i32
    return %c0_i32, %c0_i32_0, %c0_i32_1 : i32, i32, i32
  }
  func.func @transform_4(%arg0: i32) -> (i32, i32) {
    %c0_i32 = arith.constant 0 : i32
    %c0_i32_0 = arith.constant 0 : i32
    %c0_i32_1 = arith.constant 0 : i32
    return %c0_i32, %c0_i32_0 : i32, i32
  }
  func.func @transform_5(%arg0: i32) -> (i32, i32, i32) {
    %c0_i32 = arith.constant 0 : i32
    %c0_i32_0 = arith.constant 0 : i32
    %c0_i32_1 = arith.constant 0 : i32
    %c0_i32_2 = arith.constant 0 : i32
    return %c0_i32, %c0_i32_0, %c0_i32_1 : i32, i32, i32
  }
  func.func @transform_6(%arg0: i32) -> (i32, i32) {
    %c0_i32 = arith.constant 0 : i32
    %c0_i32_0 = arith.constant 0 : i32
    %c0_i32_1 = arith.constant 0 : i32
    return %c0_i32, %c0_i32_0 : i32, i32
  }
  func.func @transform_7(%arg0: i32) -> (i32, i32) {
    %c0_i32 = arith.constant 0 : i32
    %c0_i32_0 = arith.constant 0 : i32
    %c0_i32_1 = arith.constant 0 : i32
    return %c0_i32, %c0_i32_0 : i32, i32
  }
  func.func @transform_8(%arg0: i32) -> (i32, i32) {
    %c0_i32 = arith.constant 0 : i32
    %c0_i32_0 = arith.constant 0 : i32
    %c0_i32_1 = arith.constant 0 : i32
    return %c0_i32, %c0_i32_0 : i32, i32
  }
  func.func @transform_9(%arg0: i32) -> (i32, i32) {
    %c0_i32 = arith.constant 0 : i32
    %c0_i32_0 = arith.constant 0 : i32
    return %arg0, %c0_i32 : i32, i32
  }
}

</mosaic_0001>

<bundles_post_ra>
// kernel: model_forward.1
= control target key start
LH: loop header
LB: loop body
LE: loop exit
PB: predicated region body
PF: predicated region fallthrough
CT: control target
= control target key end

     0   :  { %14 = vsyncpa [#allocation4], 0  ;;  %s17919_s0 = inlined_call_operand.vmem [shape: bf16[112,90], index: 0, kind: input, shape index: {}]   ;;  %s17920_s1 = inlined_call_operand.hbm [shape: bf16[90,1024], index: 1, kind: input, shape index: {}]   ;;  %s17921_s2 = inlined_call_operand.hbm [shape: f32[1,1024], index: 2, kind: input, shape index: {}]   ;;  %s17922_s3 = inlined_call_operand.hbm [shape: bf16[3,512,1024], index: 3, kind: input, shape index: {}]   ;;  %s17923_s4 = inlined_call_operand.hbm [shape: f32[1,1024], index: 4, kind: input, shape index: {}]   ;;  %s17924_s5 = inlined_call_operand.hbm [shape: bf16[7,512,128], index: 5, kind: input, shape index: {}]   ;;  %s17925_s6 = inlined_call_operand.hbm [shape: f32[1,128], index: 6, kind: input, shape index: {}]   ;;  %s17926_s7 = inlined_call_operand.hbm [shape: bf16[128,128], index: 7, kind: input, shape index: {}]   ;;  %s17927_s8 = inlined_call_operand.hbm [shape: f32[1,128], index: 8, kind: input, shape index: {}]   ;;  %s17928_s9 = inlined_call_operand.hbm [shape: f32[2,128], index: 9, kind: output, shape index: {}]  }
   0x1   :  { %15 = vsyncpa [#allocation7], 0 }
   0x2   :  { %16 = vsyncpa [#allocation10], 0 }
   0x3   :  { %17 = vsyncpa [#allocation13], 0 }
   0x4   :  { %18 = vsyncpa [#allocation16], 0  ;;  %s40_s11 = sshll.u32 %s17921_s2, 4  ;;  %s41_s11 = int_to_ptr.hbm [resolvable:$true] %s40_s11 }
   0x5   :  { %19 = vsyncpa [#allocation5], 0  ;;  %s15939_s12 = smov [#allocation6]   ;;  %s64_s16 = sshll.u32 %s17923_s4, 4  ;;  %s65_s16 = int_to_ptr.hbm [resolvable:$true] %s64_s16 }
   0x6   :  { %s42_s13 = sshll.u32 %s15939_s12, 4  ;;  %s15940_s17 = smov [#allocation9]   ;;  %s43_s13 = int_to_ptr.vmem [resolvable:$true] %s42_s13 }
   0x7   :  { %45 = dma.hbm_to_vmem [thread:$0]  %s41_s11, 128, %s43_s13, [#allocation7]  }
   0x8   :  { %s66_s18 = sshll.u32 %s15940_s17, 4  ;;  %s88_s21 = sshll.u32 %s17925_s6, 4  ;;  %s67_s18 = int_to_ptr.vmem [resolvable:$true] %s66_s18  ;;  %s89_s21 = int_to_ptr.hbm [resolvable:$true] %s88_s21 }
   0x9   :  { %69 = dma.hbm_to_vmem [thread:$0]  %s65_s16, 128, %s67_s18, [#allocation10]  }
   0xa   :  { %s26_s23 = sshll.u32 %s17920_s1, 4  ;;  %s15941_s24 = smov [#allocation12]   ;;  %s27_s23 = int_to_ptr.hbm [resolvable:$true] %s26_s23 }
   0xb   :  { %s90_s25 = sshll.u32 %s15941_s24, 4  ;;  %s15942_s4 = smov [#allocation3]   ;;  %s91_s25 = int_to_ptr.vmem [resolvable:$true] %s90_s25 }
   0xc   :  { %93 = dma.hbm_to_vmem [thread:$0]  %s89_s21, 16, %s91_s25, [#allocation13]  }
   0xd   :  { %s28_s26 = sshll.u32 %s15942_s4, 4  ;;  %s15943_s27 = smov 512   ;;  %s29_s26 = int_to_ptr.vmem [resolvable:$true] %s28_s26 }
   0xe   :  { %s15944_s28 = smov 32   ;;  %s50_s30 = sshll.u32 %s17922_s3, 4  ;;  %s51_s30 = int_to_ptr.hbm [resolvable:$true] %s50_s30 }
   0xf   :  { %34 = dma.hbm_to_vmem [thread:$0]  %s27_s23, 6144, %s29_s26, [#allocation4], %s15943_s27, %s15943_s27, %s15944_s28  }
  0x10   :  { %s15945_s10 = smov [#allocation8]   ;;  %s74_s13 = sshll.u32 %s17924_s5, 4  ;;  %s75_s13 = int_to_ptr.hbm [resolvable:$true] %s74_s13 }
  0x11   :  { %s52_s11 = sshll.u32 %s15945_s10, 4  ;;  %s15946_s14 = smov [#allocation11]   ;;  %s53_s11 = int_to_ptr.vmem [resolvable:$true] %s52_s11 }
  0x12   :  { %58 = dma.hbm_to_vmem [thread:$0]  %s51_s30, 98304, %s53_s11, [#allocation7], %s15943_s27, %s15943_s27, %s15944_s28  }
  0x13   :  { %s76_s15 = sshll.u32 %s15946_s14, 4  ;;  %s15947_s16 = smov 64   ;;  %s77_s15 = int_to_ptr.vmem [resolvable:$true] %s76_s15 }
  0x14   :  { %s15948_s17 = smov 4   ;;  %s98_s3 = sshll.u32 %s17926_s7, 4  ;;  %s99_s3 = int_to_ptr.hbm [resolvable:$true] %s98_s3 }
  0x15   :  { %82 = dma.hbm_to_vmem [thread:$0]  %s75_s13, 28672, %s77_s15, [#allocation10], %s15947_s16, %s15947_s16, %s15948_s17  }
  0x16   :  { %s15949_s20 = smov [#allocation14]   ;;  %s112_s5 = sshll.u32 %s17927_s8, 4  ;;  %s113_s5 = int_to_ptr.hbm [resolvable:$true] %s112_s5 }
  0x17   :  { %s100_s21 = sshll.u32 %s15949_s20, 4  ;;  %s15950_s23 = smov [#allocation15]   ;;  %s101_s21 = int_to_ptr.vmem [resolvable:$true] %s100_s21 }
  0x18   :  { %106 = dma.hbm_to_vmem [thread:$0]  %s99_s3, 1024, %s101_s21, [#allocation13], %s15947_s16, %s15947_s16, %s15948_s17  }
  0x19   :  { %s114_s24 = sshll.u32 %s15950_s23, 4  ;;  %s115_s24 = int_to_ptr.vmem [resolvable:$true] %s114_s24 }
  0x1a   :  { %117 = dma.hbm_to_vmem [thread:$0]  %s113_s5, 16, %s115_s24, [#allocation16]  }
  0x1b   :  { %15927 = dma.done.wait [#allocation4], 6144  }
  0x1c   :  { %15928 = vsyncadd [#allocation4], 4294961152 }
  0x1d   :  { %15929 = dma.done.wait [#allocation7], 98432  }
  0x1e   :  { %15930 = vsyncadd [#allocation7], 4294868864 }
  0x1f   :  { %15931 = dma.done.wait [#allocation10], 28800  }
  0x20   :  { %15932 = vsyncadd [#allocation10], 4294938496 }
  0x21   :  { %15933 = dma.done.wait [#allocation13], 1040  }
  0x22   :  { %15934 = vsyncadd [#allocation13], 4294966256 }
  0x23   :  { %15935 = dma.done.wait [#allocation16], 16  }
  0x24   :  { %15936 = vsyncadd [#allocation16], 4294967280  ;;  %vm502_vm0 = vcmask 1044480   ;;  %v10467_v0 = vld [vmem:[#allocation3 + $0x140] sm:$0xf]  ;;  %v16033_v60 = vld [vmem:[%s17919_s0] sm:$0xff] }
  0x25   :  { %v14668_v1 = vld [vmem:[#allocation3 + $0x15c] sm:$0x10]  ;;  %v10475_v2 = vld [vmem:[#allocation3 + $0x148] sm:$0xf]  ;;  %v14665_v5 = vld [vmem:[#allocation3 + $0x14c] sm:$0xf] }
  0x26   :  { %v10468_v3 = vor.u32 %v14668_v1, %v10467_v0  ;;  %v14669_v4 = vld [vmem:[#allocation3 + $0x164] sm:$0x10]  ;;  %v10477_v6 = vld [vmem:[#allocation3 + $0x168] sm:$0x10]  ;;  %v10435_v9 = vld [vmem:[#allocation3 + $0x100] sm:$0xf] }
  0x27   :  { %v10476_v7 = vor.u32 %v14669_v4, %v10475_v2  ;;  %v10480_v8 = vor.u32 %v14665_v5, %v10477_v6  ;;  %v14660_v10 = vld [vmem:[#allocation3 + $0x11c] sm:$0xf0]  ;;  %v10443_v11 = vld [vmem:[#allocation3 + $0x108] sm:$0xf]  ;;  %v14657_v14 = vld [vmem:[#allocation3 + $0x10c] sm:$0xf] }
  0x28   :  { %v504_v12 = vsel %vm502_vm0, %v10468_v3, 0  ;;  %v14661_v13 = vld [vmem:[#allocation3 + $0x124] sm:$0xf0]  ;;  %v10436_v17 = vor.u32 %v14660_v10, %v10435_v9  ;;  %v10445_v18 = vld [vmem:[#allocation3 + $0x128] sm:$0xf0]  ;;  %v16039_v62 = vld [vmem:[%s17919_s0 + $0x30] sm:$0xff] }
  0x29   :  { %529 = vmatpush.bf16.msra.mxu0 %v504_v12  ;;  %15688 = vmatpush.bf16.msra.mxu1 %v504_v12  ;;  %v510_v15 = vsel %vm502_vm0, %v10476_v7, 0  ;;  %v513_v16 = vsel %vm502_vm0, %v10480_v8, 0  ;;  %v10444_v19 = vor.u32 %v14661_v13, %v10443_v11  ;;  %v10448_v20 = vor.u32 %v14657_v14, %v10445_v18  ;;  %v10403_v21 = vld [vmem:[#allocation3 + $0xc0] sm:$0xf]  ;;  %v10411_v23 = vld [vmem:[#allocation3 + $0xc8] sm:$0xf] }
  0x2a   :  { %617 = vmatpush.bf16.msra.mxu2 %v510_v15  ;;  %661 = vmatpush.bf16.msra.mxu3 %v513_v16  ;;  %v14652_v22 = vld [vmem:[#allocation3 + $0xdc] sm:$0xf0]  ;;  %v14653_v24 = vld [vmem:[#allocation3 + $0xe4] sm:$0xf0]  ;;  %v14649_v25 = vld [vmem:[#allocation3 + $0xcc] sm:$0xf] }
  0x2b   :  { %v10413_v26 = vld [vmem:[#allocation3 + $0xe8] sm:$0xf0]  ;;  %v10404_v27 = vor.u32 %v14652_v22, %v10403_v21  ;;  %v10412_v28 = vor.u32 %v14653_v24, %v10411_v23  ;;  %v10371_v30 = vld [vmem:[#allocation3 + $0x80] sm:$0xf]  ;;  %v10379_v32 = vld [vmem:[#allocation3 + $0x88] sm:$0xf] }
  0x2c   :  { %v10416_v29 = vor.u32 %v14649_v25, %v10413_v26  ;;  %v14644_v31 = vld [vmem:[#allocation3 + $0x9c] sm:$0xf0]  ;;  %v14645_v33 = vld [vmem:[#allocation3 + $0xa4] sm:$0xf0]  ;;  %v14641_v34 = vld [vmem:[#allocation3 + $0x8c] sm:$0xf] }
  0x2d   :  { %530 = vmatpush.bf16.msra.mxu0 %v10436_v17  ;;  %15689 = vmatpush.bf16.msra.mxu1 %v10436_v17  ;;  %v10381_v35 = vld [vmem:[#allocation3 + $0xa8] sm:$0xf0]  ;;  %v10372_v36 = vor.u32 %v14644_v31, %v10371_v30  ;;  %v10380_v37 = vor.u32 %v14645_v33, %v10379_v32  ;;  %v10339_v39 = vld [vmem:[#allocation3 + $0x40] sm:$0xf]  ;;  %v10347_v41 = vld [vmem:[#allocation3 + $0x48] sm:$0xf] }
  0x2e   :  { %618 = vmatpush.bf16.msra.mxu2 %v10444_v19  ;;  %662 = vmatpush.bf16.msra.mxu3 %v10448_v20  ;;  %v10384_v38 = vor.u32 %v14641_v34, %v10381_v35  ;;  %v14636_v40 = vld [vmem:[#allocation3 + $0x5c] sm:$0xf0]  ;;  %v14637_v42 = vld [vmem:[#allocation3 + $0x64] sm:$0xf0]  ;;  %v14633_v43 = vld [vmem:[#allocation3 + $0x4c] sm:$0xf] }
  0x2f   :  { %v10349_v44 = vld [vmem:[#allocation3 + $0x68] sm:$0xf0]  ;;  %v10307_v45 = vld [vmem:[#allocation3] sm:$0xf]  ;;  %v10340_v46 = vor.u32 %v14636_v40, %v10339_v39  ;;  %v14664_v48 = vld [vmem:[#allocation3 + $0x144] sm:$0xf]  ;;  %v10348_v50 = vor.u32 %v14637_v42, %v10347_v41 }
  0x30   :  { %v14628_v47 = vld [vmem:[#allocation3 + $0x1c] sm:$0xf0]  ;;  %v10469_v49 = vld [vmem:[#allocation3 + $0x160] sm:$0x10]  ;;  %v10352_v51 = vor.u32 %v14633_v43, %v10349_v44  ;;  %v10315_v52 = vld [vmem:[#allocation3 + $0x8] sm:$0xf] }
  0x31   :  { %531 = vmatpush.bf16.msra.mxu0 %v10404_v27  ;;  %15690 = vmatpush.bf16.msra.mxu1 %v10404_v27  ;;  %v14629_v53 = vld [vmem:[#allocation3 + $0x24] sm:$0xf0]  ;;  %v14625_v54 = vld [vmem:[#allocation3 + $0xc] sm:$0xf]  ;;  %v10472_v56 = vor.u32 %v14664_v48, %v10469_v49  ;;  %v10308_v57 = vor.u32 %v14628_v47, %v10307_v45  ;;  %v14656_v63 = vld [vmem:[#allocation3 + $0x104] sm:$0xf] }
  0x32   :  { %619 = vmatpush.bf16.msra.mxu2 %v10412_v28  ;;  %663 = vmatpush.bf16.msra.mxu3 %v10416_v29  ;;  %v10317_v55 = vld [vmem:[#allocation3 + $0x28] sm:$0xf0]  ;;  %v10316_v58 = vor.u32 %v14629_v53, %v10315_v52  ;;  %v10437_v0 = vld [vmem:[#allocation3 + $0x120] sm:$0xf0]  ;;  %vm480_vm1 = vcmask 736256   ;;  %v16052_v11 = vld [vmem:[%s17919_s0 + $0x8] sm:$0xff] }
  0x33   :  { %v10320_v59 = vor.u32 %v14625_v54, %v10317_v55  ;;  %v507_v61 = vsel %vm502_vm0, %v10472_v56, 0  ;;  %v10440_v1 = vor.u32 %v14656_v63, %v10437_v0  ;;  %v14648_v2 = vld [vmem:[#allocation3 + $0xc4] sm:$0xf]  ;;  %v10491_v15 = vld [vmem:[#allocation3 + $0x158] sm:$0xf]  ;;  %v16082_v35 = vld [vmem:[%s17919_s0 + $0x18] sm:$0xff] }
  0x34   :  { %v10405_v3 = vld [vmem:[#allocation3 + $0xe0] sm:$0xf0]  ;;  %v14671_v16 = vld [vmem:[#allocation3 + $0x174] sm:$0x10]  ;;  %v14667_v17 = vld [vmem:[#allocation3 + $0x15c] sm:$0xf] }
  0x35   :  { %532 = vmatpush.bf16.msra.mxu0 %v10372_v36  ;;  %15691 = vmatpush.bf16.msra.mxu1 %v10372_v36  ;;  %v10408_v4 = vor.u32 %v14648_v2, %v10405_v3  ;;  %v14640_v5 = vld [vmem:[#allocation3 + $0x84] sm:$0xf]  ;;  %v10492_v18 = vor.u32 %v14671_v16, %v10491_v15  ;;  %v10493_v19 = vld [vmem:[#allocation3 + $0x178] sm:$0x10]  ;;  %v14666_v24 = vld [vmem:[#allocation3 + $0x154] sm:$0xf] }
  0x36   :  { %620 = vmatpush.bf16.msra.mxu2 %v10380_v37  ;;  %664 = vmatpush.bf16.msra.mxu3 %v10384_v38  ;;  %v10373_v6 = vld [vmem:[#allocation3 + $0xa0] sm:$0xf0]  ;;  %v10496_v20 = vor.u32 %v14667_v17, %v10493_v19  ;;  %v10485_v25 = vld [vmem:[#allocation3 + $0x170] sm:$0x10]  ;;  %v10483_v26 = vld [vmem:[#allocation3 + $0x150] sm:$0xf] }
  0x37   :  { %v10376_v7 = vor.u32 %v14640_v5, %v10373_v6  ;;  %v14632_v8 = vld [vmem:[#allocation3 + $0x44] sm:$0xf]  ;;  %v522_v21 = vsel %vm502_vm0, %v10492_v18, 0  ;;  %v10488_v27 = vor.u32 %v14666_v24, %v10485_v25  ;;  %v14670_v28 = vld [vmem:[#allocation3 + $0x16c] sm:$0x10]  ;;  %v16108_v25 = vld [vmem:[%s17919_s0 + $0x28] sm:$0xff] }
  0x38   :  { %v10341_v9 = vld [vmem:[#allocation3 + $0x60] sm:$0xf0]  ;;  %v525_v22 = vsel %vm502_vm0, %v10496_v20, 0  ;;  %v10484_v29 = vor.u32 %v14670_v28, %v10483_v26  ;;  %v10451_v30 = vld [vmem:[#allocation3 + $0x110] sm:$0xf]  ;;  %vm5832_vm2 = vcmask 1045504  }
  0x39   :  { %533 = vmatpush.bf16.msra.mxu0 %v10340_v46  ;;  %15692 = vmatpush.bf16.msra.mxu1 %v10340_v46  ;;  %v10344_v10 = vor.u32 %v14632_v8, %v10341_v9  ;;  %v14624_v12 = vld [vmem:[#allocation3 + $0x4] sm:$0xf]  ;;  %v14662_v31 = vld [vmem:[#allocation3 + $0x12c] sm:$0xf0]  ;;  %v519_v32 = vsel %vm502_vm0, %v10488_v27, 0  ;;  %vm7797_vm3 = vcmask 1041408  }
  0x3a   :  { %621 = vmatpush.bf16.msra.mxu2 %v10348_v50  ;;  %665 = vmatpush.bf16.msra.mxu3 %v10352_v51  ;;  %v10309_v13 = vld [vmem:[#allocation3 + $0x20] sm:$0xf0]  ;;  %v516_v33 = vsel %vm502_vm0, %v10484_v29, 0  ;;  %v10452_v34 = vor.u32 %v14662_v31, %v10451_v30  ;;  %v10419_v36 = vld [vmem:[#allocation3 + $0xd0] sm:$0xf]  ;;  %s10263_s16 = sshll.u32 %s17928_s9, 4  ;;  %s10264_s16 = int_to_ptr.hbm [resolvable:$true] %s10263_s16 }
  0x3b   :  { %v10312_v14 = vor.u32 %v14624_v12, %v10309_v13  ;;  %v16067_v23 = vld [vmem:[%s17919_s0 + $0x10] sm:$0xff]  ;;  %v14654_v37 = vld [vmem:[#allocation3 + $0xec] sm:$0xf0]  ;;  %v10459_v39 = vld [vmem:[#allocation3 + $0x118] sm:$0xf] }
  0x3c   :  { %v10420_v38 = vor.u32 %v14654_v37, %v10419_v36  ;;  %v14663_v40 = vld [vmem:[#allocation3 + $0x134] sm:$0xf0]  ;;  %v14659_v41 = vld [vmem:[#allocation3 + $0x11c] sm:$0xf]  ;;  %v10387_v45 = vld [vmem:[#allocation3 + $0x90] sm:$0xf] }
  0x3d   :  { %534 = vmatpush.bf16.msra.mxu0 %v10308_v57  ;;  %15693 = vmatpush.bf16.msra.mxu1 %v10308_v57  ;;  %v10460_v42 = vor.u32 %v14663_v40, %v10459_v39  ;;  %v10461_v43 = vld [vmem:[#allocation3 + $0x138] sm:$0xf0]  ;;  %v14646_v46 = vld [vmem:[#allocation3 + $0xac] sm:$0xf0]  ;;  %v14658_v50 = vld [vmem:[#allocation3 + $0x114] sm:$0xf] }
  0x3e   :  { %622 = vmatpush.bf16.msra.mxu2 %v10316_v58  ;;  %666 = vmatpush.bf16.msra.mxu3 %v10320_v59  ;;  %v10464_v44 = vor.u32 %v14659_v41, %v10461_v43  ;;  %v10388_v47 = vor.u32 %v14646_v46, %v10387_v45  ;;  %v10355_v48 = vld [vmem:[#allocation3 + $0x50] sm:$0xf]  ;;  %v10453_v52 = vld [vmem:[#allocation3 + $0x130] sm:$0xf0]  ;;  %v10427_v58 = vld [vmem:[#allocation3 + $0xd8] sm:$0xf] }
  0x3f   :  { %v14638_v49 = vld [vmem:[#allocation3 + $0x6c] sm:$0xf0]  ;;  %v10456_v53 = vor.u32 %v14658_v50, %v10453_v52  ;;  %v14655_v59 = vld [vmem:[#allocation3 + $0xf4] sm:$0xf0]  ;;  %v10429_v0 = vld [vmem:[#allocation3 + $0xf8] sm:$0xf0] }
  0x40   :  { %10497 = vmatmul.msk.bf16.vlgmr.msra.gmra.mxu0 %vm480_vm1, %v16033_v60  ;;  %10503 = vmatmul.msk.bf16.vlgmr.msra.gmra.mxu1 %vm480_vm1, %v16039_v62  ;;  %v10356_v51 = vor.u32 %v14638_v49, %v10355_v48  ;;  %v10323_v54 = vld [vmem:[#allocation3 + $0x10] sm:$0xf]  ;;  %v10428_v63 = vor.u32 %v14655_v59, %v10427_v58  ;;  %v10395_v2 = vld [vmem:[#allocation3 + $0x98] sm:$0xf]  ;;  %v10397_v6 = vld [vmem:[#allocation3 + $0xb8] sm:$0xf0] }
  0x41   :  { %573 = vmatpush.bf16.msrb.mxu1 %v507_v61  ;;  %10511 = vmatmul.msk.bf16.vlgmr.msra.gmra.mxu2 %vm480_vm1, %v16033_v60  ;;  %v14630_v55 = vld [vmem:[#allocation3 + $0x2c] sm:$0xf0]  ;;  %v14651_v61 = vld [vmem:[#allocation3 + $0xdc] sm:$0xf]  ;;  %v14647_v3 = vld [vmem:[#allocation3 + $0xb4] sm:$0xf0] }
  0x42   :  { %10518 = vmatmul.msk.bf16.vlgmr.msra.gmra.mxu3 %vm480_vm1, %v16033_v60  ;;  %793 = vmatpush.bf16.msrb.mxu2 %v522_v21  ;;  %v10324_v56 = vor.u32 %v14630_v55, %v10323_v54  ;;  %v16095_v57 = vld [vmem:[%s17919_s0 + $0x20] sm:$0xff]  ;;  %v10396_v5 = vor.u32 %v14647_v3, %v10395_v2  ;;  %v10363_v8 = vld [vmem:[#allocation3 + $0x58] sm:$0xf]  ;;  %v10365_v13 = vld [vmem:[#allocation3 + $0x78] sm:$0xf0]  ;;  %s15952_s0 = smov [#allocation17]  }
  0x43   :  { %837 = vmatpush.bf16.msrb.mxu3 %v525_v22  ;;  %705 = vmatpush.bf16.msrb.mxu0 %v516_v33  ;;  %v14639_v9 = vld [vmem:[#allocation3 + $0x74] sm:$0xf0]  ;;  %v14627_v17 = vld [vmem:[#allocation3 + $0x1c] sm:$0xf]  ;;  %v14650_v19 = vld [vmem:[#allocation3 + $0xd4] sm:$0xf] }
  0x44   :  { %v10364_v12 = vor.u32 %v14639_v9, %v10363_v8  ;;  %v14631_v15 = vld [vmem:[#allocation3 + $0x34] sm:$0xf0]  ;;  %v10333_v18 = vld [vmem:[#allocation3 + $0x38] sm:$0xf0]  ;;  %v10421_v20 = vld [vmem:[#allocation3 + $0xf0] sm:$0xf0] }
  0x45   :  { %574 = vmatpush.bf16.msrb.mxu1 %v10440_v1  ;;  %v10432_v1 = vor.u32 %v14651_v61, %v10429_v0  ;;  %v10424_v22 = vor.u32 %v14650_v19, %v10421_v20  ;;  %v10336_v24 = vor.u32 %v14627_v17, %v10333_v18  ;;  %v14642_v26 = vld [vmem:[#allocation3 + $0x94] sm:$0xf]  ;;  %s10261_s13 = sshll.u32 %s15952_s0, 4  ;;  %s10262_s13 = int_to_ptr.vmem [resolvable:$true] %s10261_s13 }
  0x46   :  { %794 = vmatpush.bf16.msrb.mxu2 %v10460_v42  ;;  %v10389_v27 = vld [vmem:[#allocation3 + $0xb0] sm:$0xf0] }
  0x47   :  { %706 = vmatpush.bf16.msrb.mxu0 %v10452_v34  ;;  %838 = vmatpush.bf16.msrb.mxu3 %v10464_v44  ;;  %v10392_v28 = vor.u32 %v14642_v26, %v10389_v27  ;;  %v14634_v29 = vld [vmem:[#allocation3 + $0x54] sm:$0xf] }
  0x48   :  { %v10357_v30 = vld [vmem:[#allocation3 + $0x70] sm:$0xf0] }
  0x49   :  { %575 = vmatpush.bf16.msrb.mxu1 %v10408_v4  ;;  %v14643_v4 = vld [vmem:[#allocation3 + $0x9c] sm:$0xf]  ;;  %v10360_v31 = vor.u32 %v14634_v29, %v10357_v30  ;;  %v10325_v33 = vld [vmem:[#allocation3 + $0x30] sm:$0xf0] }
  0x4a   :  { %795 = vmatpush.bf16.msrb.mxu2 %v10428_v63 }
  0x4b   :  { %707 = vmatpush.bf16.msrb.mxu0 %v10420_v38  ;;  %839 = vmatpush.bf16.msrb.mxu3 %v10432_v1 }
  0x4d   :  { %576 = vmatpush.bf16.msrb.mxu1 %v10376_v7  ;;  %v10400_v7 = vor.u32 %v14643_v4, %v10397_v6 }
  0x4e   :  { %796 = vmatpush.bf16.msrb.mxu2 %v10396_v5 }
  0x4f   :  { %708 = vmatpush.bf16.msrb.mxu0 %v10388_v47  ;;  %840 = vmatpush.bf16.msrb.mxu3 %v10400_v7 }
  0x50   :  { %10498 = vmatmul.msk.bf16.gmra.mxu0 %vm480_vm1, %v16052_v11 }
  0x51   :  { %577 = vmatpush.bf16.msrb.mxu1 %v10344_v10  ;;  %10512 = vmatmul.msk.bf16.gmra.mxu2 %vm480_vm1, %v16052_v11  ;;  %v14635_v10 = vld [vmem:[#allocation3 + $0x5c] sm:$0xf] }
  0x52   :  { %10519 = vmatmul.msk.bf16.gmra.mxu3 %vm480_vm1, %v16052_v11  ;;  %v10368_v16 = vor.u32 %v14635_v10, %v10365_v13  ;;  %797 = vmatpush.bf16.msrb.mxu2 %v10364_v12 }
  0x53   :  { %709 = vmatpush.bf16.msrb.mxu0 %v10356_v51 }
  0x54   :  { %841 = vmatpush.bf16.msrb.mxu3 %v10368_v16 }
  0x55   :  { %578 = vmatpush.bf16.msrb.mxu1 %v10312_v14  ;;  %v10331_v14 = vld [vmem:[#allocation3 + $0x18] sm:$0xf] }
  0x56   :  { %v10332_v21 = vor.u32 %v14631_v15, %v10331_v14 }
  0x57   :  { %710 = vmatpush.bf16.msrb.mxu0 %v10324_v56 }
  0x58   :  { %10504 = vmatmul.msk.bf16.vlgmr.msrb.gmra.mxu1 %vm480_vm1, %v16033_v60  ;;  %798 = vmatpush.bf16.msrb.mxu2 %v10332_v21 }
  0x59   :  { %749 = vmatpush.bf16.msra.mxu1 %v519_v32  ;;  %842 = vmatpush.bf16.msrb.mxu3 %v10336_v24  ;;  %v14626_v32 = vld [vmem:[#allocation3 + $0x14] sm:$0xf] }
  0x5a   :  { %v10328_v34 = vor.u32 %v14626_v32, %v10325_v33 }
  0x5d   :  { %750 = vmatpush.bf16.msra.mxu1 %v10456_v53 }
  0x60   :  { %10499 = vmatmul.msk.bf16.gmra.mxu0 %vm480_vm1, %v16067_v23 }
  0x61   :  { %10513 = vmatmul.msk.bf16.gmra.mxu2 %vm480_vm1, %v16067_v23  ;;  %751 = vmatpush.bf16.msra.mxu1 %v10424_v22 }
  0x62   :  { %10520 = vmatmul.msk.bf16.gmra.mxu3 %vm480_vm1, %v16067_v23 }
  0x65   :  { %752 = vmatpush.bf16.msra.mxu1 %v10392_v28 }
  0x68   :  { %10505 = vmatmul.msk.bf16.gmra.mxu1 %vm480_vm1, %v16052_v11 }
  0x69   :  { %753 = vmatpush.bf16.msra.mxu1 %v10360_v31 }
  0x6d   :  { %754 = vmatpush.bf16.msra.mxu1 %v10328_v34 }
  0x70   :  { %10500 = vmatmul.msk.bf16.gmra.mxu0 %vm480_vm1, %v16082_v35 }
  0x71   :  { %10514 = vmatmul.msk.bf16.gmra.mxu2 %vm480_vm1, %v16082_v35 }
  0x72   :  { %10521 = vmatmul.msk.bf16.gmra.mxu3 %vm480_vm1, %v16082_v35 }
  0x78   :  { %10506 = vmatmul.msk.bf16.gmra.mxu1 %vm480_vm1, %v16067_v23 }
  0x80   :  { %10501 = vmatmul.msk.bf16.gmra.mxu0 %vm480_vm1, %v16095_v57 }
  0x81   :  { %10515 = vmatmul.msk.bf16.gmra.mxu2 %vm480_vm1, %v16095_v57 }
  0x82   :  { %10522 = vmatmul.msk.bf16.gmra.mxu3 %vm480_vm1, %v16095_v57 }
  0x88   :  { %10507 = vmatmul.msk.bf16.gmra.mxu1 %vm480_vm1, %v16082_v35 }
  0x90   :  { %10502 = vmatmul.msk.bf16.gmra.mxu0 %vm480_vm1, %v16108_v25 }
  0x91   :  { %10516 = vmatmul.msk.bf16.gmra.mxu2 %vm480_vm1, %v16108_v25 }
  0x92   :  { %10523 = vmatmul.msk.bf16.gmra.mxu3 %vm480_vm1, %v16108_v25 }
  0x98   :  { %10508 = vmatmul.msk.bf16.gmra.mxu1 %vm480_vm1, %v16095_v57 }
  0xa0   :  { %10525 = vmatmul.msk.bf16.vlgmr.msrb.gmra.mxu0 %vm480_vm1, %v16033_v60 }
  0xa1   :  { %10517 = vmatmul.msk.bf16.gmra.mxu2 %vm480_vm1, %v16039_v62 }
  0xa2   :  { %10524 = vmatmul.msk.bf16.gmra.mxu3 %vm480_vm1, %v16039_v62 }
  0xa8   :  { %10509 = vmatmul.msk.bf16.gmra.mxu1 %vm480_vm1, %v16108_v25 }
  0xb0   :  { %10526 = vmatmul.msk.bf16.gmra.mxu0 %vm480_vm1, %v16052_v11 }
  0xb1   :  { %10539 = vmatmul.msk.bf16.vlgmr.msrb.gmra.mxu2 %vm480_vm1, %v16033_v60 }
  0xb2   :  { %10546 = vmatmul.msk.bf16.vlgmr.msrb.gmra.mxu3 %vm480_vm1, %v16033_v60 }
  0xb8   :  { %10510 = vmatmul.msk.bf16.gmra.mxu1 %vm480_vm1, %v16039_v62 }
  0xbd   :  { %v16134_v36 = vpop.f32.mrf.mxu0  ;;  %v16138_v37 = vpop.f32.mrf.mxu1 }
  0xc0   :  { %10527 = vmatmul.msk.bf16.gmra.mxu0 %vm480_vm1, %v16067_v23 }
  0xc1   :  { %10540 = vmatmul.msk.bf16.gmra.mxu2 %vm480_vm1, %v16052_v11 }
  0xc2   :  { %10547 = vmatmul.msk.bf16.gmra.mxu3 %vm480_vm1, %v16052_v11 }
  0xc4   :  { %v16144_v38 = vpop.f32.mrf.mxu2 }
  0xc5   :  { %v16146_v39 = vpop.f32.mrf.mxu3  ;;  %v16148_v40 = vpop.f32.mrf.mxu0 }
  0xc6   :  { %v16152_v41 = vpop.f32.mrf.mxu1 }
  0xc8   :  { %10532 = vmatmul.msk.bf16.vlgmr.msra.gmra.mxu1 %vm480_vm1, %v16033_v60 }
  0xcc   :  { %v16154_v42 = vpop.f32.mrf.mxu2 }
  0xcd   :  { %v16156_v43 = vpop.f32.mrf.mxu3  ;;  %v16158_v44 = vpop.f32.mrf.mxu0 }
  0xd0   :  { %10528 = vmatmul.msk.bf16.gmra.mxu0 %vm480_vm1, %v16082_v35 }
  0xd1   :  { %10541 = vmatmul.msk.bf16.gmra.mxu2 %vm480_vm1, %v16067_v23 }
  0xd2   :  { %10548 = vmatmul.msk.bf16.gmra.mxu3 %vm480_vm1, %v16067_v23 }
  0xd4   :  { %v16168_v60 = vpop.f32.mrf.mxu2 }
  0xd5   :  { %v16166_v45 = vpop.f32.mrf.mxu1  ;;  %v16170_v46 = vpop.f32.mrf.mxu3 }
  0xd6   :  { %v16172_v47 = vpop.f32.mrf.mxu0 }
  0xd8   :  { %10533 = vmatmul.msk.bf16.gmra.mxu1 %vm480_vm1, %v16052_v11 }
  0xdc   :  { %v16178_v49 = vpop.f32.mrf.mxu2 }
  0xdd   :  { %v16176_v48 = vpop.f32.mrf.mxu1  ;;  %v16180_v50 = vpop.f32.mrf.mxu3 }
  0xde   :  { %v16182_v51 = vpop.f32.mrf.mxu0 }
  0xe0   :  { %10529 = vmatmul.msk.bf16.gmra.mxu0 %vm480_vm1, %v16095_v57 }
  0xe1   :  { %10542 = vmatmul.msk.bf16.gmra.mxu2 %vm480_vm1, %v16082_v35 }
  0xe2   :  { %10549 = vmatmul.msk.bf16.gmra.mxu3 %vm480_vm1, %v16082_v35 }
  0xe4   :  { %v16192_v11 = vpop.f32.mrf.mxu2 }
  0xe5   :  { %v16190_v52 = vpop.f32.mrf.mxu1  ;;  %v16194_v53 = vpop.f32.mrf.mxu3 }
  0xe6   :  { %v16196_v54 = vpop.f32.mrf.mxu0 }
  0xe8   :  { %10534 = vmatmul.msk.bf16.gmra.mxu1 %vm480_vm1, %v16067_v23 }
  0xec   :  { %v16202_v56 = vpop.f32.mrf.mxu2 }
  0xed   :  { %v16200_v55 = vpop.f32.mrf.mxu1  ;;  %v16204_v58 = vpop.f32.mrf.mxu3 }
  0xee   :  { %v16206_v59 = vpop.f32.mrf.mxu0 }
  0xf0   :  { %10530 = vmatmul.msk.bf16.gmra.mxu0 %vm480_vm1, %v16108_v25 }
  0xf1   :  { %10543 = vmatmul.msk.bf16.gmra.mxu2 %vm480_vm1, %v16095_v57 }
  0xf2   :  { %10550 = vmatmul.msk.bf16.gmra.mxu3 %vm480_vm1, %v16095_v57 }
  0xf4   :  { %v16218_v63 = vpop.f32.mrf.mxu2 }
  0xf5   :  { %v16216_v23 = vpop.f32.mrf.mxu1  ;;  %17935 = vst [vmem:[#allocation25_spill] sm:$0xff] %v16218_v63  ;;  %v16220_v0 = vpop.f32.mrf.mxu3 }
  0xf6   :  { %17934 = vst [vmem:[#allocation24_spill] sm:$0xff] %v16216_v23  ;;  %v16222_v1 = vpop.f32.mrf.mxu0 }
  0xf7   :  { %17936 = vst [vmem:[#allocation26_spill] sm:$0xff] %v16220_v0 }
  0xf8   :  { %10535 = vmatmul.msk.bf16.gmra.mxu1 %vm480_vm1, %v16082_v35 }
  0xfc   :  { %v16228_v3 = vpop.f32.mrf.mxu2 }
  0xfd   :  { %v16226_v2 = vpop.f32.mrf.mxu1  ;;  %v16230_v4 = vpop.f32.mrf.mxu3 }
  0xfe   :  { %17937 = vst [vmem:[#allocation27_spill] sm:$0xff] %v16226_v2  ;;  %v16232_v5 = vpop.f32.mrf.mxu0 }
 0x100   :  { %10531 = vmatmul.msk.bf16.gmra.mxu0 %vm480_vm1, %v16039_v62 }
 0x101   :  { %10544 = vmatmul.msk.bf16.gmra.mxu2 %vm480_vm1, %v16108_v25 }
 0x102   :  { %10551 = vmatmul.msk.bf16.gmra.mxu3 %vm480_vm1, %v16108_v25 }
 0x104   :  { %v16244_v7 = vpop.f32.mrf.mxu2 }
 0x105   :  { %v16242_v35 = vpop.f32.mrf.mxu1  ;;  %v16246_v8 = vpop.f32.mrf.mxu3 }
 0x106   :  { %17938 = vst [vmem:[#allocation28_spill] sm:$0xff] %v16242_v35  ;;  %v16252_v12 = vpop.f32.mrf.mxu0 }
 0x108   :  { %10536 = vmatmul.msk.bf16.gmra.mxu1 %vm480_vm1, %v16095_v57 }
 0x10c   :  { %v16258_v14 = vpop.f32.mrf.mxu2 }
 0x10d   :  { %v16256_v13 = vpop.f32.mrf.mxu1  ;;  %v16260_v15 = vpop.f32.mrf.mxu3 }
 0x10e   :  { %v16262_v16 = vpop.f32.mrf.mxu0 }
 0x111   :  { %10545 = vmatmul.msk.bf16.gmra.mxu2 %vm480_vm1, %v16039_v62 }
 0x112   :  { %10552 = vmatmul.msk.bf16.gmra.mxu3 %vm480_vm1, %v16039_v62 }
 0x114   :  { %v16272_v57 = vpop.f32.mrf.mxu2 }
 0x115   :  { %v16268_v17 = vpop.f32.mrf.mxu1  ;;  %v16274_v19 = vpop.f32.mrf.mxu3 }
 0x116   :  { %v16280_v22 = vpop.f32.mrf.mxu0 }
 0x118   :  { %10537 = vmatmul.msk.bf16.gmra.mxu1 %vm480_vm1, %v16108_v25 }
 0x11c   :  { %v16286_v26 = vpop.f32.mrf.mxu2 }
 0x11d   :  { %v16284_v24 = vpop.f32.mrf.mxu1  ;;  %v16288_v27 = vpop.f32.mrf.mxu3 }
 0x11e   :  { %v16290_v28 = vpop.f32.mrf.mxu0 }
 0x124   :  { %v16296_v31 = vpop.f32.mrf.mxu2 }
 0x125   :  { %v16292_v29 = vpop.f32.mrf.mxu1  ;;  %v16298_v32 = vpop.f32.mrf.mxu3 }
 0x126   :  { %v16300_v33 = vpop.f32.mrf.mxu0 }
 0x127   :  { %17939 = vst [vmem:[#allocation29_spill] sm:$0xff] %v16300_v33 }
 0x128   :  { %10538 = vmatmul.msk.bf16.gmra.mxu1 %vm480_vm1, %v16039_v62 }
 0x12c   :  { %v16306_v34 = vpop.f32.mrf.mxu2 }
 0x12d   :  { %v16304_v25 = vpop.f32.mrf.mxu1  ;;  %17940 = vst [vmem:[#allocation30_spill] sm:$0xff] %v16306_v34  ;;  %v16308_v21 = vpop.f32.mrf.mxu3 }
 0x12e   :  { %17941 = vst [vmem:[#allocation31_spill] sm:$0xff] %v16308_v21  ;;  %v16310_v20 = vpop.f32.mrf.mxu0 }
 0x12f   :  { %17942 = vst [vmem:[#allocation32_spill] sm:$0xff] %v16310_v20 }
 0x134   :  { %v16314_v30 = vpop.f32.mrf.mxu2 }
 0x135   :  { %v16312_v18 = vpop.f32.mrf.mxu1  ;;  %v16316_v10 = vpop.f32.mrf.mxu3 }
 0x136   :  { %17943 = vst [vmem:[#allocation33_spill] sm:$0xff] %v16312_v18  ;;  %v16318_v9 = vpop.f32.mrf.mxu0 }
 0x137   :  { %17944 = vst [vmem:[#allocation34_spill] sm:$0xff] %v16318_v9 }
 0x13c   :  { %v16322_v61 = vpop.f32.mrf.mxu2 }
 0x13d   :  { %v16320_v6 = vpop.f32.mrf.mxu1  ;;  %v16324_v62 = vpop.f32.mrf.mxu3 }
 0x13e   :  { %17945 = vst [vmem:[#allocation35_spill] sm:$0xff] %v16320_v6  ;;  %v16326_v35 = vpop.f32.mrf.mxu0 }
 0x13f   :  { %17946 = vst [vmem:[#allocation36_spill] sm:$0xff] %v16326_v35 }
 0x144   :  { %v16330_v0 = vpop.f32.mrf.mxu2 }
 0x145   :  { %v16328_v2 = vpop.f32.mrf.mxu1  ;;  %17948 = vst [vmem:[#allocation38_spill] sm:$0xff] %v16330_v0  ;;  %v16332_v21 = vpop.f32.mrf.mxu3  ;;  %v11307_v0 = vld [vmem:[#allocation8 + $0xdc0] sm:$0xf] }
 0x146   :  { %17947 = vst [vmem:[#allocation37_spill] sm:$0xff] %v16328_v2  ;;  %v16334_v18 = vpop.f32.mrf.mxu0  ;;  %v16350_v2 = vld [vmem:[#allocation6] sm:$0xff] }
 0x147   :  { %17949 = vst [vmem:[#allocation39_spill] sm:$0xff] %v16332_v21  ;;  %v15124_v21 = vld [vmem:[#allocation8 + $0xddc] sm:$0xf0] }
 0x148   :  { %17950 = vst [vmem:[#allocation40_spill] sm:$0xff] %v16334_v18  ;;  %v11308_v23 = vor.u32 %v15124_v21, %v11307_v0  ;;  %v16353_v18 = vperm.slane %v16350_v2, 0  ;;  %v882_v0 = vmax.f32 %v16146_v39, %v16230_v4  ;;  %v16369_v21 = vperm.slane %v16350_v2, 3 }
 0x14a   :  { %3043 = vmatpush.bf16.msra.mxu2 %v11308_v23  ;;  %v16382_v23 = vperm.slane %v16350_v2, 1 }
 0x14c   :  { %v16338_v33 = vpop.f32.mrf.mxu2 }
 0x14d   :  { %v16336_v20 = vpop.f32.mrf.mxu1  ;;  %17952 = vst [vmem:[#allocation42_spill] sm:$0xff] %v16338_v33  ;;  %v16340_v9 = vpop.f32.mrf.mxu3  ;;  %v919_v33 = vmax.f32 %v16196_v54, %v16138_v37  ;;  %v880_v54 = vmax.f32 %v16166_v45, %v16256_v13  ;;  %v15188_v45 = vld [vmem:[#allocation8 + $0xfdc] sm:$0xf0] }
 0x14e   :  { %17951 = vst [vmem:[#allocation41_spill] sm:$0xff] %v16336_v20  ;;  %v16342_v6 = vpop.f32.mrf.mxu0  ;;  %v10795_v13 = vld [vmem:[#allocation8 + $0x9c0] sm:$0xf] }
 0x14f   :  { %17953 = vst [vmem:[#allocation43_spill] sm:$0xff] %v16340_v9  ;;  %v16385_v39 = vadd.f32 %v16353_v18, %v919_v33  ;;  %v897_v33 = vmax.f32 %v16168_v60, %v16258_v14 }
 0x150   :  { %17954 = vst [vmem:[#allocation44_spill] sm:$0xff] %v16342_v6  ;;  %v879_v6 = vmax.f32 %v16134_v36, %v16222_v1  ;;  %v17961_v1 = vmax.f32 %v16206_v59, %v16152_v41  ;;  %v898_v41 = vmax.f32 %v16170_v46, %v16260_v15  ;;  %v17964_v46 = vmax.f32 %v16156_v43, %v16246_v8  ;;  %v15164_v43 = vld [vmem:[#allocation8 + $0xf1c] sm:$0xf0] }
 0x152   :  { %v16394_v4 = vadd.f32 %v16353_v18, %v879_v6  ;;  %v15060_v6 = vld [vmem:[#allocation8 + $0xbdc] sm:$0xf0]  ;;  %v16422_v15 = vadd.f32 %v16369_v21, %v17964_v46 }
 0x153   :  { %v15116_v46 = vld [vmem:[#allocation8 + $0xd9c] sm:$0xf0] }
 0x154   :  { %v16346_v34 = vpop.f32.mrf.mxu2 }
 0x155   :  { %v16344_v63 = vpop.f32.mrf.mxu1  ;;  %17956 = vst [vmem:[#allocation46_spill] sm:$0xff] %v16346_v34  ;;  %v16348_v35 = vpop.f32.mrf.mxu3  ;;  %v16362_v34 = vperm.slane %v16350_v2, 2 }
 0x156   :  { %17955 = vst [vmem:[#allocation45_spill] sm:$0xff] %v16344_v63  ;;  %v881_v63 = vmax.f32 %v16144_v38, %v16228_v3  ;;  %v16375_v36 = vpop.f32.mrf.mxu0  ;;  %v895_v38 = vmax.f32 %v16158_v44, %v16252_v12  ;;  %v16391_v3 = vadd.f32 %v16353_v18, %v17961_v1  ;;  %v11563_v12 = vld [vmem:[#allocation8 + $0xfc0] sm:$0xf] }
 0x157   :  { %17957 = vst [vmem:[#allocation47_spill] sm:$0xff] %v16348_v35  ;;  %v11564_v59 = vor.u32 %v15188_v45, %v11563_v12  ;;  %v14996_v1 = vld [vmem:[#allocation8 + $0x9dc] sm:$0xf0] }
 0x158   :  { %v16397_v44 = vadd.f32 %v16362_v34, %v881_v63  ;;  %v17962_v63 = vmax.f32 %v16148_v40, %v16232_v5  ;;  %v10796_v60 = vor.u32 %v14996_v1, %v10795_v13  ;;  %v16425_v12 = vadd.f32 %v16353_v18, %v895_v38  ;;  %v11531_v5 = vld [vmem:[#allocation8 + $0xf80] sm:$0xf] }
 0x159   :  { %v16428_v40 = vadd.f32 %v16382_v23, %v880_v54  ;;  %3062 = vmatpush.bf16.msra.mxu3 %v11564_v59  ;;  %v16439_v38 = vadd.f32 %v16362_v34, %v897_v33  ;;  %v16442_v54 = vadd.f32 %v16369_v21, %v898_v41  ;;  %v911_v1 = vmax.f32 %v16182_v51, %v16280_v22 }
 0x15a   :  { %3005 = vmatpush.bf16.msra.mxu0 %v10796_v60  ;;  %v1011_v8 = vmax.f32 %v16397_v44, 0.0  ;;  %v17965_v22 = vmax.f32 %v16176_v48, %v16268_v17  ;;  %v17967_v41 = vmax.f32 %v16180_v50, %v16274_v19  ;;  %v11243_v19 = vld [vmem:[#allocation8 + $0xd40] sm:$0xf] }
 0x15b   :  { %v16484_v51 = vadd.f32 %v16353_v18, %v911_v1  ;;  %v11499_v1 = vld [vmem:[#allocation8 + $0xf40] sm:$0xf] }
 0x15c   :  { %v16371_v9 = vpop.f32.mrf.mxu2  ;;  %v16469_v33 = vadd.f32 %v16382_v23, %v17965_v22  ;;  %v15172_v22 = vld [vmem:[#allocation8 + $0xf5c] sm:$0xf0] }
 0x15d   :  { %v16364_v35 = vpop.f32.mrf.mxu1  ;;  %17959 = vst [vmem:[#allocation49_spill] sm:$0xff] %v16371_v9  ;;  %v16373_v37 = vpop.f32.mrf.mxu3  ;;  %v11051_v9 = vld [vmem:[#allocation8 + $0xbc0] sm:$0xf] }
 0x15e   :  { %17958 = vst [vmem:[#allocation48_spill] sm:$0xff] %v16364_v35  ;;  %v16410_v35 = vadd.f32 %v16353_v18, %v17962_v63  ;;  %v11052_v14 = vor.u32 %v15060_v6, %v11051_v9  ;;  %v896_v63 = vmax.f32 %v16190_v52, %v16284_v24  ;;  %v16461_v60 = vpop.f32.mrf.mxu0  ;;  %v15180_v52 = vld [vmem:[#allocation8 + $0xf9c] sm:$0xf0]  ;;  %v17966_v24 = vmax.f32 %v16178_v49, %v16272_v57 }
 0x15f   :  { %17960 = vst [vmem:[#allocation50_spill] sm:$0xff] %v16373_v37  ;;  %v16400_v37 = vadd.f32 %v16369_v21, %v882_v0  ;;  %v17963_v0 = vmax.f32 %v16154_v42, %v16244_v7  ;;  %v903_v7 = vmax.f32 %v16172_v47, %v16262_v16  ;;  %v16481_v42 = vadd.f32 %v16369_v21, %v17967_v41 }
 0x160   :  { %3024 = vmatpush.bf16.msrb.mxu1 %v11052_v14  ;;  %v11275_v14 = vld [vmem:[#allocation8 + $0xd80] sm:$0xf]  ;;  %v11532_v48 = vor.u32 %v15180_v52, %v11531_v5  ;;  %v16487_v17 = vadd.f32 %v16382_v23, %v896_v63  ;;  %v16492_v49 = vperm.slane %v16350_v2, 6  ;;  %v16495_v57 = vperm.slane %v16350_v2, 7 }
 0x161   :  { %v16416_v20 = vadd.f32 %v16362_v34, %v17963_v0  ;;  %v1012_v47 = vmax.f32 %v16400_v37, 0.0  ;;  %v16459_v0 = vadd.f32 %v16353_v18, %v903_v7  ;;  %v11276_v16 = vor.u32 %v15116_v46, %v11275_v14  ;;  %v15108_v18 = vld [vmem:[#allocation8 + $0xd5c] sm:$0xf0] }
 0x162   :  { %v16475_v7 = vadd.f32 %v16362_v34, %v17966_v24  ;;  %v913_v14 = vmax.f32 %v16192_v11, %v16286_v26  ;;  %3063 = vmatpush.bf16.msra.mxu3 %v11532_v48  ;;  %v914_v11 = vmax.f32 %v16194_v53, %v16288_v27  ;;  %v11244_v46 = vor.u32 %v15108_v18, %v11243_v19  ;;  %v10763_v19 = vld [vmem:[#allocation8 + $0x980] sm:$0xf] }
 0x163   :  { %v1019_v59 = vmax.f32 %v16416_v20, 0.0  ;;  %3044 = vmatpush.bf16.msra.mxu2 %v11276_v16  ;;  %v11500_v48 = vor.u32 %v15172_v22, %v11499_v1  ;;  %v921_v53 = vmax.f32 %v16202_v56, %v16296_v31  ;;  %v11019_v18 = vld [vmem:[#allocation8 + $0xb80] sm:$0xf] }
 0x164   :  { %v16444_v45 = vpop.f32.mrf.mxu2  ;;  %v1035_v52 = vmax.f32 %v16475_v7, 0.0  ;;  %v16510_v6 = vadd.f32 %v16362_v34, %v913_v14  ;;  %v16517_v1 = vadd.f32 %v16369_v21, %v914_v11  ;;  %v11211_v22 = vld [vmem:[#allocation8 + $0xd00] sm:$0xf] }
 0x165   :  { %v16434_v9 = vpop.f32.mrf.mxu1  ;;  %v16446_v13 = vpop.f32.mrf.mxu3  ;;  %v15100_v14 = vld [vmem:[#allocation8 + $0xd1c] sm:$0xf0] }
 0x166   :  { %3064 = vmatpush.bf16.msra.mxu3 %v11500_v48  ;;  %v16519_v5 = vpop.f32.mrf.mxu0  ;;  %v11212_v31 = vor.u32 %v15100_v14, %v11211_v22  ;;  %v17968_v48 = vmax.f32 %v16200_v55, %v16292_v29  ;;  %v11179_v55 = vld [vmem:[#allocation8 + $0xcc0] sm:$0xf] }
 0x167   :  { %3045 = vmatpush.bf16.msra.mxu2 %v11244_v46  ;;  %v15092_v29 = vld [vmem:[#allocation8 + $0xcdc] sm:$0xf0] }
 0x168   :  { %v16526_v11 = vadd.f32 %v16382_v23, %v17968_v48  ;;  %v11435_v22 = vld [vmem:[#allocation8 + $0xec0] sm:$0xf]  ;;  %v11180_v44 = vor.u32 %v15092_v29, %v11179_v55  ;;  %v17971_v48 = vld [vmem:[#allocation25_spill] sm:$0xff] }
 0x169   :  { %v10987_v29 = vld [vmem:[#allocation8 + $0xb40] sm:$0xf] }
 0x16b   :  { %3046 = vmatpush.bf16.msra.mxu2 %v11212_v31 }
 0x16c   :  { %v817_v26 = vpop.f32.mrf.mxu2 }
 0x16d   :  { %v16497_v50 = vpop.f32.mrf.mxu1  ;;  %v861_v63 = vpop.f32.mrf.mxu3  ;;  %v885_v16 = vmax.f32 %v16314_v30, %v817_v26 }
 0x16e   :  { %v886_v24 = vmax.f32 %v16316_v10, %v861_v63  ;;  %v14988_v10 = vld [vmem:[#allocation8 + $0x99c] sm:$0xf0] }
 0x16f   :  { %v959_v27 = vadd.f32 %v16492_v49, %v885_v16  ;;  %v10764_v26 = vor.u32 %v14988_v10, %v10763_v19  ;;  %v15052_v63 = vld [vmem:[#allocation8 + $0xb9c] sm:$0xf0]  ;;  %v922_v19 = vmax.f32 %v16204_v58, %v16298_v32  ;;  %v883_v58 = vmax.f32 %v16290_v28, %v16375_v36  ;;  %v17969_v36 = vld [vmem:[#allocation24_spill] sm:$0xff]  ;;  %3047 = vmatpush.bf16.msra.mxu2 %v11180_v44 }
 0x170   :  { %v960_v30 = vadd.f32 %v16495_v57, %v886_v24  ;;  %v11020_v56 = vor.u32 %v15052_v63, %v11019_v18  ;;  %v11467_v16 = vld [vmem:[#allocation8 + $0xf00] sm:$0xf]  ;;  %v1043_v24 = vmax.f32 %v16510_v6, 0.0  ;;  %v16542_v32 = vperm.slane %v16350_v2, 4 }
 0x171   :  { %v1015_v46 = vmax.f32 %v959_v27, 0.0  ;;  %3006 = vmatpush.bf16.msra.mxu0 %v10764_v26  ;;  %v11468_v10 = vor.u32 %v15164_v43, %v11467_v16  ;;  %v16531_v27 = vadd.f32 %v16362_v34, %v921_v53  ;;  %v16549_v28 = vadd.f32 %v16369_v21, %v922_v19  ;;  %v17970_v16 = vld [vmem:[#allocation30_spill] sm:$0xff] }
 0x172   :  { %v1016_v41 = vmax.f32 %v960_v30, 0.0  ;;  %3025 = vmatpush.bf16.msrb.mxu1 %v11020_v56  ;;  %v912_v56 = vmax.f32 %v17969_v36, %v16304_v25  ;;  %v16559_v55 = vadd.f32 %v16542_v32, %v883_v58  ;;  %v17931_v19 = vmov 0  }
 0x173   :  { %v1067_v30 = vmax.f32 %v1011_v8, %v1015_v46  ;;  %3065 = vmatpush.bf16.msra.mxu3 %v11468_v10  ;;  %v15156_v8 = vld [vmem:[#allocation8 + $0xedc] sm:$0xf0]  ;;  %v929_v10 = vmax.f32 %v17971_v48, %v17970_v16  ;;  %v16567_v58 = vperm.slane %v16350_v2, 5 }
 0x174   :  { %v1068_v18 = vmax.f32 %v1012_v47, %v1016_v41  ;;  %v820_v43 = vpop.f32.mrf.mxu2  ;;  %v11436_v26 = vor.u32 %v15156_v8, %v11435_v22  ;;  %v15044_v22 = vld [vmem:[#allocation8 + $0xb5c] sm:$0xf0]  ;;  %v16564_v36 = vadd.f32 %v16382_v23, %v912_v56 }
 0x175   :  { %v16537_v63 = vpop.f32.mrf.mxu1  ;;  %v864_v53 = vpop.f32.mrf.mxu3  ;;  %v893_v47 = vmax.f32 %v16322_v61, %v820_v43  ;;  %v10988_v8 = vor.u32 %v15044_v22, %v10987_v29  ;;  %v11403_v16 = vld [vmem:[#allocation8 + $0xe80] sm:$0xf] }
 0x176   :  { %v1094_v37 = vpack.c.bf16 %v1068_v18, %v1067_v30  ;;  %v894_v41 = vmax.f32 %v16324_v62, %v864_v53  ;;  %v10731_v30 = vld [vmem:[#allocation8 + $0x940] sm:$0xf] }
 0x177   :  { %v967_v61 = vadd.f32 %v16492_v49, %v893_v47  ;;  %v14980_v18 = vld [vmem:[#allocation8 + $0x95c] sm:$0xf0]  ;;  %3066 = vmatpush.bf16.msra.mxu3 %v11436_v26  ;;  %v16572_v26 = vpop.f32.mrf.mxu0  ;;  %3026 = vmatpush.bf16.msrb.mxu1 %v10988_v8  ;;  %v17976_v8 = vld [vmem:[#allocation39_spill] sm:$0xff] }
 0x178   :  { %1108 = vst [vmem:[#allocation2 + $0x8] sm:$0xff] %v1094_v37  ;;  %v968_v62 = vadd.f32 %v16495_v57, %v894_v41  ;;  %v10732_v25 = vor.u32 %v14980_v18, %v10731_v30  ;;  %v11147_v37 = vld [vmem:[#allocation8 + $0xc80] sm:$0xf]  ;;  %v16570_v30 = vadd.f32 %v16362_v34, %v929_v10  ;;  %v17974_v10 = vld [vmem:[#allocation37_spill] sm:$0xff] }
 0x179   :  { %1122 = vst [vmem:[#allocation2 + $0x8] sm:$0x11] %v17931_v19  ;;  %v1023_v43 = vmax.f32 %v967_v61, 0.0  ;;  %v15084_v47 = vld [vmem:[#allocation8 + $0xc9c] sm:$0xf0] }
 0x17a   :  { %v1024_v53 = vmax.f32 %v968_v62, 0.0  ;;  %3007 = vmatpush.bf16.msra.mxu0 %v10732_v25  ;;  %v11148_v44 = vor.u32 %v15084_v47, %v11147_v37  ;;  %v15148_v48 = vld [vmem:[#allocation8 + $0xe9c] sm:$0xf0]  ;;  %v17972_v62 = vmax.f32 %v16422_v15, 0.0  ;;  %v1013_v37 = vmax.f32 %v16559_v55, 0.0  ;;  %v17973_v47 = vld [vmem:[#allocation29_spill] sm:$0xff] }
 0x17b   :  { %v1071_v61 = vmax.f32 %v1019_v59, %v1023_v43  ;;  %v11404_v29 = vor.u32 %v15148_v48, %v11403_v16  ;;  %v11115_v2 = vld [vmem:[#allocation8 + $0xc40] sm:$0xf]  ;;  %v891_v34 = vmax.f32 %v17973_v47, %v16461_v60 }
 0x17c   :  { %v1072_v18 = vmax.f32 %v17972_v62, %v1024_v53  ;;  %v15076_v22 = vld [vmem:[#allocation8 + $0xc5c] sm:$0xf0]  ;;  %v822_v31 = vpop.f32.mrf.mxu2  ;;  %3048 = vmatpush.bf16.msra.mxu2 %v11148_v44  ;;  %v17977_v62 = vld [vmem:[#allocation32_spill] sm:$0xff] }
 0x17d   :  { %v773_v56 = vpop.f32.mrf.mxu1  ;;  %v11371_v25 = vld [vmem:[#allocation8 + $0xe40] sm:$0xf]  ;;  %v866_v46 = vpop.f32.mrf.mxu3  ;;  %v11116_v20 = vor.u32 %v15076_v22, %v11115_v2  ;;  %3067 = vmatpush.bf16.msra.mxu3 %v11404_v29  ;;  %v899_v55 = vmax.f32 %v17977_v62, %v16519_v5 }
 0x17e   :  { %v884_v41 = vmax.f32 %v17974_v10, %v773_v56  ;;  %v15140_v59 = vld [vmem:[#allocation8 + $0xe5c] sm:$0xf0]  ;;  %v1096_v15 = vpack.c.bf16 %v1072_v18, %v1071_v61  ;;  %v902_v16 = vmax.f32 %v17976_v8, %v866_v46  ;;  %v17978_v8 = vmax.f32 %v16394_v4, 0.0 }
 0x17f   :  { %v17975_v43 = vld [vmem:[#allocation38_spill] sm:$0xff]  ;;  %v11372_v48 = vor.u32 %v15140_v59, %v11371_v25  ;;  %v965_v25 = vadd.f32 %v16542_v32, %v891_v34  ;;  %v973_v62 = vadd.f32 %v16542_v32, %v899_v55 }
 0x180   :  { %v901_v53 = vmax.f32 %v17975_v43, %v822_v31  ;;  %v958_v14 = vadd.f32 %v16567_v58, %v884_v41  ;;  %v10699_v60 = vld [vmem:[#allocation8 + $0x900] sm:$0xf]  ;;  %1110 = vst [vmem:[#allocation2 + $0x18] sm:$0xff] %v1096_v15  ;;  %v976_v61 = vadd.f32 %v16495_v57, %v902_v16  ;;  %3049 = vmatpush.bf16.msra.mxu2 %v11116_v20 }
 0x181   :  { %v14972_v47 = vld [vmem:[#allocation8 + $0x91c] sm:$0xf0]  ;;  %3068 = vmatpush.bf16.msra.mxu3 %v11372_v48  ;;  %v1065_v16 = vmax.f32 %v17978_v8, %v1013_v37  ;;  %v17982_v48 = vmax.f32 %v16439_v38, 0.0  ;;  %v15120_v8 = vld [vmem:[#allocation8 + $0xdc4] sm:$0xf] }
 0x182   :  { %v10955_v56 = vld [vmem:[#allocation8 + $0xb00] sm:$0xf]  ;;  %v975_v44 = vadd.f32 %v16492_v49, %v901_v53  ;;  %v10700_v31 = vor.u32 %v14972_v47, %v10699_v60  ;;  %v1014_v2 = vmax.f32 %v958_v14, 0.0  ;;  %v1032_v43 = vmax.f32 %v976_v61, 0.0  ;;  %v11309_v38 = vld [vmem:[#allocation8 + $0xde0] sm:$0xf0] }
 0x183   :  { %v15036_v18 = vld [vmem:[#allocation8 + $0xb1c] sm:$0xf0]  ;;  %v17979_v60 = vmax.f32 %v16428_v40, 0.0  ;;  %v17984_v40 = vld [vmem:[#allocation33_spill] sm:$0xff] }
 0x184   :  { %v11083_v46 = vld [vmem:[#allocation8 + $0xc00] sm:$0xf]  ;;  %v10956_v5 = vor.u32 %v15036_v18, %v10955_v56  ;;  %v1031_v59 = vmax.f32 %v975_v44, 0.0  ;;  %3008 = vmatpush.bf16.msra.mxu0 %v10700_v31  ;;  %v17980_v18 = vld [vmem:[#allocation31_spill] sm:$0xff]  ;;  %v17983_v31 = vmax.f32 %v16442_v54, 0.0  ;;  %v825_v29 = vpop.f32.mrf.mxu2 }
 0x185   :  { %v15068_v22 = vld [vmem:[#allocation8 + $0xc1c] sm:$0xf0]  ;;  %v1066_v14 = vmax.f32 %v17979_v60, %v1014_v2  ;;  %v776_v4 = vpop.f32.mrf.mxu1  ;;  %v17985_v2 = vld [vmem:[#allocation27_spill] sm:$0xff]  ;;  %v869_v10 = vpop.f32.mrf.mxu3 }
 0x186   :  { %v11339_v41 = vld [vmem:[#allocation8 + $0xe00] sm:$0xf]  ;;  %v11084_v15 = vor.u32 %v15068_v22, %v11083_v46  ;;  %3027 = vmatpush.bf16.msrb.mxu1 %v10956_v5  ;;  %v1075_v61 = vmax.f32 %v17982_v48, %v1031_v59  ;;  %v1076_v46 = vmax.f32 %v17983_v31, %v1032_v43  ;;  %v920_v5 = vmax.f32 %v17985_v2, %v17984_v40  ;;  %v15112_v2 = vld [vmem:[#allocation8 + $0xd84] sm:$0xf] }
 0x187   :  { %v15132_v53 = vld [vmem:[#allocation8 + $0xe1c] sm:$0xf0]  ;;  %v1021_v59 = vmax.f32 %v965_v25, 0.0  ;;  %v1029_v31 = vmax.f32 %v973_v62, 0.0 }
 0x188   :  { %v11340_v20 = vor.u32 %v15132_v53, %v11339_v41  ;;  %v10667_v47 = vld [vmem:[#allocation8 + $0x8c0] sm:$0xf]  ;;  %v1093_v41 = vpack.c.bf16 %v1066_v14, %v1065_v16  ;;  %v17986_v53 = vld [vmem:[#allocation41_spill] sm:$0xff]  ;;  %3050 = vmatpush.bf16.msra.mxu2 %v11084_v15  ;;  %v16608_v54 = vpack.c.bf16 %v1076_v46, %v1075_v61  ;;  %v11312_v14 = vor.u32 %v15120_v8, %v11309_v38  ;;  %v15184_v15 = vld [vmem:[#allocation8 + $0xfc4] sm:$0xf] }
 0x189   :  { %v14964_v56 = vld [vmem:[#allocation8 + $0x8dc] sm:$0xf0]  ;;  %v892_v60 = vmax.f32 %v17986_v53, %v776_v4  ;;  %v11565_v4 = vld [vmem:[#allocation8 + $0xfe0] sm:$0xf0]  ;;  %v17990_v53 = vld [vmem:[#allocation28_spill] sm:$0xff] }
 0x18a   :  { %v17981_v34 = vld [vmem:[#allocation26_spill] sm:$0xff]  ;;  %v10668_v37 = vor.u32 %v14964_v56, %v10667_v47  ;;  %v17988_v56 = vld [vmem:[#allocation43_spill] sm:$0xff]  ;;  %3069 = vmatpush.bf16.msra.mxu3 %v11340_v20  ;;  %1107 = vst [vmem:[#allocation2] sm:$0xff] %v1093_v41  ;;  %v11568_v40 = vor.u32 %v15184_v15, %v11565_v4  ;;  %v17994_v15 = vmax.f32 %v16481_v42, 0.0 }
 0x18b   :  { %v930_v44 = vmax.f32 %v17981_v34, %v17980_v18  ;;  %v10923_v22 = vld [vmem:[#allocation8 + $0xac0] sm:$0xf]  ;;  %v16606_v34 = vpop.f32.mrf.mxu0  ;;  %v910_v48 = vmax.f32 %v17988_v56, %v869_v10  ;;  %v966_v16 = vadd.f32 %v16567_v58, %v892_v60  ;;  %1121 = vst [vmem:[#allocation2] sm:$0x11] %v17931_v19  ;;  %v17989_v41 = vld [vmem:[#allocation35_spill] sm:$0xff] }
 0x18c   :  { %v15028_v55 = vld [vmem:[#allocation8 + $0xadc] sm:$0xf0]  ;;  %3009 = vmatpush.bf16.msra.mxu0 %v10668_v37  ;;  %3119 = vmatpush.bf16.msrb.mxu2 %v11312_v14  ;;  %v928_v60 = vmax.f32 %v17990_v53, %v17989_v41  ;;  %v15176_v56 = vld [vmem:[#allocation8 + $0xf84] sm:$0xf]  ;;  %v827_v7 = vpop.f32.mrf.mxu2 }
 0x18d   :  { %v10924_v18 = vor.u32 %v15028_v55, %v10923_v22  ;;  %v17987_v43 = vld [vmem:[#allocation42_spill] sm:$0xff]  ;;  %v984_v61 = vadd.f32 %v16495_v57, %v910_v48  ;;  %v16617_v10 = vadd.f32 %v16369_v21, %v930_v44  ;;  %v1022_v20 = vmax.f32 %v966_v16, 0.0 }
 0x18e   :  { %v909_v47 = vmax.f32 %v17987_v43, %v825_v29  ;;  %v10635_v46 = vld [vmem:[#allocation8 + $0x880] sm:$0xf]  ;;  %v16620_v22 = vadd.f32 %v16382_v23, %v920_v5  ;;  %v17992_v21 = vmax.f32 %v16469_v33, 0.0  ;;  %v11533_v48 = vld [vmem:[#allocation8 + $0xfa0] sm:$0xf0]  ;;  %v17993_v5 = vmax.f32 %v16425_v12, 0.0  ;;  %3138 = vmatpush.bf16.msrb.mxu3 %v11568_v40 }
 0x18f   :  { %3028 = vmatpush.bf16.msrb.mxu1 %v10924_v18  ;;  %v14956_v29 = vld [vmem:[#allocation8 + $0x89c] sm:$0xf0]  ;;  %v1040_v8 = vmax.f32 %v984_v61, 0.0  ;;  %v17991_v18 = vmax.f32 %v16410_v35, 0.0  ;;  %v15168_v19 = vld [vmem:[#allocation8 + $0xf44] sm:$0xf] }
 0x190   :  { %v983_v25 = vadd.f32 %v16492_v49, %v909_v47  ;;  %v10891_v62 = vld [vmem:[#allocation8 + $0xa80] sm:$0xf]  ;;  %v1070_v44 = vmax.f32 %v17992_v21, %v1022_v20  ;;  %v10636_v43 = vor.u32 %v14956_v29, %v10635_v46  ;;  %v11277_v47 = vld [vmem:[#allocation8 + $0xda0] sm:$0xf0]  ;;  %v16630_v16 = vmax.f32 %v17993_v5, %v1029_v31  ;;  %v17996_v20 = vld [vmem:[#allocation36_spill] sm:$0xff] }
 0x191   :  { %v15020_v37 = vld [vmem:[#allocation8 + $0xa9c] sm:$0xf0]  ;;  %v1069_v38 = vmax.f32 %v17991_v18, %v1021_v59  ;;  %v1080_v4 = vmax.f32 %v17994_v15, %v1040_v8  ;;  %v915_v12 = vmax.f32 %v17996_v20, %v16606_v34  ;;  %v17997_v18 = vld [vmem:[#allocation45_spill] sm:$0xff]  ;;  %v11501_v34 = vld [vmem:[#allocation8 + $0xf60] sm:$0xf0] }
 0x192   :  { %v1039_v55 = vmax.f32 %v983_v25, 0.0  ;;  %v778_v25 = vpop.f32.mrf.mxu1  ;;  %v10892_v35 = vor.u32 %v15020_v37, %v10891_v62  ;;  %v10603_v59 = vld [vmem:[#allocation8 + $0x840] sm:$0xf]  ;;  %3010 = vmatpush.bf16.msra.mxu0 %v10636_v43  ;;  %v17999_v37 = vld [vmem:[#allocation47_spill] sm:$0xff] }
 0x193   :  { %v14948_v33 = vld [vmem:[#allocation8 + $0x85c] sm:$0xf0]  ;;  %v1095_v31 = vpack.c.bf16 %v1070_v44, %v1069_v38  ;;  %v900_v21 = vmax.f32 %v17997_v18, %v778_v25  ;;  %v11536_v44 = vor.u32 %v15176_v56, %v11533_v48  ;;  %v11504_v48 = vor.u32 %v15168_v19, %v11501_v34  ;;  %v15144_v41 = vld [vmem:[#allocation8 + $0xe84] sm:$0xf] }
 0x194   :  { %v1079_v14 = vmax.f32 %v1035_v52, %v1039_v55  ;;  %v10859_v61 = vld [vmem:[#allocation8 + $0xa40] sm:$0xf]  ;;  %v871_v52 = vpop.f32.mrf.mxu3  ;;  %v15104_v55 = vld [vmem:[#allocation8 + $0xd44] sm:$0xf]  ;;  %3029 = vmatpush.bf16.msrb.mxu1 %v10892_v35  ;;  %v10604_v25 = vor.u32 %v14948_v33, %v10603_v59  ;;  %v1670_v19 = vunpack.c.l.b16 %v16608_v54 }
 0x195   :  { %v17995_v46 = vld [vmem:[#allocation34_spill] sm:$0xff]  ;;  %v918_v5 = vmax.f32 %v17999_v37, %v871_v52  ;;  %1109 = vst [vmem:[#allocation2 + $0x10] sm:$0xff] %v1095_v31  ;;  %v974_v38 = vadd.f32 %v16567_v58, %v900_v21  ;;  %3139 = vmatpush.bf16.msrb.mxu3 %v11536_v44  ;;  %v16653_v21 = vadd.f32 %v16542_v32, %v915_v12  ;;  %v18000_v37 = vld [vmem:[#allocation40_spill] sm:$0xff]  ;;  %v18002_v12 = vmax.f32 %v16517_v1, 0.0 }
 0x196   :  { %v907_v29 = vmax.f32 %v17995_v46, %v16572_v26  ;;  %v15012_v42 = vld [vmem:[#allocation8 + $0xa5c] sm:$0xf0]  ;;  %v1100_v8 = vpack.c.bf16 %v1080_v4, %v1079_v14  ;;  %v11280_v26 = vor.u32 %v15112_v2, %v11277_v47  ;;  %v11245_v46 = vld [vmem:[#allocation8 + $0xd60] sm:$0xf0]  ;;  %v1060_v14 = vmax.f32 %v16617_v10, 0.0  ;;  %v742_v4 = vpop.f32.mrf.mxu0  ;;  %3011 = vmatpush.bf16.msra.mxu0 %v10604_v25 }
 0x197   :  { %v17998_v40 = vld [vmem:[#allocation46_spill] sm:$0xff]  ;;  %v10860_v43 = vor.u32 %v15012_v42, %v10859_v61  ;;  %v992_v35 = vadd.f32 %v16495_v57, %v918_v5  ;;  %v11248_v2 = vor.u32 %v15104_v55, %v11245_v46  ;;  %v1030_v56 = vmax.f32 %v974_v38, 0.0 }
 0x198   :  { %v917_v62 = vmax.f32 %v17998_v40, %v827_v7  ;;  %v16643_v15 = vld [vmem:[#allocation2 + $0x18] sm:$0x88]  ;;  %1114 = vst [vmem:[#allocation2 + $0x38] sm:$0xff] %v1100_v8  ;;  %3120 = vmatpush.bf16.msrb.mxu2 %v11280_v26  ;;  %v16650_v31 = vadd.f32 %v16542_v32, %v907_v29  ;;  %v923_v5 = vmax.f32 %v18000_v37, %v742_v4  ;;  %v18001_v29 = vmax.f32 %v16487_v17, 0.0 }
 0x199   :  { %v10571_v20 = vld [vmem:[#allocation8 + $0x800] sm:$0xf]  ;;  %v15096_v33 = vld [vmem:[#allocation8 + $0xd04] sm:$0xf]  ;;  %v1048_v8 = vmax.f32 %v992_v35, 0.0  ;;  %3030 = vmatpush.bf16.msrb.mxu1 %v10860_v43  ;;  %v1666_v46 = vunpack.c.l.b16 %v16643_v15  ;;  %v18003_v35 = vld [vmem:[#allocation48_spill] sm:$0xff]  ;;  %3140 = vmatpush.bf16.msrb.mxu3 %v11504_v48 }
 0x19a   :  { %v14940_v18 = vld [vmem:[#allocation8 + $0x81c] sm:$0xf0]  ;;  %v991_v7 = vadd.f32 %v16492_v49, %v917_v62  ;;  %v11213_v61 = vld [vmem:[#allocation8 + $0xd20] sm:$0xf0]  ;;  %v1074_v26 = vmax.f32 %v18001_v29, %v1030_v56  ;;  %v781_v44 = vpop.f32.mrf.mxu1  ;;  %v1037_v17 = vmax.f32 %v16650_v31, 0.0  ;;  %v1045_v29 = vmax.f32 %v16653_v21, 0.0 }
 0x19b   :  { %v10827_v47 = vld [vmem:[#allocation8 + $0xa00] sm:$0xf]  ;;  %v10572_v59 = vor.u32 %v14940_v18, %v10571_v20  ;;  %v15160_v55 = vld [vmem:[#allocation8 + $0xf04] sm:$0xf]  ;;  %v1084_v38 = vmax.f32 %v18002_v12, %v1048_v8  ;;  %v11216_v25 = vor.u32 %v15096_v33, %v11213_v61  ;;  %v16678_v48 = vpack.c.b16 %v1670_v19, %v1666_v46 }
 0x19c   :  { %v15004_v52 = vld [vmem:[#allocation8 + $0xa1c] sm:$0xf0]  ;;  %v1047_v42 = vmax.f32 %v991_v7, 0.0  ;;  %v11469_v62 = vld [vmem:[#allocation8 + $0xf20] sm:$0xf0]  ;;  %3121 = vmatpush.bf16.msrb.mxu2 %v11248_v2  ;;  %v16666_v7 = vpack.c.bf16 %v1074_v26, %v16630_v16  ;;  %v874_v6 = vpop.f32.mrf.mxu3  ;;  %v18004_v2 = vld [vmem:[#allocation49_spill] sm:$0xff] }
 0x19d   :  { %v10828_v40 = vor.u32 %v15004_v52, %v10827_v47  ;;  %v11472_v43 = vor.u32 %v15160_v55, %v11469_v62  ;;  %v14992_v20 = vld [vmem:[#allocation8 + $0x9c4] sm:$0xf]  ;;  %v908_v47 = vmax.f32 %v18003_v35, %v781_v44  ;;  %v830_v52 = vpop.f32.mrf.mxu2  ;;  %3012 = vmatpush.bf16.msra.mxu0 %v10572_v59  ;;  %v1050_v16 = vmax.f32 %v16620_v22, 0.0  ;;  %v15181_v22 = vld [vmem:[#allocation8 + $0xfa4] sm:$0xf0] }
 0x19e   :  { %v1083_v34 = vmax.f32 %v1043_v24, %v1047_v42  ;;  %v10797_v18 = vld [vmem:[#allocation8 + $0x9e0] sm:$0xf0]  ;;  %v925_v33 = vmax.f32 %v18004_v2, %v830_v52  ;;  %v16673_v62 = vadd.f32 %v16542_v32, %v923_v5  ;;  %v1671_v44 = vunpack.c.h.b16 %v16608_v54 }
 0x19f   :  { %v15056_v4 = vld [vmem:[#allocation8 + $0xbc4] sm:$0xf]  ;;  %v10800_v1 = vor.u32 %v14992_v20, %v10797_v18  ;;  %3031 = vmatpush.bf16.msrb.mxu1 %v10828_v40  ;;  %v982_v37 = vadd.f32 %v16567_v58, %v908_v47  ;;  %3141 = vmatpush.bf16.msrb.mxu3 %v11472_v43  ;;  %v18007_v43 = vmax.f32 %v16526_v11, 0.0 }
 0x1a0   :  { %v11053_v24 = vld [vmem:[#allocation8 + $0xbe0] sm:$0xf0]  ;;  %v1102_v56 = vpack.c.bf16 %v1084_v38, %v1083_v34  ;;  %v999_v40 = vadd.f32 %v16492_v49, %v925_v33  ;;  %3122 = vmatpush.bf16.msrb.mxu2 %v11216_v25  ;;  %v1667_v38 = vunpack.c.h.b16 %v16643_v15  ;;  %v18006_v25 = vmax.f32 %v16459_v0, 0.0 }
 0x1a1   :  { %v18005_v61 = vld [vmem:[#allocation50_spill] sm:$0xff]  ;;  %v11056_v8 = vor.u32 %v15056_v4, %v11053_v24  ;;  %3081 = vmatpush.bf16.msrb.mxu0 %v10800_v1  ;;  %v1038_v12 = vmax.f32 %v982_v37, 0.0  ;;  %v16689_v4 = vadd.f32 %v16382_v23, %v928_v60  ;;  %v1053_v15 = vmax.f32 %v16673_v62, 0.0  ;;  %v15189_v62 = vld [vmem:[#allocation8 + $0xfe4] sm:$0xf0] }
 0x1a2   :  { %v926_v42 = vmax.f32 %v18005_v61, %v874_v6  ;;  %v15088_v55 = vld [vmem:[#allocation8 + $0xcc4] sm:$0xf]  ;;  %1116 = vst [vmem:[#allocation2 + $0x48] sm:$0xff] %v1102_v56  ;;  %v1077_v35 = vmax.f32 %v18006_v25, %v1037_v17  ;;  %v1055_v47 = vmax.f32 %v999_v40, 0.0  ;;  %v1703_v56 = vrot.slane %v16678_v48, 3  ;;  %v783_v17 = vpop.f32.mrf.mxu1 }
 0x1a3   :  { %v11181_v31 = vld [vmem:[#allocation8 + $0xce0] sm:$0xf0]  ;;  %3100 = vmatpush.bf16.msra.mxu1 %v11056_v8  ;;  %v1078_v24 = vmax.f32 %v18007_v43, %v1038_v12  ;;  %v18008_v23 = vmax.f32 %v16531_v27, 0.0  ;;  %v18009_v0 = vmax.f32 %v16549_v28, 0.0  ;;  %v916_v37 = vmax.f32 %v16434_v9, %v783_v17 }
 0x1a4   :  { %v15152_v59 = vld [vmem:[#allocation8 + $0xec4] sm:$0xf]  ;;  %v1000_v26 = vadd.f32 %v16495_v57, %v926_v42  ;;  %v11184_v46 = vor.u32 %v15088_v55, %v11181_v31  ;;  %v1687_v27 = vpack.c.b16 %v1671_v44, %v1667_v38 }
 0x1a5   :  { %v11437_v34 = vld [vmem:[#allocation8 + $0xee0] sm:$0xf0]  ;;  %v1087_v53 = vmax.f32 %v18008_v23, %v1055_v47  ;;  %v1099_v11 = vpack.c.bf16 %v1078_v24, %v1077_v35  ;;  %v832_v40 = vpop.f32.mrf.mxu2  ;;  %v990_v47 = vadd.f32 %v16567_v58, %v916_v37  ;;  %v18010_v37 = vmax.f32 %v16484_v51, 0.0 }
 0x1a6   :  { %v14984_v5 = vld [vmem:[#allocation8 + $0x984] sm:$0xf]  ;;  %v1056_v52 = vmax.f32 %v1000_v26, 0.0  ;;  %v11440_v2 = vor.u32 %v15152_v59, %v11437_v34  ;;  %3123 = vmatpush.bf16.msrb.mxu2 %v11184_v46  ;;  %v876_v59 = vpop.f32.mrf.mxu3  ;;  %v10563_v26 = vld [vmem:[#allocation2 + $0x38] sm:$0xf] }
 0x1a7   :  { %v10765_v20 = vld [vmem:[#allocation8 + $0x9a0] sm:$0xf0]  ;;  %1113 = vst [vmem:[#allocation2 + $0x30] sm:$0xff] %v1099_v11 }
 0x1a8   :  { %v15048_v18 = vld [vmem:[#allocation8 + $0xb84] sm:$0xf]  ;;  %v1088_v60 = vmax.f32 %v18009_v0, %v1056_v52  ;;  %v10768_v61 = vor.u32 %v14984_v5, %v10765_v20  ;;  %3142 = vmatpush.bf16.msrb.mxu3 %v11440_v2  ;;  %v933_v5 = vmax.f32 %v16444_v45, %v832_v40  ;;  %v934_v20 = vmax.f32 %v16446_v13, %v876_v59 }
 0x1a9   :  { %v11021_v6 = vld [vmem:[#allocation8 + $0xba0] sm:$0xf0]  ;;  %v14935_v52 = vld [vmem:[#allocation2 + $0x44] sm:$0xf0]  ;;  %v1046_v0 = vmax.f32 %v990_v47, 0.0  ;;  %v1081_v40 = vmax.f32 %v18010_v37, %v1045_v29  ;;  %v18011_v59 = vmax.f32 %v16564_v36, 0.0 }
 0x1aa   :  { %v15080_v1 = vld [vmem:[#allocation8 + $0xc84] sm:$0xf]  ;;  %v11024_v42 = vor.u32 %v15048_v18, %v11021_v6  ;;  %v1104_v46 = vpack.c.bf16 %v1088_v60, %v1087_v53  ;;  %3082 = vmatpush.bf16.msrb.mxu0 %v10768_v61  ;;  %v10565_v6 = vld [vmem:[#allocation2 + $0x48] sm:$0xf0]  ;;  %v1007_v24 = vadd.f32 %v16492_v49, %v933_v5  ;;  %v1008_v45 = vadd.f32 %v16495_v57, %v934_v20 }
 0x1ab   :  { %v11149_v33 = vld [vmem:[#allocation8 + $0xca0] sm:$0xf0]  ;;  %v10564_v2 = vor.u32 %v14935_v52, %v10563_v26  ;;  %v1706_v60 = vrot.slane %v1687_v27, 3  ;;  %v1082_v26 = vmax.f32 %v18011_v59, %v1046_v0 }
 0x1ac   :  { %v11405_v8 = vld [vmem:[#allocation8 + $0xea0] sm:$0xf0]  ;;  %v11152_v28 = vor.u32 %v15080_v1, %v11149_v33  ;;  %3101 = vmatpush.bf16.msra.mxu1 %v11024_v42  ;;  %1118 = vst [vmem:[#allocation2 + $0x58] sm:$0xff] %v1104_v46  ;;  %v16709_v33 = vld [vmem:[#allocation2 + $0x10] sm:$0x88]  ;;  %v18012_v46 = vmax.f32 %v16570_v30, 0.0 }
 0x1ad   :  { %v14976_v55 = vld [vmem:[#allocation8 + $0x944] sm:$0xf]  ;;  %v11408_v38 = vor.u32 %v15144_v41, %v11405_v8  ;;  %v744_v8 = vpop.f32.mrf.mxu0  ;;  %v16711_v49 = vrot.slane %v10564_v2, 3  ;;  %v1101_v47 = vpack.c.bf16 %v1082_v26, %v1081_v40  ;;  %v1058_v2 = vmax.f32 %v16689_v4, 0.0  ;;  %v11283_v26 = vld [vmem:[#allocation8 + $0xd88] sm:$0xf] }
 0x1ae   :  { %v10733_v31 = vld [vmem:[#allocation8 + $0x960] sm:$0xf0]  ;;  %3124 = vmatpush.bf16.msrb.mxu2 %v11152_v28 }
 0x1af   :  { %v14933_v34 = vld [vmem:[#allocation2 + $0x3c] sm:$0xf]  ;;  %v10736_v43 = vor.u32 %v14976_v55, %v10733_v31  ;;  %3143 = vmatpush.bf16.msrb.mxu3 %v11408_v38  ;;  %v1063_v55 = vmax.f32 %v1007_v24, 0.0  ;;  %v1064_v31 = vmax.f32 %v1008_v45, 0.0  ;;  %v16729_v51 = vsel %vm502_vm0, %v1703_v56, %v16711_v49  ;;  %1115 = vst [vmem:[#allocation2 + $0x40] sm:$0xff] %v1101_v47 }
 0x1b0   :  { %v15040_v12 = vld [vmem:[#allocation8 + $0xb44] sm:$0xf]  ;;  %v10568_v13 = vor.u32 %v14933_v34, %v10565_v6  ;;  %3051 = vmatmul.bf16.vlgmr.msra.gmra.mxu2 %v16729_v51  ;;  %v1668_v6 = vunpack.c.l.b16 %v16666_v7  ;;  %v11315_v45 = vld [vmem:[#allocation8 + $0xdc8] sm:$0xf] }
 0x1b1   :  { %v10989_v25 = vld [vmem:[#allocation8 + $0xb60] sm:$0xf0]  ;;  %3083 = vmatpush.bf16.msrb.mxu0 %v10736_v43  ;;  %v1091_v5 = vmax.f32 %v18012_v46, %v1063_v55  ;;  %v1092_v20 = vmax.f32 %v1060_v14, %v1064_v31  ;;  %v1664_v14 = vunpack.c.l.b16 %v16709_v33  ;;  %v1669_v55 = vunpack.c.h.b16 %v16666_v7  ;;  %v15117_v46 = vld [vmem:[#allocation8 + $0xda4] sm:$0xf0] }
 0x1b2   :  { %v15072_v18 = vld [vmem:[#allocation8 + $0xc44] sm:$0xf]  ;;  %v10992_v1 = vor.u32 %v15040_v12, %v10989_v25  ;;  %v16713_v57 = vrot.slane %v10568_v13, 3  ;;  %v12003_v7 = vld [vmem:[#allocation8 + $0x308] sm:$0xf] }
 0x1b3   :  { %v11117_v9 = vld [vmem:[#allocation8 + $0xc60] sm:$0xf0]  ;;  %v1106_v52 = vpack.c.bf16 %v1092_v20, %v1091_v5  ;;  %v11539_v5 = vld [vmem:[#allocation8 + $0xf88] sm:$0xf] }
 0x1b4   :  { %v15136_v35 = vld [vmem:[#allocation8 + $0xe44] sm:$0xf]  ;;  %v11120_v17 = vor.u32 %v15072_v18, %v11117_v9  ;;  %3102 = vmatpush.bf16.msra.mxu1 %v10992_v1  ;;  %v786_v18 = vpop.f32.mrf.mxu1  ;;  %v16733_v36 = vsel %vm502_vm0, %v1706_v60, %v16713_v57 }
 0x1b5   :  { %v11373_v23 = vld [vmem:[#allocation8 + $0xe60] sm:$0xf0]  ;;  %v924_v10 = vmax.f32 %v16497_v50, %v786_v18  ;;  %3070 = vmatmul.bf16.vlgmr.msra.gmra.mxu3 %v16733_v36  ;;  %1120 = vst [vmem:[#allocation2 + $0x68] sm:$0xff] %v1106_v52  ;;  %v10555_v18 = vld [vmem:[#allocation2 + $0x30] sm:$0xf] }
 0x1b6   :  { %v14968_v53 = vld [vmem:[#allocation8 + $0x904] sm:$0xf]  ;;  %v11376_v61 = vor.u32 %v15136_v35, %v11373_v23  ;;  %v18013_v35 = vld [vmem:[#allocation44_spill] sm:$0xff]  ;;  %3125 = vmatpush.bf16.msrb.mxu2 %v11120_v17  ;;  %v15125_v23 = vld [vmem:[#allocation8 + $0xde4] sm:$0xf0]  ;;  %v18015_v17 = vmov 0  }
 0x1b7   :  { %v10701_v41 = vld [vmem:[#allocation8 + $0x920] sm:$0xf0]  ;;  %v931_v30 = vmax.f32 %v18013_v35, %v744_v8  ;;  %v998_v1 = vadd.f32 %v16567_v58, %v924_v10  ;;  %1124 = vst [vmem:[#allocation2 + $0x68] sm:$0x88] %v18015_v17  ;;  %v1665_v8 = vunpack.c.h.b16 %v16709_v33  ;;  %v14934_v35 = vld [vmem:[#allocation2 + $0x3c] sm:$0xf0]  ;;  %v11540_v10 = vor.u32 %v15181_v22, %v11539_v5 }
 0x1b8   :  { %v15032_v42 = vld [vmem:[#allocation8 + $0xb04] sm:$0xf]  ;;  %v10704_v34 = vor.u32 %v14968_v53, %v10701_v41  ;;  %3144 = vmatpush.bf16.msrb.mxu3 %v11376_v61  ;;  %v18014_v53 = vmax.f32 %v16385_v39, 0.0  ;;  %v10556_v52 = vor.u32 %v14934_v35, %v10555_v18  ;;  %v14997_v18 = vld [vmem:[#allocation8 + $0x9e4] sm:$0xf0] }
 0x1b9   :  { %v10957_v11 = vld [vmem:[#allocation8 + $0xb20] sm:$0xf0]  ;;  %v16748_v60 = vadd.f32 %v16542_v32, %v931_v30  ;;  %v1054_v61 = vmax.f32 %v998_v1, 0.0  ;;  %v10557_v30 = vld [vmem:[#allocation2 + $0x40] sm:$0xf0]  ;;  %v1685_v47 = vpack.c.b16 %v1669_v55, %v1665_v8  ;;  %v18016_v8 = vmax.f32 %v16391_v3, 0.0 }
 0x1ba   :  { %v10960_v27 = vor.u32 %v15032_v42, %v10957_v11  ;;  %v15064_v28 = vld [vmem:[#allocation8 + $0xc04] sm:$0xf]  ;;  %3084 = vmatpush.bf16.msrb.mxu0 %v10704_v34  ;;  %v1085_v0 = vmax.f32 %v18014_v53, %v1053_v15  ;;  %v11571_v42 = vld [vmem:[#allocation8 + $0xfc8] sm:$0xf]  ;;  %v11316_v11 = vor.u32 %v15125_v23, %v11315_v45  ;;  %v1684_v15 = vpack.c.b16 %v1668_v6, %v1664_v14 }
 0x1bb   :  { %v11085_v12 = vld [vmem:[#allocation8 + $0xc20] sm:$0xf0]  ;;  %v1086_v32 = vmax.f32 %v1050_v16, %v1054_v61  ;;  %v11572_v40 = vor.u32 %v15189_v62, %v11571_v42  ;;  %v16765_v53 = vrot.slane %v10556_v52, 3  ;;  %v15173_v42 = vld [vmem:[#allocation8 + $0xf64] sm:$0xf0] }
 0x1bc   :  { %v15128_v25 = vld [vmem:[#allocation8 + $0xe04] sm:$0xf]  ;;  %v11088_v38 = vor.u32 %v15064_v28, %v11085_v12  ;;  %3103 = vmatpush.bf16.msra.mxu1 %v10960_v27  ;;  %v788_v34 = vpop.f32.mrf.mxu1  ;;  %v1697_v1 = vrot.slane %v1684_v15, 3  ;;  %v14989_v52 = vld [vmem:[#allocation8 + $0x9a4] sm:$0xf0] }
 0x1bd   :  { %v11341_v21 = vld [vmem:[#allocation8 + $0xe20] sm:$0xf0]  ;;  %v1103_v16 = vpack.c.bf16 %v1086_v32, %v1085_v0  ;;  %v932_v20 = vmax.f32 %v16537_v63, %v788_v34  ;;  %v15109_v0 = vld [vmem:[#allocation8 + $0xd64] sm:$0xf0] }
 0x1be   :  { %v14960_v29 = vld [vmem:[#allocation8 + $0x8c4] sm:$0xf]  ;;  %v11344_v43 = vor.u32 %v15128_v25, %v11341_v21  ;;  %3126 = vmatpush.bf16.msrb.mxu2 %v11088_v38  ;;  %v14932_v21 = vld [vmem:[#allocation2 + $0x34] sm:$0xf]  ;;  %v16775_v62 = vsel %vm502_vm0, %v1697_v1, %v16765_v53  ;;  %v15053_v1 = vld [vmem:[#allocation8 + $0xba4] sm:$0xf0] }
 0x1bf   :  { %v10669_v9 = vld [vmem:[#allocation8 + $0x8e0] sm:$0xf0]  ;;  %1117 = vst [vmem:[#allocation2 + $0x50] sm:$0xff] %v1103_v16  ;;  %v10560_v38 = vor.u32 %v14932_v21, %v10557_v30  ;;  %3013 = vmatmul.bf16.vlgmr.msra.gmra.mxu0 %v16775_v62  ;;  %v11059_v21 = vld [vmem:[#allocation8 + $0xbc8] sm:$0xf] }
 0x1c0   :  { %v15024_v48 = vld [vmem:[#allocation8 + $0xac4] sm:$0xf]  ;;  %v10672_v50 = vor.u32 %v14960_v29, %v10669_v9  ;;  %3145 = vmatpush.bf16.msrb.mxu3 %v11344_v43  ;;  %v11284_v29 = vor.u32 %v15117_v46, %v11283_v26  ;;  %v15093_v30 = vld [vmem:[#allocation8 + $0xce4] sm:$0xf0] }
 0x1c1   :  { %v10925_v56 = vld [vmem:[#allocation8 + $0xae0] sm:$0xf0]  ;;  %v16767_v61 = vrot.slane %v10560_v38, 3  ;;  %v11027_v38 = vld [vmem:[#allocation8 + $0xb88] sm:$0xf] }
 0x1c2   :  { %v10928_v24 = vor.u32 %v15024_v48, %v10925_v56  ;;  %v1396_v13 = vld [vmem:[#allocation2 + $0x58] sm:$0x11]  ;;  %3085 = vmatpush.bf16.msrb.mxu0 %v10672_v50  ;;  %3195 = vmatpush.bf16.msra.mxu2 %v11316_v11  ;;  %v1061_v48 = vmax.f32 %v16748_v60, 0.0  ;;  %v1006_v56 = vadd.f32 %v16567_v58, %v932_v20  ;;  %v11507_v60 = vld [vmem:[#allocation8 + $0xf48] sm:$0xf]  ;;  %v1700_v58 = vrot.slane %v1685_v47, 3 }
 0x1c3   :  { %v1682_v41 = vunpack.c.l.b16 %v1396_v13  ;;  %v1683_v31 = vunpack.c.h.b16 %v1396_v13  ;;  %v14952_v37 = vld [vmem:[#allocation8 + $0x884] sm:$0xf]  ;;  %v11251_v13 = vld [vmem:[#allocation8 + $0xd48] sm:$0xf]  ;;  %v11508_v4 = vor.u32 %v15173_v42, %v11507_v60 }
 0x1c4   :  { %v10637_v39 = vld [vmem:[#allocation8 + $0x8a0] sm:$0xf0]  ;;  %3104 = vmatpush.bf16.msra.mxu1 %v10928_v24  ;;  %3214 = vmatpush.bf16.msra.mxu3 %v11572_v40  ;;  %v1062_v23 = vmax.f32 %v1006_v56, 0.0  ;;  %v16780_v40 = vsel %vm502_vm0, %v1700_v58, %v16767_v61  ;;  %v11443_v47 = vld [vmem:[#allocation8 + $0xec8] sm:$0xf] }
 0x1c5   :  { %v15016_v59 = vld [vmem:[#allocation8 + $0xa84] sm:$0xf]  ;;  %v1694_v27 = vpack.c.b16 %v1682_v41, %v1682_v41  ;;  %v16757_v28 = vpack.c.b16 %v1683_v31, %v1683_v31  ;;  %v10640_v12 = vor.u32 %v14952_v37, %v10637_v39  ;;  %v1089_v31 = vmax.f32 %v18016_v8, %v1061_v48  ;;  %3032 = vmatmul.bf16.vlgmr.msrb.gmra.mxu1 %v16780_v40  ;;  %v10771_v56 = vld [vmem:[#allocation8 + $0x988] sm:$0xf] }
 0x1c6   :  { %v10893_v33 = vld [vmem:[#allocation8 + $0xaa0] sm:$0xf0]  ;;  %3196 = vmatpush.bf16.msra.mxu2 %v11284_v29  ;;  %v1090_v11 = vmax.f32 %v1058_v2, %v1062_v23  ;;  %v11252_v37 = vor.u32 %v15109_v0, %v11251_v13  ;;  %v15061_v29 = vld [vmem:[#allocation8 + $0xbe4] sm:$0xf0] }
 0x1c7   :  { %v10896_v25 = vor.u32 %v15016_v59, %v10893_v33  ;;  %v14944_v9 = vld [vmem:[#allocation8 + $0x844] sm:$0xf]  ;;  %v1713_v50 = vrot.slane %v1694_v27, 3  ;;  %v1715_v24 = vrot.slane %v16757_v28, 3  ;;  %3086 = vmatpush.bf16.msrb.mxu0 %v10640_v12  ;;  %v11219_v59 = vld [vmem:[#allocation8 + $0xd08] sm:$0xf]  ;;  %v11060_v35 = vor.u32 %v15061_v29, %v11059_v21 }
 0x1c8   :  { %v10605_v14 = vld [vmem:[#allocation8 + $0x860] sm:$0xf0]  ;;  %3215 = vmatpush.bf16.msra.mxu3 %v11540_v10  ;;  %v15101_v33 = vld [vmem:[#allocation8 + $0xd24] sm:$0xf0]  ;;  %v1105_v26 = vpack.c.bf16 %v1090_v11, %v1089_v31  ;;  %v15121_v21 = vld [vmem:[#allocation8 + $0xdcc] sm:$0xf] }
 0x1c9   :  { %v15008_v63 = vld [vmem:[#allocation8 + $0xa44] sm:$0xf]  ;;  %3105 = vmatpush.bf16.msra.mxu1 %v10896_v25  ;;  %v10608_v41 = vor.u32 %v14944_v9, %v10605_v14  ;;  %v16784_v3 = vsel %vm502_vm0, %v16711_v49, %v1713_v50  ;;  %v16790_v34 = vsel %vm502_vm0, %v16713_v57, %v1715_v24  ;;  %v11475_v28 = vld [vmem:[#allocation8 + $0xf08] sm:$0xf]  ;;  %v1395_v49 = vld [vmem:[#allocation2 + $0x50] sm:$0x11]  ;;  %v11220_v16 = vor.u32 %v15101_v33, %v11219_v59 }
 0x1ca   :  { %v10861_v43 = vld [vmem:[#allocation8 + $0xa60] sm:$0xf0]  ;;  %3056 = vmatmul.bf16.gmra.mxu2 %v16784_v3  ;;  %v15165_v12 = vld [vmem:[#allocation8 + $0xf24] sm:$0xf0]  ;;  %3075 = vmatmul.bf16.gmra.mxu3 %v16790_v34  ;;  %1119 = vst [vmem:[#allocation2 + $0x60] sm:$0xff] %v1105_v26  ;;  %v1680_v5 = vunpack.c.l.b16 %v1395_v49  ;;  %v1681_v22 = vunpack.c.h.b16 %v1395_v49  ;;  %v10772_v50 = vor.u32 %v14989_v52, %v10771_v56  ;;  %v11028_v24 = vor.u32 %v15053_v1, %v11027_v38 }
 0x1cb   :  { %v10864_v45 = vor.u32 %v15008_v63, %v10861_v43  ;;  %v14936_v39 = vld [vmem:[#allocation8 + $0x804] sm:$0xf]  ;;  %v10803_v25 = vld [vmem:[#allocation8 + $0x9c8] sm:$0xf]  ;;  %3087 = vmatpush.bf16.msrb.mxu0 %v10608_v41  ;;  %3197 = vmatpush.bf16.msra.mxu2 %v11252_v37  ;;  %v11476_v20 = vor.u32 %v15165_v12, %v11475_v28  ;;  %1123 = vst [vmem:[#allocation2 + $0x60] sm:$0x88] %v18015_v17 }
 0x1cc   :  { %v10573_v32 = vld [vmem:[#allocation8 + $0x820] sm:$0xf0]  ;;  %3216 = vmatpush.bf16.msra.mxu3 %v11508_v4  ;;  %v10804_v57 = vor.u32 %v14997_v18, %v10803_v25  ;;  %v11187_v9 = vld [vmem:[#allocation8 + $0xcc8] sm:$0xf]  ;;  %v1692_v14 = vpack.c.b16 %v1680_v5, %v1680_v5  ;;  %v1693_v48 = vpack.c.b16 %v1681_v22, %v1681_v22 }
 0x1cd   :  { %v15000_v15 = vld [vmem:[#allocation8 + $0xa04] sm:$0xf]  ;;  %3106 = vmatpush.bf16.msra.mxu1 %v10864_v45  ;;  %v10576_v46 = vor.u32 %v14936_v39, %v10573_v32  ;;  %v15157_v10 = vld [vmem:[#allocation8 + $0xee4] sm:$0xf0]  ;;  %v11188_v63 = vor.u32 %v15093_v30, %v11187_v9  ;;  %v15185_v9 = vld [vmem:[#allocation8 + $0xfcc] sm:$0xf] }
 0x1ce   :  { %v10829_v2 = vld [vmem:[#allocation8 + $0xa20] sm:$0xf0]  ;;  %v11444_v43 = vor.u32 %v15157_v10, %v11443_v47  ;;  %v11155_v17 = vld [vmem:[#allocation8 + $0xc88] sm:$0xf]  ;;  %v1709_v60 = vrot.slane %v1692_v14, 3  ;;  %v1711_v58 = vrot.slane %v1693_v48, 3 }
 0x1cf   :  { %v10832_v27 = vor.u32 %v15000_v15, %v10829_v2  ;;  %3088 = vmatpush.bf16.msrb.mxu0 %v10576_v46  ;;  %3198 = vmatpush.bf16.msra.mxu2 %v11220_v16  ;;  %v15085_v45 = vld [vmem:[#allocation8 + $0xca4] sm:$0xf0]  ;;  %v11869_v54 = vld [vmem:[#allocation8 + $0x220] sm:$0xf0] }
 0x1d0   :  { %3217 = vmatpush.bf16.msra.mxu3 %v11476_v20  ;;  %v11411_v13 = vld [vmem:[#allocation8 + $0xe88] sm:$0xf]  ;;  %v11156_v42 = vor.u32 %v15085_v45, %v11155_v17  ;;  %v16801_v5 = vsel %vm502_vm0, %v16767_v61, %v1711_v58  ;;  %v15177_v17 = vld [vmem:[#allocation8 + $0xf8c] sm:$0xf] }
 0x1d1   :  { %3107 = vmatpush.bf16.msra.mxu1 %v10832_v27  ;;  %v15149_v23 = vld [vmem:[#allocation8 + $0xea4] sm:$0xf0]  ;;  %v16796_v27 = vsel %vm502_vm0, %v16765_v53, %v1709_v60 }
 0x1d2   :  { %v10995_v0 = vld [vmem:[#allocation8 + $0xb48] sm:$0xf]  ;;  %v11412_v8 = vor.u32 %v15149_v23, %v11411_v13  ;;  %3018 = vmatmul.bf16.gmra.mxu0 %v16796_v27 }
 0x1d3   :  { %3157 = vmatpush.bf16.msra.mxu0 %v10804_v57  ;;  %v15045_v41 = vld [vmem:[#allocation8 + $0xb64] sm:$0xf0]  ;;  %3199 = vmatpush.bf16.msra.mxu2 %v11188_v63  ;;  %v11317_v57 = vld [vmem:[#allocation8 + $0xde8] sm:$0xf0] }
 0x1d4   :  { %3218 = vmatpush.bf16.msra.mxu3 %v11444_v43  ;;  %v10739_v31 = vld [vmem:[#allocation8 + $0x948] sm:$0xf]  ;;  %v10996_v39 = vor.u32 %v15045_v41, %v10995_v0  ;;  %v11320_v48 = vor.u32 %v15121_v21, %v11317_v57  ;;  %v15113_v63 = vld [vmem:[#allocation8 + $0xd8c] sm:$0xf] }
 0x1d5   :  { %3176 = vmatpush.bf16.msrb.mxu1 %v11060_v35  ;;  %v14981_v11 = vld [vmem:[#allocation8 + $0x964] sm:$0xf0]  ;;  %v11573_v35 = vld [vmem:[#allocation8 + $0xfe8] sm:$0xf0] }
 0x1d6   :  { %v11123_v37 = vld [vmem:[#allocation8 + $0xc48] sm:$0xf]  ;;  %v10740_v33 = vor.u32 %v14981_v11, %v10739_v31  ;;  %3037 = vmatmul.bf16.gmra.mxu1 %v16801_v5  ;;  %v11576_v52 = vor.u32 %v15185_v9, %v11573_v35  ;;  %v11285_v43 = vld [vmem:[#allocation8 + $0xda8] sm:$0xf0] }
 0x1d7   :  { %3158 = vmatpush.bf16.msra.mxu0 %v10772_v50  ;;  %v15077_v32 = vld [vmem:[#allocation8 + $0xc64] sm:$0xf0]  ;;  %3200 = vmatpush.bf16.msra.mxu2 %v11156_v42  ;;  %v11541_v50 = vld [vmem:[#allocation8 + $0xfa8] sm:$0xf0]  ;;  %v11288_v23 = vor.u32 %v15113_v63, %v11285_v43 }
 0x1d8   :  { %v11379_v15 = vld [vmem:[#allocation8 + $0xe48] sm:$0xf]  ;;  %3219 = vmatpush.bf16.msra.mxu3 %v11412_v8  ;;  %v11124_v28 = vor.u32 %v15077_v32, %v11123_v37  ;;  %v11544_v0 = vor.u32 %v15177_v17, %v11541_v50  ;;  %v15105_v31 = vld [vmem:[#allocation8 + $0xd4c] sm:$0xf] }
 0x1d9   :  { %3177 = vmatpush.bf16.msrb.mxu1 %v11028_v24  ;;  %v15141_v4 = vld [vmem:[#allocation8 + $0xe64] sm:$0xf0]  ;;  %v11253_v37 = vld [vmem:[#allocation8 + $0xd68] sm:$0xf0] }
 0x1da   :  { %v10963_v2 = vld [vmem:[#allocation8 + $0xb08] sm:$0xf]  ;;  %v11380_v12 = vor.u32 %v15141_v4, %v11379_v15  ;;  %3127 = vmatmul.bf16.vlgmr.msrb.gmra.mxu2 %v16729_v51  ;;  %3146 = vmatmul.bf16.vlgmr.msrb.gmra.mxu3 %v16733_v36  ;;  %v11509_v32 = vld [vmem:[#allocation8 + $0xf68] sm:$0xf0] }
 0x1db   :  { %v15037_v59 = vld [vmem:[#allocation8 + $0xb24] sm:$0xf0]  ;;  %3159 = vmatpush.bf16.msra.mxu0 %v10740_v33  ;;  %3201 = vmatpush.bf16.msra.mxu2 %v11124_v28  ;;  %v11256_v33 = vor.u32 %v15105_v31, %v11253_v37  ;;  %v15089_v35 = vld [vmem:[#allocation8 + $0xccc] sm:$0xf] }
 0x1dc   :  { %v10707_v26 = vld [vmem:[#allocation8 + $0x908] sm:$0xf]  ;;  %v10964_v22 = vor.u32 %v15037_v59, %v10963_v2  ;;  %3220 = vmatpush.bf16.msra.mxu3 %v11380_v12  ;;  %v15097_v12 = vld [vmem:[#allocation8 + $0xd0c] sm:$0xf] }
 0x1dd   :  { %v14973_v25 = vld [vmem:[#allocation8 + $0x924] sm:$0xf0]  ;;  %3178 = vmatpush.bf16.msrb.mxu1 %v10996_v39  ;;  %v15169_v39 = vld [vmem:[#allocation8 + $0xf4c] sm:$0xf] }
 0x1de   :  { %v11091_v49 = vld [vmem:[#allocation8 + $0xc08] sm:$0xf]  ;;  %v10708_v29 = vor.u32 %v14973_v25, %v10707_v26  ;;  %v11512_v26 = vor.u32 %v15169_v39, %v11509_v32  ;;  %v11221_v25 = vld [vmem:[#allocation8 + $0xd28] sm:$0xf0] }
 0x1df   :  { %v15069_v46 = vld [vmem:[#allocation8 + $0xc24] sm:$0xf0]  ;;  %v15041_v63 = vld [vmem:[#allocation8 + $0xb4c] sm:$0xf] }
 0x1e0   :  { %v11347_v16 = vld [vmem:[#allocation8 + $0xe08] sm:$0xf]  ;;  %v11092_v61 = vor.u32 %v15069_v46, %v11091_v49  ;;  %3160 = vmatpush.bf16.msra.mxu0 %v10708_v29  ;;  %v15161_v46 = vld [vmem:[#allocation8 + $0xf0c] sm:$0xf]  ;;  %v11224_v29 = vor.u32 %v15097_v12, %v11221_v25 }
 0x1e1   :  { %v15133_v20 = vld [vmem:[#allocation8 + $0xe24] sm:$0xf0]  ;;  %3179 = vmatpush.bf16.msrb.mxu1 %v10964_v22  ;;  %v11477_v22 = vld [vmem:[#allocation8 + $0xf28] sm:$0xf0] }
 0x1e2   :  { %v10931_v18 = vld [vmem:[#allocation8 + $0xac8] sm:$0xf]  ;;  %v11348_v30 = vor.u32 %v15133_v20, %v11347_v16  ;;  %3202 = vmatpush.bf16.msra.mxu2 %v11092_v61  ;;  %3089 = vmatmul.bf16.vlgmr.msrb.gmra.mxu0 %v16775_v62  ;;  %v15057_v16 = vld [vmem:[#allocation8 + $0xbcc] sm:$0xf]  ;;  %v11480_v9 = vor.u32 %v15161_v46, %v11477_v22 }
 0x1e3   :  { %v15029_v53 = vld [vmem:[#allocation8 + $0xae4] sm:$0xf0]  ;;  %v14993_v20 = vld [vmem:[#allocation8 + $0x9cc] sm:$0xf] }
 0x1e4   :  { %v10675_v47 = vld [vmem:[#allocation8 + $0x8c8] sm:$0xf]  ;;  %v10932_v14 = vor.u32 %v15029_v53, %v10931_v18  ;;  %3221 = vmatpush.bf16.msra.mxu3 %v11348_v30  ;;  %v10805_v18 = vld [vmem:[#allocation8 + $0x9e8] sm:$0xf0] }
 0x1e5   :  { %v14965_v10 = vld [vmem:[#allocation8 + $0x8e4] sm:$0xf0]  ;;  %v11061_v53 = vld [vmem:[#allocation8 + $0xbe8] sm:$0xf0] }
 0x1e6   :  { %v10899_v56 = vld [vmem:[#allocation8 + $0xa88] sm:$0xf]  ;;  %v10676_v1 = vor.u32 %v14965_v10, %v10675_v47  ;;  %3180 = vmatpush.bf16.msrb.mxu1 %v10932_v14  ;;  %3271 = vmatpush.bf16.msrb.mxu2 %v11320_v48  ;;  %v11064_v57 = vor.u32 %v15057_v16, %v11061_v53  ;;  %v15049_v61 = vld [vmem:[#allocation8 + $0xb8c] sm:$0xf]  ;;  %v10808_v47 = vor.u32 %v14993_v20, %v10805_v18  ;;  %v11323_v16 = vld [vmem:[#allocation8 + $0xdd0] sm:$0xf] }
 0x1e7   :  { %v15021_v38 = vld [vmem:[#allocation8 + $0xaa4] sm:$0xf0]  ;;  %3108 = vmatmul.bf16.vlgmr.msra.gmra.mxu1 %v16780_v40  ;;  %v11029_v30 = vld [vmem:[#allocation8 + $0xba8] sm:$0xf0]  ;;  %v15126_v20 = vld [vmem:[#allocation8 + $0xdec] sm:$0xf0] }
 0x1e8   :  { %v10643_v24 = vld [vmem:[#allocation8 + $0x888] sm:$0xf]  ;;  %v10900_v13 = vor.u32 %v15021_v38, %v10899_v56  ;;  %3290 = vmatpush.bf16.msrb.mxu3 %v11576_v52  ;;  %3161 = vmatpush.bf16.msra.mxu0 %v10676_v1  ;;  %v11189_v10 = vld [vmem:[#allocation8 + $0xce8] sm:$0xf0]  ;;  %v11032_v38 = vor.u32 %v15049_v61, %v11029_v30  ;;  %v11579_v53 = vld [vmem:[#allocation8 + $0xfd0] sm:$0xf]  ;;  %v11324_v30 = vor.u32 %v15126_v20, %v11323_v16 }
 0x1e9   :  { %v14957_v45 = vld [vmem:[#allocation8 + $0x8a4] sm:$0xf0]  ;;  %v15153_v14 = vld [vmem:[#allocation8 + $0xecc] sm:$0xf]  ;;  %v11192_v1 = vor.u32 %v15089_v35, %v11189_v10 }
 0x1ea   :  { %v10867_v60 = vld [vmem:[#allocation8 + $0xa48] sm:$0xf]  ;;  %v10644_v41 = vor.u32 %v14957_v45, %v10643_v24  ;;  %3181 = vmatpush.bf16.msrb.mxu1 %v10900_v13  ;;  %3272 = vmatpush.bf16.msrb.mxu2 %v11288_v23  ;;  %v11445_v48 = vld [vmem:[#allocation8 + $0xee8] sm:$0xf0] }
 0x1eb   :  { %v15013_v58 = vld [vmem:[#allocation8 + $0xa64] sm:$0xf0]  ;;  %3132 = vmatmul.bf16.gmra.mxu2 %v16784_v3  ;;  %3151 = vmatmul.bf16.gmra.mxu3 %v16790_v34  ;;  %v14985_v56 = vld [vmem:[#allocation8 + $0x98c] sm:$0xf]  ;;  %v11448_v17 = vor.u32 %v15153_v14, %v11445_v48  ;;  %v11291_v48 = vld [vmem:[#allocation8 + $0xd90] sm:$0xf] }
 0x1ec   :  { %v10611_v42 = vld [vmem:[#allocation8 + $0x848] sm:$0xf]  ;;  %v10868_v11 = vor.u32 %v15013_v58, %v10867_v60  ;;  %3291 = vmatpush.bf16.msrb.mxu3 %v11544_v0  ;;  %3162 = vmatpush.bf16.msra.mxu0 %v10644_v41  ;;  %v10773_v52 = vld [vmem:[#allocation8 + $0x9a8] sm:$0xf0] }
 0x1ed   :  { %v14949_v8 = vld [vmem:[#allocation8 + $0x864] sm:$0xf0]  ;;  %v10997_v43 = vld [vmem:[#allocation8 + $0xb68] sm:$0xf0]  ;;  %v10776_v24 = vor.u32 %v14985_v56, %v10773_v52  ;;  %v15118_v56 = vld [vmem:[#allocation8 + $0xdac] sm:$0xf0] }
 0x1ee   :  { %v10835_v15 = vld [vmem:[#allocation8 + $0xa08] sm:$0xf]  ;;  %v10612_v2 = vor.u32 %v14949_v8, %v10611_v42  ;;  %3182 = vmatpush.bf16.msrb.mxu1 %v10868_v11  ;;  %3273 = vmatpush.bf16.msrb.mxu2 %v11256_v33  ;;  %v15081_v50 = vld [vmem:[#allocation8 + $0xc8c] sm:$0xf]  ;;  %v11000_v0 = vor.u32 %v15041_v63, %v10997_v43  ;;  %v15182_v63 = vld [vmem:[#allocation8 + $0xfac] sm:$0xf0] }
 0x1ef   :  { %v15005_v4 = vld [vmem:[#allocation8 + $0xa24] sm:$0xf0]  ;;  %v11157_v45 = vld [vmem:[#allocation8 + $0xca8] sm:$0xf0] }
 0x1f0   :  { %v10579_v59 = vld [vmem:[#allocation8 + $0x808] sm:$0xf]  ;;  %v10836_v49 = vor.u32 %v15005_v4, %v10835_v15  ;;  %3163 = vmatpush.bf16.msra.mxu0 %v10612_v2  ;;  %3292 = vmatpush.bf16.msrb.mxu3 %v11512_v26  ;;  %v15145_v13 = vld [vmem:[#allocation8 + $0xe8c] sm:$0xf]  ;;  %v11160_v60 = vor.u32 %v15081_v50, %v11157_v45  ;;  %v11292_v50 = vor.u32 %v15118_v56, %v11291_v48  ;;  %v11003_v48 = vld [vmem:[#allocation8 + $0xb50] sm:$0xf] }
 0x1f1   :  { %v14941_v28 = vld [vmem:[#allocation8 + $0x824] sm:$0xf0]  ;;  %v11413_v23 = vld [vmem:[#allocation8 + $0xea8] sm:$0xf0]  ;;  %v15046_v56 = vld [vmem:[#allocation8 + $0xb6c] sm:$0xf0] }
 0x1f2   :  { %v10580_v21 = vor.u32 %v14941_v28, %v10579_v59  ;;  %3183 = vmatpush.bf16.msrb.mxu1 %v10836_v49  ;;  %3274 = vmatpush.bf16.msrb.mxu2 %v11224_v29  ;;  %v11416_v58 = vor.u32 %v15145_v13, %v11413_v23  ;;  %v14977_v41 = vld [vmem:[#allocation8 + $0x94c] sm:$0xf] }
 0x1f3   :  { %v10741_v42 = vld [vmem:[#allocation8 + $0x968] sm:$0xf0]  ;;  %3094 = vmatmul.bf16.gmra.mxu0 %v16796_v27 }
 0x1f4   :  { %3164 = vmatpush.bf16.msra.mxu0 %v10580_v21  ;;  %3293 = vmatpush.bf16.msrb.mxu3 %v11480_v9  ;;  %v15073_v8 = vld [vmem:[#allocation8 + $0xc4c] sm:$0xf]  ;;  %v10744_v15 = vor.u32 %v14977_v41, %v10741_v42  ;;  %v15190_v21 = vld [vmem:[#allocation8 + $0xfec] sm:$0xf0] }
 0x1f5   :  { %v11125_v31 = vld [vmem:[#allocation8 + $0xc68] sm:$0xf0]  ;;  %v11580_v10 = vor.u32 %v15190_v21, %v11579_v53  ;;  %v15110_v42 = vld [vmem:[#allocation8 + $0xd6c] sm:$0xf0] }
 0x1f6   :  { %3252 = vmatpush.bf16.msra.mxu1 %v11064_v57  ;;  %3275 = vmatpush.bf16.msrb.mxu2 %v11192_v1  ;;  %v15137_v11 = vld [vmem:[#allocation8 + $0xe4c] sm:$0xf]  ;;  %v11128_v2 = vor.u32 %v15073_v8, %v11125_v31  ;;  %v11515_v8 = vld [vmem:[#allocation8 + $0xf50] sm:$0xf] }
 0x1f7   :  { %v11381_v37 = vld [vmem:[#allocation8 + $0xe68] sm:$0xf0]  ;;  %3113 = vmatmul.bf16.gmra.mxu1 %v16801_v5  ;;  %v15174_v31 = vld [vmem:[#allocation8 + $0xf6c] sm:$0xf0] }
 0x1f8   :  { %3233 = vmatpush.bf16.msrb.mxu0 %v10808_v47  ;;  %3294 = vmatpush.bf16.msrb.mxu3 %v11448_v17  ;;  %v15033_v39 = vld [vmem:[#allocation8 + $0xb0c] sm:$0xf]  ;;  %v11384_v59 = vor.u32 %v15137_v11, %v11381_v37  ;;  %v11195_v21 = vld [vmem:[#allocation8 + $0xcd0] sm:$0xf] }
 0x1f9   :  { %v10965_v32 = vld [vmem:[#allocation8 + $0xb28] sm:$0xf0] }
 0x1fa   :  { %3253 = vmatpush.bf16.msra.mxu1 %v11032_v38  ;;  %v14969_v4 = vld [vmem:[#allocation8 + $0x90c] sm:$0xf]  ;;  %3276 = vmatpush.bf16.msrb.mxu2 %v11160_v60  ;;  %v10968_v12 = vor.u32 %v15033_v39, %v10965_v32  ;;  %v11547_v38 = vld [vmem:[#allocation8 + $0xf90] sm:$0xf] }
 0x1fb   :  { %v10709_v33 = vld [vmem:[#allocation8 + $0x928] sm:$0xf0]  ;;  %3203 = vmatmul.bf16.vlgmr.msra.gmra.mxu2 %v16729_v51  ;;  %3222 = vmatmul.bf16.vlgmr.msra.gmra.mxu3 %v16733_v36 }
 0x1fc   :  { %3234 = vmatpush.bf16.msrb.mxu0 %v10776_v24  ;;  %3295 = vmatpush.bf16.msrb.mxu3 %v11416_v58  ;;  %v15065_v26 = vld [vmem:[#allocation8 + $0xc0c] sm:$0xf]  ;;  %v10712_v18 = vor.u32 %v14969_v4, %v10709_v33  ;;  %v11548_v24 = vor.u32 %v15182_v63, %v11547_v38  ;;  %v11259_v58 = vld [vmem:[#allocation8 + $0xd50] sm:$0xf]  ;;  %v11516_v4 = vor.u32 %v15174_v31, %v11515_v8 }
 0x1fd   :  { %v11093_v28 = vld [vmem:[#allocation8 + $0xc28] sm:$0xf0]  ;;  %v15102_v33 = vld [vmem:[#allocation8 + $0xd2c] sm:$0xf0] }
 0x1fe   :  { %3254 = vmatpush.bf16.msra.mxu1 %v11000_v0  ;;  %v15129_v25 = vld [vmem:[#allocation8 + $0xe0c] sm:$0xf]  ;;  %3277 = vmatpush.bf16.msrb.mxu2 %v11128_v2  ;;  %v11096_v57 = vor.u32 %v15065_v26, %v11093_v28  ;;  %v11483_v28 = vld [vmem:[#allocation8 + $0xf10] sm:$0xf] }
 0x1ff   :  { %v11349_v49 = vld [vmem:[#allocation8 + $0xe28] sm:$0xf0]  ;;  %v11163_v63 = vld [vmem:[#allocation8 + $0xc90] sm:$0xf] }
 0x200   :  { %v15025_v46 = vld [vmem:[#allocation8 + $0xacc] sm:$0xf]  ;;  %3235 = vmatpush.bf16.msrb.mxu0 %v10744_v15  ;;  %3296 = vmatpush.bf16.msrb.mxu3 %v11384_v59  ;;  %v11352_v29 = vor.u32 %v15129_v25, %v11349_v49  ;;  %v11260_v15 = vor.u32 %v15110_v42, %v11259_v58  ;;  %v11227_v59 = vld [vmem:[#allocation8 + $0xd10] sm:$0xf] }
 0x201   :  { %v10933_v22 = vld [vmem:[#allocation8 + $0xae8] sm:$0xf0]  ;;  %v11067_v25 = vld [vmem:[#allocation8 + $0xbd0] sm:$0xf] }
 0x202   :  { %v14961_v9 = vld [vmem:[#allocation8 + $0x8cc] sm:$0xf]  ;;  %3255 = vmatpush.bf16.msra.mxu1 %v10968_v12  ;;  %v10936_v61 = vor.u32 %v15025_v46, %v10933_v22  ;;  %3278 = vmatpush.bf16.msrb.mxu2 %v11096_v57  ;;  %v15166_v12 = vld [vmem:[#allocation8 + $0xf2c] sm:$0xf0] }
 0x203   :  { %v10677_v35 = vld [vmem:[#allocation8 + $0x8e8] sm:$0xf0]  ;;  %3165 = vmatmul.bf16.vlgmr.msra.gmra.mxu0 %v16775_v62  ;;  %v10811_v49 = vld [vmem:[#allocation8 + $0x9d0] sm:$0xf]  ;;  %v11484_v53 = vor.u32 %v15166_v12, %v11483_v28 }
 0x204   :  { %v15017_v47 = vld [vmem:[#allocation8 + $0xa8c] sm:$0xf]  ;;  %3236 = vmatpush.bf16.msrb.mxu0 %v10712_v18  ;;  %v10680_v52 = vor.u32 %v14961_v9, %v10677_v35  ;;  %3297 = vmatpush.bf16.msrb.mxu3 %v11352_v29  ;;  %v14998_v46 = vld [vmem:[#allocation8 + $0x9ec] sm:$0xf0]  ;;  %v11228_v18 = vor.u32 %v15102_v33, %v11227_v59 }
 0x205   :  { %v10901_v14 = vld [vmem:[#allocation8 + $0xaa8] sm:$0xf0]  ;;  %v15062_v22 = vld [vmem:[#allocation8 + $0xbec] sm:$0xf0]  ;;  %v10812_v9 = vor.u32 %v14998_v46, %v10811_v49  ;;  %v11325_v49 = vld [vmem:[#allocation8 + $0xdf0] sm:$0xf0] }
 0x206   :  { %v14953_v43 = vld [vmem:[#allocation8 + $0x88c] sm:$0xf]  ;;  %3256 = vmatpush.bf16.msra.mxu1 %v10936_v61  ;;  %3347 = vmatpush.bf16.msra.mxu2 %v11324_v30  ;;  %v10904_v17 = vor.u32 %v15017_v47, %v10901_v14  ;;  %v11068_v20 = vor.u32 %v15062_v22, %v11067_v25  ;;  %v11035_v57 = vld [vmem:[#allocation8 + $0xb90] sm:$0xf]  ;;  %v15122_v25 = vld [vmem:[#allocation8 + $0xdd4] sm:$0xf] }
 0x207   :  { %v10645_v1 = vld [vmem:[#allocation8 + $0x8a8] sm:$0xf0]  ;;  %3184 = vmatmul.bf16.vlgmr.msrb.gmra.mxu1 %v16780_v40  ;;  %v15054_v29 = vld [vmem:[#allocation8 + $0xbac] sm:$0xf0]  ;;  %v15186_v22 = vld [vmem:[#allocation8 + $0xfd4] sm:$0xf] }
 0x208   :  { %3366 = vmatpush.bf16.msra.mxu3 %v11580_v10  ;;  %v15009_v45 = vld [vmem:[#allocation8 + $0xa4c] sm:$0xf]  ;;  %3237 = vmatpush.bf16.msrb.mxu0 %v10680_v52  ;;  %v10648_v23 = vor.u32 %v14953_v43, %v10645_v1  ;;  %v15094_v35 = vld [vmem:[#allocation8 + $0xcec] sm:$0xf0]  ;;  %v11036_v14 = vor.u32 %v15054_v29, %v11035_v57  ;;  %v11328_v29 = vor.u32 %v15122_v25, %v11325_v49 }
 0x209   :  { %v10869_v13 = vld [vmem:[#allocation8 + $0xa68] sm:$0xf0]  ;;  %v11451_v61 = vld [vmem:[#allocation8 + $0xed0] sm:$0xf]  ;;  %v11196_v52 = vor.u32 %v15094_v35, %v11195_v21 }
 0x20a   :  { %v14945_v0 = vld [vmem:[#allocation8 + $0x84c] sm:$0xf]  ;;  %3257 = vmatpush.bf16.msra.mxu1 %v10904_v17  ;;  %3348 = vmatpush.bf16.msra.mxu2 %v11292_v50  ;;  %v10872_v41 = vor.u32 %v15009_v45, %v10869_v13  ;;  %v15158_v30 = vld [vmem:[#allocation8 + $0xeec] sm:$0xf0] }
 0x20b   :  { %v10613_v60 = vld [vmem:[#allocation8 + $0x868] sm:$0xf0]  ;;  %3208 = vmatmul.bf16.gmra.mxu2 %v16784_v3  ;;  %3227 = vmatmul.bf16.gmra.mxu3 %v16790_v34  ;;  %v10779_v47 = vld [vmem:[#allocation8 + $0x990] sm:$0xf]  ;;  %v11452_v38 = vor.u32 %v15158_v30, %v11451_v61  ;;  %v15114_v30 = vld [vmem:[#allocation8 + $0xd94] sm:$0xf] }
 0x20c   :  { %3367 = vmatpush.bf16.msra.mxu3 %v11548_v24  ;;  %v15001_v11 = vld [vmem:[#allocation8 + $0xa0c] sm:$0xf]  ;;  %3238 = vmatpush.bf16.msrb.mxu0 %v10648_v23  ;;  %v10616_v39 = vor.u32 %v14945_v0, %v10613_v60  ;;  %v14990_v10 = vld [vmem:[#allocation8 + $0x9ac] sm:$0xf0]  ;;  %v11004_v24 = vor.u32 %v15046_v56, %v11003_v48  ;;  %v11549_v48 = vld [vmem:[#allocation8 + $0xfb0] sm:$0xf0] }
 0x20d   :  { %v10837_v37 = vld [vmem:[#allocation8 + $0xa28] sm:$0xf0]  ;;  %v10780_v43 = vor.u32 %v14990_v10, %v10779_v47  ;;  %v15086_v1 = vld [vmem:[#allocation8 + $0xcac] sm:$0xf0]  ;;  %v11293_v47 = vld [vmem:[#allocation8 + $0xdb0] sm:$0xf0] }
 0x20e   :  { %v14937_v32 = vld [vmem:[#allocation8 + $0x80c] sm:$0xf]  ;;  %3258 = vmatpush.bf16.msra.mxu1 %v10872_v41  ;;  %v10840_v26 = vor.u32 %v15001_v11, %v10837_v37  ;;  %3349 = vmatpush.bf16.msra.mxu2 %v11260_v15  ;;  %v11419_v17 = vld [vmem:[#allocation8 + $0xe90] sm:$0xf]  ;;  %v11164_v45 = vor.u32 %v15086_v1, %v11163_v63  ;;  %v11296_v63 = vor.u32 %v15114_v30, %v11293_v47 }
 0x20f   :  { %v10581_v2 = vld [vmem:[#allocation8 + $0x828] sm:$0xf0]  ;;  %v15150_v50 = vld [vmem:[#allocation8 + $0xeac] sm:$0xf0] }
 0x210   :  { %3239 = vmatpush.bf16.msrb.mxu0 %v10616_v39  ;;  %v10584_v16 = vor.u32 %v14937_v32, %v10581_v2  ;;  %3368 = vmatpush.bf16.msra.mxu3 %v11516_v4  ;;  %v11420_v13 = vor.u32 %v15150_v50, %v11419_v17  ;;  %v10747_v23 = vld [vmem:[#allocation8 + $0x950] sm:$0xf] }
 0x211   :  { %v14982_v0 = vld [vmem:[#allocation8 + $0x96c] sm:$0xf0] }
 0x212   :  { %3259 = vmatpush.bf16.msra.mxu1 %v10840_v26  ;;  %3350 = vmatpush.bf16.msra.mxu2 %v11228_v18  ;;  %v11131_v60 = vld [vmem:[#allocation8 + $0xc50] sm:$0xf]  ;;  %v10748_v11 = vor.u32 %v14982_v0, %v10747_v23  ;;  %v11261_v0 = vld [vmem:[#allocation8 + $0xd70] sm:$0xf0] }
 0x213   :  { %v15078_v58 = vld [vmem:[#allocation8 + $0xc6c] sm:$0xf0]  ;;  %3170 = vmatmul.bf16.gmra.mxu0 %v16796_v27 }
 0x214   :  { %3240 = vmatpush.bf16.msrb.mxu0 %v10584_v16  ;;  %3369 = vmatpush.bf16.msra.mxu3 %v11484_v53  ;;  %v11387_v41 = vld [vmem:[#allocation8 + $0xe50] sm:$0xf]  ;;  %v11132_v39 = vor.u32 %v15078_v58, %v11131_v60  ;;  %v11581_v16 = vld [vmem:[#allocation8 + $0xff0] sm:$0xf0] }
 0x215   :  { %v15142_v42 = vld [vmem:[#allocation8 + $0xe6c] sm:$0xf0]  ;;  %v11584_v35 = vor.u32 %v15186_v22, %v11581_v16  ;;  %v15170_v60 = vld [vmem:[#allocation8 + $0xf54] sm:$0xf] }
 0x216   :  { %3328 = vmatpush.bf16.msrb.mxu1 %v11068_v20  ;;  %3351 = vmatpush.bf16.msra.mxu2 %v11196_v52  ;;  %v10971_v8 = vld [vmem:[#allocation8 + $0xb10] sm:$0xf]  ;;  %v11388_v32 = vor.u32 %v15142_v42, %v11387_v41  ;;  %v11517_v58 = vld [vmem:[#allocation8 + $0xf70] sm:$0xf0] }
 0x217   :  { %v15038_v31 = vld [vmem:[#allocation8 + $0xb2c] sm:$0xf0]  ;;  %3189 = vmatmul.bf16.gmra.mxu1 %v16801_v5  ;;  %v15090_v16 = vld [vmem:[#allocation8 + $0xcd4] sm:$0xf] }
 0x218   :  { %3309 = vmatpush.bf16.msra.mxu0 %v10812_v9  ;;  %3370 = vmatpush.bf16.msra.mxu3 %v11452_v38  ;;  %v10715_v37 = vld [vmem:[#allocation8 + $0x910] sm:$0xf]  ;;  %v10972_v59 = vor.u32 %v15038_v31, %v10971_v8 }
 0x219   :  { %v14974_v15 = vld [vmem:[#allocation8 + $0x92c] sm:$0xf0] }
 0x21a   :  { %3329 = vmatpush.bf16.msrb.mxu1 %v11036_v14  ;;  %3352 = vmatpush.bf16.msra.mxu2 %v11164_v45  ;;  %v11099_v4 = vld [vmem:[#allocation8 + $0xc10] sm:$0xf]  ;;  %v10716_v46 = vor.u32 %v14974_v15, %v10715_v37  ;;  %v15178_v14 = vld [vmem:[#allocation8 + $0xf94] sm:$0xf]  ;;  %v11520_v37 = vor.u32 %v15170_v60, %v11517_v58 }
 0x21b   :  { %v15070_v2 = vld [vmem:[#allocation8 + $0xc2c] sm:$0xf0]  ;;  %3279 = vmatmul.bf16.vlgmr.msrb.gmra.mxu2 %v16729_v51  ;;  %3298 = vmatmul.bf16.vlgmr.msrb.gmra.mxu3 %v16733_v36  ;;  %v11229_v15 = vld [vmem:[#allocation8 + $0xd30] sm:$0xf0] }
 0x21c   :  { %3310 = vmatpush.bf16.msra.mxu0 %v10780_v43  ;;  %3371 = vmatpush.bf16.msra.mxu3 %v11420_v13  ;;  %v11355_v33 = vld [vmem:[#allocation8 + $0xe10] sm:$0xf]  ;;  %v11100_v20 = vor.u32 %v15070_v2, %v11099_v4  ;;  %v11552_v43 = vor.u32 %v15178_v14, %v11549_v48  ;;  %v15106_v13 = vld [vmem:[#allocation8 + $0xd54] sm:$0xf] }
 0x21d   :  { %v15134_v26 = vld [vmem:[#allocation8 + $0xe2c] sm:$0xf0]  ;;  %v15162_v2 = vld [vmem:[#allocation8 + $0xf14] sm:$0xf] }
 0x21e   :  { %3330 = vmatpush.bf16.msrb.mxu1 %v11004_v24  ;;  %v10939_v28 = vld [vmem:[#allocation8 + $0xad0] sm:$0xf]  ;;  %3353 = vmatpush.bf16.msra.mxu2 %v11132_v39  ;;  %v11356_v18 = vor.u32 %v15134_v26, %v11355_v33  ;;  %v15058_v33 = vld [vmem:[#allocation8 + $0xbd4] sm:$0xf] }
 0x21f   :  { %v15030_v12 = vld [vmem:[#allocation8 + $0xaec] sm:$0xf0]  ;;  %v14994_v26 = vld [vmem:[#allocation8 + $0x9d4] sm:$0xf] }
 0x220   :  { %3311 = vmatpush.bf16.msra.mxu0 %v10748_v11  ;;  %3372 = vmatpush.bf16.msra.mxu3 %v11388_v32  ;;  %v10683_v53 = vld [vmem:[#allocation8 + $0x8d0] sm:$0xf]  ;;  %v10940_v57 = vor.u32 %v15030_v12, %v10939_v28  ;;  %v11264_v11 = vor.u32 %v15106_v13, %v11261_v0  ;;  %v15098_v32 = vld [vmem:[#allocation8 + $0xd14] sm:$0xf] }
 0x221   :  { %v14966_v21 = vld [vmem:[#allocation8 + $0x8ec] sm:$0xf0]  ;;  %v10813_v28 = vld [vmem:[#allocation8 + $0x9f0] sm:$0xf0] }
 0x222   :  { %3331 = vmatpush.bf16.msrb.mxu1 %v10972_v59  ;;  %v10907_v9 = vld [vmem:[#allocation8 + $0xa90] sm:$0xf]  ;;  %v10684_v10 = vor.u32 %v14966_v21, %v10683_v53  ;;  %3354 = vmatpush.bf16.msra.mxu2 %v11100_v20  ;;  %v11485_v59 = vld [vmem:[#allocation8 + $0xf30] sm:$0xf0] }
 0x223   :  { %v15022_v61 = vld [vmem:[#allocation8 + $0xaac] sm:$0xf0]  ;;  %3241 = vmatmul.bf16.vlgmr.msrb.gmra.mxu0 %v16775_v62  ;;  %v11069_v12 = vld [vmem:[#allocation8 + $0xbf0] sm:$0xf0]  ;;  %v11488_v22 = vor.u32 %v15162_v2, %v11485_v59 }
 0x224   :  { %3312 = vmatpush.bf16.msra.mxu0 %v10716_v46  ;;  %3373 = vmatpush.bf16.msra.mxu3 %v11356_v18  ;;  %v10651_v56 = vld [vmem:[#allocation8 + $0x890] sm:$0xf]  ;;  %v10908_v38 = vor.u32 %v15022_v61, %v10907_v9  ;;  %v11072_v49 = vor.u32 %v15058_v33, %v11069_v12  ;;  %v11232_v46 = vor.u32 %v15098_v32, %v11229_v15  ;;  %v11197_v20 = vld [vmem:[#allocation8 + $0xcf0] sm:$0xf0]  ;;  %v11331_v33 = vld [vmem:[#allocation8 + $0xdd8] sm:$0xf] }
 0x225   :  { %v14958_v52 = vld [vmem:[#allocation8 + $0x8ac] sm:$0xf0]  ;;  %v10816_v18 = vor.u32 %v14994_v26, %v10813_v28  ;;  %v15154_v53 = vld [vmem:[#allocation8 + $0xed4] sm:$0xf]  ;;  %v11200_v30 = vor.u32 %v15090_v16, %v11197_v20  ;;  %v15127_v26 = vld [vmem:[#allocation8 + $0xdf4] sm:$0xf0] }
 0x226   :  { %3332 = vmatpush.bf16.msrb.mxu1 %v10940_v57  ;;  %3423 = vmatpush.bf16.msrb.mxu2 %v11328_v29  ;;  %v10875_v1 = vld [vmem:[#allocation8 + $0xa50] sm:$0xf]  ;;  %v10652_v50 = vor.u32 %v14958_v52, %v10651_v56  ;;  %v11453_v21 = vld [vmem:[#allocation8 + $0xef0] sm:$0xf0]  ;;  %v11587_v12 = vld [vmem:[#allocation8 + $0xfd8] sm:$0xf] }
 0x227   :  { %v15014_v17 = vld [vmem:[#allocation8 + $0xa6c] sm:$0xf0]  ;;  %3260 = vmatmul.bf16.vlgmr.msra.gmra.mxu1 %v16780_v40  ;;  %v15050_v57 = vld [vmem:[#allocation8 + $0xb94] sm:$0xf]  ;;  %v11456_v47 = vor.u32 %v15154_v53, %v11453_v21  ;;  %v11332_v21 = vor.u32 %v15127_v26, %v11331_v33  ;;  %v11491_v26 = vld [vmem:[#allocation8 + $0xf18] sm:$0xf] }
 0x228   :  { %3442 = vmatpush.bf16.msrb.mxu3 %v11584_v35  ;;  %3313 = vmatpush.bf16.msra.mxu0 %v10684_v10  ;;  %v10619_v24 = vld [vmem:[#allocation8 + $0x850] sm:$0xf]  ;;  %v10876_v23 = vor.u32 %v15014_v17, %v10875_v1  ;;  %v14986_v29 = vld [vmem:[#allocation8 + $0x994] sm:$0xf] }
 0x229   :  { %v14950_v45 = vld [vmem:[#allocation8 + $0x86c] sm:$0xf0]  ;;  %v10781_v9 = vld [vmem:[#allocation8 + $0x9b0] sm:$0xf0] }
 0x22a   :  { %3333 = vmatpush.bf16.msrb.mxu1 %v10908_v38  ;;  %3424 = vmatpush.bf16.msrb.mxu2 %v11296_v63  ;;  %v10843_v41 = vld [vmem:[#allocation8 + $0xa10] sm:$0xf]  ;;  %v10620_v8 = vor.u32 %v14950_v45, %v10619_v24  ;;  %v11037_v35 = vld [vmem:[#allocation8 + $0xbb0] sm:$0xf0]  ;;  %v10784_v48 = vor.u32 %v14986_v29, %v10781_v9 }
 0x22b   :  { %v15006_v42 = vld [vmem:[#allocation8 + $0xa2c] sm:$0xf0]  ;;  %3284 = vmatmul.bf16.gmra.mxu2 %v16784_v3  ;;  %3303 = vmatmul.bf16.gmra.mxu3 %v16790_v34  ;;  %v11040_v61 = vor.u32 %v15050_v57, %v11037_v35  ;;  %v15082_v10 = vld [vmem:[#allocation8 + $0xc94] sm:$0xf]  ;;  %v11299_v35 = vld [vmem:[#allocation8 + $0xd98] sm:$0xf] }
 0x22c   :  { %3443 = vmatpush.bf16.msrb.mxu3 %v11552_v43  ;;  %3314 = vmatpush.bf16.msra.mxu0 %v10652_v50  ;;  %v10587_v31 = vld [vmem:[#allocation8 + $0x810] sm:$0xf]  ;;  %v10844_v4 = vor.u32 %v15006_v42, %v10843_v41  ;;  %v11165_v14 = vld [vmem:[#allocation8 + $0xcb0] sm:$0xf0] }
 0x22d   :  { %v14942_v39 = vld [vmem:[#allocation8 + $0x82c] sm:$0xf0]  ;;  %v15146_v56 = vld [vmem:[#allocation8 + $0xe94] sm:$0xf]  ;;  %v11168_v1 = vor.u32 %v15082_v10, %v11165_v14  ;;  %v15183_v10 = vld [vmem:[#allocation8 + $0xfb4] sm:$0xf0] }
 0x22e   :  { %3334 = vmatpush.bf16.msrb.mxu1 %v10876_v23  ;;  %v10588_v25 = vor.u32 %v14942_v39, %v10587_v31  ;;  %3425 = vmatpush.bf16.msrb.mxu2 %v11264_v11  ;;  %v11421_v52 = vld [vmem:[#allocation8 + $0xeb0] sm:$0xf0] }
 0x22f   :  { %v15042_v38 = vld [vmem:[#allocation8 + $0xb54] sm:$0xf]  ;;  %v11424_v17 = vor.u32 %v15146_v56, %v11421_v52 }
 0x230   :  { %3315 = vmatpush.bf16.msra.mxu0 %v10620_v8  ;;  %3444 = vmatpush.bf16.msrb.mxu3 %v11520_v37  ;;  %v11005_v63 = vld [vmem:[#allocation8 + $0xb70] sm:$0xf0] }
 0x231   :  { %v11008_v43 = vor.u32 %v15042_v38, %v11005_v63  ;;  %v14978_v50 = vld [vmem:[#allocation8 + $0x954] sm:$0xf] }
 0x232   :  { %3335 = vmatpush.bf16.msrb.mxu1 %v10844_v4  ;;  %3426 = vmatpush.bf16.msrb.mxu2 %v11232_v46  ;;  %v10749_v24 = vld [vmem:[#allocation8 + $0x970] sm:$0xf0] }
 0x233   :  { %v15074_v45 = vld [vmem:[#allocation8 + $0xc54] sm:$0xf]  ;;  %v10752_v41 = vor.u32 %v14978_v50, %v10749_v24  ;;  %3246 = vmatmul.bf16.gmra.mxu0 %v16796_v27  ;;  %v3052_v20 = vpop.f32.mrf.mxu2  ;;  %v11267_v24 = vld [vmem:[#allocation8 + $0xd58] sm:$0xf] }
 0x234   :  { %3316 = vmatpush.bf16.msra.mxu0 %v10588_v25  ;;  %3445 = vmatpush.bf16.msrb.mxu3 %v11488_v22  ;;  %v11133_v13 = vld [vmem:[#allocation8 + $0xc70] sm:$0xf0]  ;;  %v15191_v25 = vld [vmem:[#allocation8 + $0xff4] sm:$0xf0] }
 0x235   :  { %v15138_v23 = vld [vmem:[#allocation8 + $0xe54] sm:$0xf]  ;;  %v11136_v8 = vor.u32 %v15074_v45, %v11133_v13  ;;  %v11588_v29 = vor.u32 %v15191_v25, %v11587_v12  ;;  %v11075_v12 = vld [vmem:[#allocation8 + $0xbd8] sm:$0xf] }
 0x236   :  { %3404 = vmatpush.bf16.msra.mxu1 %v11072_v49  ;;  %3427 = vmatpush.bf16.msrb.mxu2 %v11200_v30  ;;  %v11389_v0 = vld [vmem:[#allocation8 + $0xe70] sm:$0xf0] }
 0x237   :  { %v15034_v60 = vld [vmem:[#allocation8 + $0xb14] sm:$0xf]  ;;  %v11392_v31 = vor.u32 %v15138_v23, %v11389_v0  ;;  %3265 = vmatmul.bf16.gmra.mxu1 %v16801_v5  ;;  %v15111_v0 = vld [vmem:[#allocation8 + $0xd74] sm:$0xf0] }
 0x238   :  { %3385 = vmatpush.bf16.msrb.mxu0 %v10816_v18  ;;  %3446 = vmatpush.bf16.msrb.mxu3 %v11456_v47  ;;  %v10973_v58 = vld [vmem:[#allocation8 + $0xb30] sm:$0xf0]  ;;  %v16830_v18 = vpop.f32.mrf.mxu3  ;;  %v11555_v47 = vld [vmem:[#allocation8 + $0xf98] sm:$0xf] }
 0x239   :  { %v14970_v42 = vld [vmem:[#allocation8 + $0x914] sm:$0xf]  ;;  %v10976_v32 = vor.u32 %v15034_v60, %v10973_v58  ;;  %v11556_v38 = vor.u32 %v15183_v10, %v11555_v47  ;;  %v11523_v60 = vld [vmem:[#allocation8 + $0xf58] sm:$0xf] }
 0x23a   :  { %3405 = vmatpush.bf16.msra.mxu1 %v11040_v61  ;;  %3428 = vmatpush.bf16.msrb.mxu2 %v11168_v1  ;;  %v10717_v11 = vld [vmem:[#allocation8 + $0x930] sm:$0xf0]  ;;  %v15119_v61 = vld [vmem:[#allocation8 + $0xdb4] sm:$0xf0] }
 0x23b   :  { %v15066_v37 = vld [vmem:[#allocation8 + $0xc14] sm:$0xf]  ;;  %3355 = vmatmul.bf16.vlgmr.msra.gmra.mxu2 %v16729_v51  ;;  %3374 = vmatmul.bf16.vlgmr.msra.gmra.mxu3 %v16733_v36  ;;  %v10720_v28 = vor.u32 %v14970_v42, %v10717_v11  ;;  %v11300_v52 = vor.u32 %v15119_v61, %v11299_v35  ;;  %v16832_v45 = vpop.f32.mrf.mxu2  ;;  %v15175_v58 = vld [vmem:[#allocation8 + $0xf74] sm:$0xf0] }
 0x23c   :  { %3386 = vmatpush.bf16.msrb.mxu0 %v10784_v48  ;;  %3447 = vmatpush.bf16.msrb.mxu3 %v11424_v17  ;;  %v11101_v39 = vld [vmem:[#allocation8 + $0xc30] sm:$0xf0]  ;;  %v11459_v61 = vld [vmem:[#allocation8 + $0xed8] sm:$0xf] }
 0x23d   :  { %v15130_v15 = vld [vmem:[#allocation8 + $0xe14] sm:$0xf]  ;;  %v11104_v49 = vor.u32 %v15066_v37, %v11101_v39  ;;  %v11043_v47 = vld [vmem:[#allocation8 + $0xb98] sm:$0xf] }
 0x23e   :  { %3406 = vmatpush.bf16.msra.mxu1 %v11008_v43  ;;  %v11357_v4 = vld [vmem:[#allocation8 + $0xe30] sm:$0xf0]  ;;  %3429 = vmatpush.bf16.msrb.mxu2 %v11136_v8 }
 0x23f   :  { %v15026_v2 = vld [vmem:[#allocation8 + $0xad4] sm:$0xf]  ;;  %v11360_v46 = vor.u32 %v15130_v15, %v11357_v4  ;;  %v11524_v15 = vor.u32 %v15175_v58, %v11523_v60  ;;  %v15151_v60 = vld [vmem:[#allocation8 + $0xeb4] sm:$0xf0] }
 0x240   :  { %v10941_v59 = vld [vmem:[#allocation8 + $0xaf0] sm:$0xf0]  ;;  %3387 = vmatpush.bf16.msrb.mxu0 %v10752_v41  ;;  %3448 = vmatpush.bf16.msrb.mxu3 %v11392_v31  ;;  %v16834_v13 = vpop.f32.mrf.mxu3  ;;  %v3014_v41 = vpop.f32.mrf.mxu0  ;;  %v11011_v58 = vld [vmem:[#allocation8 + $0xb58] sm:$0xf] }
 0x241   :  { %v14962_v22 = vld [vmem:[#allocation8 + $0x8d4] sm:$0xf]  ;;  %v10944_v53 = vor.u32 %v15026_v2, %v10941_v59  ;;  %v11235_v2 = vld [vmem:[#allocation8 + $0xd18] sm:$0xf] }
 0x242   :  { %v10685_v16 = vld [vmem:[#allocation8 + $0x8f0] sm:$0xf0]  ;;  %3407 = vmatpush.bf16.msra.mxu1 %v10976_v32  ;;  %3430 = vmatpush.bf16.msrb.mxu2 %v11104_v49  ;;  %v3033_v31 = vpop.f32.mrf.mxu1  ;;  %v11268_v32 = vor.u32 %v15111_v0, %v11267_v24  ;;  %v15103_v59 = vld [vmem:[#allocation8 + $0xd34] sm:$0xf0] }
 0x243   :  { %v15018_v57 = vld [vmem:[#allocation8 + $0xa94] sm:$0xf]  ;;  %v10688_v30 = vor.u32 %v14962_v22, %v10685_v16  ;;  %v3034_v39 = vadd.f32 %v3033_v31, %v3014_v41  ;;  %3317 = vmatmul.bf16.vlgmr.msra.gmra.mxu0 %v16775_v62  ;;  %v10819_v49 = vld [vmem:[#allocation8 + $0x9d8] sm:$0xf] }
 0x244   :  { %v10909_v9 = vld [vmem:[#allocation8 + $0xab0] sm:$0xf0]  ;;  %3388 = vmatpush.bf16.msrb.mxu0 %v10720_v28  ;;  %3449 = vmatpush.bf16.msrb.mxu3 %v11360_v46  ;;  %v15167_v28 = vld [vmem:[#allocation8 + $0xf34] sm:$0xf0] }
 0x245   :  { %v14954_v14 = vld [vmem:[#allocation8 + $0x894] sm:$0xf]  ;;  %v10912_v56 = vor.u32 %v15018_v57, %v10909_v9  ;;  %v16837_v25 = vadd.f32 %v3052_v20, %v3034_v39  ;;  %v14999_v46 = vld [vmem:[#allocation8 + $0x9f4] sm:$0xf0]  ;;  %v11492_v57 = vor.u32 %v15167_v28, %v11491_v26 }
 0x246   :  { %v10653_v48 = vld [vmem:[#allocation8 + $0x8b0] sm:$0xf0]  ;;  %3408 = vmatpush.bf16.msra.mxu1 %v10944_v53  ;;  %3499 = vmatpush.bf16.msra.mxu2 %v11332_v21  ;;  %v15063_v22 = vld [vmem:[#allocation8 + $0xbf4] sm:$0xf0]  ;;  %v11236_v21 = vor.u32 %v15103_v59, %v11235_v2  ;;  %v10820_v35 = vor.u32 %v14999_v46, %v10819_v49 }
 0x247   :  { %v15010_v63 = vld [vmem:[#allocation8 + $0xa54] sm:$0xf]  ;;  %v10656_v1 = vor.u32 %v14954_v14, %v10653_v48  ;;  %3336 = vmatmul.bf16.vlgmr.msrb.gmra.mxu1 %v16780_v40  ;;  %v11076_v53 = vor.u32 %v15063_v22, %v11075_v12  ;;  %v15095_v9 = vld [vmem:[#allocation8 + $0xcf4] sm:$0xf0] }
 0x248   :  { %3518 = vmatpush.bf16.msra.mxu3 %v11588_v29  ;;  %v10877_v43 = vld [vmem:[#allocation8 + $0xa70] sm:$0xf0]  ;;  %3389 = vmatpush.bf16.msrb.mxu0 %v10688_v30  ;;  %v11203_v29 = vld [vmem:[#allocation8 + $0xcd8] sm:$0xf]  ;;  %v3016_v14 = vpop.f32.mrf.mxu0 }
 0x249   :  { %v14946_v17 = vld [vmem:[#allocation8 + $0x854] sm:$0xf]  ;;  %v10880_v23 = vor.u32 %v15010_v63, %v10877_v43  ;;  %v15159_v30 = vld [vmem:[#allocation8 + $0xef4] sm:$0xf0] }
 0x24a   :  { %v10621_v50 = vld [vmem:[#allocation8 + $0x870] sm:$0xf0]  ;;  %3409 = vmatpush.bf16.msra.mxu1 %v10912_v56  ;;  %3500 = vmatpush.bf16.msra.mxu2 %v11300_v52  ;;  %v10787_v48 = vld [vmem:[#allocation8 + $0x998] sm:$0xf] }
 0x24b   :  { %v15002_v42 = vld [vmem:[#allocation8 + $0xa14] sm:$0xf]  ;;  %v10624_v11 = vor.u32 %v14946_v17, %v10621_v50  ;;  %3360 = vmatmul.bf16.gmra.mxu2 %v16784_v3  ;;  %3379 = vmatmul.bf16.gmra.mxu3 %v16790_v34  ;;  %v14991_v56 = vld [vmem:[#allocation8 + $0x9b4] sm:$0xf0]  ;;  %v11460_v17 = vor.u32 %v15159_v30, %v11459_v61 }
 0x24c   :  { %3519 = vmatpush.bf16.msra.mxu3 %v11556_v38  ;;  %v10845_v8 = vld [vmem:[#allocation8 + $0xa30] sm:$0xf0]  ;;  %3390 = vmatpush.bf16.msrb.mxu0 %v10656_v1  ;;  %v15055_v52 = vld [vmem:[#allocation8 + $0xbb4] sm:$0xf0]  ;;  %v3035_v38 = vpop.f32.mrf.mxu1  ;;  %v11204_v1 = vor.u32 %v15095_v9, %v11203_v29 }
 0x24d   :  { %v14938_v37 = vld [vmem:[#allocation8 + $0x814] sm:$0xf]  ;;  %v10848_v33 = vor.u32 %v15002_v42, %v10845_v8  ;;  %v16842_v20 = vpop.f32.mrf.mxu2  ;;  %v16844_v10 = vpop.f32.mrf.mxu3  ;;  %v11044_v63 = vor.u32 %v15055_v52, %v11043_v47  ;;  %v3036_v43 = vadd.f32 %v3035_v38, %v3016_v14  ;;  %v11171_v50 = vld [vmem:[#allocation8 + $0xc98] sm:$0xf]  ;;  %v15187_v38 = vld [vmem:[#allocation8 + $0xfdc] sm:$0xf] }
 0x24e   :  { %v10589_v4 = vld [vmem:[#allocation8 + $0x830] sm:$0xf0]  ;;  %3410 = vmatpush.bf16.msra.mxu1 %v10880_v23  ;;  %3501 = vmatpush.bf16.msra.mxu2 %v11268_v32  ;;  %v15087_v24 = vld [vmem:[#allocation8 + $0xcb4] sm:$0xf0]  ;;  %v10788_v23 = vor.u32 %v14991_v56, %v10787_v48  ;;  %v15123_v48 = vld [vmem:[#allocation8 + $0xddc] sm:$0xf] }
 0x24f   :  { %v10592_v16 = vor.u32 %v14938_v37, %v10589_v4  ;;  %v11427_v0 = vld [vmem:[#allocation8 + $0xe98] sm:$0xf]  ;;  %v16847_v41 = vadd.f32 %v16832_v45, %v3036_v43  ;;  %v11172_v31 = vor.u32 %v15087_v24, %v11171_v50  ;;  %v11333_v56 = vld [vmem:[#allocation8 + $0xdf8] sm:$0xf0] }
 0x250   :  { %3391 = vmatpush.bf16.msrb.mxu0 %v10624_v11  ;;  %3520 = vmatpush.bf16.msra.mxu3 %v11524_v15  ;;  %v15047_v42 = vld [vmem:[#allocation8 + $0xb74] sm:$0xf0]  ;;  %v11428_v11 = vor.u32 %v15151_v60, %v11427_v0  ;;  %v3019_v45 = vpop.f32.mrf.mxu0 }
 0x251   :  { %v11012_v8 = vor.u32 %v15047_v42, %v11011_v58  ;;  %v10755_v37 = vld [vmem:[#allocation8 + $0x958] sm:$0xf] }
 0x252   :  { %3411 = vmatpush.bf16.msra.mxu1 %v10848_v33  ;;  %3502 = vmatpush.bf16.msra.mxu2 %v11236_v21  ;;  %v14983_v39 = vld [vmem:[#allocation8 + $0x974] sm:$0xf0] }
 0x253   :  { %v11139_v32 = vld [vmem:[#allocation8 + $0xc58] sm:$0xf]  ;;  %v10756_v49 = vor.u32 %v14983_v39, %v10755_v37  ;;  %3322 = vmatmul.bf16.gmra.mxu0 %v16796_v27 }
 0x254   :  { %3392 = vmatpush.bf16.msrb.mxu0 %v10592_v16  ;;  %3521 = vmatpush.bf16.msra.mxu3 %v11492_v57  ;;  %v15079_v4 = vld [vmem:[#allocation8 + $0xc74] sm:$0xf0]  ;;  %v3038_v12 = vpop.f32.mrf.mxu1 }
 0x255   :  { %v16849_v15 = vpop.f32.mrf.mxu2  ;;  %v11395_v2 = vld [vmem:[#allocation8 + $0xe58] sm:$0xf]  ;;  %v16851_v33 = vpop.f32.mrf.mxu3  ;;  %v3039_v22 = vadd.f32 %v3038_v12, %v3019_v45  ;;  %v11140_v16 = vor.u32 %v15079_v4, %v11139_v32  ;;  %v15179_v32 = vld [vmem:[#allocation8 + $0xf9c] sm:$0xf] }
 0x256   :  { %3480 = vmatpush.bf16.msrb.mxu1 %v11076_v53  ;;  %3503 = vmatpush.bf16.msra.mxu2 %v11204_v1  ;;  %v15143_v59 = vld [vmem:[#allocation8 + $0xe74] sm:$0xf0]  ;;  %v11557_v4 = vld [vmem:[#allocation8 + $0xfb8] sm:$0xf0] }
 0x257   :  { %v10979_v26 = vld [vmem:[#allocation8 + $0xb18] sm:$0xf]  ;;  %v11396_v53 = vor.u32 %v15143_v59, %v11395_v2  ;;  %v16855_v47 = vadd.f32 %v16842_v20, %v3039_v22  ;;  %3341 = vmatmul.bf16.gmra.mxu1 %v16801_v5 }
 0x258   :  { %3461 = vmatpush.bf16.msra.mxu0 %v10820_v35  ;;  %3522 = vmatpush.bf16.msra.mxu3 %v11460_v17  ;;  %v15039_v28 = vld [vmem:[#allocation8 + $0xb34] sm:$0xf0]  ;;  %v3021_v58 = vpop.f32.mrf.mxu0 }
 0x259   :  { %v10723_v46 = vld [vmem:[#allocation8 + $0x918] sm:$0xf]  ;;  %v10980_v9 = vor.u32 %v15039_v28, %v10979_v26 }
 0x25a   :  { %3481 = vmatpush.bf16.msrb.mxu1 %v11044_v63  ;;  %3504 = vmatpush.bf16.msra.mxu2 %v11172_v31  ;;  %v14975_v21 = vld [vmem:[#allocation8 + $0x934] sm:$0xf0]  ;;  %v11589_v63 = vld [vmem:[#allocation8 + $0xff8] sm:$0xf0] }
 0x25b   :  { %v11107_v57 = vld [vmem:[#allocation8 + $0xc18] sm:$0xf]  ;;  %3431 = vmatmul.bf16.vlgmr.msrb.gmra.mxu2 %v16729_v51  ;;  %3450 = vmatmul.bf16.vlgmr.msrb.gmra.mxu3 %v16733_v36  ;;  %v10724_v52 = vor.u32 %v14975_v21, %v10723_v46  ;;  %v11592_v42 = vor.u32 %v15187_v38, %v11589_v63  ;;  %v15115_v31 = vld [vmem:[#allocation8 + $0xd9c] sm:$0xf] }
 0x25c   :  { %3462 = vmatpush.bf16.msra.mxu0 %v10788_v23  ;;  %3523 = vmatpush.bf16.msra.mxu3 %v11428_v11  ;;  %v15071_v29 = vld [vmem:[#allocation8 + $0xc34] sm:$0xf0]  ;;  %v11336_v23 = vor.u32 %v15123_v48, %v11333_v56  ;;  %v11301_v11 = vld [vmem:[#allocation8 + $0xdb8] sm:$0xf0]  ;;  %v3040_v37 = vpop.f32.mrf.mxu1 }
 0x25d   :  { %v11363_v35 = vld [vmem:[#allocation8 + $0xe18] sm:$0xf]  ;;  %v11108_v43 = vor.u32 %v15071_v29, %v11107_v57  ;;  %v16860_v50 = vpop.f32.mrf.mxu2  ;;  %v16862_v60 = vpop.f32.mrf.mxu3  ;;  %v3041_v2 = vadd.f32 %v3040_v37, %v3021_v58  ;;  %v11304_v28 = vor.u32 %v15115_v31, %v11301_v11  ;;  %v15107_v29 = vld [vmem:[#allocation8 + $0xd5c] sm:$0xf] }
 0x25e   :  { %3482 = vmatpush.bf16.msrb.mxu1 %v11012_v8  ;;  %v15135_v61 = vld [vmem:[#allocation8 + $0xe34] sm:$0xf0]  ;;  %3505 = vmatpush.bf16.msra.mxu2 %v11140_v16  ;;  %v11493_v58 = vld [vmem:[#allocation8 + $0xf38] sm:$0xf0] }
 0x25f   :  { %v10947_v30 = vld [vmem:[#allocation8 + $0xad8] sm:$0xf]  ;;  %v11364_v1 = vor.u32 %v15135_v61, %v11363_v35  ;;  %v16865_v12 = vadd.f32 %v16849_v15, %v3041_v2  ;;  %v11269_v15 = vld [vmem:[#allocation8 + $0xd78] sm:$0xf0] }
 0x260   :  { %v15031_v14 = vld [vmem:[#allocation8 + $0xaf4] sm:$0xf0]  ;;  %3463 = vmatpush.bf16.msra.mxu0 %v10756_v49  ;;  %3524 = vmatpush.bf16.msra.mxu3 %v11396_v53  ;;  %v11560_v49 = vor.u32 %v15179_v32, %v11557_v4  ;;  %v16869_v53 = vadd.f32 %v16830_v18, %v16837_v25  ;;  %v15171_v61 = vld [vmem:[#allocation8 + $0xf5c] sm:$0xf]  ;;  %v3090_v48 = vpop.f32.mrf.mxu0  ;;  %v16884_v4 = vadd.f32 %v16834_v13, %v16847_v41 }
 0x261   :  { %v10691_v17 = vld [vmem:[#allocation8 + $0x8d8] sm:$0xf]  ;;  %v10948_v24 = vor.u32 %v15031_v14, %v10947_v30  ;;  %v11525_v30 = vld [vmem:[#allocation8 + $0xf78] sm:$0xf0] }
 0x262   :  { %v14967_v20 = vld [vmem:[#allocation8 + $0x8f4] sm:$0xf0]  ;;  %3483 = vmatpush.bf16.msrb.mxu1 %v10980_v9  ;;  %3506 = vmatpush.bf16.msra.mxu2 %v11108_v43  ;;  %v11272_v43 = vor.u32 %v15107_v29, %v11269_v15  ;;  %v14995_v31 = vld [vmem:[#allocation8 + $0x9dc] sm:$0xf] }
 0x263   :  { %v10915_v0 = vld [vmem:[#allocation8 + $0xa98] sm:$0xf]  ;;  %v10692_v39 = vor.u32 %v14967_v20, %v10691_v17  ;;  %v15099_v20 = vld [vmem:[#allocation8 + $0xd1c] sm:$0xf]  ;;  %3393 = vmatmul.bf16.vlgmr.msrb.gmra.mxu0 %v16775_v62 }
 0x264   :  { %v15023_v8 = vld [vmem:[#allocation8 + $0xab4] sm:$0xf0]  ;;  %3464 = vmatpush.bf16.msra.mxu0 %v10724_v52  ;;  %3525 = vmatpush.bf16.msra.mxu3 %v11364_v1  ;;  %v3109_v38 = vpop.f32.mrf.mxu1  ;;  %v11528_v1 = vor.u32 %v15171_v61, %v11525_v30  ;;  %v10821_v11 = vld [vmem:[#allocation8 + $0x9f8] sm:$0xf0] }
 0x265   :  { %v10659_v59 = vld [vmem:[#allocation8 + $0x898] sm:$0xf]  ;;  %v10916_v26 = vor.u32 %v15023_v8, %v10915_v0  ;;  %v16871_v9 = vpop.f32.mrf.mxu2  ;;  %v16873_v14 = vpop.f32.mrf.mxu3  ;;  %v3110_v63 = vadd.f32 %v3109_v38, %v3090_v48  ;;  %v15163_v0 = vld [vmem:[#allocation8 + $0xf1c] sm:$0xf] }
 0x266   :  { %v14959_v45 = vld [vmem:[#allocation8 + $0x8b4] sm:$0xf0]  ;;  %3484 = vmatpush.bf16.msrb.mxu1 %v10948_v24  ;;  %3575 = vmatpush.bf16.msrb.mxu2 %v11336_v23  ;;  %v11237_v24 = vld [vmem:[#allocation8 + $0xd38] sm:$0xf0]  ;;  %v11496_v2 = vor.u32 %v15163_v0, %v11493_v58 }
 0x267   :  { %v10883_v46 = vld [vmem:[#allocation8 + $0xa58] sm:$0xf]  ;;  %v10660_v16 = vor.u32 %v14959_v45, %v10659_v59  ;;  %v16877_v8 = vadd.f32 %v16860_v50, %v3110_v63  ;;  %3412 = vmatmul.bf16.vlgmr.msra.gmra.mxu1 %v16780_v40  ;;  %v11077_v37 = vld [vmem:[#allocation8 + $0xbf8] sm:$0xf0]  ;;  %v11240_v50 = vor.u32 %v15099_v20, %v11237_v24 }
 0x268   :  { %3594 = vmatpush.bf16.msrb.mxu3 %v11592_v42  ;;  %v15015_v22 = vld [vmem:[#allocation8 + $0xa74] sm:$0xf0]  ;;  %3465 = vmatpush.bf16.msra.mxu0 %v10692_v39  ;;  %v15059_v42 = vld [vmem:[#allocation8 + $0xbdc] sm:$0xf] }
 0x269   :  { %v10627_v21 = vld [vmem:[#allocation8 + $0x858] sm:$0xf]  ;;  %v10884_v35 = vor.u32 %v15015_v22, %v10883_v46  ;;  %v11080_v32 = vor.u32 %v15059_v42, %v11077_v37  ;;  %v15091_v59 = vld [vmem:[#allocation8 + $0xcdc] sm:$0xf] }
 0x26a   :  { %v14951_v57 = vld [vmem:[#allocation8 + $0x874] sm:$0xf0]  ;;  %3485 = vmatpush.bf16.msrb.mxu1 %v10916_v26  ;;  %3576 = vmatpush.bf16.msrb.mxu2 %v11304_v28  ;;  %v11205_v45 = vld [vmem:[#allocation8 + $0xcf8] sm:$0xf0]  ;;  %v10824_v28 = vor.u32 %v14995_v31, %v10821_v11 }
 0x26b   :  { %v10851_v56 = vld [vmem:[#allocation8 + $0xa18] sm:$0xf]  ;;  %v10628_v18 = vor.u32 %v14951_v57, %v10627_v21  ;;  %3436 = vmatmul.bf16.gmra.mxu2 %v16784_v3  ;;  %3455 = vmatmul.bf16.gmra.mxu3 %v16790_v34  ;;  %v11461_v46 = vld [vmem:[#allocation8 + $0xef8] sm:$0xf0]  ;;  %v3092_v21 = vpop.f32.mrf.mxu0  ;;  %v11208_v61 = vor.u32 %v15091_v59, %v11205_v45 }
 0x26c   :  { %3595 = vmatpush.bf16.msrb.mxu3 %v11560_v49  ;;  %v15007_v52 = vld [vmem:[#allocation8 + $0xa34] sm:$0xf0]  ;;  %3466 = vmatpush.bf16.msra.mxu0 %v10660_v16  ;;  %v15155_v49 = vld [vmem:[#allocation8 + $0xedc] sm:$0xf]  ;;  %v3111_v29 = vpop.f32.mrf.mxu1 }
 0x26d   :  { %v10595_v25 = vld [vmem:[#allocation8 + $0x818] sm:$0xf]  ;;  %v10852_v23 = vor.u32 %v15007_v52, %v10851_v56  ;;  %v15051_v22 = vld [vmem:[#allocation8 + $0xb9c] sm:$0xf]  ;;  %v3112_v15 = vadd.f32 %v3111_v29, %v3092_v21  ;;  %v11464_v30 = vor.u32 %v15155_v49, %v11461_v46 }
 0x26e   :  { %v14943_v17 = vld [vmem:[#allocation8 + $0x834] sm:$0xf0]  ;;  %3486 = vmatpush.bf16.msrb.mxu1 %v10884_v35  ;;  %3577 = vmatpush.bf16.msrb.mxu2 %v11272_v43  ;;  %v16886_v26 = vpop.f32.mrf.mxu2  ;;  %v16888_v16 = vpop.f32.mrf.mxu3  ;;  %v14987_v57 = vld [vmem:[#allocation8 + $0x99c] sm:$0xf] }
 0x26f   :  { %v10596_v39 = vor.u32 %v14943_v17, %v10595_v25  ;;  %v10789_v13 = vld [vmem:[#allocation8 + $0x9b8] sm:$0xf0]  ;;  %v16891_v63 = vadd.f32 %v16871_v9, %v3112_v15  ;;  %v16895_v17 = vadd.f32 %v16844_v10, %v16855_v47  ;;  %v12347_v15 = vld [vmem:[#allocation8 + $0x5c0] sm:$0xf] }
 0x270   :  { %3467 = vmatpush.bf16.msra.mxu0 %v10628_v18  ;;  %3596 = vmatpush.bf16.msrb.mxu3 %v11528_v1  ;;  %v11045_v41 = vld [vmem:[#allocation8 + $0xbb8] sm:$0xf0]  ;;  %v10792_v52 = vor.u32 %v14987_v57, %v10789_v13 }
 0x271   :  { %v11048_v35 = vor.u32 %v15051_v22, %v11045_v41  ;;  %v15083_v48 = vld [vmem:[#allocation8 + $0xc9c] sm:$0xf] }
 0x272   :  { %3487 = vmatpush.bf16.msrb.mxu1 %v10852_v23  ;;  %3578 = vmatpush.bf16.msrb.mxu2 %v11240_v50  ;;  %v11173_v56 = vld [vmem:[#allocation8 + $0xcb8] sm:$0xf0] }
 0x273   :  { %v15147_v38 = vld [vmem:[#allocation8 + $0xe9c] sm:$0xf]  ;;  %v11176_v20 = vor.u32 %v15083_v48, %v11173_v56  ;;  %3398 = vmatmul.bf16.gmra.mxu0 %v16796_v27  ;;  %v12603_v48 = vld [vmem:[#allocation8 + $0x7c0] sm:$0xf] }
 0x274   :  { %3468 = vmatpush.bf16.msra.mxu0 %v10596_v39  ;;  %3597 = vmatpush.bf16.msrb.mxu3 %v11496_v2  ;;  %v11429_v18 = vld [vmem:[#allocation8 + $0xeb8] sm:$0xf0]  ;;  %v3095_v39 = vpop.f32.mrf.mxu0  ;;  %v3114_v47 = vpop.f32.mrf.mxu1  ;;  %v14928_v56 = vld [vmem:[#allocation8 + $0x7dc] sm:$0xf0] }
 0x275   :  { %v15043_v25 = vld [vmem:[#allocation8 + $0xb5c] sm:$0xf]  ;;  %v11432_v24 = vor.u32 %v15147_v38, %v11429_v18  ;;  %v3115_v59 = vadd.f32 %v3114_v47, %v3095_v39  ;;  %v12571_v39 = vld [vmem:[#allocation8 + $0x780] sm:$0xf] }
 0x276   :  { %3556 = vmatpush.bf16.msra.mxu1 %v11080_v32  ;;  %v11013_v43 = vld [vmem:[#allocation8 + $0xb78] sm:$0xf0]  ;;  %3579 = vmatpush.bf16.msrb.mxu2 %v11208_v61  ;;  %v16897_v42 = vpop.f32.mrf.mxu2  ;;  %v16899_v37 = vpop.f32.mrf.mxu3  ;;  %v14864_v61 = vld [vmem:[#allocation8 + $0x5dc] sm:$0xf0] }
 0x277   :  { %v11016_v1 = vor.u32 %v15043_v25, %v11013_v43  ;;  %v14979_v23 = vld [vmem:[#allocation8 + $0x95c] sm:$0xf]  ;;  %v16903_v29 = vadd.f32 %v16886_v26, %v3115_v59  ;;  %3417 = vmatmul.bf16.gmra.mxu1 %v16801_v5 }
 0x278   :  { %3537 = vmatpush.bf16.msrb.mxu0 %v10824_v28  ;;  %3598 = vmatpush.bf16.msrb.mxu3 %v11464_v30  ;;  %v10757_v0 = vld [vmem:[#allocation8 + $0x978] sm:$0xf0] }
 0x279   :  { %v15075_v58 = vld [vmem:[#allocation8 + $0xc5c] sm:$0xf]  ;;  %v10760_v50 = vor.u32 %v14979_v23, %v10757_v0 }
 0x27a   :  { %3557 = vmatpush.bf16.msra.mxu1 %v11048_v35  ;;  %v11141_v31 = vld [vmem:[#allocation8 + $0xc78] sm:$0xf0]  ;;  %3580 = vmatpush.bf16.msrb.mxu2 %v11176_v20  ;;  %v12348_v20 = vor.u32 %v14864_v61, %v12347_v15  ;;  %v12539_v61 = vld [vmem:[#allocation8 + $0x740] sm:$0xf] }
 0x27b   :  { %v15139_v9 = vld [vmem:[#allocation8 + $0xe5c] sm:$0xf]  ;;  %v11144_v45 = vor.u32 %v15075_v58, %v11141_v31  ;;  %3507 = vmatmul.bf16.vlgmr.msra.gmra.mxu2 %v16729_v51  ;;  %3526 = vmatmul.bf16.vlgmr.msra.gmra.mxu3 %v16733_v36  ;;  %v12604_v58 = vor.u32 %v14928_v56, %v12603_v48 }
 0x27c   :  { %3538 = vmatpush.bf16.msrb.mxu0 %v10792_v52  ;;  %v11397_v11 = vld [vmem:[#allocation8 + $0xe78] sm:$0xf0]  ;;  %3599 = vmatpush.bf16.msrb.mxu3 %v11432_v24  ;;  %v16910_v52 = vadd.f32 %v16851_v33, %v16865_v12  ;;  %v3097_v0 = vpop.f32.mrf.mxu0  ;;  %v14856_v33 = vld [vmem:[#allocation8 + $0x59c] sm:$0xf0]  ;;  %v3116_v12 = vpop.f32.mrf.mxu1 }
 0x27d   :  { %v15035_v32 = vld [vmem:[#allocation8 + $0xb1c] sm:$0xf]  ;;  %v11400_v28 = vor.u32 %v15139_v9, %v11397_v11  ;;  %v12315_v9 = vld [vmem:[#allocation8 + $0x580] sm:$0xf] }
 0x27e   :  { %3558 = vmatpush.bf16.msra.mxu1 %v11016_v1  ;;  %v10981_v10 = vld [vmem:[#allocation8 + $0xb38] sm:$0xf0]  ;;  %3581 = vmatpush.bf16.msrb.mxu2 %v11144_v45  ;;  %v16912_v43 = vpop.f32.mrf.mxu2  ;;  %v16914_v23 = vpop.f32.mrf.mxu3  ;;  %v12316_v59 = vor.u32 %v14856_v33, %v12315_v9  ;;  %v12507_v9 = vld [vmem:[#allocation8 + $0x700] sm:$0xf] }
 0x27f   :  { %v14971_v2 = vld [vmem:[#allocation8 + $0x91c] sm:$0xf]  ;;  %v10984_v21 = vor.u32 %v15035_v32, %v10981_v10  ;;  %v14920_v32 = vld [vmem:[#allocation8 + $0x79c] sm:$0xf0]  ;;  %v3117_v10 = vadd.f32 %v3116_v12, %v3097_v0 }
 0x280   :  { %v10725_v49 = vld [vmem:[#allocation8 + $0x938] sm:$0xf0]  ;;  %3539 = vmatpush.bf16.msrb.mxu0 %v10760_v50  ;;  %3600 = vmatpush.bf16.msrb.mxu3 %v11400_v28  ;;  %v12572_v28 = vor.u32 %v14920_v32, %v12571_v39  ;;  %v12251_v0 = vld [vmem:[#allocation8 + $0x500] sm:$0xf] }
 0x281   :  { %v15067_v46 = vld [vmem:[#allocation8 + $0xc1c] sm:$0xf]  ;;  %v10728_v30 = vor.u32 %v14971_v2, %v10725_v49  ;;  %v16917_v45 = vadd.f32 %v16897_v42, %v3117_v10  ;;  %v14848_v42 = vld [vmem:[#allocation8 + $0x55c] sm:$0xf0] }
 0x282   :  { %v11109_v22 = vld [vmem:[#allocation8 + $0xc38] sm:$0xf0]  ;;  %3559 = vmatpush.bf16.msra.mxu1 %v10984_v21  ;;  %v16921_v21 = vadd.f32 %v16862_v60, %v16877_v8  ;;  %v14904_v33 = vld [vmem:[#allocation8 + $0x71c] sm:$0xf0] }
 0x283   :  { %v15131_v57 = vld [vmem:[#allocation8 + $0xe1c] sm:$0xf]  ;;  %v11112_v26 = vor.u32 %v15067_v46, %v11109_v22  ;;  %3469 = vmatmul.bf16.vlgmr.msra.gmra.mxu0 %v16775_v62  ;;  %v12091_v12 = vld [vmem:[#allocation8 + $0x3c0] sm:$0xf] }
 0x284   :  { %v11365_v13 = vld [vmem:[#allocation8 + $0xe38] sm:$0xf0]  ;;  %3540 = vmatpush.bf16.msrb.mxu0 %v10728_v30  ;;  %v14912_v30 = vld [vmem:[#allocation8 + $0x75c] sm:$0xf0]  ;;  %v3166_v56 = vpop.f32.mrf.mxu0 }
 0x285   :  { %v15027_v41 = vld [vmem:[#allocation8 + $0xadc] sm:$0xf]  ;;  %v11368_v38 = vor.u32 %v15131_v57, %v11365_v13  ;;  %3582 = vmatpush.bf16.msrb.mxu2 %v11112_v26  ;;  %v11835_v39 = vld [vmem:[#allocation8 + $0x1c0] sm:$0xf] }
 0x286   :  { %v10949_v35 = vld [vmem:[#allocation8 + $0xaf8] sm:$0xf0]  ;;  %v16925_v48 = vpop.f32.mrf.mxu3  ;;  %v14736_v32 = vld [vmem:[#allocation8 + $0x1dc] sm:$0xf0] }
 0x287   :  { %v14963_v18 = vld [vmem:[#allocation8 + $0x8dc] sm:$0xf]  ;;  %v10952_v1 = vor.u32 %v15027_v41, %v10949_v35  ;;  %3601 = vmatpush.bf16.msrb.mxu3 %v11368_v38  ;;  %v12283_v41 = vld [vmem:[#allocation8 + $0x540] sm:$0xf]  ;;  %v16923_v35 = vpop.f32.mrf.mxu2  ;;  %3488 = vmatmul.bf16.vlgmr.msrb.gmra.mxu1 %v16780_v40 }
 0x288   :  { %v10693_v25 = vld [vmem:[#allocation8 + $0x8f8] sm:$0xf0]  ;;  %v14800_v10 = vld [vmem:[#allocation8 + $0x3dc] sm:$0xf0] }
 0x289   :  { %v15019_v24 = vld [vmem:[#allocation8 + $0xa9c] sm:$0xf]  ;;  %v10696_v11 = vor.u32 %v14963_v18, %v10693_v25  ;;  %3560 = vmatpush.bf16.msra.mxu1 %v10952_v1  ;;  %4965 = vmatpush.bf16.msra.mxu2 %v12348_v20  ;;  %v3185_v18 = vpop.f32.mrf.mxu1  ;;  %v12284_v1 = vor.u32 %v14848_v42, %v12283_v41  ;;  %v12540_v20 = vor.u32 %v14912_v30, %v12539_v61  ;;  %v12059_v41 = vld [vmem:[#allocation8 + $0x380] sm:$0xf] }
 0x28a   :  { %v10917_v31 = vld [vmem:[#allocation8 + $0xab8] sm:$0xf0]  ;;  %v3186_v25 = vadd.f32 %v3185_v18, %v3166_v56  ;;  %v11803_v61 = vld [vmem:[#allocation8 + $0x180] sm:$0xf] }
 0x28b   :  { %v14955_v47 = vld [vmem:[#allocation8 + $0x89c] sm:$0xf]  ;;  %v10920_v2 = vor.u32 %v15019_v24, %v10917_v31  ;;  %4984 = vmatpush.bf16.msra.mxu3 %v12604_v58  ;;  %3541 = vmatpush.bf16.msrb.mxu0 %v10696_v11  ;;  %v14840_v58 = vld [vmem:[#allocation8 + $0x51c] sm:$0xf0] }
 0x28c   :  { %v10661_v50 = vld [vmem:[#allocation8 + $0x8b8] sm:$0xf0]  ;;  %v16929_v11 = vadd.f32 %v16912_v43, %v3186_v25  ;;  %3512 = vmatmul.bf16.gmra.mxu2 %v16784_v3  ;;  %3531 = vmatmul.bf16.gmra.mxu3 %v16790_v34  ;;  %v12252_v43 = vor.u32 %v14840_v58, %v12251_v0  ;;  %v3168_v42 = vpop.f32.mrf.mxu0  ;;  %v14784_v58 = vld [vmem:[#allocation8 + $0x35c] sm:$0xf0] }
 0x28d   :  { %v15011_v49 = vld [vmem:[#allocation8 + $0xa5c] sm:$0xf]  ;;  %v10664_v22 = vor.u32 %v14955_v47, %v10661_v50  ;;  %3561 = vmatpush.bf16.msra.mxu1 %v10920_v2  ;;  %4966 = vmatpush.bf16.msra.mxu2 %v12316_v59  ;;  %v12092_v50 = vor.u32 %v14800_v10, %v12091_v12  ;;  %v16936_v2 = vadd.f32 %v16873_v14, %v16891_v63  ;;  %v14728_v14 = vld [vmem:[#allocation8 + $0x19c] sm:$0xf0] }
 0x28e   :  { %v10885_v46 = vld [vmem:[#allocation8 + $0xa78] sm:$0xf0]  ;;  %v12508_v59 = vor.u32 %v14904_v33, %v12507_v9  ;;  %v14792_v63 = vld [vmem:[#allocation8 + $0x39c] sm:$0xf0]  ;;  %v11804_v25 = vor.u32 %v14728_v14, %v11803_v61  ;;  %v16947_v9 = vadd.f32 %v16888_v16, %v16903_v29 }
 0x28f   :  { %v14947_v57 = vld [vmem:[#allocation8 + $0x85c] sm:$0xf]  ;;  %v10888_v15 = vor.u32 %v15011_v49, %v10885_v46  ;;  %4985 = vmatpush.bf16.msra.mxu3 %v12572_v28  ;;  %3542 = vmatpush.bf16.msrb.mxu0 %v10664_v22  ;;  %v12219_v28 = vld [vmem:[#allocation8 + $0x4c0] sm:$0xf]  ;;  %v16938_v46 = vpop.f32.mrf.mxu2  ;;  %v11836_v22 = vor.u32 %v14736_v32, %v11835_v39  ;;  %v12060_v56 = vor.u32 %v14792_v63, %v12059_v41 }
 0x290   :  { %v10629_v13 = vld [vmem:[#allocation8 + $0x878] sm:$0xf0]  ;;  %v14832_v49 = vld [vmem:[#allocation8 + $0x4dc] sm:$0xf0] }
 0x291   :  { %v15003_v26 = vld [vmem:[#allocation8 + $0xa1c] sm:$0xf]  ;;  %v10632_v60 = vor.u32 %v14947_v57, %v10629_v13  ;;  %3562 = vmatpush.bf16.msra.mxu1 %v10888_v15  ;;  %4967 = vmatpush.bf16.msra.mxu2 %v12284_v1  ;;  %v12475_v57 = vld [vmem:[#allocation8 + $0x6c0] sm:$0xf]  ;;  %v16940_v15 = vpop.f32.mrf.mxu3  ;;  %v3187_v30 = vpop.f32.mrf.mxu1 }
 0x292   :  { %v10853_v38 = vld [vmem:[#allocation8 + $0xa38] sm:$0xf0]  ;;  %v14896_v13 = vld [vmem:[#allocation8 + $0x6dc] sm:$0xf0] }
 0x293   :  { %v14939_v8 = vld [vmem:[#allocation8 + $0x81c] sm:$0xf]  ;;  %v10856_v31 = vor.u32 %v15003_v26, %v10853_v38  ;;  %3543 = vmatpush.bf16.msrb.mxu0 %v10632_v60  ;;  %4986 = vmatpush.bf16.msra.mxu3 %v12540_v20  ;;  %v3188_v26 = vadd.f32 %v3187_v30, %v3168_v42  ;;  %v12220_v38 = vor.u32 %v14832_v49, %v12219_v28  ;;  %v12187_v60 = vld [vmem:[#allocation8 + $0x480] sm:$0xf] }
 0x294   :  { %v10597_v24 = vld [vmem:[#allocation8 + $0x838] sm:$0xf0]  ;;  %v12476_v18 = vor.u32 %v14896_v13, %v12475_v57  ;;  %v12443_v1 = vld [vmem:[#allocation8 + $0x680] sm:$0xf]  ;;  %v3171_v28 = vpop.f32.mrf.mxu0  ;;  %3474 = vmatmul.bf16.gmra.mxu0 %v16796_v27 }
 0x295   :  { %v10600_v47 = vor.u32 %v14939_v8, %v10597_v24  ;;  %3563 = vmatpush.bf16.msra.mxu1 %v10856_v31  ;;  %4968 = vmatpush.bf16.msra.mxu2 %v12252_v43  ;;  %v14824_v8 = vld [vmem:[#allocation8 + $0x49c] sm:$0xf0]  ;;  %v16943_v0 = vadd.f32 %v16923_v35, %v3188_v26 }
 0x296   :  { %v14888_v20 = vld [vmem:[#allocation8 + $0x69c] sm:$0xf0]  ;;  %v12188_v33 = vor.u32 %v14824_v8, %v12187_v60 }
 0x297   :  { %3544 = vmatpush.bf16.msrb.mxu0 %v10600_v47  ;;  %4987 = vmatpush.bf16.msra.mxu3 %v12508_v59  ;;  %v12027_v24 = vld [vmem:[#allocation8 + $0x340] sm:$0xf]  ;;  %v12444_v12 = vor.u32 %v14888_v20, %v12443_v1  ;;  %v3211_v47 = vpop.f32.mrf.mxu2  ;;  %v12349_v1 = vld [vmem:[#allocation8 + $0x5e0] sm:$0xf0] }
 0x298   :  { %v12028_v31 = vor.u32 %v14784_v58, %v12027_v24  ;;  %v11771_v39 = vld [vmem:[#allocation8 + $0x140] sm:$0xf]  ;;  %3493 = vmatmul.bf16.gmra.mxu1 %v16801_v5  ;;  %v14924_v20 = vld [vmem:[#allocation8 + $0x7c4] sm:$0xf]  ;;  %v16960_v24 = vadd.f32 %v16899_v37, %v16917_v45 }
 0x299   :  { %4946 = vmatpush.bf16.msrb.mxu1 %v12092_v50  ;;  %4969 = vmatpush.bf16.msra.mxu2 %v12220_v38  ;;  %v14720_v32 = vld [vmem:[#allocation8 + $0x15c] sm:$0xf0]  ;;  %v16949_v59 = vpop.f32.mrf.mxu3  ;;  %v3190_v16 = vpop.f32.mrf.mxu1 }
 0x29a   :  { %v12155_v10 = vld [vmem:[#allocation8 + $0x440] sm:$0xf]  ;;  %v11772_v29 = vor.u32 %v14720_v32, %v11771_v39  ;;  %v3191_v57 = vadd.f32 %v3190_v16, %v3171_v28 }
 0x29b   :  { %4927 = vmatpush.bf16.msra.mxu0 %v11836_v22  ;;  %4988 = vmatpush.bf16.msra.mxu3 %v12476_v18  ;;  %v14816_v50 = vld [vmem:[#allocation8 + $0x45c] sm:$0xf0] }
 0x29c   :  { %v12411_v43 = vld [vmem:[#allocation8 + $0x640] sm:$0xf]  ;;  %v12156_v13 = vor.u32 %v14816_v50, %v12155_v10  ;;  %v16953_v38 = vadd.f32 %v16938_v46, %v3191_v57  ;;  %3583 = vmatmul.bf16.vlgmr.msrb.gmra.mxu2 %v16729_v51  ;;  %3602 = vmatmul.bf16.vlgmr.msrb.gmra.mxu3 %v16733_v36  ;;  %v12605_v51 = vld [vmem:[#allocation8 + $0x7e0] sm:$0xf0]  ;;  %v3173_v10 = vpop.f32.mrf.mxu0 }
 0x29d   :  { %4947 = vmatpush.bf16.msrb.mxu1 %v12060_v56  ;;  %v14880_v35 = vld [vmem:[#allocation8 + $0x65c] sm:$0xf0]  ;;  %4970 = vmatpush.bf16.msra.mxu2 %v12188_v33  ;;  %v12608_v50 = vor.u32 %v14924_v20, %v12605_v51  ;;  %v14852_v57 = vld [vmem:[#allocation8 + $0x584] sm:$0xf] }
 0x29e   :  { %v11995_v49 = vld [vmem:[#allocation8 + $0x300] sm:$0xf]  ;;  %v12412_v41 = vor.u32 %v14880_v35, %v12411_v43  ;;  %v12285_v20 = vld [vmem:[#allocation8 + $0x560] sm:$0xf0] }
 0x29f   :  { %4928 = vmatpush.bf16.msra.mxu0 %v11804_v25  ;;  %v14776_v22 = vld [vmem:[#allocation8 + $0x31c] sm:$0xf0]  ;;  %4989 = vmatpush.bf16.msra.mxu3 %v12444_v12  ;;  %v14860_v25 = vld [vmem:[#allocation8 + $0x5c4] sm:$0xf]  ;;  %v3280_v12 = vpop.f32.mrf.mxu2 }
 0x2a0   :  { %v11739_v42 = vld [vmem:[#allocation8 + $0x100] sm:$0xf]  ;;  %v11996_v63 = vor.u32 %v14776_v22, %v11995_v49  ;;  %v12352_v36 = vor.u32 %v14860_v25, %v12349_v1  ;;  %v14844_v1 = vld [vmem:[#allocation8 + $0x544] sm:$0xf] }
 0x2a1   :  { %4948 = vmatpush.bf16.msrb.mxu1 %v12028_v31  ;;  %v14712_v61 = vld [vmem:[#allocation8 + $0x11c] sm:$0xf0]  ;;  %4971 = vmatpush.bf16.msra.mxu2 %v12156_v13  ;;  %v16962_v32 = vpop.f32.mrf.mxu3  ;;  %v3192_v43 = vpop.f32.mrf.mxu1  ;;  %v12317_v13 = vld [vmem:[#allocation8 + $0x5a0] sm:$0xf0]  ;;  %v12288_v51 = vor.u32 %v14844_v1, %v12285_v20 }
 0x2a2   :  { %v12123_v14 = vld [vmem:[#allocation8 + $0x400] sm:$0xf]  ;;  %v11740_v8 = vor.u32 %v14712_v61, %v11739_v42  ;;  %v3193_v37 = vadd.f32 %v3192_v43, %v3173_v10  ;;  %v12320_v61 = vor.u32 %v14852_v57, %v12317_v13  ;;  %v11837_v57 = vld [vmem:[#allocation8 + $0x1e0] sm:$0xf0] }
 0x2a3   :  { %v14808_v30 = vld [vmem:[#allocation8 + $0x41c] sm:$0xf0]  ;;  %4929 = vmatpush.bf16.msra.mxu0 %v11772_v29  ;;  %4990 = vmatpush.bf16.msra.mxu3 %v12412_v41  ;;  %v16968_v41 = vadd.f32 %v16914_v23, %v16929_v11  ;;  %v14908_v23 = vld [vmem:[#allocation8 + $0x744] sm:$0xf] }
 0x2a4   :  { %v12379_v56 = vld [vmem:[#allocation8 + $0x600] sm:$0xf]  ;;  %v12124_v46 = vor.u32 %v14808_v30, %v12123_v14  ;;  %v16964_v45 = vadd.f32 %v3211_v47, %v3193_v37  ;;  %v14916_v14 = vld [vmem:[#allocation8 + $0x784] sm:$0xf]  ;;  %v3242_v25 = vpop.f32.mrf.mxu0  ;;  %3545 = vmatmul.bf16.vlgmr.msrb.gmra.mxu0 %v16775_v62  ;;  %v16982_v62 = vadd.f32 %v16925_v48, %v16943_v0 }
 0x2a5   :  { %v14872_v26 = vld [vmem:[#allocation8 + $0x61c] sm:$0xf0]  ;;  %4949 = vmatpush.bf16.msrb.mxu1 %v11996_v63  ;;  %v12573_v63 = vld [vmem:[#allocation8 + $0x7a0] sm:$0xf0] }
 0x2a6   :  { %v11963_v18 = vld [vmem:[#allocation8 + $0x2c0] sm:$0xf]  ;;  %v12380_v58 = vor.u32 %v14872_v26, %v12379_v56  ;;  %4972 = vmatpush.bf16.msra.mxu2 %v12124_v46  ;;  %v12576_v56 = vor.u32 %v14916_v14, %v12573_v63  ;;  %v14796_v13 = vld [vmem:[#allocation8 + $0x3c4] sm:$0xf] }
 0x2a7   :  { %v14768_v60 = vld [vmem:[#allocation8 + $0x2dc] sm:$0xf0]  ;;  %4930 = vmatpush.bf16.msra.mxu0 %v11740_v8  ;;  %v16970_v47 = vpop.f32.mrf.mxu2  ;;  %v14828_v0 = vld [vmem:[#allocation8 + $0x4c4] sm:$0xf] }
 0x2a8   :  { %v11707_v31 = vld [vmem:[#allocation8 + $0xc0] sm:$0xf]  ;;  %v11964_v39 = vor.u32 %v14768_v60, %v11963_v18  ;;  %4991 = vmatpush.bf16.msra.mxu3 %v12380_v58  ;;  %v12541_v58 = vld [vmem:[#allocation8 + $0x760] sm:$0xf0]  ;;  %3564 = vmatmul.bf16.vlgmr.msra.gmra.mxu1 %v16780_v40 }
 0x2a9   :  { %v14704_v33 = vld [vmem:[#allocation8 + $0xdc] sm:$0xf0]  ;;  %v16972_v8 = vpop.f32.mrf.mxu3  ;;  %v3261_v11 = vpop.f32.mrf.mxu1 }
 0x2aa   :  { %v11708_v35 = vor.u32 %v14704_v33, %v11707_v31  ;;  %4950 = vmatpush.bf16.msrb.mxu1 %v11964_v39  ;;  %5041 = vmatpush.bf16.msrb.mxu2 %v12352_v36  ;;  %v11675_v28 = vld [vmem:[#allocation8 + $0x80] sm:$0xf]  ;;  %v3262_v31 = vadd.f32 %v3261_v11, %v3242_v25  ;;  %v12544_v39 = vor.u32 %v14908_v23, %v12541_v58  ;;  %v14724_v23 = vld [vmem:[#allocation8 + $0x184] sm:$0xf] }
 0x2ab   :  { %v14696_v49 = vld [vmem:[#allocation8 + $0x9c] sm:$0xf0]  ;;  %v11805_v11 = vld [vmem:[#allocation8 + $0x1a0] sm:$0xf0] }
 0x2ac   :  { %5060 = vmatpush.bf16.msrb.mxu3 %v12608_v50  ;;  %v11931_v22 = vld [vmem:[#allocation8 + $0x280] sm:$0xf]  ;;  %4931 = vmatpush.bf16.msra.mxu0 %v11708_v35  ;;  %v11676_v16 = vor.u32 %v14696_v49, %v11675_v28  ;;  %v16975_v36 = vadd.f32 %v3280_v12, %v3262_v31  ;;  %v14836_v28 = vld [vmem:[#allocation8 + $0x504] sm:$0xf]  ;;  %v3244_v14 = vpop.f32.mrf.mxu0  ;;  %v11808_v31 = vor.u32 %v14724_v23, %v11805_v11 }
 0x2ad   :  { %v14760_v29 = vld [vmem:[#allocation8 + $0x29c] sm:$0xf0]  ;;  %3588 = vmatmul.bf16.gmra.mxu2 %v16784_v3  ;;  %3607 = vmatmul.bf16.gmra.mxu3 %v16790_v34  ;;  %v12253_v49 = vld [vmem:[#allocation8 + $0x520] sm:$0xf0] }
 0x2ae   :  { %v11932_v42 = vor.u32 %v14760_v29, %v11931_v22  ;;  %v11643_v30 = vld [vmem:[#allocation8 + $0x40] sm:$0xf]  ;;  %5042 = vmatpush.bf16.msrb.mxu2 %v12320_v61  ;;  %v12256_v40 = vor.u32 %v14836_v28, %v12253_v49  ;;  %v14900_v22 = vld [vmem:[#allocation8 + $0x704] sm:$0xf] }
 0x2af   :  { %v14688_v26 = vld [vmem:[#allocation8 + $0x5c] sm:$0xf0]  ;;  %v12509_v3 = vld [vmem:[#allocation8 + $0x720] sm:$0xf0]  ;;  %v16984_v29 = vpop.f32.mrf.mxu2 }
 0x2b0   :  { %v11899_v18 = vld [vmem:[#allocation8 + $0x240] sm:$0xf]  ;;  %4951 = vmatpush.bf16.msrb.mxu1 %v11932_v42  ;;  %4932 = vmatpush.bf16.msra.mxu0 %v11676_v16  ;;  %v11644_v46 = vor.u32 %v14688_v26, %v11643_v30  ;;  %v14732_v16 = vld [vmem:[#allocation8 + $0x1c4] sm:$0xf]  ;;  %v12512_v34 = vor.u32 %v14900_v22, %v12509_v3 }
 0x2b1   :  { %v14752_v60 = vld [vmem:[#allocation8 + $0x25c] sm:$0xf0]  ;;  %5061 = vmatpush.bf16.msrb.mxu3 %v12576_v56  ;;  %v12093_v42 = vld [vmem:[#allocation8 + $0x3e0] sm:$0xf0]  ;;  %v16986_v61 = vpop.f32.mrf.mxu3  ;;  %v11840_v63 = vor.u32 %v14732_v16, %v11837_v57  ;;  %v3263_v26 = vpop.f32.mrf.mxu1 }
 0x2b2   :  { %v11900_v33 = vor.u32 %v14752_v60, %v11899_v18  ;;  %v11611_v10 = vld [vmem:[#allocation8] sm:$0xf]  ;;  %5043 = vmatpush.bf16.msrb.mxu2 %v12288_v51  ;;  %v12096_v48 = vor.u32 %v14796_v13, %v12093_v42  ;;  %v12221_v30 = vld [vmem:[#allocation8 + $0x4e0] sm:$0xf0]  ;;  %v3264_v60 = vadd.f32 %v3263_v26, %v3244_v14  ;;  %v11603_v42 = vld [vmem:[#allocation2 + $0x8] sm:$0xf] }
 0x2b3   :  { %v14680_v50 = vld [vmem:[#allocation8 + $0x1c] sm:$0xf0]  ;;  %v14892_v56 = vld [vmem:[#allocation8 + $0x6c4] sm:$0xf]  ;;  %v12224_v25 = vor.u32 %v14828_v0, %v12221_v30  ;;  %v14673_v30 = vld [vmem:[#allocation2 + $0xc] sm:$0xf] }
 0x2b4   :  { %v11867_v43 = vld [vmem:[#allocation8 + $0x200] sm:$0xf]  ;;  %4933 = vmatpush.bf16.msra.mxu0 %v11644_v46  ;;  %v11612_v35 = vor.u32 %v14680_v50, %v11611_v10  ;;  %4952 = vmatpush.bf16.msrb.mxu1 %v11900_v33  ;;  %v12477_v18 = vld [vmem:[#allocation8 + $0x6e0] sm:$0xf0]  ;;  %v16989_v20 = vadd.f32 %v16970_v47, %v3264_v60  ;;  %v16993_v10 = vadd.f32 %v16940_v15, %v16953_v38 }
 0x2b5   :  { %v14744_v37 = vld [vmem:[#allocation8 + $0x21c] sm:$0xf0]  ;;  %5062 = vmatpush.bf16.msrb.mxu3 %v12544_v39  ;;  %v12480_v1 = vor.u32 %v14892_v56, %v12477_v18  ;;  %v14788_v46 = vld [vmem:[#allocation8 + $0x384] sm:$0xf]  ;;  %3550 = vmatmul.bf16.gmra.mxu0 %v16796_v27 }
 0x2b6   :  { %v11868_v12 = vor.u32 %v14744_v37, %v11867_v43  ;;  %5044 = vmatpush.bf16.msrb.mxu2 %v12256_v40  ;;  %v14675_v58 = vld [vmem:[#allocation2 + $0x14] sm:$0xf0]  ;;  %v12061_v33 = vld [vmem:[#allocation8 + $0x3a0] sm:$0xf0] }
 0x2b7   :  { %v14820_v51 = vld [vmem:[#allocation8 + $0x484] sm:$0xf]  ;;  %v12064_v43 = vor.u32 %v14788_v46, %v12061_v33  ;;  %v16995_v49 = vpop.f32.mrf.mxu2  ;;  %v16999_v0 = vor.u32 %v14675_v58, %v11603_v42  ;;  %v17012_v33 = vadd.f32 %v16949_v59, %v16964_v45  ;;  %v14865_v59 = vld [vmem:[#allocation8 + $0x5e4] sm:$0xf0] }
 0x2b8   :  { %4934 = vmatpush.bf16.msra.mxu0 %v11612_v35  ;;  %4953 = vmatpush.bf16.msrb.mxu1 %v11868_v12  ;;  %v12189_v39 = vld [vmem:[#allocation8 + $0x4a0] sm:$0xf0]  ;;  %v12611_v45 = vld [vmem:[#allocation8 + $0x7c8] sm:$0xf] }
 0x2b9   :  { %5063 = vmatpush.bf16.msrb.mxu3 %v12512_v34  ;;  %v11605_v50 = vld [vmem:[#allocation2 + $0x18] sm:$0xf0]  ;;  %v12192_v35 = vor.u32 %v14820_v51, %v12189_v39  ;;  %v16997_v16 = vpop.f32.mrf.mxu3  ;;  %v3247_v34 = vpop.f32.mrf.mxu0  ;;  %3569 = vmatmul.bf16.gmra.mxu1 %v16801_v5 }
 0x2ba   :  { %5045 = vmatpush.bf16.msrb.mxu2 %v12224_v25  ;;  %v14884_v37 = vld [vmem:[#allocation8 + $0x684] sm:$0xf]  ;;  %v3266_v13 = vpop.f32.mrf.mxu1  ;;  %v17002_v18 = vor.u32 %v14673_v30, %v11605_v50 }
 0x2bb   :  { %v12445_v47 = vld [vmem:[#allocation8 + $0x6a0] sm:$0xf0] }
 0x2bc   :  { %5003 = vmatpush.bf16.msrb.mxu0 %v11840_v63  ;;  %5022 = vmatpush.bf16.msra.mxu1 %v12096_v48  ;;  %v14716_v28 = vld [vmem:[#allocation8 + $0x144] sm:$0xf]  ;;  %v12448_v12 = vor.u32 %v14884_v37, %v12445_v47  ;;  %v3267_v48 = vadd.f32 %v3266_v13, %v3247_v34 }
 0x2bd   :  { %5064 = vmatpush.bf16.msrb.mxu3 %v12480_v1  ;;  %v11773_v40 = vld [vmem:[#allocation8 + $0x160] sm:$0xf0]  ;;  %4973 = vmatmul.bf16.vlgmr.msra.gmra.mxu2 %v16999_v0 }
 0x2be   :  { %v14780_v22 = vld [vmem:[#allocation8 + $0x344] sm:$0xf]  ;;  %v11776_v14 = vor.u32 %v14716_v28, %v11773_v40  ;;  %5046 = vmatpush.bf16.msrb.mxu2 %v12192_v35  ;;  %v17005_v25 = vadd.f32 %v16984_v29, %v3267_v48  ;;  %4992 = vmatmul.bf16.vlgmr.msra.gmra.mxu3 %v17002_v18  ;;  %v14674_v48 = vld [vmem:[#allocation2 + $0xc] sm:$0xf0] }
 0x2bf   :  { %v12029_v3 = vld [vmem:[#allocation8 + $0x360] sm:$0xf0] }
 0x2c0   :  { %5004 = vmatpush.bf16.msrb.mxu0 %v11808_v31  ;;  %5023 = vmatpush.bf16.msra.mxu1 %v12064_v43  ;;  %v14812_v15 = vld [vmem:[#allocation8 + $0x444] sm:$0xf]  ;;  %v12032_v56 = vor.u32 %v14780_v22, %v12029_v3  ;;  %v17014_v43 = vpop.f32.mrf.mxu2  ;;  %v12355_v22 = vld [vmem:[#allocation8 + $0x5c8] sm:$0xf] }
 0x2c1   :  { %v12157_v38 = vld [vmem:[#allocation8 + $0x460] sm:$0xf0]  ;;  %5065 = vmatpush.bf16.msrb.mxu3 %v12448_v12  ;;  %v17016_v12 = vpop.f32.mrf.mxu3  ;;  %v3249_v40 = vpop.f32.mrf.mxu0 }
 0x2c2   :  { %v14876_v57 = vld [vmem:[#allocation8 + $0x644] sm:$0xf]  ;;  %v12160_v26 = vor.u32 %v14812_v15, %v12157_v38  ;;  %v3268_v3 = vpop.f32.mrf.mxu1  ;;  %v12356_v15 = vor.u32 %v14865_v59, %v12355_v22  ;;  %v14929_v38 = vld [vmem:[#allocation8 + $0x7e4] sm:$0xf0] }
 0x2c3   :  { %v12413_v63 = vld [vmem:[#allocation8 + $0x660] sm:$0xf0]  ;;  %v3269_v13 = vadd.f32 %v3268_v3, %v3249_v40 }
 0x2c4   :  { %v12416_v60 = vor.u32 %v14876_v57, %v12413_v63  ;;  %v14708_v1 = vld [vmem:[#allocation8 + $0x104] sm:$0xf]  ;;  %5005 = vmatpush.bf16.msrb.mxu0 %v11776_v14  ;;  %5024 = vmatpush.bf16.msra.mxu1 %v12032_v56  ;;  %v12612_v14 = vor.u32 %v14929_v38, %v12611_v45  ;;  %v12547_v45 = vld [vmem:[#allocation8 + $0x748] sm:$0xf]  ;;  %v14672_v38 = vld [vmem:[#allocation2 + $0x4] sm:$0xf] }
 0x2c5   :  { %v11741_v23 = vld [vmem:[#allocation8 + $0x120] sm:$0xf0]  ;;  %5047 = vmatpush.bf16.msrb.mxu2 %v12160_v26  ;;  %v17019_v63 = vadd.f32 %v16995_v49, %v3269_v13  ;;  %v14913_v13 = vld [vmem:[#allocation8 + $0x764] sm:$0xf0] }
 0x2c6   :  { %v14772_v11 = vld [vmem:[#allocation8 + $0x304] sm:$0xf]  ;;  %v11744_v46 = vor.u32 %v14708_v1, %v11741_v23  ;;  %5066 = vmatpush.bf16.msrb.mxu3 %v12416_v60  ;;  %v11597_v1 = vld [vmem:[#allocation2 + $0x10] sm:$0xf0] }
 0x2c7   :  { %v11997_v58 = vld [vmem:[#allocation8 + $0x320] sm:$0xf0] }
 0x2c8   :  { %v14804_v27 = vld [vmem:[#allocation8 + $0x404] sm:$0xf]  ;;  %v12000_v29 = vor.u32 %v14772_v11, %v11997_v58  ;;  %5006 = vmatpush.bf16.msrb.mxu0 %v11744_v46  ;;  %v12323_v46 = vld [vmem:[#allocation8 + $0x588] sm:$0xf] }
 0x2c9   :  { %v12125_v31 = vld [vmem:[#allocation8 + $0x420] sm:$0xf0]  ;;  %v14857_v58 = vld [vmem:[#allocation8 + $0x5a4] sm:$0xf0]  ;;  %v17027_v22 = vpop.f32.mrf.mxu3  ;;  %v3318_v59 = vpop.f32.mrf.mxu0 }
 0x2ca   :  { %v12128_v5 = vor.u32 %v14804_v27, %v12125_v31  ;;  %v14868_v51 = vld [vmem:[#allocation8 + $0x604] sm:$0xf]  ;;  %5025 = vmatpush.bf16.msra.mxu1 %v12000_v29  ;;  %v17023_v27 = vadd.f32 %v16962_v32, %v16975_v36  ;;  %v11595_v31 = vld [vmem:[#allocation2] sm:$0xf]  ;;  %v12324_v29 = vor.u32 %v14857_v58, %v12323_v46  ;;  %v17050_v58 = vadd.f32 %v16972_v8, %v16989_v20 }
 0x2cb   :  { %v12381_v39 = vld [vmem:[#allocation8 + $0x620] sm:$0xf0]  ;;  %v12291_v32 = vld [vmem:[#allocation8 + $0x548] sm:$0xf] }
 0x2cc   :  { %v14700_v50 = vld [vmem:[#allocation8 + $0xc4] sm:$0xf]  ;;  %v12384_v35 = vor.u32 %v14868_v51, %v12381_v39  ;;  %5048 = vmatpush.bf16.msrb.mxu2 %v12128_v5  ;;  %v12579_v5 = vld [vmem:[#allocation8 + $0x788] sm:$0xf] }
 0x2cd   :  { %v11709_v37 = vld [vmem:[#allocation8 + $0xe0] sm:$0xf0]  ;;  %v14921_v51 = vld [vmem:[#allocation8 + $0x7a4] sm:$0xf0] }
 0x2ce   :  { %v14764_v47 = vld [vmem:[#allocation8 + $0x2c4] sm:$0xf]  ;;  %v11712_v34 = vor.u32 %v14700_v50, %v11709_v37  ;;  %5067 = vmatpush.bf16.msrb.mxu3 %v12384_v35  ;;  %v17025_v35 = vpop.f32.mrf.mxu2  ;;  %v12580_v37 = vor.u32 %v14921_v51, %v12579_v5  ;;  %v14849_v36 = vld [vmem:[#allocation8 + $0x564] sm:$0xf0] }
 0x2cf   :  { %v11965_v28 = vld [vmem:[#allocation8 + $0x2e0] sm:$0xf0]  ;;  %v14841_v46 = vld [vmem:[#allocation8 + $0x524] sm:$0xf0] }
 0x2d0   :  { %v1132_v57 = vld [vmem:[#allocation2 + $0x38] sm:$0x33]  ;;  %v11968_v42 = vor.u32 %v14764_v47, %v11965_v28  ;;  %5117 = vmatpush.bf16.msra.mxu2 %v12356_v15  ;;  %5007 = vmatpush.bf16.msrb.mxu0 %v11712_v34  ;;  %v3337_v34 = vpop.f32.mrf.mxu1  ;;  %v17033_v15 = vor.u32 %v14674_v48, %v11595_v31  ;;  %v11843_v5 = vld [vmem:[#allocation8 + $0x1c8] sm:$0xf] }
 0x2d1   :  { %v14692_v30 = vld [vmem:[#allocation8 + $0x84] sm:$0xf]  ;;  %v3629_v60 = vunpack.c.l.b16 %v1132_v57  ;;  %v3630_v50 = vunpack.c.h.b16 %v1132_v57  ;;  %v12227_v20 = vld [vmem:[#allocation8 + $0x4c8] sm:$0xf] }
 0x2d2   :  { %5136 = vmatpush.bf16.msra.mxu3 %v12612_v14  ;;  %v11677_v56 = vld [vmem:[#allocation8 + $0xa0] sm:$0xf0]  ;;  %5026 = vmatpush.bf16.msra.mxu1 %v11968_v42  ;;  %v3338_v42 = vadd.f32 %v3337_v34, %v3318_v59  ;;  %v17035_v14 = vor.u32 %v14672_v38, %v11597_v1  ;;  %v14897_v34 = vld [vmem:[#allocation8 + $0x6e4] sm:$0xf0]  ;;  %v1131_v38 = vld [vmem:[#allocation2 + $0x30] sm:$0x33] }
 0x2d3   :  { %v14756_v26 = vld [vmem:[#allocation8 + $0x284] sm:$0xf]  ;;  %v11680_v23 = vor.u32 %v14692_v30, %v11677_v56  ;;  %v17031_v3 = vpack.c.b16 %v3629_v60, %v1670_v19  ;;  %v12292_v56 = vor.u32 %v14849_v36, %v12291_v32  ;;  %4935 = vmatmul.bf16.vlgmr.msra.gmra.mxu0 %v17033_v15  ;;  %v12548_v19 = vor.u32 %v14913_v13, %v12547_v45  ;;  %v14833_v32 = vld [vmem:[#allocation8 + $0x4e4] sm:$0xf0] }
 0x2d4   :  { %v11933_v11 = vld [vmem:[#allocation8 + $0x2a0] sm:$0xf0]  ;;  %5118 = vmatpush.bf16.msra.mxu2 %v12324_v29  ;;  %v17043_v48 = vadd.f32 %v17014_v43, %v3338_v42  ;;  %4954 = vmatmul.bf16.vlgmr.msrb.gmra.mxu1 %v17035_v14  ;;  %v14905_v29 = vld [vmem:[#allocation8 + $0x724] sm:$0xf0]  ;;  %v12228_v13 = vor.u32 %v14833_v32, %v12227_v20 }
 0x2d5   :  { %v11936_v49 = vor.u32 %v14756_v26, %v11933_v11  ;;  %v14684_v39 = vld [vmem:[#allocation8 + $0x44] sm:$0xf]  ;;  %5008 = vmatpush.bf16.msrb.mxu0 %v11680_v23  ;;  %v17039_v26 = vpack.c.b16 %v3630_v50, %v1671_v44  ;;  %4978 = vmatmul.bf16.gmra.mxu2 %v17031_v3  ;;  %v12259_v44 = vld [vmem:[#allocation8 + $0x508] sm:$0xf] }
 0x2d6   :  { %v11645_v47 = vld [vmem:[#allocation8 + $0x60] sm:$0xf0]  ;;  %5137 = vmatpush.bf16.msra.mxu3 %v12580_v37  ;;  %v12260_v31 = vor.u32 %v14841_v46, %v12259_v44  ;;  %v17052_v51 = vpop.f32.mrf.mxu2  ;;  %v14737_v50 = vld [vmem:[#allocation8 + $0x1e4] sm:$0xf0]  ;;  %v17061_v46 = vadd.f32 %v16986_v61, %v17005_v25 }
 0x2d7   :  { %v14748_v28 = vld [vmem:[#allocation8 + $0x244] sm:$0xf]  ;;  %v11648_v57 = vor.u32 %v14684_v39, %v11645_v47  ;;  %5027 = vmatpush.bf16.msra.mxu1 %v11936_v49  ;;  %4997 = vmatmul.bf16.gmra.mxu3 %v17039_v26  ;;  %v12515_v49 = vld [vmem:[#allocation8 + $0x708] sm:$0xf]  ;;  %v11844_v59 = vor.u32 %v14737_v50, %v11843_v5 }
 0x2d8   :  { %v11901_v40 = vld [vmem:[#allocation8 + $0x260] sm:$0xf0]  ;;  %5119 = vmatpush.bf16.msra.mxu2 %v12292_v56  ;;  %v12516_v39 = vor.u32 %v14905_v29, %v12515_v49  ;;  %v12099_v37 = vld [vmem:[#allocation8 + $0x3c8] sm:$0xf]  ;;  %v3339_v45 = vpop.f32.mrf.mxu1 }
 0x2d9   :  { %v11904_v30 = vor.u32 %v14748_v28, %v11901_v40  ;;  %v14676_v60 = vld [vmem:[#allocation8 + $0x4] sm:$0xf]  ;;  %5009 = vmatpush.bf16.msrb.mxu0 %v11648_v57  ;;  %v14801_v47 = vld [vmem:[#allocation8 + $0x3e4] sm:$0xf0]  ;;  %v17054_v28 = vpop.f32.mrf.mxu3  ;;  %v3320_v40 = vpop.f32.mrf.mxu0 }
 0x2da   :  { %v11613_v1 = vld [vmem:[#allocation8 + $0x20] sm:$0xf0]  ;;  %5138 = vmatpush.bf16.msra.mxu3 %v12548_v19  ;;  %v12100_v8 = vor.u32 %v14801_v47, %v12099_v37  ;;  %v12483_v36 = vld [vmem:[#allocation8 + $0x6c8] sm:$0xf]  ;;  %v3340_v57 = vadd.f32 %v3339_v45, %v3320_v40 }
 0x2db   :  { %v14740_v23 = vld [vmem:[#allocation8 + $0x204] sm:$0xf]  ;;  %v11616_v11 = vor.u32 %v14676_v60, %v11613_v1  ;;  %5028 = vmatpush.bf16.msra.mxu1 %v11904_v30  ;;  %v12484_v42 = vor.u32 %v14897_v34, %v12483_v36  ;;  %v11811_v56 = vld [vmem:[#allocation8 + $0x188] sm:$0xf]  ;;  %v3627_v1 = vunpack.c.l.b16 %v1131_v38 }
 0x2dc   :  { %v11872_v43 = vor.u32 %v14740_v23, %v11869_v54  ;;  %5120 = vmatpush.bf16.msra.mxu2 %v12260_v31  ;;  %v17057_v30 = vadd.f32 %v17025_v35, %v3340_v57  ;;  %v14729_v19 = vld [vmem:[#allocation8 + $0x1a4] sm:$0xf0] }
 0x2dd   :  { %5010 = vmatpush.bf16.msrb.mxu0 %v11616_v11  ;;  %v12067_v60 = vld [vmem:[#allocation8 + $0x388] sm:$0xf]  ;;  %v11812_v23 = vor.u32 %v14729_v19, %v11811_v56  ;;  %v17069_v32 = vpack.c.b16 %v3627_v1, %v1668_v6 }
 0x2de   :  { %5139 = vmatpush.bf16.msra.mxu3 %v12516_v39  ;;  %v14793_v54 = vld [vmem:[#allocation8 + $0x3a4] sm:$0xf0]  ;;  %v17063_v39 = vpop.f32.mrf.mxu2 }
 0x2df   :  { %5029 = vmatpush.bf16.msra.mxu1 %v11872_v43  ;;  %v12195_v11 = vld [vmem:[#allocation8 + $0x488] sm:$0xf]  ;;  %v3628_v43 = vunpack.c.h.b16 %v1131_v38  ;;  %v12068_v31 = vor.u32 %v14793_v54, %v12067_v60 }
 0x2e0   :  { %v14825_v44 = vld [vmem:[#allocation8 + $0x4a4] sm:$0xf0]  ;;  %5121 = vmatpush.bf16.msra.mxu2 %v12228_v13  ;;  %v3342_v36 = vpop.f32.mrf.mxu1 }
 0x2e1   :  { %5079 = vmatpush.bf16.msra.mxu0 %v11844_v59  ;;  %v12196_v49 = vor.u32 %v14825_v44, %v12195_v11  ;;  %v12451_v29 = vld [vmem:[#allocation8 + $0x688] sm:$0xf]  ;;  %v17065_v59 = vpop.f32.mrf.mxu3  ;;  %v17073_v38 = vpack.c.b16 %v3628_v43, %v1669_v55 }
 0x2e2   :  { %v14889_v35 = vld [vmem:[#allocation8 + $0x6a4] sm:$0xf0]  ;;  %5140 = vmatpush.bf16.msra.mxu3 %v12484_v42 }
 0x2e3   :  { %5098 = vmatpush.bf16.msrb.mxu1 %v12100_v8  ;;  %v11779_v5 = vld [vmem:[#allocation8 + $0x148] sm:$0xf]  ;;  %v12452_v50 = vor.u32 %v14889_v35, %v12451_v29  ;;  %v3323_v8 = vpop.f32.mrf.mxu0  ;;  %4940 = vmatmul.bf16.gmra.mxu0 %v17069_v32 }
 0x2e4   :  { %v14721_v37 = vld [vmem:[#allocation8 + $0x164] sm:$0xf0]  ;;  %v3343_v57 = vadd.f32 %v3342_v36, %v3323_v8  ;;  %5122 = vmatpush.bf16.msra.mxu2 %v12196_v49  ;;  %4959 = vmatmul.bf16.gmra.mxu1 %v17073_v38  ;;  %v17084_v49 = vadd.f32 %v16997_v16, %v17019_v63  ;;  %v14861_v8 = vld [vmem:[#allocation8 + $0x5cc] sm:$0xf] }
 0x2e5   :  { %5080 = vmatpush.bf16.msra.mxu0 %v11812_v23  ;;  %v12035_v47 = vld [vmem:[#allocation8 + $0x348] sm:$0xf]  ;;  %v11780_v45 = vor.u32 %v14721_v37, %v11779_v5  ;;  %5049 = vmatmul.bf16.vlgmr.msrb.gmra.mxu2 %v16999_v0 }
 0x2e6   :  { %v14785_v40 = vld [vmem:[#allocation8 + $0x364] sm:$0xf0]  ;;  %5141 = vmatpush.bf16.msra.mxu3 %v12452_v50  ;;  %v17077_v19 = vadd.f32 %v17052_v51, %v3343_v57  ;;  %v3432_v29 = vpop.f32.mrf.mxu2 }
 0x2e7   :  { %5099 = vmatpush.bf16.msrb.mxu1 %v12068_v31  ;;  %v12163_v61 = vld [vmem:[#allocation8 + $0x448] sm:$0xf]  ;;  %v12036_v13 = vor.u32 %v14785_v40, %v12035_v47  ;;  %5068 = vmatmul.bf16.vlgmr.msrb.gmra.mxu3 %v17002_v18 }
 0x2e8   :  { %v14817_v25 = vld [vmem:[#allocation8 + $0x464] sm:$0xf0] }
 0x2e9   :  { %v12419_v20 = vld [vmem:[#allocation8 + $0x648] sm:$0xf]  ;;  %v12164_v42 = vor.u32 %v14817_v25, %v12163_v61  ;;  %5081 = vmatpush.bf16.msra.mxu0 %v11780_v45  ;;  %v17086_v47 = vpop.f32.mrf.mxu3  ;;  %v12357_v61 = vld [vmem:[#allocation8 + $0x5e8] sm:$0xf0] }
 0x2ea   :  { %v14881_v34 = vld [vmem:[#allocation8 + $0x664] sm:$0xf0]  ;;  %v14925_v25 = vld [vmem:[#allocation8 + $0x7cc] sm:$0xf]  ;;  %v12360_v45 = vor.u32 %v14861_v8, %v12357_v61 }
 0x2eb   :  { %v12420_v56 = vor.u32 %v14881_v34, %v12419_v20  ;;  %v11747_v6 = vld [vmem:[#allocation8 + $0x108] sm:$0xf]  ;;  %5100 = vmatpush.bf16.msrb.mxu1 %v12036_v13  ;;  %5123 = vmatpush.bf16.msra.mxu2 %v12164_v42  ;;  %v3325_v40 = vpop.f32.mrf.mxu0  ;;  %v3344_v20 = vpop.f32.mrf.mxu1  ;;  %v12613_v34 = vld [vmem:[#allocation8 + $0x7e8] sm:$0xf0] }
 0x2ec   :  { %v14713_v60 = vld [vmem:[#allocation8 + $0x124] sm:$0xf0]  ;;  %v3345_v57 = vadd.f32 %v3344_v20, %v3325_v40  ;;  %v12616_v63 = vor.u32 %v14925_v25, %v12613_v34  ;;  %v14845_v8 = vld [vmem:[#allocation8 + $0x54c] sm:$0xf] }
 0x2ed   :  { %v11748_v55 = vor.u32 %v14713_v60, %v11747_v6  ;;  %v14777_v1 = vld [vmem:[#allocation8 + $0x324] sm:$0xf0]  ;;  %5142 = vmatpush.bf16.msra.mxu3 %v12420_v56  ;;  %v12293_v61 = vld [vmem:[#allocation8 + $0x568] sm:$0xf0] }
 0x2ee   :  { %v12131_v23 = vld [vmem:[#allocation8 + $0x408] sm:$0xf]  ;;  %v12004_v11 = vor.u32 %v14777_v1, %v12003_v7  ;;  %v17089_v13 = vadd.f32 %v17063_v39, %v3345_v57  ;;  %v12325_v1 = vld [vmem:[#allocation8 + $0x5a8] sm:$0xf0]  ;;  %v17095_v39 = vpop.f32.mrf.mxu2  ;;  %v12296_v34 = vor.u32 %v14845_v8, %v12293_v61 }
 0x2ef   :  { %v14809_v54 = vld [vmem:[#allocation8 + $0x424] sm:$0xf0]  ;;  %5082 = vmatpush.bf16.msra.mxu0 %v11748_v55  ;;  %v14853_v55 = vld [vmem:[#allocation8 + $0x58c] sm:$0xf] }
 0x2f0   :  { %v12132_v44 = vor.u32 %v14809_v54, %v12131_v23  ;;  %v12387_v51 = vld [vmem:[#allocation8 + $0x608] sm:$0xf]  ;;  %5101 = vmatpush.bf16.msrb.mxu1 %v12004_v11  ;;  %v12328_v54 = vor.u32 %v14853_v55, %v12325_v1  ;;  %v14917_v11 = vld [vmem:[#allocation8 + $0x78c] sm:$0xf] }
 0x2f1   :  { %v14873_v43 = vld [vmem:[#allocation8 + $0x624] sm:$0xf0]  ;;  %v14909_v25 = vld [vmem:[#allocation8 + $0x74c] sm:$0xf] }
 0x2f2   :  { %v11715_v31 = vld [vmem:[#allocation8 + $0xc8] sm:$0xf]  ;;  %v12388_v35 = vor.u32 %v14873_v43, %v12387_v51  ;;  %5124 = vmatpush.bf16.msra.mxu2 %v12132_v44  ;;  %v12581_v44 = vld [vmem:[#allocation8 + $0x7a8] sm:$0xf0]  ;;  %v17093_v43 = vadd.f32 %v17016_v12, %v17043_v48 }
 0x2f3   :  { %v14705_v5 = vld [vmem:[#allocation8 + $0xe4] sm:$0xf0]  ;;  %v3394_v40 = vpop.f32.mrf.mxu0  ;;  %v3413_v20 = vpop.f32.mrf.mxu1  ;;  %5011 = vmatmul.bf16.vlgmr.msrb.gmra.mxu0 %v17033_v15  ;;  %v12261_v55 = vld [vmem:[#allocation8 + $0x528] sm:$0xf0] }
 0x2f4   :  { %v11971_v50 = vld [vmem:[#allocation8 + $0x2c8] sm:$0xf]  ;;  %v11716_v36 = vor.u32 %v14705_v5, %v11715_v31  ;;  %5143 = vmatpush.bf16.msra.mxu3 %v12388_v35  ;;  %v12584_v31 = vor.u32 %v14917_v11, %v12581_v44  ;;  %v3414_v12 = vadd.f32 %v3413_v20, %v3394_v40  ;;  %5030 = vmatmul.bf16.vlgmr.msra.gmra.mxu1 %v17035_v14  ;;  %v14733_v11 = vld [vmem:[#allocation8 + $0x1cc] sm:$0xf] }
 0x2f5   :  { %v14769_v37 = vld [vmem:[#allocation8 + $0x2e4] sm:$0xf0]  ;;  %5054 = vmatmul.bf16.gmra.mxu2 %v17031_v3  ;;  %v17107_v44 = vadd.f32 %v17027_v22, %v17057_v30  ;;  %v14829_v20 = vld [vmem:[#allocation8 + $0x4cc] sm:$0xf] }
 0x2f6   :  { %v11972_v16 = vor.u32 %v14769_v37, %v11971_v50  ;;  %5193 = vmatpush.bf16.msrb.mxu2 %v12360_v45  ;;  %v11683_v42 = vld [vmem:[#allocation8 + $0x88] sm:$0xf]  ;;  %5083 = vmatpush.bf16.msra.mxu0 %v11716_v36  ;;  %v17097_v37 = vpop.f32.mrf.mxu3  ;;  %v12549_v45 = vld [vmem:[#allocation8 + $0x768] sm:$0xf0] }
 0x2f7   :  { %v14697_v56 = vld [vmem:[#allocation8 + $0xa4] sm:$0xf0]  ;;  %v12552_v57 = vor.u32 %v14909_v25, %v12549_v45  ;;  %5073 = vmatmul.bf16.gmra.mxu3 %v17039_v26  ;;  %v14893_v45 = vld [vmem:[#allocation8 + $0x6cc] sm:$0xf] }
 0x2f8   :  { %5212 = vmatpush.bf16.msrb.mxu3 %v12616_v63  ;;  %v11939_v6 = vld [vmem:[#allocation8 + $0x288] sm:$0xf]  ;;  %v11684_v60 = vor.u32 %v14697_v56, %v11683_v42  ;;  %5102 = vmatpush.bf16.msrb.mxu1 %v11972_v16  ;;  %v17100_v16 = vadd.f32 %v3432_v29, %v3414_v12  ;;  %v14901_v29 = vld [vmem:[#allocation8 + $0x70c] sm:$0xf] }
 0x2f9   :  { %v14761_v7 = vld [vmem:[#allocation8 + $0x2a4] sm:$0xf0] }
 0x2fa   :  { %v11940_v23 = vor.u32 %v14761_v7, %v11939_v6  ;;  %v11651_v51 = vld [vmem:[#allocation8 + $0x48] sm:$0xf]  ;;  %5194 = vmatpush.bf16.msrb.mxu2 %v12328_v54  ;;  %5084 = vmatpush.bf16.msra.mxu0 %v11684_v60  ;;  %v14837_v7 = vld [vmem:[#allocation8 + $0x50c] sm:$0xf] }
 0x2fb   :  { %v14689_v35 = vld [vmem:[#allocation8 + $0x64] sm:$0xf0]  ;;  %v12517_v54 = vld [vmem:[#allocation8 + $0x728] sm:$0xf0]  ;;  %v3396_v8 = vpop.f32.mrf.mxu0  ;;  %v3415_v12 = vpop.f32.mrf.mxu1 }
 0x2fc   :  { %v11907_v5 = vld [vmem:[#allocation8 + $0x248] sm:$0xf]  ;;  %5213 = vmatpush.bf16.msrb.mxu3 %v12584_v31  ;;  %v11652_v36 = vor.u32 %v14689_v35, %v11651_v51  ;;  %5103 = vmatpush.bf16.msrb.mxu1 %v11940_v23  ;;  %v12264_v23 = vor.u32 %v14837_v7, %v12261_v55  ;;  %v3437_v51 = vpop.f32.mrf.mxu2  ;;  %v12520_v31 = vor.u32 %v14901_v29, %v12517_v54  ;;  %v11845_v35 = vld [vmem:[#allocation8 + $0x1e8] sm:$0xf0] }
 0x2fd   :  { %v14753_v50 = vld [vmem:[#allocation8 + $0x264] sm:$0xf0]  ;;  %v11848_v61 = vor.u32 %v14733_v11, %v11845_v35  ;;  %v12069_v7 = vld [vmem:[#allocation8 + $0x3a8] sm:$0xf0] }
 0x2fe   :  { %v11908_v48 = vor.u32 %v14753_v50, %v11907_v5  ;;  %v11619_v63 = vld [vmem:[#allocation8 + $0x8] sm:$0xf]  ;;  %5085 = vmatpush.bf16.msra.mxu0 %v11652_v36  ;;  %5195 = vmatpush.bf16.msrb.mxu2 %v12296_v34  ;;  %v14797_v5 = vld [vmem:[#allocation8 + $0x3cc] sm:$0xf]  ;;  %v17109_v40 = vpop.f32.mrf.mxu3  ;;  %v3416_v34 = vadd.f32 %v3415_v12, %v3396_v8 }
 0x2ff   :  { %v14681_v42 = vld [vmem:[#allocation8 + $0x24] sm:$0xf0]  ;;  %v12101_v50 = vld [vmem:[#allocation8 + $0x3e8] sm:$0xf0] }
 0x300   :  { %v11875_v56 = vld [vmem:[#allocation8 + $0x208] sm:$0xf]  ;;  %v11620_v6 = vor.u32 %v14681_v42, %v11619_v63  ;;  %5104 = vmatpush.bf16.msrb.mxu1 %v11908_v48  ;;  %5214 = vmatpush.bf16.msrb.mxu3 %v12552_v57  ;;  %v12104_v25 = vor.u32 %v14797_v5, %v12101_v50  ;;  %v12229_v36 = vld [vmem:[#allocation8 + $0x4e8] sm:$0xf0]  ;;  %v17112_v57 = vadd.f32 %v17095_v39, %v3416_v34 }
 0x301   :  { %v14745_v60 = vld [vmem:[#allocation8 + $0x224] sm:$0xf0]  ;;  %v12485_v48 = vld [vmem:[#allocation8 + $0x6e8] sm:$0xf0]  ;;  %v12232_v22 = vor.u32 %v14829_v20, %v12229_v36 }
 0x302   :  { %v11876_v1 = vor.u32 %v14745_v60, %v11875_v56  ;;  %5086 = vmatpush.bf16.msra.mxu0 %v11620_v6  ;;  %5196 = vmatpush.bf16.msrb.mxu2 %v12264_v23  ;;  %v12488_v30 = vor.u32 %v14893_v45, %v12485_v48  ;;  %v14725_v63 = vld [vmem:[#allocation8 + $0x18c] sm:$0xf] }
 0x303   :  { %v11813_v42 = vld [vmem:[#allocation8 + $0x1a8] sm:$0xf0]  ;;  %v3418_v12 = vpop.f32.mrf.mxu1  ;;  %5016 = vmatmul.bf16.gmra.mxu0 %v17069_v32 }
 0x304   :  { %5105 = vmatpush.bf16.msrb.mxu1 %v11876_v1  ;;  %5215 = vmatpush.bf16.msrb.mxu3 %v12520_v31  ;;  %v14789_v56 = vld [vmem:[#allocation8 + $0x38c] sm:$0xf]  ;;  %v11816_v60 = vor.u32 %v14725_v63, %v11813_v42  ;;  %v17116_v31 = vadd.f32 %v17054_v28, %v17077_v19  ;;  %v17118_v39 = vpop.f32.mrf.mxu2 }
 0x305   :  { %v14821_v55 = vld [vmem:[#allocation8 + $0x48c] sm:$0xf]  ;;  %v12072_v6 = vor.u32 %v14789_v56, %v12069_v7  ;;  %5035 = vmatmul.bf16.gmra.mxu1 %v17073_v38  ;;  %5125 = vmatmul.bf16.vlgmr.msra.gmra.mxu2 %v16999_v0 }
 0x306   :  { %5155 = vmatpush.bf16.msrb.mxu0 %v11848_v61  ;;  %v12197_v29 = vld [vmem:[#allocation8 + $0x4a8] sm:$0xf0]  ;;  %5197 = vmatpush.bf16.msrb.mxu2 %v12232_v22  ;;  %v17120_v61 = vpop.f32.mrf.mxu3 }
 0x307   :  { %v12200_v54 = vor.u32 %v14821_v55, %v12197_v29  ;;  %v14885_v1 = vld [vmem:[#allocation8 + $0x68c] sm:$0xf]  ;;  %5144 = vmatmul.bf16.vlgmr.msra.gmra.mxu3 %v17002_v18 }
 0x308   :  { %5174 = vmatpush.bf16.msra.mxu1 %v12104_v25  ;;  %v12453_v23 = vld [vmem:[#allocation8 + $0x6a8] sm:$0xf0]  ;;  %5216 = vmatpush.bf16.msrb.mxu3 %v12488_v30  ;;  %v3399_v25 = vpop.f32.mrf.mxu0 }
 0x309   :  { %v14717_v11 = vld [vmem:[#allocation8 + $0x14c] sm:$0xf]  ;;  %v12456_v35 = vor.u32 %v14885_v1, %v12453_v23  ;;  %v3419_v28 = vadd.f32 %v3418_v12, %v3399_v25  ;;  %v12363_v12 = vld [vmem:[#allocation8 + $0x5d0] sm:$0xf] }
 0x30a   :  { %5156 = vmatpush.bf16.msrb.mxu0 %v11816_v60  ;;  %v11781_v5 = vld [vmem:[#allocation8 + $0x168] sm:$0xf0]  ;;  %5198 = vmatpush.bf16.msrb.mxu2 %v12200_v54 }
 0x30b   :  { %v14781_v50 = vld [vmem:[#allocation8 + $0x34c] sm:$0xf]  ;;  %v11784_v48 = vor.u32 %v14717_v11, %v11781_v5  ;;  %v17123_v63 = vadd.f32 %v3437_v51, %v3419_v28  ;;  %v3420_v28 = vpop.f32.mrf.mxu1 }
 0x30c   :  { %v12037_v8 = vld [vmem:[#allocation8 + $0x368] sm:$0xf0]  ;;  %5175 = vmatpush.bf16.msra.mxu1 %v12072_v6  ;;  %5217 = vmatpush.bf16.msrb.mxu3 %v12456_v35  ;;  %v17130_v35 = vadd.f32 %v17065_v59, %v17089_v13  ;;  %v3508_v5 = vpop.f32.mrf.mxu2 }
 0x30d   :  { %v14813_v20 = vld [vmem:[#allocation8 + $0x44c] sm:$0xf]  ;;  %v12040_v19 = vor.u32 %v14781_v50, %v12037_v8 }
 0x30e   :  { %v12165_v36 = vld [vmem:[#allocation8 + $0x468] sm:$0xf0]  ;;  %5157 = vmatpush.bf16.msrb.mxu0 %v11784_v48  ;;  %v14866_v48 = vld [vmem:[#allocation8 + $0x5ec] sm:$0xf0] }
 0x30f   :  { %v14877_v45 = vld [vmem:[#allocation8 + $0x64c] sm:$0xf]  ;;  %v12168_v22 = vor.u32 %v14813_v20, %v12165_v36  ;;  %v17132_v36 = vpop.f32.mrf.mxu3 }
 0x310   :  { %v12421_v34 = vld [vmem:[#allocation8 + $0x668] sm:$0xf0]  ;;  %5176 = vmatpush.bf16.msra.mxu1 %v12040_v19 }
 0x311   :  { %v12424_v30 = vor.u32 %v14877_v45, %v12421_v34  ;;  %v14709_v42 = vld [vmem:[#allocation8 + $0x10c] sm:$0xf]  ;;  %5199 = vmatpush.bf16.msrb.mxu2 %v12168_v22  ;;  %v3401_v45 = vpop.f32.mrf.mxu0  ;;  %v12619_v34 = vld [vmem:[#allocation8 + $0x7d0] sm:$0xf]  ;;  %v12364_v22 = vor.u32 %v14866_v48, %v12363_v12 }
 0x312   :  { %v11749_v56 = vld [vmem:[#allocation8 + $0x128] sm:$0xf0] }
 0x313   :  { %v14773_v60 = vld [vmem:[#allocation8 + $0x30c] sm:$0xf]  ;;  %v11752_v7 = vor.u32 %v14709_v42, %v11749_v56  ;;  %5218 = vmatpush.bf16.msrb.mxu3 %v12424_v30  ;;  %v14930_v42 = vld [vmem:[#allocation8 + $0x7ec] sm:$0xf0]  ;;  %v3421_v56 = vadd.f32 %v3420_v28, %v3401_v45  ;;  %5087 = vmatmul.bf16.vlgmr.msra.gmra.mxu0 %v17033_v15 }
 0x314   :  { %v12005_v55 = vld [vmem:[#allocation8 + $0x328] sm:$0xf0]  ;;  %v12620_v13 = vor.u32 %v14930_v42, %v12619_v34  ;;  %v12555_v42 = vld [vmem:[#allocation8 + $0x750] sm:$0xf] }
 0x315   :  { %v14805_v29 = vld [vmem:[#allocation8 + $0x40c] sm:$0xf]  ;;  %v12008_v54 = vor.u32 %v14773_v60, %v12005_v55  ;;  %5158 = vmatpush.bf16.msrb.mxu0 %v11752_v7  ;;  %v17135_v30 = vadd.f32 %v17118_v39, %v3421_v56  ;;  %v17141_v39 = vpop.f32.mrf.mxu2  ;;  %v3489_v56 = vpop.f32.mrf.mxu1  ;;  %5106 = vmatmul.bf16.vlgmr.msrb.gmra.mxu1 %v17035_v14 }
 0x316   :  { %v12133_v6 = vld [vmem:[#allocation8 + $0x428] sm:$0xf0]  ;;  %5130 = vmatmul.bf16.gmra.mxu2 %v17031_v3 }
 0x317   :  { %v12136_v1 = vor.u32 %v14805_v29, %v12133_v6  ;;  %v14869_v51 = vld [vmem:[#allocation8 + $0x60c] sm:$0xf]  ;;  %5177 = vmatpush.bf16.msra.mxu1 %v12008_v54  ;;  %v17143_v34 = vpop.f32.mrf.mxu3  ;;  %5149 = vmatmul.bf16.gmra.mxu3 %v17039_v26 }
 0x318   :  { %v12389_v23 = vld [vmem:[#allocation8 + $0x628] sm:$0xf0] }
 0x319   :  { %v14701_v11 = vld [vmem:[#allocation8 + $0xcc] sm:$0xf]  ;;  %v12392_v50 = vor.u32 %v14869_v51, %v12389_v23  ;;  %5200 = vmatpush.bf16.msrb.mxu2 %v12136_v1  ;;  %v12331_v51 = vld [vmem:[#allocation8 + $0x590] sm:$0xf]  ;;  %v3470_v28 = vpop.f32.mrf.mxu0 }
 0x31a   :  { %v11717_v8 = vld [vmem:[#allocation8 + $0xe8] sm:$0xf0]  ;;  %v14858_v23 = vld [vmem:[#allocation8 + $0x5ac] sm:$0xf0] }
 0x31b   :  { %v14765_v25 = vld [vmem:[#allocation8 + $0x2cc] sm:$0xf]  ;;  %v11720_v19 = vor.u32 %v14701_v11, %v11717_v8  ;;  %5219 = vmatpush.bf16.msrb.mxu3 %v12392_v50  ;;  %v12332_v54 = vor.u32 %v14858_v23, %v12331_v51  ;;  %v12587_v1 = vld [vmem:[#allocation8 + $0x790] sm:$0xf]  ;;  %v17139_v50 = vadd.f32 %v17086_v47, %v17100_v16  ;;  %v3490_v47 = vadd.f32 %v3489_v56, %v3470_v28 }
 0x31c   :  { %v11973_v20 = vld [vmem:[#allocation8 + $0x2e8] sm:$0xf0]  ;;  %v14922_v8 = vld [vmem:[#allocation8 + $0x7ac] sm:$0xf0] }
 0x31d   :  { %v11976_v59 = vor.u32 %v14765_v25, %v11973_v20  ;;  %5269 = vmatpush.bf16.msra.mxu2 %v12364_v22  ;;  %v14693_v60 = vld [vmem:[#allocation8 + $0x8c] sm:$0xf]  ;;  %5159 = vmatpush.bf16.msrb.mxu0 %v11720_v19  ;;  %v12588_v20 = vor.u32 %v14922_v8, %v12587_v1  ;;  %v12299_v19 = vld [vmem:[#allocation8 + $0x550] sm:$0xf] }
 0x31e   :  { %v11685_v55 = vld [vmem:[#allocation8 + $0xa8] sm:$0xf0]  ;;  %v14850_v22 = vld [vmem:[#allocation8 + $0x56c] sm:$0xf0] }
 0x31f   :  { %5288 = vmatpush.bf16.msra.mxu3 %v12620_v13  ;;  %v14757_v29 = vld [vmem:[#allocation8 + $0x28c] sm:$0xf]  ;;  %v11688_v6 = vor.u32 %v14693_v60, %v11685_v55  ;;  %5178 = vmatpush.bf16.msra.mxu1 %v11976_v59  ;;  %v14914_v13 = vld [vmem:[#allocation8 + $0x76c] sm:$0xf0]  ;;  %v12300_v60 = vor.u32 %v14850_v22, %v12299_v19  ;;  %v17155_v56 = vpop.f32.mrf.mxu3 }
 0x320   :  { %v11941_v7 = vld [vmem:[#allocation8 + $0x2a8] sm:$0xf0]  ;;  %v12556_v55 = vor.u32 %v14914_v13, %v12555_v42  ;;  %v14842_v1 = vld [vmem:[#allocation8 + $0x52c] sm:$0xf0] }
 0x321   :  { %v11944_v11 = vor.u32 %v14757_v29, %v11941_v7  ;;  %v14685_v25 = vld [vmem:[#allocation8 + $0x4c] sm:$0xf]  ;;  %5270 = vmatpush.bf16.msra.mxu2 %v12332_v54  ;;  %5160 = vmatpush.bf16.msrb.mxu0 %v11688_v6  ;;  %v17146_v29 = vadd.f32 %v3508_v5, %v3490_v47  ;;  %v12523_v5 = vld [vmem:[#allocation8 + $0x710] sm:$0xf] }
 0x322   :  { %v11653_v45 = vld [vmem:[#allocation8 + $0x68] sm:$0xf0]  ;;  %v14738_v19 = vld [vmem:[#allocation8 + $0x1ec] sm:$0xf0] }
 0x323   :  { %v14749_v12 = vld [vmem:[#allocation8 + $0x24c] sm:$0xf]  ;;  %5289 = vmatpush.bf16.msra.mxu3 %v12588_v20  ;;  %v11656_v59 = vor.u32 %v14685_v25, %v11653_v45  ;;  %5179 = vmatpush.bf16.msra.mxu1 %v11944_v11  ;;  %v12267_v11 = vld [vmem:[#allocation8 + $0x510] sm:$0xf] }
 0x324   :  { %v11909_v48 = vld [vmem:[#allocation8 + $0x268] sm:$0xf0]  ;;  %v12268_v25 = vor.u32 %v14842_v1, %v12267_v11  ;;  %v14906_v20 = vld [vmem:[#allocation8 + $0x72c] sm:$0xf0]  ;;  %5092 = vmatmul.bf16.gmra.mxu0 %v17069_v32 }
 0x325   :  { %v11912_v16 = vor.u32 %v14749_v12, %v11909_v48  ;;  %v14677_v7 = vld [vmem:[#allocation8 + $0xc] sm:$0xf]  ;;  %5161 = vmatpush.bf16.msrb.mxu0 %v11656_v59  ;;  %5271 = vmatpush.bf16.msra.mxu2 %v12300_v60  ;;  %v11851_v45 = vld [vmem:[#allocation8 + $0x1d0] sm:$0xf]  ;;  %v17153_v12 = vadd.f32 %v17097_v37, %v17112_v57  ;;  %v3513_v48 = vpop.f32.mrf.mxu2  ;;  %v12524_v28 = vor.u32 %v14906_v20, %v12523_v5  ;;  %v3472_v59 = vpop.f32.mrf.mxu0 }
 0x326   :  { %v11621_v51 = vld [vmem:[#allocation8 + $0x28] sm:$0xf0]  ;;  %v12107_v22 = vld [vmem:[#allocation8 + $0x3d0] sm:$0xf]  ;;  %v11852_v13 = vor.u32 %v14738_v19, %v11851_v45  ;;  %5111 = vmatmul.bf16.gmra.mxu1 %v17073_v38  ;;  %5201 = vmatmul.bf16.vlgmr.msrb.gmra.mxu2 %v16999_v0 }
 0x327   :  { %v14741_v23 = vld [vmem:[#allocation8 + $0x20c] sm:$0xf]  ;;  %v11624_v6 = vor.u32 %v14677_v7, %v11621_v51  ;;  %5180 = vmatpush.bf16.msra.mxu1 %v11912_v16  ;;  %5290 = vmatpush.bf16.msra.mxu3 %v12556_v55  ;;  %v14802_v42 = vld [vmem:[#allocation8 + $0x3ec] sm:$0xf0]  ;;  %v3491_v51 = vpop.f32.mrf.mxu1 }
 0x328   :  { %v11877_v54 = vld [vmem:[#allocation8 + $0x228] sm:$0xf0]  ;;  %v12108_v47 = vor.u32 %v14802_v42, %v12107_v22  ;;  %v12235_v16 = vld [vmem:[#allocation8 + $0x4d0] sm:$0xf]  ;;  %5220 = vmatmul.bf16.vlgmr.msrb.gmra.mxu3 %v17002_v18 }
 0x329   :  { %v11880_v8 = vor.u32 %v14741_v23, %v11877_v54  ;;  %v14834_v60 = vld [vmem:[#allocation8 + $0x4ec] sm:$0xf0]  ;;  %5162 = vmatpush.bf16.msrb.mxu0 %v11624_v6  ;;  %v3492_v54 = vadd.f32 %v3491_v51, %v3472_v59  ;;  %5272 = vmatpush.bf16.msra.mxu2 %v12268_v25 }
 0x32a   :  { %v12491_v7 = vld [vmem:[#allocation8 + $0x6d0] sm:$0xf]  ;;  %v12236_v37 = vor.u32 %v14834_v60, %v12235_v16 }
 0x32b   :  { %v14898_v23 = vld [vmem:[#allocation8 + $0x6ec] sm:$0xf0]  ;;  %5181 = vmatpush.bf16.msra.mxu1 %v11880_v8  ;;  %5291 = vmatpush.bf16.msra.mxu3 %v12524_v28  ;;  %v17158_v55 = vadd.f32 %v17141_v39, %v3492_v54  ;;  %v17162_v28 = vadd.f32 %v17109_v40, %v17123_v63 }
 0x32c   :  { %v12492_v57 = vor.u32 %v14898_v23, %v12491_v7  ;;  %v11819_v11 = vld [vmem:[#allocation8 + $0x190] sm:$0xf]  ;;  %v17166_v7 = vpop.f32.mrf.mxu3 }
 0x32d   :  { %5231 = vmatpush.bf16.msra.mxu0 %v11852_v13  ;;  %v14730_v1 = vld [vmem:[#allocation8 + $0x1ac] sm:$0xf0]  ;;  %5273 = vmatpush.bf16.msra.mxu2 %v12236_v37  ;;  %18017 = vst [vmem:[#allocation24_spill] sm:$0xff] %v17162_v28  ;;  %v17164_v39 = vpop.f32.mrf.mxu2  ;;  %v3475_v51 = vpop.f32.mrf.mxu0 }
 0x32e   :  { %v12075_v5 = vld [vmem:[#allocation8 + $0x390] sm:$0xf]  ;;  %v11820_v20 = vor.u32 %v14730_v1, %v11819_v11 }
 0x32f   :  { %5250 = vmatpush.bf16.msrb.mxu1 %v12108_v47  ;;  %v14794_v45 = vld [vmem:[#allocation8 + $0x3ac] sm:$0xf0]  ;;  %5292 = vmatpush.bf16.msra.mxu3 %v12492_v57  ;;  %v3494_v11 = vpop.f32.mrf.mxu1 }
 0x330   :  { %v12203_v19 = vld [vmem:[#allocation8 + $0x490] sm:$0xf]  ;;  %v12076_v6 = vor.u32 %v14794_v45, %v12075_v5  ;;  %v3495_v40 = vadd.f32 %v3494_v11, %v3475_v51  ;;  %v17176_v51 = vadd.f32 %v17120_v61, %v17135_v30 }
 0x331   :  { %v14826_v22 = vld [vmem:[#allocation8 + $0x4ac] sm:$0xf0]  ;;  %5232 = vmatpush.bf16.msra.mxu0 %v11820_v20 }
 0x332   :  { %v12204_v42 = vor.u32 %v14826_v22, %v12203_v19  ;;  %v12459_v8 = vld [vmem:[#allocation8 + $0x690] sm:$0xf]  ;;  %v17169_v20 = vadd.f32 %v3513_v48, %v3495_v40  ;;  %18018 = vst [vmem:[#allocation30_spill] sm:$0xff] %v17176_v51 }
 0x333   :  { %v14890_v25 = vld [vmem:[#allocation8 + $0x6ac] sm:$0xf0]  ;;  %5251 = vmatpush.bf16.msrb.mxu1 %v12076_v6 }
 0x334   :  { %v11787_v59 = vld [vmem:[#allocation8 + $0x150] sm:$0xf]  ;;  %v12460_v13 = vor.u32 %v14890_v25, %v12459_v8  ;;  %5274 = vmatpush.bf16.msra.mxu2 %v12204_v42  ;;  %5163 = vmatmul.bf16.vlgmr.msrb.gmra.mxu0 %v17033_v15 }
 0x335   :  { %v14722_v47 = vld [vmem:[#allocation8 + $0x16c] sm:$0xf0]  ;;  %v3477_v40 = vpop.f32.mrf.mxu0 }
 0x336   :  { %v12043_v16 = vld [vmem:[#allocation8 + $0x350] sm:$0xf]  ;;  %v11788_v1 = vor.u32 %v14722_v47, %v11787_v59  ;;  %5293 = vmatpush.bf16.msra.mxu3 %v12460_v13  ;;  %5182 = vmatmul.bf16.vlgmr.msra.gmra.mxu1 %v17035_v14 }
 0x337   :  { %v14786_v60 = vld [vmem:[#allocation8 + $0x36c] sm:$0xf0]  ;;  %5206 = vmatmul.bf16.gmra.mxu2 %v17031_v3 }
 0x338   :  { %v12171_v23 = vld [vmem:[#allocation8 + $0x450] sm:$0xf]  ;;  %v12044_v63 = vor.u32 %v14786_v60, %v12043_v16  ;;  %5233 = vmatpush.bf16.msra.mxu0 %v11788_v1  ;;  %5225 = vmatmul.bf16.gmra.mxu3 %v17039_v26 }
 0x339   :  { %v14818_v54 = vld [vmem:[#allocation8 + $0x46c] sm:$0xf0] }
 0x33a   :  { %v12427_v37 = vld [vmem:[#allocation8 + $0x650] sm:$0xf]  ;;  %v12172_v45 = vor.u32 %v14818_v54, %v12171_v23  ;;  %5252 = vmatpush.bf16.msrb.mxu1 %v12044_v63  ;;  %v3584_v23 = vpop.f32.mrf.mxu2  ;;  %v14862_v63 = vld [vmem:[#allocation8 + $0x5d4] sm:$0xf] }
 0x33b   :  { %v14882_v5 = vld [vmem:[#allocation8 + $0x66c] sm:$0xf0] }
 0x33c   :  { %v12428_v57 = vor.u32 %v14882_v5, %v12427_v37  ;;  %v11755_v19 = vld [vmem:[#allocation8 + $0x110] sm:$0xf]  ;;  %5275 = vmatpush.bf16.msra.mxu2 %v12172_v45  ;;  %v17178_v5 = vpop.f32.mrf.mxu3  ;;  %v12365_v45 = vld [vmem:[#allocation8 + $0x5f0] sm:$0xf0] }
 0x33d   :  { %v14714_v22 = vld [vmem:[#allocation8 + $0x12c] sm:$0xf0] }
 0x33e   :  { %v12011_v6 = vld [vmem:[#allocation8 + $0x310] sm:$0xf]  ;;  %v11756_v8 = vor.u32 %v14714_v22, %v11755_v19  ;;  %5294 = vmatpush.bf16.msra.mxu3 %v12428_v57  ;;  %v14926_v19 = vld [vmem:[#allocation8 + $0x7d4] sm:$0xf]  ;;  %v3496_v22 = vpop.f32.mrf.mxu1 }
 0x33f   :  { %v14778_v42 = vld [vmem:[#allocation8 + $0x32c] sm:$0xf0] }
 0x340   :  { %v12139_v25 = vld [vmem:[#allocation8 + $0x410] sm:$0xf]  ;;  %v12012_v13 = vor.u32 %v14778_v42, %v12011_v6  ;;  %5234 = vmatpush.bf16.msra.mxu0 %v11756_v8  ;;  %v12368_v42 = vor.u32 %v14862_v63, %v12365_v45 }
 0x341   :  { %v14810_v59 = vld [vmem:[#allocation8 + $0x42c] sm:$0xf0] }
 0x342   :  { %v12140_v47 = vor.u32 %v14810_v59, %v12139_v25  ;;  %v12395_v48 = vld [vmem:[#allocation8 + $0x610] sm:$0xf]  ;;  %v12621_v25 = vld [vmem:[#allocation8 + $0x7f0] sm:$0xf0]  ;;  %v3497_v59 = vadd.f32 %v3496_v22, %v3477_v40  ;;  %5253 = vmatpush.bf16.msrb.mxu1 %v12012_v13 }
 0x343   :  { %v14874_v16 = vld [vmem:[#allocation8 + $0x62c] sm:$0xf0]  ;;  %v12624_v30 = vor.u32 %v14926_v19, %v12621_v25  ;;  %v14846_v25 = vld [vmem:[#allocation8 + $0x554] sm:$0xf] }
 0x344   :  { %v11723_v60 = vld [vmem:[#allocation8 + $0xd0] sm:$0xf]  ;;  %v12396_v54 = vor.u32 %v14874_v16, %v12395_v48  ;;  %5276 = vmatpush.bf16.msra.mxu2 %v12140_v47  ;;  %v17181_v57 = vadd.f32 %v17164_v39, %v3497_v59  ;;  %v14918_v47 = vld [vmem:[#allocation8 + $0x794] sm:$0xf]  ;;  %v3586_v39 = vpop.f32.mrf.mxu2  ;;  %5168 = vmatmul.bf16.gmra.mxu0 %v17069_v32 }
 0x345   :  { %v14706_v37 = vld [vmem:[#allocation8 + $0xec] sm:$0xf0]  ;;  %v12301_v59 = vld [vmem:[#allocation8 + $0x570] sm:$0xf0] }
 0x346   :  { %v11979_v11 = vld [vmem:[#allocation8 + $0x2d0] sm:$0xf]  ;;  %v11724_v6 = vor.u32 %v14706_v37, %v11723_v60  ;;  %5295 = vmatpush.bf16.msra.mxu3 %v12396_v54  ;;  %v14854_v60 = vld [vmem:[#allocation8 + $0x594] sm:$0xf]  ;;  %v17185_v54 = vadd.f32 %v17132_v36, %v17146_v29  ;;  %v12304_v29 = vor.u32 %v14846_v25, %v12301_v59  ;;  %5187 = vmatmul.bf16.gmra.mxu1 %v17073_v38 }
 0x347   :  { %v14770_v1 = vld [vmem:[#allocation8 + $0x2ec] sm:$0xf0]  ;;  %v12333_v37 = vld [vmem:[#allocation8 + $0x5b0] sm:$0xf0]  ;;  %5277 = vmatmul.bf16.vlgmr.msra.gmra.mxu2 %v16999_v0 }
 0x348   :  { %v11980_v61 = vor.u32 %v14770_v1, %v11979_v11  ;;  %5345 = vmatpush.bf16.msrb.mxu2 %v12368_v42  ;;  %v11691_v48 = vld [vmem:[#allocation8 + $0x90] sm:$0xf]  ;;  %5235 = vmatpush.bf16.msra.mxu0 %v11724_v6  ;;  %v12336_v13 = vor.u32 %v14854_v60, %v12333_v37  ;;  %v12589_v11 = vld [vmem:[#allocation8 + $0x7b0] sm:$0xf0]  ;;  %18019 = vst [vmem:[#allocation25_spill] sm:$0xff] %v17185_v54  ;;  %v17187_v6 = vpop.f32.mrf.mxu3  ;;  %v3546_v42 = vpop.f32.mrf.mxu0 }
 0x349   :  { %v14698_v16 = vld [vmem:[#allocation8 + $0xac] sm:$0xf0]  ;;  %v12592_v63 = vor.u32 %v14918_v47, %v12589_v11  ;;  %v14902_v59 = vld [vmem:[#allocation8 + $0x714] sm:$0xf]  ;;  %5296 = vmatmul.bf16.vlgmr.msra.gmra.mxu3 %v17002_v18  ;;  %v12627_v54 = vld [vmem:[#allocation8 + $0x7d8] sm:$0xf] }
 0x34a   :  { %5364 = vmatpush.bf16.msrb.mxu3 %v12624_v30  ;;  %v11947_v51 = vld [vmem:[#allocation8 + $0x290] sm:$0xf]  ;;  %v11692_v28 = vor.u32 %v14698_v16, %v11691_v48  ;;  %5254 = vmatpush.bf16.msrb.mxu1 %v11980_v61  ;;  %v3565_v61 = vpop.f32.mrf.mxu1  ;;  %v12557_v48 = vld [vmem:[#allocation8 + $0x770] sm:$0xf0] }
 0x34b   :  { %v14762_v8 = vld [vmem:[#allocation8 + $0x2ac] sm:$0xf0]  ;;  %v3566_v16 = vadd.f32 %v3565_v61, %v3546_v42 }
 0x34c   :  { %v11948_v40 = vor.u32 %v14762_v8, %v11947_v51  ;;  %v11659_v1 = vld [vmem:[#allocation8 + $0x50] sm:$0xf]  ;;  %5346 = vmatpush.bf16.msrb.mxu2 %v12336_v13  ;;  %v14910_v51 = vld [vmem:[#allocation8 + $0x754] sm:$0xf]  ;;  %5236 = vmatpush.bf16.msra.mxu0 %v11692_v28  ;;  %v17197_v28 = vadd.f32 %v17143_v34, %v17158_v55  ;;  %v17199_v37 = vpop.f32.mrf.mxu2 }
 0x34d   :  { %v14690_v45 = vld [vmem:[#allocation8 + $0x6c] sm:$0xf0]  ;;  %v12560_v8 = vor.u32 %v14910_v51, %v12557_v48  ;;  %v17190_v60 = vadd.f32 %v3584_v23, %v3566_v16  ;;  %v12525_v51 = vld [vmem:[#allocation8 + $0x730] sm:$0xf0] }
 0x34e   :  { %v11915_v19 = vld [vmem:[#allocation8 + $0x250] sm:$0xf]  ;;  %5365 = vmatpush.bf16.msrb.mxu3 %v12592_v63  ;;  %v11660_v30 = vor.u32 %v14690_v45, %v11659_v1  ;;  %5255 = vmatpush.bf16.msrb.mxu1 %v11948_v40  ;;  %18020 = vst [vmem:[#allocation29_spill] sm:$0xff] %v17197_v28  ;;  %v14838_v45 = vld [vmem:[#allocation8 + $0x514] sm:$0xf]  ;;  %v12528_v61 = vor.u32 %v14902_v59, %v12525_v51 }
 0x34f   :  { %v14754_v22 = vld [vmem:[#allocation8 + $0x26c] sm:$0xf0]  ;;  %v14734_v34 = vld [vmem:[#allocation8 + $0x1d4] sm:$0xf] }
 0x350   :  { %v11916_v36 = vor.u32 %v14754_v22, %v11915_v19  ;;  %5237 = vmatpush.bf16.msra.mxu0 %v11660_v30  ;;  %5347 = vmatpush.bf16.msrb.mxu2 %v12304_v29  ;;  %v11627_v40 = vld [vmem:[#allocation8 + $0x10] sm:$0xf]  ;;  %v17201_v47 = vpop.f32.mrf.mxu3  ;;  %v3548_v11 = vpop.f32.mrf.mxu0  ;;  %v12269_v19 = vld [vmem:[#allocation8 + $0x530] sm:$0xf0] }
 0x351   :  { %v14682_v13 = vld [vmem:[#allocation8 + $0x2c] sm:$0xf0]  ;;  %v12272_v25 = vor.u32 %v14838_v45, %v12269_v19  ;;  %v11853_v30 = vld [vmem:[#allocation8 + $0x1f0] sm:$0xf0] }
 0x352   :  { %5256 = vmatpush.bf16.msrb.mxu1 %v11916_v36  ;;  %5366 = vmatpush.bf16.msrb.mxu3 %v12560_v8  ;;  %v11883_v23 = vld [vmem:[#allocation8 + $0x210] sm:$0xf]  ;;  %v11628_v1 = vor.u32 %v14682_v13, %v11627_v40  ;;  %v3567_v22 = vpop.f32.mrf.mxu1  ;;  %v14798_v48 = vld [vmem:[#allocation8 + $0x3d4] sm:$0xf]  ;;  %v11856_v36 = vor.u32 %v14734_v34, %v11853_v30 }
 0x353   :  { %v14746_v63 = vld [vmem:[#allocation8 + $0x22c] sm:$0xf0]  ;;  %v3568_v55 = vadd.f32 %v3567_v22, %v3548_v11  ;;  %v12109_v16 = vld [vmem:[#allocation8 + $0x3f0] sm:$0xf0] }
 0x354   :  { %v11884_v42 = vor.u32 %v14746_v63, %v11883_v23  ;;  %5238 = vmatpush.bf16.msra.mxu0 %v11628_v1  ;;  %5348 = vmatpush.bf16.msrb.mxu2 %v12272_v25  ;;  %v12112_v29 = vor.u32 %v14798_v48, %v12109_v16  ;;  %v14830_v8 = vld [vmem:[#allocation8 + $0x4d4] sm:$0xf]  ;;  %v17207_v1 = vadd.f32 %v17155_v56, %v17169_v20  ;;  %v17209_v45 = vpop.f32.mrf.mxu2 }
 0x355   :  { %v12237_v40 = vld [vmem:[#allocation8 + $0x4f0] sm:$0xf0]  ;;  %v17203_v28 = vadd.f32 %v3586_v39, %v3568_v55 }
 0x356   :  { %5257 = vmatpush.bf16.msrb.mxu1 %v11884_v42  ;;  %v14894_v13 = vld [vmem:[#allocation8 + $0x6d4] sm:$0xf]  ;;  %5367 = vmatpush.bf16.msrb.mxu3 %v12528_v61  ;;  %v12240_v23 = vor.u32 %v14830_v8, %v12237_v40  ;;  %18021 = vst [vmem:[#allocation37_spill] sm:$0xff] %v17207_v1  ;;  %v14867_v1 = vld [vmem:[#allocation8 + $0x5f4] sm:$0xf0] }
 0x357   :  { %v12493_v63 = vld [vmem:[#allocation8 + $0x6f0] sm:$0xf0]  ;;  %5239 = vmatmul.bf16.vlgmr.msra.gmra.mxu0 %v17033_v15  ;;  %5282 = vmatmul.bf16.gmra.mxu2 %v17031_v3 }
 0x358   :  { %5307 = vmatpush.bf16.msrb.mxu0 %v11856_v36  ;;  %v12496_v11 = vor.u32 %v14894_v13, %v12493_v63  ;;  %5349 = vmatpush.bf16.msrb.mxu2 %v12240_v23  ;;  %v14726_v19 = vld [vmem:[#allocation8 + $0x194] sm:$0xf]  ;;  %v17211_v25 = vpop.f32.mrf.mxu3  ;;  %v3551_v39 = vpop.f32.mrf.mxu0 }
 0x359   :  { %v11821_v22 = vld [vmem:[#allocation8 + $0x1b0] sm:$0xf0]  ;;  %5258 = vmatmul.bf16.vlgmr.msrb.gmra.mxu1 %v17035_v14  ;;  %5301 = vmatmul.bf16.gmra.mxu3 %v17039_v26 }
 0x35a   :  { %5326 = vmatpush.bf16.msra.mxu1 %v12112_v29  ;;  %v14790_v42 = vld [vmem:[#allocation8 + $0x394] sm:$0xf]  ;;  %5368 = vmatpush.bf16.msrb.mxu3 %v12496_v11  ;;  %v11824_v59 = vor.u32 %v14726_v19, %v11821_v22  ;;  %v3570_v61 = vpop.f32.mrf.mxu1 }
 0x35b   :  { %v12077_v51 = vld [vmem:[#allocation8 + $0x3b0] sm:$0xf0]  ;;  %v3571_v36 = vadd.f32 %v3570_v61, %v3551_v39 }
 0x35c   :  { %v14822_v34 = vld [vmem:[#allocation8 + $0x494] sm:$0xf]  ;;  %v12080_v30 = vor.u32 %v14790_v42, %v12077_v51  ;;  %5308 = vmatpush.bf16.msrb.mxu0 %v11824_v59 }
 0x35d   :  { %v12205_v55 = vld [vmem:[#allocation8 + $0x4b0] sm:$0xf0]  ;;  %v17215_v42 = vadd.f32 %v17199_v37, %v3571_v36 }
 0x35e   :  { %v12208_v48 = vor.u32 %v14822_v34, %v12205_v55  ;;  %v14886_v16 = vld [vmem:[#allocation8 + $0x694] sm:$0xf]  ;;  %5327 = vmatpush.bf16.msra.mxu1 %v12080_v30  ;;  %v17222_v34 = vadd.f32 %v17166_v7, %v17181_v57  ;;  %v17224_v55 = vpop.f32.mrf.mxu2 }
 0x35f   :  { %v12461_v56 = vld [vmem:[#allocation8 + $0x6b0] sm:$0xf0] }
 0x360   :  { %v14718_v20 = vld [vmem:[#allocation8 + $0x154] sm:$0xf]  ;;  %v12464_v29 = vor.u32 %v14886_v16, %v12461_v56  ;;  %5350 = vmatpush.bf16.msrb.mxu2 %v12208_v48  ;;  %18022 = vst [vmem:[#allocation38_spill] sm:$0xff] %v17222_v34  ;;  %v17226_v16 = vpop.f32.mrf.mxu3  ;;  %v3553_v56 = vpop.f32.mrf.mxu0 }
 0x361   :  { %v11789_v8 = vld [vmem:[#allocation8 + $0x170] sm:$0xf0] }
 0x362   :  { %v14782_v40 = vld [vmem:[#allocation8 + $0x354] sm:$0xf]  ;;  %v11792_v23 = vor.u32 %v14718_v20, %v11789_v8  ;;  %5369 = vmatpush.bf16.msrb.mxu3 %v12464_v29  ;;  %v3572_v29 = vpop.f32.mrf.mxu1 }
 0x363   :  { %v12045_v13 = vld [vmem:[#allocation8 + $0x370] sm:$0xf0] }
 0x364   :  { %v12048_v63 = vor.u32 %v14782_v40, %v12045_v13  ;;  %v14814_v11 = vld [vmem:[#allocation8 + $0x454] sm:$0xf]  ;;  %5309 = vmatpush.bf16.msrb.mxu0 %v11792_v23 }
 0x365   :  { %v12173_v19 = vld [vmem:[#allocation8 + $0x470] sm:$0xf0] }
 0x366   :  { %v14878_v22 = vld [vmem:[#allocation8 + $0x654] sm:$0xf]  ;;  %v12176_v59 = vor.u32 %v14814_v11, %v12173_v19  ;;  %5328 = vmatpush.bf16.msra.mxu1 %v12048_v63  ;;  %v3573_v11 = vadd.f32 %v3572_v29, %v3553_v56  ;;  %v17235_v56 = vpop.f32.mrf.mxu2 }
 0x367   :  { %v12429_v39 = vld [vmem:[#allocation8 + $0x670] sm:$0xf0]  ;;  %5244 = vmatmul.bf16.gmra.mxu0 %v17069_v32 }
 0x368   :  { %v12432_v51 = vor.u32 %v14878_v22, %v12429_v39  ;;  %v14710_v37 = vld [vmem:[#allocation8 + $0x114] sm:$0xf]  ;;  %5351 = vmatpush.bf16.msrb.mxu2 %v12176_v59  ;;  %v17229_v59 = vadd.f32 %v17209_v45, %v3573_v11  ;;  %v4936_v45 = vpop.f32.mrf.mxu0  ;;  %v14923_v11 = vld [vmem:[#allocation8 + $0x7b4] sm:$0xf0] }
 0x369   :  { %v11757_v61 = vld [vmem:[#allocation8 + $0x130] sm:$0xf0]  ;;  %5263 = vmatmul.bf16.gmra.mxu1 %v17073_v38 }
 0x36a   :  { %v14774_v30 = vld [vmem:[#allocation8 + $0x314] sm:$0xf]  ;;  %v11760_v20 = vor.u32 %v14710_v37, %v11757_v61  ;;  %5370 = vmatpush.bf16.msrb.mxu3 %v12432_v51  ;;  %v12371_v61 = vld [vmem:[#allocation8 + $0x5d8] sm:$0xf]  ;;  %v17233_v51 = vadd.f32 %v17178_v5, %v17190_v60 }
 0x36b   :  { %v12013_v36 = vld [vmem:[#allocation8 + $0x330] sm:$0xf0] }
 0x36c   :  { %v14806_v48 = vld [vmem:[#allocation8 + $0x414] sm:$0xf]  ;;  %v12016_v40 = vor.u32 %v14774_v30, %v12013_v36  ;;  %5310 = vmatpush.bf16.msrb.mxu0 %v11760_v20  ;;  %v12372_v30 = vor.u32 %v14867_v1, %v12371_v61  ;;  %v14931_v36 = vld [vmem:[#allocation8 + $0x7f4] sm:$0xf0] }
 0x36d   :  { %v12141_v8 = vld [vmem:[#allocation8 + $0x430] sm:$0xf0] }
 0x36e   :  { %v12144_v13 = vor.u32 %v14806_v48, %v12141_v8  ;;  %v14870_v23 = vld [vmem:[#allocation8 + $0x614] sm:$0xf]  ;;  %5329 = vmatpush.bf16.msra.mxu1 %v12016_v40  ;;  %v12628_v48 = vor.u32 %v14931_v36, %v12627_v54  ;;  %v17237_v40 = vpop.f32.mrf.mxu3  ;;  %v12339_v54 = vld [vmem:[#allocation8 + $0x598] sm:$0xf] }
 0x36f   :  { %v12397_v7 = vld [vmem:[#allocation8 + $0x630] sm:$0xf0] }
 0x370   :  { %v14702_v57 = vld [vmem:[#allocation8 + $0xd4] sm:$0xf]  ;;  %v12400_v63 = vor.u32 %v14870_v23, %v12397_v7  ;;  %5352 = vmatpush.bf16.msrb.mxu2 %v12144_v13  ;;  %v14859_v23 = vld [vmem:[#allocation8 + $0x5b4] sm:$0xf0]  ;;  %v4955_v7 = vpop.f32.mrf.mxu1 }
 0x371   :  { %v11725_v19 = vld [vmem:[#allocation8 + $0xf0] sm:$0xf0]  ;;  %v12340_v60 = vor.u32 %v14859_v23, %v12339_v54  ;;  %v17252_v23 = vpop.f32.mrf.mxu2 }
 0x372   :  { %v14766_v22 = vld [vmem:[#allocation8 + $0x2d4] sm:$0xf]  ;;  %v11728_v34 = vor.u32 %v14702_v57, %v11725_v19  ;;  %5371 = vmatpush.bf16.msrb.mxu3 %v12400_v63  ;;  %v12595_v57 = vld [vmem:[#allocation8 + $0x798] sm:$0xf] }
 0x373   :  { %v11981_v39 = vld [vmem:[#allocation8 + $0x2f0] sm:$0xf0]  ;;  %v12596_v19 = vor.u32 %v14923_v11, %v12595_v57  ;;  %5353 = vmatmul.bf16.vlgmr.msrb.gmra.mxu2 %v16999_v0 }
 0x374   :  { %v11984_v37 = vor.u32 %v14766_v22, %v11981_v39  ;;  %5311 = vmatpush.bf16.msrb.mxu0 %v11728_v34  ;;  %5421 = vmatpush.bf16.msra.mxu2 %v12372_v30  ;;  %v14694_v20 = vld [vmem:[#allocation8 + $0x94] sm:$0xf]  ;;  %v4937_v34 = vadd.f32 %v4936_v45, %v16869_v53  ;;  %v12563_v53 = vld [vmem:[#allocation8 + $0x758] sm:$0xf] }
 0x375   :  { %v11693_v8 = vld [vmem:[#allocation8 + $0xb0] sm:$0xf0]  ;;  %5372 = vmatmul.bf16.vlgmr.msrb.gmra.mxu3 %v17002_v18 }
 0x376   :  { %5330 = vmatpush.bf16.msra.mxu1 %v11984_v37  ;;  %v14758_v29 = vld [vmem:[#allocation8 + $0x294] sm:$0xf]  ;;  %5440 = vmatpush.bf16.msra.mxu3 %v12628_v48  ;;  %v11696_v1 = vor.u32 %v14694_v20, %v11693_v8  ;;  %v4956_v61 = vadd.f32 %v4955_v7, %v4937_v34  ;;  %v12307_v48 = vld [vmem:[#allocation8 + $0x558] sm:$0xf] }
 0x377   :  { %v11949_v13 = vld [vmem:[#allocation8 + $0x2b0] sm:$0xf0]  ;;  %v14851_v20 = vld [vmem:[#allocation8 + $0x574] sm:$0xf0] }
 0x378   :  { %v11952_v5 = vor.u32 %v14758_v29, %v11949_v13  ;;  %v14686_v63 = vld [vmem:[#allocation8 + $0x54] sm:$0xf]  ;;  %5312 = vmatpush.bf16.msrb.mxu0 %v11696_v1  ;;  %v14915_v8 = vld [vmem:[#allocation8 + $0x774] sm:$0xf0]  ;;  %v4975_v29 = vadd.f32 %v17224_v55, %v4956_v61  ;;  %5422 = vmatpush.bf16.msra.mxu2 %v12340_v60  ;;  %v12308_v45 = vor.u32 %v14851_v20, %v12307_v48  ;;  %v4938_v60 = vpop.f32.mrf.mxu0 }
 0x379   :  { %v11661_v22 = vld [vmem:[#allocation8 + $0x70] sm:$0xf0]  ;;  %v12564_v1 = vor.u32 %v14915_v8, %v12563_v53  ;;  %v17247_v13 = vadd.f32 %v17187_v6, %v17203_v28  ;;  %v4957_v6 = vpop.f32.mrf.mxu1  ;;  %v11859_v61 = vld [vmem:[#allocation8 + $0x1d8] sm:$0xf] }
 0x37a   :  { %v14750_v39 = vld [vmem:[#allocation8 + $0x254] sm:$0xf]  ;;  %5331 = vmatpush.bf16.msra.mxu1 %v11952_v5  ;;  %v11664_v30 = vor.u32 %v14686_v63, %v11661_v22  ;;  %5441 = vmatpush.bf16.msra.mxu3 %v12596_v19  ;;  %v17250_v54 = vadd.f32 %v17226_v16, %v4975_v29  ;;  %v17254_v5 = vpop.f32.mrf.mxu3  ;;  %v12275_v63 = vld [vmem:[#allocation8 + $0x518] sm:$0xf]  ;;  %v4939_v22 = vadd.f32 %v4938_v60, %v16884_v4 }
 0x37b   :  { %v11917_v37 = vld [vmem:[#allocation8 + $0x270] sm:$0xf0]  ;;  %v14843_v19 = vld [vmem:[#allocation8 + $0x534] sm:$0xf0] }
 0x37c   :  { %v11920_v36 = vor.u32 %v14750_v39, %v11917_v37  ;;  %5313 = vmatpush.bf16.msrb.mxu0 %v11664_v30  ;;  %v14678_v34 = vld [vmem:[#allocation8 + $0x14] sm:$0xf]  ;;  %5423 = vmatpush.bf16.msra.mxu2 %v12308_v45  ;;  %v12276_v16 = vor.u32 %v14843_v19, %v12275_v63  ;;  %v12531_v39 = vld [vmem:[#allocation8 + $0x718] sm:$0xf]  ;;  %v4958_v53 = vadd.f32 %v4957_v6, %v4939_v22  ;;  %v17265_v63 = vpop.f32.mrf.mxu2 }
 0x37d   :  { %v11629_v7 = vld [vmem:[#allocation8 + $0x30] sm:$0xf0]  ;;  %v14907_v37 = vld [vmem:[#allocation8 + $0x734] sm:$0xf0] }
 0x37e   :  { %5332 = vmatpush.bf16.msra.mxu1 %v11920_v36  ;;  %v14742_v55 = vld [vmem:[#allocation8 + $0x214] sm:$0xf]  ;;  %v11632_v57 = vor.u32 %v14678_v34, %v11629_v7  ;;  %5442 = vmatpush.bf16.msra.mxu3 %v12564_v1  ;;  %v12532_v30 = vor.u32 %v14907_v37, %v12531_v39  ;;  %v14739_v36 = vld [vmem:[#allocation8 + $0x1f4] sm:$0xf0]  ;;  %v4977_v45 = vadd.f32 %v17235_v56, %v4958_v53 }
 0x37f   :  { %v11885_v11 = vld [vmem:[#allocation8 + $0x230] sm:$0xf0]  ;;  %v12115_v48 = vld [vmem:[#allocation8 + $0x3d8] sm:$0xf]  ;;  %v11860_v8 = vor.u32 %v14739_v36, %v11859_v61 }
 0x380   :  { %v11888_v28 = vor.u32 %v14742_v55, %v11885_v11  ;;  %5314 = vmatpush.bf16.msrb.mxu0 %v11632_v57  ;;  %v14803_v20 = vld [vmem:[#allocation8 + $0x3f4] sm:$0xf0]  ;;  %5424 = vmatpush.bf16.msra.mxu2 %v12276_v16  ;;  %v17260_v57 = vadd.f32 %v17201_v47, %v17215_v42  ;;  %v17263_v11 = vadd.f32 %v17237_v40, %v4977_v45  ;;  %v4941_v56 = vpop.f32.mrf.mxu0 }
 0x381   :  { %v12116_v29 = vor.u32 %v14803_v20, %v12115_v48  ;;  %v12243_v34 = vld [vmem:[#allocation8 + $0x4d8] sm:$0xf]  ;;  %v4960_v36 = vpop.f32.mrf.mxu1 }
 0x382   :  { %5333 = vmatpush.bf16.msra.mxu1 %v11888_v28  ;;  %v14835_v7 = vld [vmem:[#allocation8 + $0x4f4] sm:$0xf0]  ;;  %5443 = vmatpush.bf16.msra.mxu3 %v12532_v30  ;;  %v17267_v28 = vpop.f32.mrf.mxu3  ;;  %v4942_v30 = vadd.f32 %v4941_v56, %v16895_v17  ;;  %v17277_v56 = vadd.f32 %v17211_v25, %v17229_v59 }
 0x383   :  { %v12499_v4 = vld [vmem:[#allocation8 + $0x6d8] sm:$0xf]  ;;  %v12244_v55 = vor.u32 %v14835_v7, %v12243_v34  ;;  %5315 = vmatmul.bf16.vlgmr.msrb.gmra.mxu0 %v17033_v15  ;;  %5358 = vmatmul.bf16.gmra.mxu2 %v17031_v3 }
 0x384   :  { %v14899_v60 = vld [vmem:[#allocation8 + $0x6f4] sm:$0xf0]  ;;  %5383 = vmatpush.bf16.msra.mxu0 %v11860_v8  ;;  %v4961_v7 = vadd.f32 %v4960_v36, %v4942_v30 }
 0x385   :  { %v12500_v1 = vor.u32 %v14899_v60, %v12499_v4  ;;  %v11827_v19 = vld [vmem:[#allocation8 + $0x198] sm:$0xf]  ;;  %5425 = vmatpush.bf16.msra.mxu2 %v12244_v55  ;;  %5334 = vmatmul.bf16.vlgmr.msra.gmra.mxu1 %v17035_v14 }
 0x386   :  { %5402 = vmatpush.bf16.msrb.mxu1 %v12116_v29  ;;  %v14731_v22 = vld [vmem:[#allocation8 + $0x1b4] sm:$0xf0]  ;;  %5377 = vmatmul.bf16.gmra.mxu3 %v17039_v26 }
 0x387   :  { %v12083_v6 = vld [vmem:[#allocation8 + $0x398] sm:$0xf]  ;;  %v11828_v16 = vor.u32 %v14731_v22, %v11827_v19  ;;  %5444 = vmatpush.bf16.msra.mxu3 %v12500_v1  ;;  %v4980_v1 = vadd.f32 %v17252_v23, %v4961_v7 }
 0x388   :  { %v14795_v39 = vld [vmem:[#allocation8 + $0x3b4] sm:$0xf0]  ;;  %v4943_v36 = vpop.f32.mrf.mxu0 }
 0x389   :  { %v12211_v37 = vld [vmem:[#allocation8 + $0x498] sm:$0xf]  ;;  %v12084_v47 = vor.u32 %v14795_v39, %v12083_v6  ;;  %5384 = vmatpush.bf16.msra.mxu0 %v11828_v16  ;;  %v17280_v16 = vadd.f32 %v17254_v5, %v4980_v1  ;;  %v17282_v39 = vpop.f32.mrf.mxu2  ;;  %v4962_v25 = vpop.f32.mrf.mxu1  ;;  %v12373_v1 = vld [vmem:[#allocation8 + $0x5f8] sm:$0xf0] }
 0x38a   :  { %v14827_v61 = vld [vmem:[#allocation8 + $0x4b4] sm:$0xf0]  ;;  %v17284_v30 = vpop.f32.mrf.mxu3 }
 0x38b   :  { %v12212_v42 = vor.u32 %v14827_v61, %v12211_v37  ;;  %v12467_v40 = vld [vmem:[#allocation8 + $0x698] sm:$0xf]  ;;  %5403 = vmatpush.bf16.msrb.mxu1 %v12084_v47 }
 0x38c   :  { %v14891_v48 = vld [vmem:[#allocation8 + $0x6b4] sm:$0xf0] }
 0x38d   :  { %v11795_v20 = vld [vmem:[#allocation8 + $0x158] sm:$0xf]  ;;  %v12468_v53 = vor.u32 %v14891_v48, %v12467_v40  ;;  %5426 = vmatpush.bf16.msra.mxu2 %v12212_v42 }
 0x38e   :  { %v14723_v8 = vld [vmem:[#allocation8 + $0x174] sm:$0xf0] }
 0x38f   :  { %v12051_v29 = vld [vmem:[#allocation8 + $0x358] sm:$0xf]  ;;  %v11796_v4 = vor.u32 %v14723_v8, %v11795_v20  ;;  %5445 = vmatpush.bf16.msra.mxu3 %v12468_v53  ;;  %v4944_v20 = vadd.f32 %v4943_v36, %v16910_v52  ;;  %v14927_v52 = vld [vmem:[#allocation8 + $0x7dc] sm:$0xf] }
 0x390   :  { %v14787_v34 = vld [vmem:[#allocation8 + $0x374] sm:$0xf0] }
 0x391   :  { %v12052_v60 = vor.u32 %v14787_v34, %v12051_v29  ;;  %v12179_v17 = vld [vmem:[#allocation8 + $0x458] sm:$0xf]  ;;  %5385 = vmatpush.bf16.msra.mxu0 %v11796_v4  ;;  %v17291_v36 = vpop.f32.mrf.mxu2 }
 0x392   :  { %v14819_v45 = vld [vmem:[#allocation8 + $0x474] sm:$0xf0] }
 0x393   :  { %v12435_v55 = vld [vmem:[#allocation8 + $0x658] sm:$0xf]  ;;  %v12180_v22 = vor.u32 %v14819_v45, %v12179_v17  ;;  %5404 = vmatpush.bf16.msrb.mxu1 %v12052_v60  ;;  %v4963_v17 = vadd.f32 %v4962_v25, %v4944_v20  ;;  %v5012_v20 = vpop.f32.mrf.mxu0  ;;  %5320 = vmatmul.bf16.gmra.mxu0 %v17069_v32 }
 0x394   :  { %v14883_v19 = vld [vmem:[#allocation8 + $0x674] sm:$0xf0] }
 0x395   :  { %v12436_v6 = vor.u32 %v14883_v19, %v12435_v55  ;;  %v11763_v37 = vld [vmem:[#allocation8 + $0x118] sm:$0xf]  ;;  %5427 = vmatpush.bf16.msra.mxu2 %v12180_v22  ;;  %v14863_v19 = vld [vmem:[#allocation8 + $0x5dc] sm:$0xf]  ;;  %5339 = vmatmul.bf16.gmra.mxu1 %v17073_v38 }
 0x396   :  { %v14715_v61 = vld [vmem:[#allocation8 + $0x134] sm:$0xf0]  ;;  %v12629_v22 = vld [vmem:[#allocation8 + $0x7f8] sm:$0xf0] }
 0x397   :  { %v12019_v23 = vld [vmem:[#allocation8 + $0x318] sm:$0xf]  ;;  %v11764_v47 = vor.u32 %v14715_v61, %v11763_v37  ;;  %5446 = vmatpush.bf16.msra.mxu3 %v12436_v6  ;;  %v12376_v37 = vor.u32 %v14863_v19, %v12373_v1  ;;  %v4982_v61 = vadd.f32 %v17265_v63, %v4963_v17 }
 0x398   :  { %v14779_v42 = vld [vmem:[#allocation8 + $0x334] sm:$0xf0] }
 0x399   :  { %v12147_v40 = vld [vmem:[#allocation8 + $0x418] sm:$0xf]  ;;  %v12020_v59 = vor.u32 %v14779_v42, %v12019_v23  ;;  %5386 = vmatpush.bf16.msra.mxu0 %v11764_v47  ;;  %v12632_v23 = vor.u32 %v14927_v52, %v12629_v22  ;;  %v17289_v6 = vadd.f32 %v17267_v28, %v4982_v61  ;;  %v12309_v22 = vld [vmem:[#allocation8 + $0x578] sm:$0xf0] }
 0x39a   :  { %v14811_v48 = vld [vmem:[#allocation8 + $0x434] sm:$0xf0]  ;;  %v12565_v61 = vld [vmem:[#allocation8 + $0x778] sm:$0xf0] }
 0x39b   :  { %v12148_v5 = vor.u32 %v14811_v48, %v12147_v40  ;;  %v12403_v53 = vld [vmem:[#allocation8 + $0x618] sm:$0xf]  ;;  %5405 = vmatpush.bf16.msrb.mxu1 %v12020_v59  ;;  %v17293_v48 = vpop.f32.mrf.mxu3  ;;  %v14855_v59 = vld [vmem:[#allocation8 + $0x59c] sm:$0xf] }
 0x39c   :  { %v14875_v8 = vld [vmem:[#allocation8 + $0x634] sm:$0xf0] }
 0x39d   :  { %v11731_v29 = vld [vmem:[#allocation8 + $0xd8] sm:$0xf]  ;;  %v12404_v34 = vor.u32 %v14875_v8, %v12403_v53  ;;  %5428 = vmatpush.bf16.msra.mxu2 %v12148_v5  ;;  %v12341_v5 = vld [vmem:[#allocation8 + $0x5b8] sm:$0xf0]  ;;  %v5013_v53 = vadd.f32 %v5012_v20, %v16921_v21  ;;  %v5031_v8 = vpop.f32.mrf.mxu1  ;;  %v17304_v20 = vpop.f32.mrf.mxu2 }
 0x39e   :  { %v14707_v7 = vld [vmem:[#allocation8 + $0xf4] sm:$0xf0]  ;;  %v14911_v21 = vld [vmem:[#allocation8 + $0x75c] sm:$0xf] }
 0x39f   :  { %v11987_v4 = vld [vmem:[#allocation8 + $0x2d8] sm:$0xf]  ;;  %v11732_v45 = vor.u32 %v14707_v7, %v11731_v29  ;;  %5447 = vmatpush.bf16.msra.mxu3 %v12404_v34  ;;  %v12344_v29 = vor.u32 %v14855_v59, %v12341_v5  ;;  %v14919_v34 = vld [vmem:[#allocation8 + $0x79c] sm:$0xf]  ;;  %v5032_v19 = vadd.f32 %v5031_v8, %v5013_v53  ;;  %v5014_v53 = vpop.f32.mrf.mxu0 }
 0x3a0   :  { %v14771_v60 = vld [vmem:[#allocation8 + $0x2f4] sm:$0xf0]  ;;  %v12597_v7 = vld [vmem:[#allocation8 + $0x7b8] sm:$0xf0]  ;;  %5429 = vmatmul.bf16.vlgmr.msra.gmra.mxu2 %v16999_v0 }
 0x3a1   :  { %v11988_v55 = vor.u32 %v14771_v60, %v11987_v4  ;;  %5387 = vmatpush.bf16.msra.mxu0 %v11732_v45  ;;  %5497 = vmatpush.bf16.msrb.mxu2 %v12376_v37  ;;  %v11699_v47 = vld [vmem:[#allocation8 + $0x98] sm:$0xf]  ;;  %v12600_v60 = vor.u32 %v14919_v34, %v12597_v7  ;;  %v14847_v37 = vld [vmem:[#allocation8 + $0x55c] sm:$0xf]  ;;  %v5015_v34 = vadd.f32 %v5014_v53, %v16936_v2 }
 0x3a2   :  { %v14699_v42 = vld [vmem:[#allocation8 + $0xb4] sm:$0xf0]  ;;  %v14895_v2 = vld [vmem:[#allocation8 + $0x6dc] sm:$0xf]  ;;  %5448 = vmatmul.bf16.vlgmr.msra.gmra.mxu3 %v17002_v18 }
 0x3a3   :  { %5406 = vmatpush.bf16.msrb.mxu1 %v11988_v55  ;;  %v11955_v40 = vld [vmem:[#allocation8 + $0x298] sm:$0xf]  ;;  %5516 = vmatpush.bf16.msrb.mxu3 %v12632_v23  ;;  %v11700_v25 = vor.u32 %v14699_v42, %v11699_v47  ;;  %v5051_v23 = vadd.f32 %v17282_v39, %v5032_v19  ;;  %v12312_v47 = vor.u32 %v14847_v37, %v12309_v22  ;;  %v17306_v5 = vpop.f32.mrf.mxu3  ;;  %v11861_v19 = vld [vmem:[#allocation8 + $0x1f8] sm:$0xf0] }
 0x3a4   :  { %v14763_v63 = vld [vmem:[#allocation8 + $0x2b4] sm:$0xf0]  ;;  %v12568_v42 = vor.u32 %v14911_v21, %v12565_v61  ;;  %v14831_v61 = vld [vmem:[#allocation8 + $0x4dc] sm:$0xf] }
 0x3a5   :  { %v11956_v28 = vor.u32 %v14763_v63, %v11955_v40  ;;  %v11667_v4 = vld [vmem:[#allocation8 + $0x58] sm:$0xf]  ;;  %5388 = vmatpush.bf16.msra.mxu0 %v11700_v25  ;;  %5498 = vmatpush.bf16.msrb.mxu2 %v12344_v29  ;;  %v17302_v40 = vadd.f32 %v17284_v30, %v5051_v23  ;;  %v12277_v29 = vld [vmem:[#allocation8 + $0x538] sm:$0xf0]  ;;  %v5033_v7 = vpop.f32.mrf.mxu1  ;;  %v17313_v53 = vpop.f32.mrf.mxu2 }
 0x3a6   :  { %v14691_v17 = vld [vmem:[#allocation8 + $0x74] sm:$0xf0]  ;;  %v5034_v37 = vadd.f32 %v5033_v7, %v5015_v34  ;;  %v12245_v23 = vld [vmem:[#allocation8 + $0x4f8] sm:$0xf0] }
 0x3a7   :  { %v11923_v45 = vld [vmem:[#allocation8 + $0x258] sm:$0xf]  ;;  %5407 = vmatpush.bf16.msrb.mxu1 %v11956_v28  ;;  %v11668_v1 = vor.u32 %v14691_v17, %v11667_v4  ;;  %5517 = vmatpush.bf16.msrb.mxu3 %v12600_v60  ;;  %v14839_v28 = vld [vmem:[#allocation8 + $0x51c] sm:$0xf]  ;;  %v5017_v34 = vpop.f32.mrf.mxu0 }
 0x3a8   :  { %v14755_v55 = vld [vmem:[#allocation8 + $0x274] sm:$0xf0]  ;;  %v12280_v30 = vor.u32 %v14839_v28, %v12277_v29  ;;  %v14903_v60 = vld [vmem:[#allocation8 + $0x71c] sm:$0xf] }
 0x3a9   :  { %v11924_v52 = vor.u32 %v14755_v55, %v11923_v45  ;;  %5389 = vmatpush.bf16.msra.mxu0 %v11668_v1  ;;  %v11635_v25 = vld [vmem:[#allocation8 + $0x18] sm:$0xf]  ;;  %5499 = vmatpush.bf16.msrb.mxu2 %v12312_v47  ;;  %v12533_v17 = vld [vmem:[#allocation8 + $0x738] sm:$0xf0]  ;;  %v5053_v47 = vadd.f32 %v17291_v36, %v5034_v37 }
 0x3aa   :  { %v14683_v63 = vld [vmem:[#allocation8 + $0x34] sm:$0xf0]  ;;  %v14735_v45 = vld [vmem:[#allocation8 + $0x1dc] sm:$0xf]  ;;  %v12536_v55 = vor.u32 %v14903_v60, %v12533_v17  ;;  %v5018_v60 = vadd.f32 %v5017_v34, %v16947_v9 }
 0x3ab   :  { %5408 = vmatpush.bf16.msrb.mxu1 %v11924_v52  ;;  %v11891_v59 = vld [vmem:[#allocation8 + $0x218] sm:$0xf]  ;;  %v11636_v39 = vor.u32 %v14683_v63, %v11635_v25  ;;  %5518 = vmatpush.bf16.msrb.mxu3 %v12568_v42  ;;  %v14799_v1 = vld [vmem:[#allocation8 + $0x3dc] sm:$0xf]  ;;  %v11864_v22 = vor.u32 %v14735_v45, %v11861_v19  ;;  %v12248_v63 = vor.u32 %v14831_v61, %v12245_v23  ;;  %v17315_v29 = vpop.f32.mrf.mxu3 }
 0x3ac   :  { %v14747_v8 = vld [vmem:[#allocation8 + $0x234] sm:$0xf0]  ;;  %v12117_v52 = vld [vmem:[#allocation8 + $0x3f8] sm:$0xf0] }
 0x3ad   :  { %v11892_v4 = vor.u32 %v14747_v8, %v11891_v59  ;;  %5390 = vmatpush.bf16.msra.mxu0 %v11636_v39  ;;  %v12120_v21 = vor.u32 %v14799_v1, %v12117_v52  ;;  %v12501_v25 = vld [vmem:[#allocation8 + $0x6f8] sm:$0xf0]  ;;  %5500 = vmatpush.bf16.msrb.mxu2 %v12280_v30  ;;  %v17311_v59 = vadd.f32 %v17293_v48, %v5053_v47  ;;  %v5036_v17 = vpop.f32.mrf.mxu1  ;;  %v17326_v34 = vpop.f32.mrf.mxu2 }
 0x3ae   :  { %v12504_v42 = vor.u32 %v14895_v2, %v12501_v25  ;;  %v14727_v39 = vld [vmem:[#allocation8 + $0x19c] sm:$0xf]  ;;  %v5037_v61 = vadd.f32 %v5036_v17, %v5018_v60 }
 0x3af   :  { %5409 = vmatpush.bf16.msrb.mxu1 %v11892_v4  ;;  %5519 = vmatpush.bf16.msrb.mxu3 %v12536_v55  ;;  %v11829_v8 = vld [vmem:[#allocation8 + $0x1b8] sm:$0xf0]  ;;  %v5019_v60 = vpop.f32.mrf.mxu0 }
 0x3b0   :  { %v14791_v28 = vld [vmem:[#allocation8 + $0x39c] sm:$0xf]  ;;  %v11832_v7 = vor.u32 %v14727_v39, %v11829_v8  ;;  %5391 = vmatmul.bf16.vlgmr.msra.gmra.mxu0 %v17033_v15  ;;  %5434 = vmatmul.bf16.gmra.mxu2 %v17031_v3 }
 0x3b1   :  { %5459 = vmatpush.bf16.msrb.mxu0 %v11864_v22  ;;  %v12085_v4 = vld [vmem:[#allocation8 + $0x3b8] sm:$0xf0]  ;;  %5501 = vmatpush.bf16.msrb.mxu2 %v12248_v63 }
 0x3b2   :  { %v14823_v36 = vld [vmem:[#allocation8 + $0x49c] sm:$0xf]  ;;  %v12088_v45 = vor.u32 %v14791_v28, %v12085_v4  ;;  %5410 = vmatmul.bf16.vlgmr.msrb.gmra.mxu1 %v17035_v14  ;;  %5453 = vmatmul.bf16.gmra.mxu3 %v17039_v26 }
 0x3b3   :  { %5478 = vmatpush.bf16.msra.mxu1 %v12120_v21  ;;  %v12213_v30 = vld [vmem:[#allocation8 + $0x4b8] sm:$0xf0]  ;;  %5520 = vmatpush.bf16.msrb.mxu3 %v12504_v42  ;;  %v5056_v42 = vadd.f32 %v17304_v20, %v5037_v61 }
 0x3b4   :  { %v12216_v55 = vor.u32 %v14823_v36, %v12213_v30  ;;  %v14887_v48 = vld [vmem:[#allocation8 + $0x69c] sm:$0xf]  ;;  %v17328_v30 = vpop.f32.mrf.mxu3 }
 0x3b5   :  { %v12469_v19 = vld [vmem:[#allocation8 + $0x6b8] sm:$0xf0]  ;;  %5460 = vmatpush.bf16.msrb.mxu0 %v11832_v7  ;;  %v17324_v28 = vadd.f32 %v17306_v5, %v5056_v42  ;;  %v15388_v42 = vld [vmem:[#allocation8 + $0x15dc] sm:$0xf0] }
 0x3b6   :  { %v14719_v1 = vld [vmem:[#allocation8 + $0x15c] sm:$0xf]  ;;  %v12472_v52 = vor.u32 %v14887_v48, %v12469_v19  ;;  %5502 = vmatpush.bf16.msrb.mxu2 %v12216_v55  ;;  %v5020_v48 = vadd.f32 %v5019_v60, %v16960_v24  ;;  %v5038_v19 = vpop.f32.mrf.mxu1  ;;  %v13659_v24 = vld [vmem:[#allocation8 + $0x17c0] sm:$0xf]  ;;  %v17335_v60 = vpop.f32.mrf.mxu2 }
 0x3b7   :  { %v11797_v37 = vld [vmem:[#allocation8 + $0x178] sm:$0xf0]  ;;  %5479 = vmatpush.bf16.msra.mxu1 %v12088_v45 }
 0x3b8   :  { %v14783_v22 = vld [vmem:[#allocation8 + $0x35c] sm:$0xf]  ;;  %v11800_v23 = vor.u32 %v14719_v1, %v11797_v37  ;;  %5521 = vmatpush.bf16.msrb.mxu3 %v12472_v52 }
 0x3b9   :  { %v12053_v21 = vld [vmem:[#allocation8 + $0x378] sm:$0xf0] }
 0x3ba   :  { %v12056_v2 = vor.u32 %v14783_v22, %v12053_v21  ;;  %v14815_v9 = vld [vmem:[#allocation8 + $0x45c] sm:$0xf]  ;;  %5461 = vmatpush.bf16.msrb.mxu0 %v11800_v23 }
 0x3bb   :  { %v12181_v25 = vld [vmem:[#allocation8 + $0x478] sm:$0xf0] }
 0x3bc   :  { %v14879_v47 = vld [vmem:[#allocation8 + $0x65c] sm:$0xf]  ;;  %v12184_v39 = vor.u32 %v14815_v9, %v12181_v25  ;;  %5480 = vmatpush.bf16.msra.mxu1 %v12056_v2  ;;  %v5039_v9 = vadd.f32 %v5038_v19, %v5020_v48  ;;  %v5088_v48 = vpop.f32.mrf.mxu0 }
 0x3bd   :  { %v12437_v63 = vld [vmem:[#allocation8 + $0x678] sm:$0xf0] }
 0x3be   :  { %v12440_v8 = vor.u32 %v14879_v47, %v12437_v63  ;;  %v14711_v7 = vld [vmem:[#allocation8 + $0x11c] sm:$0xf]  ;;  %5503 = vmatpush.bf16.msrb.mxu2 %v12184_v39  ;;  %v13403_v63 = vld [vmem:[#allocation8 + $0x15c0] sm:$0xf] }
 0x3bf   :  { %v11765_v4 = vld [vmem:[#allocation8 + $0x138] sm:$0xf0]  ;;  %v15452_v39 = vld [vmem:[#allocation8 + $0x17dc] sm:$0xf0] }
 0x3c0   :  { %v14775_v36 = vld [vmem:[#allocation8 + $0x31c] sm:$0xf]  ;;  %v11768_v20 = vor.u32 %v14711_v7, %v11765_v4  ;;  %5522 = vmatpush.bf16.msrb.mxu3 %v12440_v8  ;;  %v13404_v7 = vor.u32 %v15388_v42, %v13403_v63  ;;  %v5058_v4 = vadd.f32 %v17313_v53, %v5039_v9  ;;  %5396 = vmatmul.bf16.gmra.mxu0 %v17069_v32 }
 0x3c1   :  { %v12021_v17 = vld [vmem:[#allocation8 + $0x338] sm:$0xf0] }
 0x3c2   :  { %v14807_v45 = vld [vmem:[#allocation8 + $0x41c] sm:$0xf]  ;;  %v12024_v1 = vor.u32 %v14775_v36, %v12021_v17  ;;  %5462 = vmatpush.bf16.msrb.mxu0 %v11768_v20  ;;  %v13660_v36 = vor.u32 %v15452_v39, %v13659_v24  ;;  %v17333_v8 = vadd.f32 %v17315_v29, %v5058_v4  ;;  %v15372_v39 = vld [vmem:[#allocation8 + $0x155c] sm:$0xf0]  ;;  %5415 = vmatmul.bf16.gmra.mxu1 %v17073_v38 }
 0x3c3   :  { %v12149_v55 = vld [vmem:[#allocation8 + $0x438] sm:$0xf0]  ;;  %v15436_v4 = vld [vmem:[#allocation8 + $0x175c] sm:$0xf0] }
 0x3c4   :  { %v12152_v5 = vor.u32 %v14807_v45, %v12149_v55  ;;  %v14871_v52 = vld [vmem:[#allocation8 + $0x61c] sm:$0xf]  ;;  %5481 = vmatpush.bf16.msra.mxu1 %v12024_v1  ;;  %v17337_v55 = vpop.f32.mrf.mxu3  ;;  %v13371_v1 = vld [vmem:[#allocation8 + $0x1580] sm:$0xf] }
 0x3c5   :  { %v12405_v37 = vld [vmem:[#allocation8 + $0x638] sm:$0xf0] }
 0x3c6   :  { %v14703_v22 = vld [vmem:[#allocation8 + $0xdc] sm:$0xf]  ;;  %v12408_v21 = vor.u32 %v14871_v52, %v12405_v37  ;;  %5504 = vmatpush.bf16.msrb.mxu2 %v12152_v5  ;;  %v15380_v5 = vld [vmem:[#allocation8 + $0x159c] sm:$0xf0]  ;;  %v5089_v52 = vadd.f32 %v5088_v48, %v16968_v41  ;;  %v5107_v37 = vpop.f32.mrf.mxu1  ;;  %v17348_v48 = vpop.f32.mrf.mxu2 }
 0x3c7   :  { %v11733_v61 = vld [vmem:[#allocation8 + $0xf8] sm:$0xf0]  ;;  %v13595_v41 = vld [vmem:[#allocation8 + $0x1740] sm:$0xf] }
 0x3c8   :  { %v14767_v23 = vld [vmem:[#allocation8 + $0x2dc] sm:$0xf]  ;;  %v11736_v25 = vor.u32 %v14703_v22, %v11733_v61  ;;  %5523 = vmatpush.bf16.msrb.mxu3 %v12408_v21  ;;  %v13372_v22 = vor.u32 %v15380_v5, %v13371_v1  ;;  %v13627_v21 = vld [vmem:[#allocation8 + $0x1780] sm:$0xf]  ;;  %v5108_v63 = vadd.f32 %v5107_v37, %v5089_v52  ;;  %v5090_v52 = vpop.f32.mrf.mxu0 }
 0x3c9   :  { %v11989_v2 = vld [vmem:[#allocation8 + $0x2f8] sm:$0xf0]  ;;  %v15444_v61 = vld [vmem:[#allocation8 + $0x179c] sm:$0xf0]  ;;  %5505 = vmatmul.bf16.vlgmr.msrb.gmra.mxu2 %v16999_v0 }
 0x3ca   :  { %v11992_v47 = vor.u32 %v14767_v23, %v11989_v2  ;;  %5463 = vmatpush.bf16.msrb.mxu0 %v11736_v25  ;;  %7171 = vmatpush.bf16.msra.mxu2 %v13404_v7  ;;  %v14695_v20 = vld [vmem:[#allocation8 + $0x9c] sm:$0xf]  ;;  %v13628_v2 = vor.u32 %v15444_v61, %v13627_v21  ;;  %v13339_v7 = vld [vmem:[#allocation8 + $0x1540] sm:$0xf]  ;;  %v5091_v21 = vadd.f32 %v5090_v52, %v16982_v62 }
 0x3cb   :  { %v11701_v17 = vld [vmem:[#allocation8 + $0xb8] sm:$0xf0]  ;;  %v13531_v62 = vld [vmem:[#allocation8 + $0x16c0] sm:$0xf]  ;;  %5524 = vmatmul.bf16.vlgmr.msrb.gmra.mxu3 %v17002_v18 }
 0x3cc   :  { %5482 = vmatpush.bf16.msra.mxu1 %v11992_v47  ;;  %v14759_v45 = vld [vmem:[#allocation8 + $0x29c] sm:$0xf]  ;;  %7190 = vmatpush.bf16.msra.mxu3 %v13660_v36  ;;  %v11704_v19 = vor.u32 %v14695_v20, %v11701_v17  ;;  %v5127_v36 = vadd.f32 %v17326_v34, %v5108_v63  ;;  %v13340_v20 = vor.u32 %v15372_v39, %v13339_v7  ;;  %v17350_v5 = vpop.f32.mrf.mxu3  ;;  %v15260_v63 = vld [vmem:[#allocation8 + $0x11dc] sm:$0xf0] }
 0x3cd   :  { %v11957_v53 = vld [vmem:[#allocation8 + $0x2b8] sm:$0xf0]  ;;  %v13596_v17 = vor.u32 %v15436_v4, %v13595_v41  ;;  %v13275_v4 = vld [vmem:[#allocation8 + $0x14c0] sm:$0xf] }
 0x3ce   :  { %v11960_v29 = vor.u32 %v14759_v45, %v11957_v53  ;;  %v14687_v23 = vld [vmem:[#allocation8 + $0x5c] sm:$0xf]  ;;  %5464 = vmatpush.bf16.msrb.mxu0 %v11704_v19  ;;  %7172 = vmatpush.bf16.msra.mxu2 %v13372_v22  ;;  %v17346_v45 = vadd.f32 %v17328_v30, %v5127_v36  ;;  %v15364_v22 = vld [vmem:[#allocation8 + $0x151c] sm:$0xf0]  ;;  %v5109_v61 = vpop.f32.mrf.mxu1  ;;  %v17357_v52 = vpop.f32.mrf.mxu2 }
 0x3cf   :  { %v11669_v9 = vld [vmem:[#allocation8 + $0x78] sm:$0xf0]  ;;  %v5110_v7 = vadd.f32 %v5109_v61, %v5091_v21  ;;  %v15356_v36 = vld [vmem:[#allocation8 + $0x14dc] sm:$0xf0] }
 0x3d0   :  { %v14751_v25 = vld [vmem:[#allocation8 + $0x25c] sm:$0xf]  ;;  %5483 = vmatpush.bf16.msra.mxu1 %v11960_v29  ;;  %v11672_v42 = vor.u32 %v14687_v23, %v11669_v9  ;;  %7191 = vmatpush.bf16.msra.mxu3 %v13628_v2  ;;  %v13307_v29 = vld [vmem:[#allocation8 + $0x1500] sm:$0xf]  ;;  %v5093_v21 = vpop.f32.mrf.mxu0 }
 0x3d1   :  { %v11925_v47 = vld [vmem:[#allocation8 + $0x278] sm:$0xf0]  ;;  %v13308_v30 = vor.u32 %v15364_v22, %v13307_v29  ;;  %v13563_v2 = vld [vmem:[#allocation8 + $0x1700] sm:$0xf] }
 0x3d2   :  { %v11928_v24 = vor.u32 %v14751_v25, %v11925_v47  ;;  %5465 = vmatpush.bf16.msrb.mxu0 %v11672_v42  ;;  %v14679_v19 = vld [vmem:[#allocation8 + $0x1c] sm:$0xf]  ;;  %7173 = vmatpush.bf16.msra.mxu2 %v13340_v20  ;;  %v15428_v9 = vld [vmem:[#allocation8 + $0x171c] sm:$0xf0]  ;;  %v5129_v20 = vadd.f32 %v17335_v60, %v5110_v7 }
 0x3d3   :  { %v11637_v53 = vld [vmem:[#allocation8 + $0x38] sm:$0xf0]  ;;  %v12891_v25 = vld [vmem:[#allocation8 + $0x11c0] sm:$0xf]  ;;  %v13564_v47 = vor.u32 %v15428_v9, %v13563_v2  ;;  %v5094_v2 = vadd.f32 %v5093_v21, %v16993_v10 }
 0x3d4   :  { %5484 = vmatpush.bf16.msra.mxu1 %v11928_v24  ;;  %v14743_v1 = vld [vmem:[#allocation8 + $0x21c] sm:$0xf]  ;;  %v11640_v34 = vor.u32 %v14679_v19, %v11637_v53  ;;  %7192 = vmatpush.bf16.msra.mxu3 %v13596_v17  ;;  %v13147_v42 = vld [vmem:[#allocation8 + $0x13c0] sm:$0xf]  ;;  %v12892_v39 = vor.u32 %v15260_v63, %v12891_v25  ;;  %v13276_v53 = vor.u32 %v15356_v36, %v13275_v4  ;;  %v17359_v22 = vpop.f32.mrf.mxu3 }
 0x3d5   :  { %v11893_v37 = vld [vmem:[#allocation8 + $0x238] sm:$0xf0]  ;;  %v15324_v24 = vld [vmem:[#allocation8 + $0x13dc] sm:$0xf0] }
 0x3d6   :  { %v11896_v23 = vor.u32 %v14743_v1, %v11893_v37  ;;  %5466 = vmatpush.bf16.msrb.mxu0 %v11640_v34  ;;  %v13148_v41 = vor.u32 %v15324_v24, %v13147_v42  ;;  %v15420_v19 = vld [vmem:[#allocation8 + $0x16dc] sm:$0xf0]  ;;  %7174 = vmatpush.bf16.msra.mxu2 %v13308_v30  ;;  %v17355_v1 = vadd.f32 %v17337_v55, %v5129_v20  ;;  %v5112_v9 = vpop.f32.mrf.mxu1  ;;  %v17370_v21 = vpop.f32.mrf.mxu2 }
 0x3d7   :  { %v13532_v17 = vor.u32 %v15420_v19, %v13531_v62  ;;  %v12859_v34 = vld [vmem:[#allocation8 + $0x1180] sm:$0xf]  ;;  %v5113_v4 = vadd.f32 %v5112_v9, %v5094_v2 }
 0x3d8   :  { %5485 = vmatpush.bf16.msra.mxu1 %v11896_v23  ;;  %7193 = vmatpush.bf16.msra.mxu3 %v13564_v47  ;;  %v15252_v37 = vld [vmem:[#allocation8 + $0x119c] sm:$0xf0] }
 0x3d9   :  { %v13115_v29 = vld [vmem:[#allocation8 + $0x1380] sm:$0xf]  ;;  %v12860_v61 = vor.u32 %v15252_v37, %v12859_v34  ;;  %5467 = vmatmul.bf16.vlgmr.msrb.gmra.mxu0 %v17033_v15  ;;  %5510 = vmatmul.bf16.gmra.mxu2 %v17031_v3  ;;  %v15197_v15 = vld [vmem:[#allocation2 + $0x5c] sm:$0xf] }
 0x3da   :  { %7133 = vmatpush.bf16.msra.mxu0 %v12892_v39  ;;  %v15316_v23 = vld [vmem:[#allocation8 + $0x139c] sm:$0xf0]  ;;  %7175 = vmatpush.bf16.msra.mxu2 %v13276_v53 }
 0x3db   :  { %v13243_v60 = vld [vmem:[#allocation8 + $0x1480] sm:$0xf]  ;;  %v13116_v25 = vor.u32 %v15316_v23, %v13115_v29  ;;  %5486 = vmatmul.bf16.vlgmr.msra.gmra.mxu1 %v17035_v14  ;;  %5529 = vmatmul.bf16.gmra.mxu3 %v17039_v26 }
 0x3dc   :  { %7152 = vmatpush.bf16.msrb.mxu1 %v13148_v41  ;;  %v15348_v30 = vld [vmem:[#allocation8 + $0x149c] sm:$0xf0]  ;;  %7194 = vmatpush.bf16.msra.mxu3 %v13532_v17  ;;  %v5132_v17 = vadd.f32 %v17348_v48, %v5113_v4  ;;  %v17372_v0 = vpop.f32.mrf.mxu3 }
 0x3dd   :  { %v13244_v47 = vor.u32 %v15348_v30, %v13243_v60  ;;  %v13499_v55 = vld [vmem:[#allocation8 + $0x1680] sm:$0xf]  ;;  %v5095_v30 = vpop.f32.mrf.mxu0 }
 0x3de   :  { %v15412_v63 = vld [vmem:[#allocation8 + $0x169c] sm:$0xf0]  ;;  %7134 = vmatpush.bf16.msra.mxu0 %v12860_v61  ;;  %v17368_v29 = vadd.f32 %v17350_v5, %v5132_v17  ;;  %v13661_v17 = vld [vmem:[#allocation8 + $0x17e0] sm:$0xf0] }
 0x3df   :  { %v12827_v42 = vld [vmem:[#allocation8 + $0x1140] sm:$0xf]  ;;  %v13500_v24 = vor.u32 %v15412_v63, %v13499_v55  ;;  %7176 = vmatpush.bf16.msra.mxu2 %v13244_v47  ;;  %v5114_v47 = vpop.f32.mrf.mxu1 }
 0x3e0   :  { %v15244_v7 = vld [vmem:[#allocation8 + $0x115c] sm:$0xf0]  ;;  %7153 = vmatpush.bf16.msrb.mxu1 %v13116_v25  ;;  %v5096_v25 = vadd.f32 %v5095_v30, %v17012_v33  ;;  %v15448_v33 = vld [vmem:[#allocation8 + $0x17c4] sm:$0xf] }
 0x3e1   :  { %v13083_v39 = vld [vmem:[#allocation8 + $0x1340] sm:$0xf]  ;;  %v12828_v36 = vor.u32 %v15244_v7, %v12827_v42  ;;  %7195 = vmatpush.bf16.msra.mxu3 %v13500_v24 }
 0x3e2   :  { %v15308_v41 = vld [vmem:[#allocation8 + $0x135c] sm:$0xf0] }
 0x3e3   :  { %v13084_v62 = vor.u32 %v15308_v41, %v13083_v39  ;;  %v13211_v10 = vld [vmem:[#allocation8 + $0x1440] sm:$0xf]  ;;  %7135 = vmatpush.bf16.msra.mxu0 %v12828_v36  ;;  %v5115_v36 = vadd.f32 %v5114_v47, %v5096_v25  ;;  %v15376_v25 = vld [vmem:[#allocation8 + $0x1584] sm:$0xf] }
 0x3e4   :  { %v15340_v19 = vld [vmem:[#allocation8 + $0x145c] sm:$0xf0]  ;;  %v13373_v47 = vld [vmem:[#allocation8 + $0x15a0] sm:$0xf0] }
 0x3e5   :  { %v13467_v20 = vld [vmem:[#allocation8 + $0x1640] sm:$0xf]  ;;  %v13212_v34 = vor.u32 %v15340_v19, %v13211_v10  ;;  %7154 = vmatpush.bf16.msrb.mxu1 %v13084_v62  ;;  %v15384_v19 = vld [vmem:[#allocation8 + $0x15c4] sm:$0xf] }
 0x3e6   :  { %v15404_v53 = vld [vmem:[#allocation8 + $0x165c] sm:$0xf0] }
 0x3e7   :  { %v13468_v37 = vor.u32 %v15404_v53, %v13467_v20  ;;  %v12795_v61 = vld [vmem:[#allocation8 + $0x1100] sm:$0xf]  ;;  %7177 = vmatpush.bf16.msra.mxu2 %v13212_v34  ;;  %v13405_v20 = vld [vmem:[#allocation8 + $0x15e0] sm:$0xf0]  ;;  %v5134_v34 = vadd.f32 %v17357_v52, %v5115_v36 }
 0x3e8   :  { %v15236_v23 = vld [vmem:[#allocation8 + $0x111c] sm:$0xf0]  ;;  %v13408_v53 = vor.u32 %v15384_v19, %v13405_v20  ;;  %v15368_v20 = vld [vmem:[#allocation8 + $0x1544] sm:$0xf] }
 0x3e9   :  { %v13051_v60 = vld [vmem:[#allocation8 + $0x1300] sm:$0xf]  ;;  %v12796_v48 = vor.u32 %v15236_v23, %v12795_v61  ;;  %7196 = vmatpush.bf16.msra.mxu3 %v13468_v37  ;;  %v13664_v61 = vor.u32 %v15448_v33, %v13661_v17  ;;  %v17377_v37 = vadd.f32 %v17359_v22, %v5134_v34  ;;  %v17379_v23 = vpop.f32.mrf.mxu2  ;;  %v13341_v33 = vld [vmem:[#allocation8 + $0x1560] sm:$0xf0]  ;;  %v15199_v34 = vld [vmem:[#allocation2 + $0x64] sm:$0xf0]  ;;  %5472 = vmatmul.bf16.gmra.mxu0 %v17069_v32 }
 0x3ea   :  { %v15300_v2 = vld [vmem:[#allocation8 + $0x131c] sm:$0xf0] }
 0x3eb   :  { %v13179_v18 = vld [vmem:[#allocation8 + $0x1400] sm:$0xf]  ;;  %v13052_v55 = vor.u32 %v15300_v2, %v13051_v60  ;;  %7136 = vmatpush.bf16.msra.mxu0 %v12796_v48  ;;  %v17381_v2 = vpop.f32.mrf.mxu3  ;;  %5491 = vmatmul.bf16.gmra.mxu1 %v17073_v38 }
 0x3ec   :  { %v15332_v9 = vld [vmem:[#allocation8 + $0x141c] sm:$0xf0] }
 0x3ed   :  { %v13180_v5 = vor.u32 %v15332_v9, %v13179_v18  ;;  %v13435_v63 = vld [vmem:[#allocation8 + $0x1600] sm:$0xf]  ;;  %7155 = vmatpush.bf16.msrb.mxu1 %v13052_v55  ;;  %v5164_v18 = vpop.f32.mrf.mxu0 }
 0x3ee   :  { %v15396_v42 = vld [vmem:[#allocation8 + $0x161c] sm:$0xf0]  ;;  %v5165_v55 = vadd.f32 %v5164_v18, %v17023_v27  ;;  %v15432_v27 = vld [vmem:[#allocation8 + $0x1744] sm:$0xf]  ;;  %v12645_v18 = vld [vmem:[#allocation2 + $0x48] sm:$0xf0] }
 0x3ef   :  { %v12763_v24 = vld [vmem:[#allocation8 + $0x10c0] sm:$0xf]  ;;  %v13436_v7 = vor.u32 %v15396_v42, %v13435_v63  ;;  %7178 = vmatpush.bf16.msra.mxu2 %v13180_v5  ;;  %v5183_v5 = vpop.f32.mrf.mxu1  ;;  %v13376_v63 = vor.u32 %v15376_v25, %v13373_v47  ;;  %v15440_v42 = vld [vmem:[#allocation8 + $0x1784] sm:$0xf] }
 0x3f0   :  { %v15228_v39 = vld [vmem:[#allocation8 + $0x10dc] sm:$0xf0]  ;;  %v15193_v25 = vld [vmem:[#allocation2 + $0x3c] sm:$0xc] }
 0x3f1   :  { %v13019_v41 = vld [vmem:[#allocation8 + $0x12c0] sm:$0xf]  ;;  %v12764_v62 = vor.u32 %v15228_v39, %v12763_v24  ;;  %7197 = vmatpush.bf16.msra.mxu3 %v13436_v7  ;;  %v13629_v24 = vld [vmem:[#allocation8 + $0x17a0] sm:$0xf0]  ;;  %v17392_v3 = vpop.f32.mrf.mxu2 }
 0x3f2   :  { %v15292_v4 = vld [vmem:[#allocation8 + $0x12dc] sm:$0xf0]  ;;  %v13632_v39 = vor.u32 %v15440_v42, %v13629_v24  ;;  %v15360_v24 = vld [vmem:[#allocation8 + $0x1504] sm:$0xf] }
 0x3f3   :  { %v13020_v10 = vor.u32 %v15292_v4, %v13019_v41  ;;  %7137 = vmatpush.bf16.msra.mxu0 %v12764_v62  ;;  %7247 = vmatpush.bf16.msrb.mxu2 %v13408_v53  ;;  %v12731_v60 = vld [vmem:[#allocation8 + $0x1080] sm:$0xf]  ;;  %v5184_v62 = vadd.f32 %v5183_v5, %v5165_v55  ;;  %v13597_v53 = vld [vmem:[#allocation8 + $0x1760] sm:$0xf0]  ;;  %v17394_v5 = vpop.f32.mrf.mxu3 }
 0x3f4   :  { %v15220_v30 = vld [vmem:[#allocation8 + $0x109c] sm:$0xf0] }
 0x3f5   :  { %7156 = vmatpush.bf16.msrb.mxu1 %v13020_v10  ;;  %v12987_v48 = vld [vmem:[#allocation8 + $0x1280] sm:$0xf]  ;;  %7266 = vmatpush.bf16.msrb.mxu3 %v13664_v61  ;;  %v12732_v9 = vor.u32 %v15220_v30, %v12731_v60  ;;  %v5203_v61 = vadd.f32 %v17370_v21, %v5184_v62  ;;  %v13344_v60 = vor.u32 %v15368_v20, %v13341_v33  ;;  %v12661_v30 = vld [vmem:[#allocation2 + $0x68] sm:$0xf0]  ;;  %v15424_v62 = vld [vmem:[#allocation8 + $0x1704] sm:$0xf] }
 0x3f6   :  { %v15284_v52 = vld [vmem:[#allocation8 + $0x129c] sm:$0xf0]  ;;  %v12648_v33 = vor.u32 %v15193_v25, %v12645_v18 }
 0x3f7   :  { %v12988_v22 = vor.u32 %v15284_v52, %v12987_v48  ;;  %v12699_v7 = vld [vmem:[#allocation8 + $0x1040] sm:$0xf]  ;;  %7138 = vmatpush.bf16.msra.mxu0 %v12732_v9  ;;  %7248 = vmatpush.bf16.msrb.mxu2 %v13376_v63  ;;  %v15195_v48 = vld [vmem:[#allocation2 + $0x44] sm:$0xf0]  ;;  %v13600_v9 = vor.u32 %v15432_v27, %v13597_v53  ;;  %v17390_v14 = vadd.f32 %v17372_v0, %v5203_v61  ;;  %v12893_v53 = vld [vmem:[#allocation8 + $0x11e0] sm:$0xf0] }
 0x3f8   :  { %v15212_v41 = vld [vmem:[#allocation8 + $0x105c] sm:$0xf0] }
 0x3f9   :  { %v12955_v4 = vld [vmem:[#allocation8 + $0x1240] sm:$0xf]  ;;  %7157 = vmatpush.bf16.msrb.mxu1 %v12988_v22  ;;  %v12700_v10 = vor.u32 %v15212_v41, %v12699_v7  ;;  %7267 = vmatpush.bf16.msrb.mxu3 %v13632_v39  ;;  %v5166_v22 = vpop.f32.mrf.mxu0  ;;  %v13309_v7 = vld [vmem:[#allocation8 + $0x1520] sm:$0xf0]  ;;  %v12664_v39 = vor.u32 %v15197_v15, %v12661_v30  ;;  %v5185_v41 = vpop.f32.mrf.mxu1 }
 0x3fa   :  { %v15276_v36 = vld [vmem:[#allocation8 + $0x125c] sm:$0xf0]  ;;  %v5167_v0 = vadd.f32 %v5166_v22, %v17050_v58  ;;  %v15352_v58 = vld [vmem:[#allocation8 + $0x14c4] sm:$0xf] }
 0x3fb   :  { %v12956_v19 = vor.u32 %v15276_v36, %v12955_v4  ;;  %v12659_v17 = vld [vmem:[#allocation2 + $0x58] sm:$0xf]  ;;  %7139 = vmatpush.bf16.msra.mxu0 %v12700_v10  ;;  %7249 = vmatpush.bf16.msrb.mxu2 %v13344_v60  ;;  %v13312_v36 = vor.u32 %v15360_v24, %v13309_v7  ;;  %v13565_v10 = vld [vmem:[#allocation8 + $0x1720] sm:$0xf0]  ;;  %v17399_v22 = vrot.slane %v12664_v39, 2  ;;  %v17407_v39 = vpop.f32.mrf.mxu3 }
 0x3fc   :  { %v12643_v52 = vld [vmem:[#allocation2 + $0x38] sm:$0xc]  ;;  %v12660_v55 = vor.u32 %v15199_v34, %v12659_v17  ;;  %v13568_v27 = vor.u32 %v15424_v62, %v13565_v10  ;;  %v15320_v17 = vld [vmem:[#allocation8 + $0x13c4] sm:$0xf]  ;;  %v5186_v61 = vadd.f32 %v5185_v41, %v5167_v0 }
 0x3fd   :  { %7158 = vmatpush.bf16.msrb.mxu1 %v12956_v19  ;;  %v12667_v21 = vld [vmem:[#allocation8 + $0x1000] sm:$0xf]  ;;  %v15256_v19 = vld [vmem:[#allocation8 + $0x11c4] sm:$0xf]  ;;  %v12644_v20 = vor.u32 %v15195_v48, %v12643_v52  ;;  %7268 = vmatpush.bf16.msrb.mxu3 %v13600_v9  ;;  %v5842_v52 = vrot.slane %v12648_v33, 2 }
 0x3fe   :  { %v15204_v47 = vld [vmem:[#allocation8 + $0x101c] sm:$0xf0]  ;;  %v13149_v34 = vld [vmem:[#allocation8 + $0x13e0] sm:$0xf0]  ;;  %v12896_v15 = vor.u32 %v15256_v19, %v12893_v53  ;;  %v5205_v48 = vadd.f32 %v17379_v23, %v5186_v61 }
 0x3ff   :  { %v12923_v26 = vld [vmem:[#allocation8 + $0x1200] sm:$0xf]  ;;  %v12668_v63 = vor.u32 %v15204_v47, %v12667_v21  ;;  %v13152_v30 = vor.u32 %v15320_v17, %v13149_v34  ;;  %v13277_v21 = vld [vmem:[#allocation8 + $0x14e0] sm:$0xf0]  ;;  %7250 = vmatpush.bf16.msrb.mxu2 %v13312_v36  ;;  %v5839_v9 = vrot.slane %v12644_v20, 2 }
 0x400   :  { %v15268_v42 = vld [vmem:[#allocation8 + $0x121c] sm:$0xf0]  ;;  %v15416_v60 = vld [vmem:[#allocation8 + $0x16c4] sm:$0xf]  ;;  %v13280_v18 = vor.u32 %v15352_v58, %v13277_v21 }
 0x401   :  { %v12924_v4 = vor.u32 %v15268_v42, %v12923_v26  ;;  %7140 = vmatpush.bf16.msra.mxu0 %v12668_v63  ;;  %v13533_v47 = vld [vmem:[#allocation8 + $0x16e0] sm:$0xf0]  ;;  %v17397_v26 = vrot.slane %v12660_v55, 2  ;;  %7269 = vmatpush.bf16.msrb.mxu3 %v13568_v27  ;;  %v17403_v63 = vadd.f32 %v17381_v2, %v5205_v48  ;;  %v17405_v42 = vpop.f32.mrf.mxu2  ;;  %v5169_v23 = vpop.f32.mrf.mxu0  ;;  %v17419_v48 = vsel %vm5832_vm2, %v5842_v52, %v17399_v22 }
 0x402   :  { %v13536_v25 = vor.u32 %v15416_v60, %v13533_v47  ;;  %v15248_v55 = vld [vmem:[#allocation8 + $0x1184] sm:$0xf]  ;;  %v5170_v62 = vadd.f32 %v5169_v23, %v17061_v46  ;;  %v5188_v10 = vpop.f32.mrf.mxu1  ;;  %7198 = vmatmul.bf16.vlgmr.msra.gmra.mxu3 %v17419_v48  ;;  %v15194_v23 = vld [vmem:[#allocation2 + $0x3c] sm:$0xf0] }
 0x403   :  { %7159 = vmatpush.bf16.msrb.mxu1 %v12924_v4  ;;  %v12861_v24 = vld [vmem:[#allocation8 + $0x11a0] sm:$0xf0]  ;;  %7251 = vmatpush.bf16.msrb.mxu2 %v13280_v18  ;;  %v17412_v53 = vsel %vm5832_vm2, %v5839_v9, %v17397_v26  ;;  %v12651_v9 = vld [vmem:[#allocation2 + $0x50] sm:$0xf] }
 0x404   :  { %v15312_v7 = vld [vmem:[#allocation8 + $0x1384] sm:$0xf]  ;;  %v12864_v0 = vor.u32 %v15248_v55, %v12861_v24  ;;  %7179 = vmatmul.bf16.vlgmr.msra.gmra.mxu2 %v17412_v53  ;;  %v15196_v24 = vld [vmem:[#allocation2 + $0x54] sm:$0xf] }
 0x405   :  { %7209 = vmatpush.bf16.msrb.mxu0 %v12896_v15  ;;  %v13117_v41 = vld [vmem:[#allocation8 + $0x13a0] sm:$0xf0]  ;;  %7270 = vmatpush.bf16.msrb.mxu3 %v13536_v25  ;;  %v15198_v25 = vld [vmem:[#allocation2 + $0x5c] sm:$0xf0] }
 0x406   :  { %v15344_v4 = vld [vmem:[#allocation8 + $0x1484] sm:$0xf]  ;;  %v13120_v19 = vor.u32 %v15312_v7, %v13117_v41  ;;  %v12653_v7 = vld [vmem:[#allocation2 + $0x60] sm:$0xf0] }
 0x407   :  { %7228 = vmatpush.bf16.msra.mxu1 %v13152_v30  ;;  %v13245_v36 = vld [vmem:[#allocation8 + $0x14a0] sm:$0xf0]  ;;  %v5189_v30 = vadd.f32 %v5188_v10, %v5170_v62 }
 0x408   :  { %v13248_v20 = vor.u32 %v15344_v4, %v13245_v36  ;;  %v15408_v2 = vld [vmem:[#allocation8 + $0x1684] sm:$0xf]  ;;  %v12635_v4 = vld [vmem:[#allocation2 + $0x30] sm:$0xc]  ;;  %v15192_v36 = vld [vmem:[#allocation2 + $0x34] sm:$0xc] }
 0x409   :  { %v13501_v33 = vld [vmem:[#allocation8 + $0x16a0] sm:$0xf0]  ;;  %7210 = vmatpush.bf16.msrb.mxu0 %v12864_v0  ;;  %v5208_v55 = vadd.f32 %v17392_v3, %v5189_v30  ;;  %v12637_v0 = vld [vmem:[#allocation2 + $0x40] sm:$0xf0]  ;;  %v17426_v52 = vpop.f32.mrf.mxu2 }
 0x40a   :  { %v15240_v27 = vld [vmem:[#allocation8 + $0x1144] sm:$0xf]  ;;  %v13504_v17 = vor.u32 %v15408_v2, %v13501_v33  ;;  %7252 = vmatpush.bf16.msrb.mxu2 %v13248_v20  ;;  %v17428_v20 = vpop.f32.mrf.mxu3  ;;  %v5171_v2 = vpop.f32.mrf.mxu0 }
 0x40b   :  { %v12829_v34 = vld [vmem:[#allocation8 + $0x1160] sm:$0xf0]  ;;  %7229 = vmatpush.bf16.msra.mxu1 %v13120_v19  ;;  %v17424_v41 = vadd.f32 %v17394_v5, %v5208_v55  ;;  %v12652_v19 = vor.u32 %v15198_v25, %v12651_v9  ;;  %v5172_v5 = vadd.f32 %v5171_v2, %v17084_v49  ;;  %v13411_v49 = vld [vmem:[#allocation8 + $0x15c8] sm:$0xf] }
 0x40c   :  { %v15304_v61 = vld [vmem:[#allocation8 + $0x1344] sm:$0xf]  ;;  %v12832_v46 = vor.u32 %v15240_v27, %v12829_v34  ;;  %7271 = vmatpush.bf16.msrb.mxu3 %v13504_v17  ;;  %v15389_v2 = vld [vmem:[#allocation8 + $0x15e4] sm:$0xf0] }
 0x40d   :  { %v13085_v15 = vld [vmem:[#allocation8 + $0x1360] sm:$0xf0] }
 0x40e   :  { %v13088_v58 = vor.u32 %v15304_v61, %v13085_v15  ;;  %v15336_v21 = vld [vmem:[#allocation8 + $0x1444] sm:$0xf]  ;;  %7211 = vmatpush.bf16.msrb.mxu0 %v12832_v46  ;;  %v12656_v61 = vor.u32 %v15196_v24, %v12653_v7  ;;  %v5190_v15 = vpop.f32.mrf.mxu1 }
 0x40f   :  { %v13213_v60 = vld [vmem:[#allocation8 + $0x1460] sm:$0xf0] }
 0x410   :  { %v15400_v47 = vld [vmem:[#allocation8 + $0x1644] sm:$0xf]  ;;  %v13216_v32 = vor.u32 %v15336_v21, %v13213_v60  ;;  %7230 = vmatpush.bf16.msra.mxu1 %v13088_v58 }
 0x411   :  { %v13469_v18 = vld [vmem:[#allocation8 + $0x1660] sm:$0xf0] }
 0x412   :  { %v13472_v38 = vor.u32 %v15400_v47, %v13469_v18  ;;  %v15232_v3 = vld [vmem:[#allocation8 + $0x1104] sm:$0xf]  ;;  %7253 = vmatpush.bf16.msrb.mxu2 %v13216_v32  ;;  %v12636_v47 = vor.u32 %v15194_v23, %v12635_v4  ;;  %v12640_v18 = vor.u32 %v15192_v36, %v12637_v0  ;;  %v13667_v32 = vld [vmem:[#allocation8 + $0x17c8] sm:$0xf]  ;;  %v17432_v0 = vrot.slane %v12652_v19, 2  ;;  %v5240_v19 = vpop.f32.mrf.mxu0  ;;  %7203 = vmatmul.bf16.gmra.mxu3 %v17399_v22 }
 0x413   :  { %v12797_v62 = vld [vmem:[#allocation8 + $0x1120] sm:$0xf0] }
 0x414   :  { %v15296_v10 = vld [vmem:[#allocation8 + $0x1304] sm:$0xf]  ;;  %v12800_v33 = vor.u32 %v15232_v3, %v12797_v62  ;;  %7272 = vmatpush.bf16.msrb.mxu3 %v13472_v38  ;;  %v5191_v62 = vadd.f32 %v5190_v15, %v5172_v5  ;;  %v17434_v38 = vrot.slane %v12656_v61, 2  ;;  %v5833_v4 = vrot.slane %v12636_v47, 2  ;;  %7184 = vmatmul.bf16.gmra.mxu2 %v17397_v26 }
 0x415   :  { %v13053_v27 = vld [vmem:[#allocation8 + $0x1320] sm:$0xf0]  ;;  %v5836_v36 = vrot.slane %v12640_v18, 2 }
 0x416   :  { %v15328_v17 = vld [vmem:[#allocation8 + $0x1404] sm:$0xf]  ;;  %v13056_v30 = vor.u32 %v15296_v10, %v13053_v27  ;;  %7212 = vmatpush.bf16.msrb.mxu0 %v12800_v33  ;;  %v13412_v10 = vor.u32 %v15389_v2, %v13411_v49  ;;  %v15453_v27 = vld [vmem:[#allocation8 + $0x17e4] sm:$0xf0]  ;;  %v5259_v47 = vpop.f32.mrf.mxu1 }
 0x417   :  { %v13181_v34 = vld [vmem:[#allocation8 + $0x1420] sm:$0xf0]  ;;  %v13668_v23 = vor.u32 %v15453_v27, %v13667_v32  ;;  %v13347_v27 = vld [vmem:[#allocation8 + $0x1548] sm:$0xf] }
 0x418   :  { %v13184_v46 = vor.u32 %v15328_v17, %v13181_v34  ;;  %v15392_v21 = vld [vmem:[#allocation8 + $0x1604] sm:$0xf]  ;;  %7231 = vmatpush.bf16.msra.mxu1 %v13056_v30  ;;  %v5210_v17 = vadd.f32 %v17405_v42, %v5191_v62  ;;  %v17439_v34 = vpop.f32.mrf.mxu2  ;;  %v17441_v30 = vpop.f32.mrf.mxu3  ;;  %v17450_v62 = vsel %vm5832_vm2, %v5836_v36, %v17434_v38 }
 0x419   :  { %v13437_v58 = vld [vmem:[#allocation8 + $0x1620] sm:$0xf0]  ;;  %7160 = vmatmul.bf16.vlgmr.msrb.gmra.mxu1 %v17450_v62 }
 0x41a   :  { %v15224_v60 = vld [vmem:[#allocation8 + $0x10c4] sm:$0xf]  ;;  %v13440_v9 = vor.u32 %v15392_v21, %v13437_v58  ;;  %7254 = vmatpush.bf16.msrb.mxu2 %v13184_v46  ;;  %v17437_v33 = vadd.f32 %v17407_v39, %v5210_v17  ;;  %v13379_v21 = vld [vmem:[#allocation8 + $0x1588] sm:$0xf] }
 0x41b   :  { %v12765_v25 = vld [vmem:[#allocation8 + $0x10e0] sm:$0xf0]  ;;  %v15381_v58 = vld [vmem:[#allocation8 + $0x15a4] sm:$0xf0] }
 0x41c   :  { %v15288_v55 = vld [vmem:[#allocation8 + $0x12c4] sm:$0xf]  ;;  %v12768_v24 = vor.u32 %v15224_v60, %v12765_v25  ;;  %7273 = vmatpush.bf16.msrb.mxu3 %v13440_v9  ;;  %v5241_v60 = vadd.f32 %v5240_v19, %v17093_v43  ;;  %v13380_v18 = vor.u32 %v15381_v58, %v13379_v21  ;;  %v13635_v9 = vld [vmem:[#allocation8 + $0x1788] sm:$0xf] }
 0x41d   :  { %v13021_v3 = vld [vmem:[#allocation8 + $0x12e0] sm:$0xf0]  ;;  %v15445_v25 = vld [vmem:[#allocation8 + $0x17a4] sm:$0xf0] }
 0x41e   :  { %v13024_v7 = vor.u32 %v15288_v55, %v13021_v3  ;;  %7213 = vmatpush.bf16.msrb.mxu0 %v12768_v24  ;;  %7323 = vmatpush.bf16.msra.mxu2 %v13412_v10  ;;  %v15216_v5 = vld [vmem:[#allocation8 + $0x1084] sm:$0xf]  ;;  %v17446_v3 = vsel %vm5832_vm2, %v5833_v4, %v17432_v0  ;;  %v13636_v24 = vor.u32 %v15445_v25, %v13635_v9  ;;  %v15373_v17 = vld [vmem:[#allocation8 + $0x1564] sm:$0xf0]  ;;  %v5261_v25 = vpop.f32.mrf.mxu1 }
 0x41f   :  { %v12733_v15 = vld [vmem:[#allocation8 + $0x10a0] sm:$0xf0]  ;;  %v5260_v43 = vadd.f32 %v5259_v47, %v5241_v60  ;;  %7141 = vmatmul.bf16.vlgmr.msra.gmra.mxu0 %v17446_v3  ;;  %v15437_v4 = vld [vmem:[#allocation8 + $0x1764] sm:$0xf0]  ;;  %v5242_v60 = vpop.f32.mrf.mxu0 }
 0x420   :  { %7232 = vmatpush.bf16.msra.mxu1 %v13024_v7  ;;  %v15280_v42 = vld [vmem:[#allocation8 + $0x1284] sm:$0xf]  ;;  %7342 = vmatpush.bf16.msra.mxu3 %v13668_v23  ;;  %v12736_v61 = vor.u32 %v15216_v5, %v12733_v15  ;;  %v13603_v23 = vld [vmem:[#allocation8 + $0x1748] sm:$0xf]  ;;  %v13348_v5 = vor.u32 %v15373_v17, %v13347_v27  ;;  %v17460_v19 = vpop.f32.mrf.mxu2  ;;  %v17462_v58 = vpop.f32.mrf.mxu3  ;;  %v5243_v9 = vadd.f32 %v5242_v60, %v17107_v44 }
 0x421   :  { %v12989_v46 = vld [vmem:[#allocation8 + $0x12a0] sm:$0xf0]  ;;  %v5279_v36 = vadd.f32 %v17426_v52, %v5260_v43  ;;  %v13604_v15 = vor.u32 %v15437_v4, %v13603_v23  ;;  %v15261_v43 = vld [vmem:[#allocation8 + $0x11e4] sm:$0xf0] }
 0x422   :  { %v12992_v39 = vor.u32 %v15280_v42, %v12989_v46  ;;  %v15208_v55 = vld [vmem:[#allocation8 + $0x1044] sm:$0xf]  ;;  %7214 = vmatpush.bf16.msrb.mxu0 %v12736_v61  ;;  %7324 = vmatpush.bf16.msra.mxu2 %v13380_v18  ;;  %v15365_v18 = vld [vmem:[#allocation8 + $0x1524] sm:$0xf0]  ;;  %v5262_v27 = vadd.f32 %v5261_v25, %v5243_v9 }
 0x423   :  { %v12701_v7 = vld [vmem:[#allocation8 + $0x1060] sm:$0xf0]  ;;  %v17458_v42 = vadd.f32 %v17428_v20, %v5279_v36  ;;  %v13283_v4 = vld [vmem:[#allocation8 + $0x14c8] sm:$0xf]  ;;  %7274 = vmatmul.bf16.vlgmr.msrb.gmra.mxu3 %v17419_v48 }
 0x424   :  { %v15272_v49 = vld [vmem:[#allocation8 + $0x1244] sm:$0xf]  ;;  %7233 = vmatpush.bf16.msra.mxu1 %v12992_v39  ;;  %v12704_v32 = vor.u32 %v15208_v55, %v12701_v7  ;;  %7343 = vmatpush.bf16.msra.mxu3 %v13636_v24  ;;  %v13315_v39 = vld [vmem:[#allocation8 + $0x1508] sm:$0xf] }
 0x425   :  { %v12957_v2 = vld [vmem:[#allocation8 + $0x1260] sm:$0xf0]  ;;  %v13316_v20 = vor.u32 %v15365_v18, %v13315_v39  ;;  %v13571_v24 = vld [vmem:[#allocation8 + $0x1708] sm:$0xf]  ;;  %7255 = vmatmul.bf16.vlgmr.msrb.gmra.mxu2 %v17412_v53 }
 0x426   :  { %v12960_v10 = vor.u32 %v15272_v49, %v12957_v2  ;;  %7215 = vmatpush.bf16.msrb.mxu0 %v12704_v32  ;;  %v15200_v61 = vld [vmem:[#allocation8 + $0x1004] sm:$0xf]  ;;  %7325 = vmatpush.bf16.msra.mxu2 %v13348_v5  ;;  %v15429_v7 = vld [vmem:[#allocation8 + $0x1724] sm:$0xf0]  ;;  %v5281_v5 = vadd.f32 %v17439_v34, %v5262_v27 }
 0x427   :  { %v12669_v46 = vld [vmem:[#allocation8 + $0x1020] sm:$0xf0]  ;;  %v12899_v49 = vld [vmem:[#allocation8 + $0x11c8] sm:$0xf]  ;;  %v13572_v2 = vor.u32 %v15429_v7, %v13571_v24  ;;  %v5245_v9 = vpop.f32.mrf.mxu0  ;;  %v5264_v7 = vpop.f32.mrf.mxu1 }
 0x428   :  { %7234 = vmatpush.bf16.msra.mxu1 %v12960_v10  ;;  %v15264_v21 = vld [vmem:[#allocation8 + $0x1204] sm:$0xf]  ;;  %v12672_v52 = vor.u32 %v15200_v61, %v12669_v46  ;;  %7344 = vmatpush.bf16.msra.mxu3 %v13604_v15  ;;  %v13155_v32 = vld [vmem:[#allocation8 + $0x13c8] sm:$0xf]  ;;  %v12900_v17 = vor.u32 %v15261_v43, %v12899_v49  ;;  %v17469_v60 = vpop.f32.mrf.mxu2  ;;  %v17471_v18 = vpop.f32.mrf.mxu3  ;;  %v5246_v24 = vadd.f32 %v5245_v9, %v17116_v31 }
 0x429   :  { %v12925_v47 = vld [vmem:[#allocation8 + $0x1220] sm:$0xf0]  ;;  %v15325_v10 = vld [vmem:[#allocation8 + $0x13e4] sm:$0xf0]  ;;  %7165 = vmatmul.bf16.gmra.mxu1 %v17434_v38 }
 0x42a   :  { %v12928_v55 = vor.u32 %v15264_v21, %v12925_v47  ;;  %7216 = vmatpush.bf16.msrb.mxu0 %v12672_v52  ;;  %v13156_v23 = vor.u32 %v15325_v10, %v13155_v32  ;;  %v15357_v36 = vld [vmem:[#allocation8 + $0x14e4] sm:$0xf0]  ;;  %7326 = vmatpush.bf16.msra.mxu2 %v13316_v20  ;;  %v17467_v21 = vadd.f32 %v17441_v30, %v5281_v5 }
 0x42b   :  { %v13539_v44 = vld [vmem:[#allocation8 + $0x16c8] sm:$0xf]  ;;  %v13284_v46 = vor.u32 %v15357_v36, %v13283_v4  ;;  %v5265_v4 = vadd.f32 %v5264_v7, %v5246_v24 }
 0x42c   :  { %7235 = vmatpush.bf16.msra.mxu1 %v12928_v55  ;;  %v15421_v61 = vld [vmem:[#allocation8 + $0x16e4] sm:$0xf0]  ;;  %7345 = vmatpush.bf16.msra.mxu3 %v13572_v2 }
 0x42d   :  { %v13540_v15 = vor.u32 %v15421_v61, %v13539_v44  ;;  %v12867_v52 = vld [vmem:[#allocation8 + $0x1188] sm:$0xf] }
 0x42e   :  { %7285 = vmatpush.bf16.msra.mxu0 %v12900_v17  ;;  %v15253_v47 = vld [vmem:[#allocation8 + $0x11a4] sm:$0xf0]  ;;  %7327 = vmatpush.bf16.msra.mxu2 %v13284_v46 }
 0x42f   :  { %v13123_v39 = vld [vmem:[#allocation8 + $0x1388] sm:$0xf]  ;;  %v12868_v25 = vor.u32 %v15253_v47, %v12867_v52  ;;  %7146 = vmatmul.bf16.gmra.mxu0 %v17432_v0  ;;  %v5247_v24 = vpop.f32.mrf.mxu0 }
 0x430   :  { %7304 = vmatpush.bf16.msrb.mxu1 %v13156_v23  ;;  %v15317_v55 = vld [vmem:[#allocation8 + $0x13a4] sm:$0xf0]  ;;  %7346 = vmatpush.bf16.msra.mxu3 %v13540_v15  ;;  %v5284_v15 = vadd.f32 %v17460_v19, %v5265_v4  ;;  %v17482_v9 = vpop.f32.mrf.mxu2 }
 0x431   :  { %v13251_v34 = vld [vmem:[#allocation8 + $0x1488] sm:$0xf]  ;;  %v13124_v49 = vor.u32 %v15317_v55, %v13123_v39 }
 0x432   :  { %v15349_v20 = vld [vmem:[#allocation8 + $0x14a4] sm:$0xf0]  ;;  %7286 = vmatpush.bf16.msra.mxu0 %v12868_v25  ;;  %v17480_v39 = vadd.f32 %v17462_v58, %v5284_v15  ;;  %v13413_v15 = vld [vmem:[#allocation8 + $0x15e8] sm:$0xf0] }
 0x433   :  { %v13252_v2 = vor.u32 %v15349_v20, %v13251_v34  ;;  %v13507_v30 = vld [vmem:[#allocation8 + $0x1688] sm:$0xf]  ;;  %v17484_v20 = vpop.f32.mrf.mxu3  ;;  %7279 = vmatmul.bf16.gmra.mxu3 %v17399_v22 }
 0x434   :  { %v15413_v43 = vld [vmem:[#allocation8 + $0x16a4] sm:$0xf0]  ;;  %7305 = vmatpush.bf16.msrb.mxu1 %v13124_v49 }
 0x435   :  { %v12835_v32 = vld [vmem:[#allocation8 + $0x1148] sm:$0xf]  ;;  %v13508_v10 = vor.u32 %v15413_v43, %v13507_v30  ;;  %7328 = vmatpush.bf16.msra.mxu2 %v13252_v2  ;;  %v5248_v30 = vadd.f32 %v5247_v24, %v17130_v35  ;;  %v5266_v43 = vpop.f32.mrf.mxu1  ;;  %v15449_v35 = vld [vmem:[#allocation8 + $0x17cc] sm:$0xf] }
 0x436   :  { %v15245_v27 = vld [vmem:[#allocation8 + $0x1164] sm:$0xf0]  ;;  %7260 = vmatmul.bf16.gmra.mxu2 %v17397_v26 }
 0x437   :  { %v13091_v17 = vld [vmem:[#allocation8 + $0x1348] sm:$0xf]  ;;  %v12836_v36 = vor.u32 %v15245_v27, %v12835_v32  ;;  %7347 = vmatpush.bf16.msra.mxu3 %v13508_v10 }
 0x438   :  { %v15309_v23 = vld [vmem:[#allocation8 + $0x1364] sm:$0xf0]  ;;  %v17491_v24 = vpop.f32.mrf.mxu2 }
 0x439   :  { %v13092_v44 = vor.u32 %v15309_v23, %v13091_v17  ;;  %v13219_v31 = vld [vmem:[#allocation8 + $0x1448] sm:$0xf]  ;;  %7287 = vmatpush.bf16.msra.mxu0 %v12836_v36  ;;  %7236 = vmatmul.bf16.vlgmr.msra.gmra.mxu1 %v17450_v62 }
 0x43a   :  { %v15341_v61 = vld [vmem:[#allocation8 + $0x1464] sm:$0xf0] }
 0x43b   :  { %v13475_v5 = vld [vmem:[#allocation8 + $0x1648] sm:$0xf]  ;;  %v13220_v52 = vor.u32 %v15341_v61, %v13219_v31  ;;  %7306 = vmatpush.bf16.msrb.mxu1 %v13092_v44  ;;  %v5267_v31 = vadd.f32 %v5266_v43, %v5248_v30  ;;  %v5316_v30 = vpop.f32.mrf.mxu0 }
 0x43c   :  { %v15405_v46 = vld [vmem:[#allocation8 + $0x1664] sm:$0xf0] }
 0x43d   :  { %v13476_v47 = vor.u32 %v15405_v46, %v13475_v5  ;;  %v12803_v25 = vld [vmem:[#allocation8 + $0x1108] sm:$0xf]  ;;  %7329 = vmatpush.bf16.msra.mxu2 %v13220_v52  ;;  %v15385_v46 = vld [vmem:[#allocation8 + $0x15cc] sm:$0xf] }
 0x43e   :  { %v15237_v55 = vld [vmem:[#allocation8 + $0x1124] sm:$0xf0]  ;;  %v13669_v52 = vld [vmem:[#allocation8 + $0x17e8] sm:$0xf0] }
 0x43f   :  { %v13059_v34 = vld [vmem:[#allocation8 + $0x1308] sm:$0xf]  ;;  %v12804_v19 = vor.u32 %v15237_v55, %v12803_v25  ;;  %7348 = vmatpush.bf16.msra.mxu3 %v13476_v47  ;;  %v13416_v25 = vor.u32 %v15385_v46, %v13413_v15  ;;  %v5286_v55 = vadd.f32 %v17469_v60, %v5267_v31  ;;  %7217 = vmatmul.bf16.vlgmr.msrb.gmra.mxu0 %v17446_v3 }
 0x440   :  { %v15301_v7 = vld [vmem:[#allocation8 + $0x1324] sm:$0xf0] }
 0x441   :  { %v13187_v49 = vld [vmem:[#allocation8 + $0x1408] sm:$0xf]  ;;  %v13060_v32 = vor.u32 %v15301_v7, %v13059_v34  ;;  %7288 = vmatpush.bf16.msra.mxu0 %v12804_v19  ;;  %v13672_v34 = vor.u32 %v15449_v35, %v13669_v52  ;;  %v17489_v47 = vadd.f32 %v17471_v18, %v5286_v55  ;;  %v13349_v52 = vld [vmem:[#allocation8 + $0x1568] sm:$0xf0] }
 0x442   :  { %v15333_v2 = vld [vmem:[#allocation8 + $0x1424] sm:$0xf0]  ;;  %v13605_v55 = vld [vmem:[#allocation8 + $0x1768] sm:$0xf0] }
 0x443   :  { %v13188_v58 = vor.u32 %v15333_v2, %v13187_v49  ;;  %v13443_v10 = vld [vmem:[#allocation8 + $0x1608] sm:$0xf]  ;;  %7307 = vmatpush.bf16.msrb.mxu1 %v13060_v32  ;;  %v17493_v2 = vpop.f32.mrf.mxu3  ;;  %v15377_v32 = vld [vmem:[#allocation8 + $0x158c] sm:$0xf] }
 0x444   :  { %v15397_v27 = vld [vmem:[#allocation8 + $0x1624] sm:$0xf0] }
 0x445   :  { %v12771_v17 = vld [vmem:[#allocation8 + $0x10c8] sm:$0xf]  ;;  %v13444_v23 = vor.u32 %v15397_v27, %v13443_v10  ;;  %7330 = vmatpush.bf16.msra.mxu2 %v13188_v58  ;;  %v13381_v58 = vld [vmem:[#allocation8 + $0x15a8] sm:$0xf0]  ;;  %v5317_v10 = vadd.f32 %v5316_v30, %v17139_v50  ;;  %v5335_v27 = vpop.f32.mrf.mxu1  ;;  %v17504_v30 = vpop.f32.mrf.mxu2 }
 0x446   :  { %v15229_v4 = vld [vmem:[#allocation8 + $0x10e4] sm:$0xf0]  ;;  %v15433_v50 = vld [vmem:[#allocation8 + $0x174c] sm:$0xf] }
 0x447   :  { %v13027_v36 = vld [vmem:[#allocation8 + $0x12c8] sm:$0xf]  ;;  %v12772_v61 = vor.u32 %v15229_v4, %v12771_v17  ;;  %7349 = vmatpush.bf16.msra.mxu3 %v13444_v23  ;;  %v13384_v17 = vor.u32 %v15377_v32, %v13381_v58  ;;  %v15441_v23 = vld [vmem:[#allocation8 + $0x178c] sm:$0xf]  ;;  %v5336_v46 = vadd.f32 %v5335_v27, %v5317_v10  ;;  %v5318_v10 = vpop.f32.mrf.mxu0 }
 0x448   :  { %v15293_v44 = vld [vmem:[#allocation8 + $0x12e4] sm:$0xf0]  ;;  %v13637_v4 = vld [vmem:[#allocation8 + $0x17a8] sm:$0xf0]  ;;  %7331 = vmatmul.bf16.vlgmr.msra.gmra.mxu2 %v17412_v53 }
 0x449   :  { %v13028_v5 = vor.u32 %v15293_v44, %v13027_v36  ;;  %7289 = vmatpush.bf16.msra.mxu0 %v12772_v61  ;;  %7399 = vmatpush.bf16.msrb.mxu2 %v13416_v25  ;;  %v12739_v19 = vld [vmem:[#allocation8 + $0x1088] sm:$0xf]  ;;  %v13640_v44 = vor.u32 %v15441_v23, %v13637_v4  ;;  %v15369_v25 = vld [vmem:[#allocation8 + $0x154c] sm:$0xf]  ;;  %v5319_v23 = vadd.f32 %v5318_v10, %v17153_v12 }
 0x44a   :  { %v15221_v7 = vld [vmem:[#allocation8 + $0x10a4] sm:$0xf0]  ;;  %v15417_v12 = vld [vmem:[#allocation8 + $0x16cc] sm:$0xf]  ;;  %7241 = vmatmul.bf16.gmra.mxu1 %v17434_v38  ;;  %7350 = vmatmul.bf16.vlgmr.msra.gmra.mxu3 %v17419_v48 }
 0x44b   :  { %7308 = vmatpush.bf16.msrb.mxu1 %v13028_v5  ;;  %v12995_v49 = vld [vmem:[#allocation8 + $0x1288] sm:$0xf]  ;;  %7418 = vmatpush.bf16.msrb.mxu3 %v13672_v34  ;;  %v12740_v43 = vor.u32 %v15221_v7, %v12739_v19  ;;  %v5355_v34 = vadd.f32 %v17482_v9, %v5336_v46  ;;  %v13352_v19 = vor.u32 %v15369_v25, %v13349_v52  ;;  %v17506_v58 = vpop.f32.mrf.mxu3  ;;  %v12901_v46 = vld [vmem:[#allocation8 + $0x11e8] sm:$0xf0] }
 0x44c   :  { %v15285_v60 = vld [vmem:[#allocation8 + $0x12a4] sm:$0xf0]  ;;  %v13608_v7 = vor.u32 %v15433_v50, %v13605_v55  ;;  %v15353_v55 = vld [vmem:[#allocation8 + $0x14cc] sm:$0xf] }
 0x44d   :  { %v12996_v18 = vor.u32 %v15285_v60, %v12995_v49  ;;  %v12707_v36 = vld [vmem:[#allocation8 + $0x1048] sm:$0xf]  ;;  %7290 = vmatpush.bf16.msra.mxu0 %v12740_v43  ;;  %7400 = vmatpush.bf16.msrb.mxu2 %v13384_v17  ;;  %v17502_v49 = vadd.f32 %v17484_v20, %v5355_v34  ;;  %v13317_v17 = vld [vmem:[#allocation8 + $0x1528] sm:$0xf0]  ;;  %v5337_v4 = vpop.f32.mrf.mxu1  ;;  %v17513_v10 = vpop.f32.mrf.mxu2 }
 0x44e   :  { %v15213_v31 = vld [vmem:[#allocation8 + $0x1064] sm:$0xf0]  ;;  %v5338_v25 = vadd.f32 %v5337_v4, %v5319_v23  ;;  %v13285_v34 = vld [vmem:[#allocation8 + $0x14e8] sm:$0xf0] }
 0x44f   :  { %v12963_v61 = vld [vmem:[#allocation8 + $0x1248] sm:$0xf]  ;;  %7309 = vmatpush.bf16.msrb.mxu1 %v12996_v18  ;;  %v12708_v15 = vor.u32 %v15213_v31, %v12707_v36  ;;  %7419 = vmatpush.bf16.msrb.mxu3 %v13640_v44  ;;  %v15361_v18 = vld [vmem:[#allocation8 + $0x150c] sm:$0xf]  ;;  %v5321_v23 = vpop.f32.mrf.mxu0 }
 0x450   :  { %v15277_v5 = vld [vmem:[#allocation8 + $0x1264] sm:$0xf0]  ;;  %v13320_v20 = vor.u32 %v15361_v18, %v13317_v17  ;;  %v15425_v44 = vld [vmem:[#allocation8 + $0x170c] sm:$0xf]  ;;  %7222 = vmatmul.bf16.gmra.mxu0 %v17432_v0 }
 0x451   :  { %v12964_v35 = vor.u32 %v15277_v5, %v12963_v61  ;;  %7291 = vmatpush.bf16.msra.mxu0 %v12708_v15  ;;  %v12675_v43 = vld [vmem:[#allocation8 + $0x1008] sm:$0xf]  ;;  %7401 = vmatpush.bf16.msrb.mxu2 %v13352_v19  ;;  %v13573_v31 = vld [vmem:[#allocation8 + $0x1728] sm:$0xf0]  ;;  %v5357_v19 = vadd.f32 %v17491_v24, %v5338_v25 }
 0x452   :  { %v15205_v60 = vld [vmem:[#allocation8 + $0x1024] sm:$0xf0]  ;;  %v15257_v61 = vld [vmem:[#allocation8 + $0x11cc] sm:$0xf]  ;;  %v13576_v5 = vor.u32 %v15425_v44, %v13573_v31 }
 0x453   :  { %7310 = vmatpush.bf16.msrb.mxu1 %v12964_v35  ;;  %v12931_v32 = vld [vmem:[#allocation8 + $0x1208] sm:$0xf]  ;;  %v12676_v9 = vor.u32 %v15205_v60, %v12675_v43  ;;  %7420 = vmatpush.bf16.msrb.mxu3 %v13608_v7  ;;  %v15321_v15 = vld [vmem:[#allocation8 + $0x13cc] sm:$0xf]  ;;  %v12904_v52 = vor.u32 %v15257_v61, %v12901_v46  ;;  %v13288_v60 = vor.u32 %v15353_v55, %v13285_v34  ;;  %v17515_v17 = vpop.f32.mrf.mxu3 }
 0x454   :  { %v15269_v27 = vld [vmem:[#allocation8 + $0x1224] sm:$0xf0]  ;;  %v13157_v35 = vld [vmem:[#allocation8 + $0x13e8] sm:$0xf0] }
 0x455   :  { %v12932_v36 = vor.u32 %v15269_v27, %v12931_v32  ;;  %7292 = vmatpush.bf16.msra.mxu0 %v12676_v9  ;;  %v13160_v50 = vor.u32 %v15321_v15, %v13157_v35  ;;  %v13541_v43 = vld [vmem:[#allocation8 + $0x16e8] sm:$0xf0]  ;;  %7402 = vmatpush.bf16.msrb.mxu2 %v13320_v20  ;;  %v17511_v32 = vadd.f32 %v17493_v2, %v5357_v19  ;;  %v5340_v61 = vpop.f32.mrf.mxu1 }
 0x456   :  { %v13544_v7 = vor.u32 %v15417_v12, %v13541_v43  ;;  %v15249_v9 = vld [vmem:[#allocation8 + $0x118c] sm:$0xf] }
 0x457   :  { %7311 = vmatpush.bf16.msrb.mxu1 %v12932_v36  ;;  %7421 = vmatpush.bf16.msrb.mxu3 %v13576_v5  ;;  %v12869_v27 = vld [vmem:[#allocation8 + $0x11a8] sm:$0xf0] }
 0x458   :  { %v15313_v18 = vld [vmem:[#allocation8 + $0x138c] sm:$0xf]  ;;  %v12872_v4 = vor.u32 %v15249_v9, %v12869_v27  ;;  %7336 = vmatmul.bf16.gmra.mxu2 %v17397_v26 }
 0x459   :  { %7361 = vmatpush.bf16.msrb.mxu0 %v12904_v52  ;;  %v13125_v36 = vld [vmem:[#allocation8 + $0x13a8] sm:$0xf0]  ;;  %7403 = vmatpush.bf16.msrb.mxu2 %v13288_v60 }
 0x45a   :  { %v15345_v24 = vld [vmem:[#allocation8 + $0x148c] sm:$0xf]  ;;  %v13128_v5 = vor.u32 %v15313_v18, %v13125_v36  ;;  %v17526_v36 = vpop.f32.mrf.mxu2  ;;  %7312 = vmatmul.bf16.vlgmr.msrb.gmra.mxu1 %v17450_v62  ;;  %7355 = vmatmul.bf16.gmra.mxu3 %v17399_v22 }
 0x45b   :  { %7380 = vmatpush.bf16.msra.mxu1 %v13160_v50  ;;  %v13253_v20 = vld [vmem:[#allocation8 + $0x14a8] sm:$0xf0]  ;;  %7422 = vmatpush.bf16.msrb.mxu3 %v13544_v7 }
 0x45c   :  { %v18023_v44 = vld [vmem:[#allocation24_spill] sm:$0xff]  ;;  %v13256_v46 = vor.u32 %v15345_v24, %v13253_v20 }
 0x45d   :  { %v5322_v31 = vadd.f32 %v5321_v23, %v18023_v44  ;;  %v15409_v2 = vld [vmem:[#allocation8 + $0x168c] sm:$0xf]  ;;  %7362 = vmatpush.bf16.msrb.mxu0 %v12872_v4 }
 0x45e   :  { %v13509_v15 = vld [vmem:[#allocation8 + $0x16a8] sm:$0xf0]  ;;  %7404 = vmatpush.bf16.msrb.mxu2 %v13256_v46 }
 0x45f   :  { %v15241_v35 = vld [vmem:[#allocation8 + $0x114c] sm:$0xf]  ;;  %v13512_v25 = vor.u32 %v15409_v2, %v13509_v15  ;;  %v5341_v34 = vadd.f32 %v5340_v61, %v5322_v31  ;;  %7381 = vmatpush.bf16.msra.mxu1 %v13128_v5  ;;  %v17528_v31 = vpop.f32.mrf.mxu3  ;;  %v5323_v61 = vpop.f32.mrf.mxu0  ;;  %v18024_v15 = vld [vmem:[#allocation30_spill] sm:$0xff] }
 0x460   :  { %v12837_v52 = vld [vmem:[#allocation8 + $0x1168] sm:$0xf0]  ;;  %7293 = vmatmul.bf16.vlgmr.msra.gmra.mxu0 %v17446_v3 }
 0x461   :  { %v15305_v50 = vld [vmem:[#allocation8 + $0x134c] sm:$0xf]  ;;  %v12840_v12 = vor.u32 %v15241_v35, %v12837_v52  ;;  %v5360_v7 = vadd.f32 %v17504_v30, %v5341_v34  ;;  %7423 = vmatpush.bf16.msrb.mxu3 %v13512_v25  ;;  %v5324_v35 = vadd.f32 %v5323_v61, %v18024_v15  ;;  %v5342_v25 = vpop.f32.mrf.mxu1  ;;  %v13675_v61 = vld [vmem:[#allocation8 + $0x17d0] sm:$0xf] }
 0x462   :  { %v13093_v55 = vld [vmem:[#allocation8 + $0x1368] sm:$0xf0] }
 0x463   :  { %v13096_v43 = vor.u32 %v15305_v50, %v13093_v55  ;;  %v15337_v19 = vld [vmem:[#allocation8 + $0x144c] sm:$0xf]  ;;  %7363 = vmatpush.bf16.msrb.mxu0 %v12840_v12  ;;  %v17524_v4 = vadd.f32 %v17506_v58, %v5360_v7 }
 0x464   :  { %v13221_v9 = vld [vmem:[#allocation8 + $0x1468] sm:$0xf0] }
 0x465   :  { %v15401_v60 = vld [vmem:[#allocation8 + $0x164c] sm:$0xf]  ;;  %v13224_v18 = vor.u32 %v15337_v19, %v13221_v9  ;;  %7382 = vmatpush.bf16.msra.mxu1 %v13096_v43 }
 0x466   :  { %v13477_v27 = vld [vmem:[#allocation8 + $0x1668] sm:$0xf0] }
 0x467   :  { %v13480_v23 = vor.u32 %v15401_v60, %v13477_v27  ;;  %v15233_v24 = vld [vmem:[#allocation8 + $0x110c] sm:$0xf]  ;;  %7405 = vmatpush.bf16.msrb.mxu2 %v13224_v18  ;;  %v5343_v60 = vadd.f32 %v5342_v25, %v5324_v35  ;;  %v15454_v18 = vld [vmem:[#allocation8 + $0x17ec] sm:$0xf0]  ;;  %v17537_v25 = vpop.f32.mrf.mxu3 }
 0x468   :  { %v12805_v20 = vld [vmem:[#allocation8 + $0x1128] sm:$0xf0] }
 0x469   :  { %v15297_v44 = vld [vmem:[#allocation8 + $0x130c] sm:$0xf]  ;;  %v12808_v30 = vor.u32 %v15233_v24, %v12805_v20  ;;  %7424 = vmatpush.bf16.msrb.mxu3 %v13480_v23  ;;  %v13419_v24 = vld [vmem:[#allocation8 + $0x15d0] sm:$0xf] }
 0x46a   :  { %v13061_v5 = vld [vmem:[#allocation8 + $0x1328] sm:$0xf0]  ;;  %v15390_v20 = vld [vmem:[#allocation8 + $0x15ec] sm:$0xf0]  ;;  %7317 = vmatmul.bf16.gmra.mxu1 %v17434_v38 }
 0x46b   :  { %v15329_v2 = vld [vmem:[#allocation8 + $0x140c] sm:$0xf]  ;;  %v13064_v52 = vor.u32 %v15297_v44, %v13061_v5  ;;  %7364 = vmatpush.bf16.msrb.mxu0 %v12808_v30  ;;  %v13420_v15 = vor.u32 %v15390_v20, %v13419_v24  ;;  %v5362_v44 = vadd.f32 %v17513_v10, %v5343_v60  ;;  %v13676_v5 = vor.u32 %v15454_v18, %v13675_v61  ;;  %v17535_v30 = vpop.f32.mrf.mxu2  ;;  %v15446_v60 = vld [vmem:[#allocation8 + $0x17ac] sm:$0xf0] }
 0x46c   :  { %v13189_v46 = vld [vmem:[#allocation8 + $0x1428] sm:$0xf0] }
 0x46d   :  { %v13192_v58 = vor.u32 %v15329_v2, %v13189_v46  ;;  %v15393_v50 = vld [vmem:[#allocation8 + $0x160c] sm:$0xf]  ;;  %7383 = vmatpush.bf16.msra.mxu1 %v13064_v52  ;;  %v17533_v23 = vadd.f32 %v17515_v17, %v5362_v44  ;;  %v5392_v52 = vpop.f32.mrf.mxu0 }
 0x46e   :  { %v13445_v55 = vld [vmem:[#allocation8 + $0x1628] sm:$0xf0] }
 0x46f   :  { %v15225_v34 = vld [vmem:[#allocation8 + $0x10cc] sm:$0xf]  ;;  %v13448_v12 = vor.u32 %v15393_v50, %v13445_v55  ;;  %7406 = vmatpush.bf16.msrb.mxu2 %v13192_v58  ;;  %18025 = vst [vmem:[#allocation39_spill] sm:$0xff] %v17533_v23  ;;  %v13387_v58 = vld [vmem:[#allocation8 + $0x1590] sm:$0xf] }
 0x470   :  { %v12773_v43 = vld [vmem:[#allocation8 + $0x10e8] sm:$0xf0]  ;;  %v15382_v55 = vld [vmem:[#allocation8 + $0x15ac] sm:$0xf0]  ;;  %7298 = vmatmul.bf16.gmra.mxu0 %v17432_v0 }
 0x471   :  { %v15289_v19 = vld [vmem:[#allocation8 + $0x12cc] sm:$0xf]  ;;  %v12776_v27 = vor.u32 %v15225_v34, %v12773_v43  ;;  %7425 = vmatpush.bf16.msrb.mxu3 %v13448_v12  ;;  %v18026_v34 = vld [vmem:[#allocation25_spill] sm:$0xff]  ;;  %v5411_v43 = vpop.f32.mrf.mxu1  ;;  %v15358_v23 = vld [vmem:[#allocation8 + $0x14ec] sm:$0xf0] }
 0x472   :  { %v13029_v9 = vld [vmem:[#allocation8 + $0x12e8] sm:$0xf0]  ;;  %v5393_v12 = vadd.f32 %v5392_v52, %v18026_v34  ;;  %7407 = vmatmul.bf16.vlgmr.msrb.gmra.mxu2 %v17412_v53 }
 0x473   :  { %v13032_v7 = vor.u32 %v15289_v19, %v13029_v9  ;;  %7365 = vmatpush.bf16.msrb.mxu0 %v12776_v27  ;;  %7475 = vmatpush.bf16.msra.mxu2 %v13420_v15  ;;  %v15217_v2 = vld [vmem:[#allocation8 + $0x108c] sm:$0xf]  ;;  %v13388_v19 = vor.u32 %v15382_v55, %v13387_v58  ;;  %v13643_v9 = vld [vmem:[#allocation8 + $0x1790] sm:$0xf]  ;;  %v17548_v55 = vpop.f32.mrf.mxu2 }
 0x474   :  { %v12741_v46 = vld [vmem:[#allocation8 + $0x10a8] sm:$0xf0]  ;;  %v5412_v15 = vadd.f32 %v5411_v43, %v5393_v12  ;;  %7426 = vmatmul.bf16.vlgmr.msrb.gmra.mxu3 %v17419_v48 }
 0x475   :  { %7384 = vmatpush.bf16.msra.mxu1 %v13032_v7  ;;  %v15281_v35 = vld [vmem:[#allocation8 + $0x128c] sm:$0xf]  ;;  %7494 = vmatpush.bf16.msra.mxu3 %v13676_v5  ;;  %v12744_v50 = vor.u32 %v15217_v2, %v12741_v46  ;;  %v13644_v7 = vor.u32 %v15446_v60, %v13643_v9  ;;  %v13355_v5 = vld [vmem:[#allocation8 + $0x1550] sm:$0xf]  ;;  %v5394_v9 = vpop.f32.mrf.mxu0 }
 0x476   :  { %v12997_v10 = vld [vmem:[#allocation8 + $0x12a8] sm:$0xf0]  ;;  %v15374_v2 = vld [vmem:[#allocation8 + $0x156c] sm:$0xf0]  ;;  %v5431_v52 = vadd.f32 %v17526_v36, %v5412_v15 }
 0x477   :  { %v13000_v17 = vor.u32 %v15281_v35, %v12997_v10  ;;  %v15209_v27 = vld [vmem:[#allocation8 + $0x104c] sm:$0xf]  ;;  %7366 = vmatpush.bf16.msrb.mxu0 %v12744_v50  ;;  %v13611_v46 = vld [vmem:[#allocation8 + $0x1750] sm:$0xf]  ;;  %7476 = vmatpush.bf16.msra.mxu2 %v13388_v19  ;;  %v13356_v50 = vor.u32 %v15374_v2, %v13355_v5 }
 0x478   :  { %v12709_v24 = vld [vmem:[#allocation8 + $0x1068] sm:$0xf0]  ;;  %v15438_v35 = vld [vmem:[#allocation8 + $0x176c] sm:$0xf0]  ;;  %v17546_v58 = vadd.f32 %v17528_v31, %v5431_v52 }
 0x479   :  { %v15273_v20 = vld [vmem:[#allocation8 + $0x124c] sm:$0xf]  ;;  %7385 = vmatpush.bf16.msra.mxu1 %v13000_v17  ;;  %v12712_v18 = vor.u32 %v15209_v27, %v12709_v24  ;;  %7495 = vmatpush.bf16.msra.mxu3 %v13644_v7  ;;  %v13612_v10 = vor.u32 %v15438_v35, %v13611_v46  ;;  %v17550_v17 = vpop.f32.mrf.mxu3  ;;  %v13323_v27 = vld [vmem:[#allocation8 + $0x1510] sm:$0xf]  ;;  %v18028_v24 = vld [vmem:[#allocation29_spill] sm:$0xff] }
 0x47a   :  { %v12965_v61 = vld [vmem:[#allocation8 + $0x1268] sm:$0xf0]  ;;  %18027 = vst [vmem:[#allocation32_spill] sm:$0xff] %v17546_v58  ;;  %v15366_v19 = vld [vmem:[#allocation8 + $0x152c] sm:$0xf0]  ;;  %v5395_v7 = vadd.f32 %v5394_v9, %v18028_v24 }
 0x47b   :  { %v12968_v44 = vor.u32 %v15273_v20, %v12965_v61  ;;  %7367 = vmatpush.bf16.msrb.mxu0 %v12712_v18  ;;  %v15201_v34 = vld [vmem:[#allocation8 + $0x100c] sm:$0xf]  ;;  %v5413_v20 = vpop.f32.mrf.mxu1  ;;  %7477 = vmatpush.bf16.msra.mxu2 %v13356_v50  ;;  %v13324_v31 = vor.u32 %v15366_v19, %v13323_v27  ;;  %v13579_v15 = vld [vmem:[#allocation8 + $0x1710] sm:$0xf] }
 0x47c   :  { %v12677_v12 = vld [vmem:[#allocation8 + $0x1028] sm:$0xf0]  ;;  %v15430_v18 = vld [vmem:[#allocation8 + $0x172c] sm:$0xf0]  ;;  %v5414_v52 = vadd.f32 %v5413_v20, %v5395_v7 }
 0x47d   :  { %7386 = vmatpush.bf16.msra.mxu1 %v12968_v44  ;;  %v15265_v43 = vld [vmem:[#allocation8 + $0x120c] sm:$0xf]  ;;  %v12680_v36 = vor.u32 %v15201_v34, %v12677_v12  ;;  %v12907_v5 = vld [vmem:[#allocation8 + $0x11d0] sm:$0xf]  ;;  %7496 = vmatpush.bf16.msra.mxu3 %v13612_v10  ;;  %v13580_v44 = vor.u32 %v15430_v18, %v13579_v15 }
 0x47e   :  { %v12933_v60 = vld [vmem:[#allocation8 + $0x1228] sm:$0xf0]  ;;  %v15262_v2 = vld [vmem:[#allocation8 + $0x11ec] sm:$0xf0]  ;;  %v5433_v50 = vadd.f32 %v17535_v30, %v5414_v52 }
 0x47f   :  { %v12936_v61 = vor.u32 %v15265_v43, %v12933_v60  ;;  %7368 = vmatpush.bf16.msrb.mxu0 %v12680_v36  ;;  %v13163_v46 = vld [vmem:[#allocation8 + $0x13d0] sm:$0xf]  ;;  %v12908_v34 = vor.u32 %v15262_v2, %v12907_v5  ;;  %7478 = vmatpush.bf16.msra.mxu2 %v13324_v31  ;;  %v17557_v60 = vpop.f32.mrf.mxu2  ;;  %v18030_v5 = vld [vmem:[#allocation37_spill] sm:$0xff] }
 0x480   :  { %v15326_v35 = vld [vmem:[#allocation8 + $0x13ec] sm:$0xf0]  ;;  %v17555_v36 = vadd.f32 %v17537_v25, %v5433_v50 }
 0x481   :  { %7387 = vmatpush.bf16.msra.mxu1 %v12936_v61  ;;  %v13164_v12 = vor.u32 %v15326_v35, %v13163_v46  ;;  %v13291_v58 = vld [vmem:[#allocation8 + $0x14d0] sm:$0xf]  ;;  %7497 = vmatpush.bf16.msra.mxu3 %v13580_v44  ;;  %v17559_v20 = vpop.f32.mrf.mxu3  ;;  %v5397_v61 = vpop.f32.mrf.mxu0 }
 0x482   :  { %v13547_v9 = vld [vmem:[#allocation8 + $0x16d0] sm:$0xf]  ;;  %v13292_v43 = vor.u32 %v15358_v23, %v13291_v58  ;;  %18029 = vst [vmem:[#allocation31_spill] sm:$0xff] %v17555_v36  ;;  %v5398_v23 = vadd.f32 %v5397_v61, %v18030_v5  ;;  %v13421_v36 = vld [vmem:[#allocation8 + $0x15f0] sm:$0xf0]  ;;  %7369 = vmatmul.bf16.vlgmr.msrb.gmra.mxu0 %v17446_v3  ;;  %7412 = vmatmul.bf16.gmra.mxu2 %v17397_v26 }
 0x483   :  { %v15422_v24 = vld [vmem:[#allocation8 + $0x16ec] sm:$0xf0]  ;;  %7437 = vmatpush.bf16.msra.mxu0 %v12908_v34  ;;  %v5416_v58 = vpop.f32.mrf.mxu1 }
 0x484   :  { %v13548_v10 = vor.u32 %v15422_v24, %v13547_v9  ;;  %v12875_v27 = vld [vmem:[#allocation8 + $0x1190] sm:$0xf]  ;;  %7479 = vmatpush.bf16.msra.mxu2 %v13292_v43  ;;  %v5417_v24 = vadd.f32 %v5416_v58, %v5398_v23  ;;  %7388 = vmatmul.bf16.vlgmr.msra.gmra.mxu1 %v17450_v62 }
 0x485   :  { %7456 = vmatpush.bf16.msrb.mxu1 %v13164_v12  ;;  %v15254_v19 = vld [vmem:[#allocation8 + $0x11ac] sm:$0xf0]  ;;  %7431 = vmatmul.bf16.gmra.mxu3 %v17399_v22 }
 0x486   :  { %v13131_v7 = vld [vmem:[#allocation8 + $0x1390] sm:$0xf]  ;;  %v12876_v15 = vor.u32 %v15254_v19, %v12875_v27  ;;  %7498 = vmatpush.bf16.msra.mxu3 %v13548_v10  ;;  %v5436_v10 = vadd.f32 %v17548_v55, %v5417_v24 }
 0x487   :  { %v15318_v18 = vld [vmem:[#allocation8 + $0x13ac] sm:$0xf0] }
 0x488   :  { %v13259_v30 = vld [vmem:[#allocation8 + $0x1490] sm:$0xf]  ;;  %v13132_v44 = vor.u32 %v15318_v18, %v13131_v7  ;;  %7438 = vmatpush.bf16.msra.mxu0 %v12876_v15 }
 0x489   :  { %v15350_v31 = vld [vmem:[#allocation8 + $0x14ac] sm:$0xf0] }
 0x48a   :  { %v13260_v2 = vor.u32 %v15350_v31, %v13259_v30  ;;  %v13515_v25 = vld [vmem:[#allocation8 + $0x1690] sm:$0xf]  ;;  %7457 = vmatpush.bf16.msrb.mxu1 %v13132_v44  ;;  %v17568_v30 = vadd.f32 %v17550_v17, %v5436_v10  ;;  %v17570_v31 = vpop.f32.mrf.mxu2  ;;  %v17572_v44 = vpop.f32.mrf.mxu3 }
 0x48b   :  { %v15414_v46 = vld [vmem:[#allocation8 + $0x16ac] sm:$0xf0] }
 0x48c   :  { %v12843_v35 = vld [vmem:[#allocation8 + $0x1150] sm:$0xf]  ;;  %v13516_v52 = vor.u32 %v15414_v46, %v13515_v25  ;;  %7480 = vmatpush.bf16.msra.mxu2 %v13260_v2  ;;  %18031 = vst [vmem:[#allocation26_spill] sm:$0xff] %v17568_v30  ;;  %v5399_v25 = vpop.f32.mrf.mxu0  ;;  %v15386_v30 = vld [vmem:[#allocation8 + $0x15d4] sm:$0xf] }
 0x48d   :  { %v15246_v34 = vld [vmem:[#allocation8 + $0x116c] sm:$0xf0] }
 0x48e   :  { %v13099_v12 = vld [vmem:[#allocation8 + $0x1350] sm:$0xf]  ;;  %v12844_v50 = vor.u32 %v15246_v34, %v12843_v35  ;;  %7499 = vmatpush.bf16.msra.mxu3 %v13516_v52  ;;  %v18032_v34 = vld [vmem:[#allocation38_spill] sm:$0xff] }
 0x48f   :  { %v15310_v9 = vld [vmem:[#allocation8 + $0x136c] sm:$0xf0]  ;;  %v5400_v52 = vadd.f32 %v5399_v25, %v18032_v34  ;;  %v15450_v25 = vld [vmem:[#allocation8 + $0x17d4] sm:$0xf]  ;;  %v13424_v34 = vor.u32 %v15386_v30, %v13421_v36 }
 0x490   :  { %v13100_v27 = vor.u32 %v15310_v9, %v13099_v12  ;;  %v13227_v19 = vld [vmem:[#allocation8 + $0x1450] sm:$0xf]  ;;  %7439 = vmatpush.bf16.msra.mxu0 %v12844_v50  ;;  %v5418_v12 = vpop.f32.mrf.mxu1 }
 0x491   :  { %v15342_v61 = vld [vmem:[#allocation8 + $0x146c] sm:$0xf0]  ;;  %v5419_v10 = vadd.f32 %v5418_v12, %v5400_v52 }
 0x492   :  { %v13483_v43 = vld [vmem:[#allocation8 + $0x1650] sm:$0xf]  ;;  %v13228_v15 = vor.u32 %v15342_v61, %v13227_v19  ;;  %7458 = vmatpush.bf16.msrb.mxu1 %v13100_v27  ;;  %v17581_v12 = vpop.f32.mrf.mxu3  ;;  %7374 = vmatmul.bf16.gmra.mxu0 %v17432_v0 }
 0x493   :  { %v15406_v7 = vld [vmem:[#allocation8 + $0x166c] sm:$0xf0] }
 0x494   :  { %v13484_v18 = vor.u32 %v15406_v7, %v13483_v43  ;;  %v12811_v5 = vld [vmem:[#allocation8 + $0x1110] sm:$0xf]  ;;  %7481 = vmatpush.bf16.msra.mxu2 %v13228_v15  ;;  %v13677_v15 = vld [vmem:[#allocation8 + $0x17f0] sm:$0xf0]  ;;  %v5468_v36 = vpop.f32.mrf.mxu0  ;;  %7393 = vmatmul.bf16.gmra.mxu1 %v17434_v38 }
 0x495   :  { %v15238_v23 = vld [vmem:[#allocation8 + $0x112c] sm:$0xf0] }
 0x496   :  { %v13067_v58 = vld [vmem:[#allocation8 + $0x1310] sm:$0xf]  ;;  %v12812_v55 = vor.u32 %v15238_v23, %v12811_v5  ;;  %7500 = vmatpush.bf16.msra.mxu3 %v13484_v18 }
 0x497   :  { %v15302_v46 = vld [vmem:[#allocation8 + $0x132c] sm:$0xf0] }
 0x498   :  { %v13195_v35 = vld [vmem:[#allocation8 + $0x1410] sm:$0xf]  ;;  %v13068_v9 = vor.u32 %v15302_v46, %v13067_v58  ;;  %7440 = vmatpush.bf16.msra.mxu0 %v12812_v55  ;;  %v5438_v58 = vadd.f32 %v17557_v60, %v5419_v10  ;;  %v13680_v46 = vor.u32 %v15450_v25, %v13677_v15  ;;  %v17579_v55 = vpop.f32.mrf.mxu2 }
 0x499   :  { %v15334_v2 = vld [vmem:[#allocation8 + $0x142c] sm:$0xf0] }
 0x49a   :  { %v13196_v17 = vor.u32 %v15334_v2, %v13195_v35  ;;  %v13451_v24 = vld [vmem:[#allocation8 + $0x1610] sm:$0xf]  ;;  %7459 = vmatpush.bf16.msrb.mxu1 %v13068_v9  ;;  %v17577_v18 = vadd.f32 %v17559_v20, %v5438_v58  ;;  %v15378_v9 = vld [vmem:[#allocation8 + $0x1594] sm:$0xf] }
 0x49b   :  { %v15398_v50 = vld [vmem:[#allocation8 + $0x162c] sm:$0xf0]  ;;  %v15370_v58 = vld [vmem:[#allocation8 + $0x1554] sm:$0xf] }
 0x49c   :  { %v12779_v19 = vld [vmem:[#allocation8 + $0x10d0] sm:$0xf]  ;;  %v13452_v27 = vor.u32 %v15398_v50, %v13451_v24  ;;  %7482 = vmatpush.bf16.msra.mxu2 %v13196_v17  ;;  %v13389_v17 = vld [vmem:[#allocation8 + $0x15b0] sm:$0xf0]  ;;  %v5469_v24 = vadd.f32 %v5468_v36, %v17233_v51  ;;  %v5487_v50 = vpop.f32.mrf.mxu1 }
 0x49d   :  { %v15230_v61 = vld [vmem:[#allocation8 + $0x10ec] sm:$0xf0]  ;;  %v15434_v51 = vld [vmem:[#allocation8 + $0x1754] sm:$0xf] }
 0x49e   :  { %v13035_v43 = vld [vmem:[#allocation8 + $0x12d0] sm:$0xf]  ;;  %v12780_v5 = vor.u32 %v15230_v61, %v12779_v19  ;;  %7501 = vmatpush.bf16.msra.mxu3 %v13452_v27  ;;  %v13392_v19 = vor.u32 %v15378_v9, %v13389_v17  ;;  %v15442_v27 = vld [vmem:[#allocation8 + $0x1794] sm:$0xf]  ;;  %v5488_v25 = vadd.f32 %v5487_v50, %v5469_v24  ;;  %v17594_v9 = vpop.f32.mrf.mxu3  ;;  %v5470_v17 = vpop.f32.mrf.mxu0 }
 0x49f   :  { %v15294_v7 = vld [vmem:[#allocation8 + $0x12ec] sm:$0xf0]  ;;  %v13645_v61 = vld [vmem:[#allocation8 + $0x17b0] sm:$0xf0]  ;;  %7483 = vmatmul.bf16.vlgmr.msra.gmra.mxu2 %v17412_v53 }
 0x4a0   :  { %v13036_v23 = vor.u32 %v15294_v7, %v13035_v43  ;;  %7441 = vmatpush.bf16.msra.mxu0 %v12780_v5  ;;  %7551 = vmatpush.bf16.msrb.mxu2 %v13424_v34  ;;  %v12747_v35 = vld [vmem:[#allocation8 + $0x1090] sm:$0xf]  ;;  %v13648_v7 = vor.u32 %v15442_v27, %v13645_v61 }
 0x4a1   :  { %v15222_v2 = vld [vmem:[#allocation8 + $0x10ac] sm:$0xf0]  ;;  %7502 = vmatmul.bf16.vlgmr.msra.gmra.mxu3 %v17419_v48 }
 0x4a2   :  { %7460 = vmatpush.bf16.msrb.mxu1 %v13036_v23  ;;  %v13003_v52 = vld [vmem:[#allocation8 + $0x1290] sm:$0xf]  ;;  %7570 = vmatpush.bf16.msrb.mxu3 %v13680_v46  ;;  %v12748_v30 = vor.u32 %v15222_v2, %v12747_v35  ;;  %v13357_v46 = vld [vmem:[#allocation8 + $0x1570] sm:$0xf0]  ;;  %v5507_v2 = vadd.f32 %v17570_v31, %v5488_v25  ;;  %v5471_v31 = vadd.f32 %v5470_v17, %v17247_v13 }
 0x4a3   :  { %v15286_v60 = vld [vmem:[#allocation8 + $0x12ac] sm:$0xf0]  ;;  %v13613_v35 = vld [vmem:[#allocation8 + $0x1770] sm:$0xf0] }
 0x4a4   :  { %v13004_v20 = vor.u32 %v15286_v60, %v13003_v52  ;;  %v12715_v43 = vld [vmem:[#allocation8 + $0x1050] sm:$0xf]  ;;  %7442 = vmatpush.bf16.msra.mxu0 %v12748_v30  ;;  %7552 = vmatpush.bf16.msrb.mxu2 %v13392_v19  ;;  %v13360_v52 = vor.u32 %v15370_v58, %v13357_v46  ;;  %v13616_v36 = vor.u32 %v15434_v51, %v13613_v35  ;;  %v17592_v60 = vpop.f32.mrf.mxu2  ;;  %v5489_v27 = vpop.f32.mrf.mxu1  ;;  %v15258_v25 = vld [vmem:[#allocation8 + $0x11d4] sm:$0xf] }
 0x4a5   :  { %v15214_v10 = vld [vmem:[#allocation8 + $0x106c] sm:$0xf0]  ;;  %v17590_v30 = vadd.f32 %v17572_v44, %v5507_v2  ;;  %v12909_v58 = vld [vmem:[#allocation8 + $0x11f0] sm:$0xf0] }
 0x4a6   :  { %v12971_v5 = vld [vmem:[#allocation8 + $0x1250] sm:$0xf]  ;;  %7461 = vmatpush.bf16.msrb.mxu1 %v13004_v20  ;;  %v12716_v34 = vor.u32 %v15214_v10, %v12715_v43  ;;  %7571 = vmatpush.bf16.msrb.mxu3 %v13648_v7  ;;  %v15362_v43 = vld [vmem:[#allocation8 + $0x1514] sm:$0xf]  ;;  %v12912_v13 = vor.u32 %v15258_v25, %v12909_v58 }
 0x4a7   :  { %v15278_v23 = vld [vmem:[#allocation8 + $0x126c] sm:$0xf0]  ;;  %18033 = vst [vmem:[#allocation33_spill] sm:$0xff] %v17590_v30  ;;  %v13325_v7 = vld [vmem:[#allocation8 + $0x1530] sm:$0xf0] }
 0x4a8   :  { %v12972_v15 = vor.u32 %v15278_v23, %v12971_v5  ;;  %7443 = vmatpush.bf16.msra.mxu0 %v12716_v34  ;;  %v12683_v24 = vld [vmem:[#allocation8 + $0x1010] sm:$0xf]  ;;  %7553 = vmatpush.bf16.msrb.mxu2 %v13360_v52  ;;  %v13328_v10 = vor.u32 %v15362_v43, %v13325_v7  ;;  %v15426_v5 = vld [vmem:[#allocation8 + $0x1714] sm:$0xf]  ;;  %v5490_v34 = vadd.f32 %v5489_v27, %v5471_v31  ;;  %v15359_v30 = vld [vmem:[#allocation8 + $0x14f4] sm:$0xf0] }
 0x4a9   :  { %v15206_v50 = vld [vmem:[#allocation8 + $0x102c] sm:$0xf0]  ;;  %v13581_v23 = vld [vmem:[#allocation8 + $0x1730] sm:$0xf0] }
 0x4aa   :  { %7462 = vmatpush.bf16.msrb.mxu1 %v12972_v15  ;;  %v12939_v20 = vld [vmem:[#allocation8 + $0x1210] sm:$0xf]  ;;  %v12684_v19 = vor.u32 %v15206_v50, %v12683_v24  ;;  %7572 = vmatpush.bf16.msrb.mxu3 %v13616_v36  ;;  %v13584_v15 = vor.u32 %v15426_v5, %v13581_v23  ;;  %v15322_v46 = vld [vmem:[#allocation8 + $0x13d4] sm:$0xf]  ;;  %v5509_v24 = vadd.f32 %v17579_v55, %v5490_v34 }
 0x4ab   :  { %v15270_v61 = vld [vmem:[#allocation8 + $0x122c] sm:$0xf0]  ;;  %v13165_v51 = vld [vmem:[#allocation8 + $0x13f0] sm:$0xf0] }
 0x4ac   :  { %v12940_v44 = vor.u32 %v15270_v61, %v12939_v20  ;;  %7444 = vmatpush.bf16.msra.mxu0 %v12684_v19  ;;  %v13168_v35 = vor.u32 %v15322_v46, %v13165_v51  ;;  %v15354_v2 = vld [vmem:[#allocation8 + $0x14d4] sm:$0xf]  ;;  %7554 = vmatpush.bf16.msrb.mxu2 %v13328_v10  ;;  %v17599_v31 = vadd.f32 %v17581_v12, %v5509_v24  ;;  %v5513_v27 = vpop.f32.mrf.mxu2  ;;  %v5532_v19 = vpop.f32.mrf.mxu3 }
 0x4ad   :  { %v13293_v52 = vld [vmem:[#allocation8 + $0x14f0] sm:$0xf0]  ;;  %v5473_v61 = vpop.f32.mrf.mxu0  ;;  %v5492_v7 = vpop.f32.mrf.mxu1 }
 0x4ae   :  { %7463 = vmatpush.bf16.msrb.mxu1 %v12940_v44  ;;  %v15418_v17 = vld [vmem:[#allocation8 + $0x16d4] sm:$0xf]  ;;  %v13296_v36 = vor.u32 %v15354_v2, %v13293_v52  ;;  %7573 = vmatpush.bf16.msrb.mxu3 %v13584_v15  ;;  %v5474_v43 = vadd.f32 %v5473_v61, %v17260_v57 }
 0x4af   :  { %v13549_v50 = vld [vmem:[#allocation8 + $0x16f0] sm:$0xf0]  ;;  %7445 = vmatmul.bf16.vlgmr.msra.gmra.mxu0 %v17446_v3  ;;  %7488 = vmatmul.bf16.gmra.mxu2 %v17397_v26 }
 0x4b0   :  { %7513 = vmatpush.bf16.msrb.mxu0 %v12912_v13  ;;  %v13552_v20 = vor.u32 %v15418_v17, %v13549_v50  ;;  %7555 = vmatpush.bf16.msrb.mxu2 %v13296_v36  ;;  %v15250_v44 = vld [vmem:[#allocation8 + $0x1194] sm:$0xf]  ;;  %v5493_v5 = vadd.f32 %v5492_v7, %v5474_v43 }
 0x4b1   :  { %v12877_v55 = vld [vmem:[#allocation8 + $0x11b0] sm:$0xf0]  ;;  %7464 = vmatmul.bf16.vlgmr.msrb.gmra.mxu1 %v17450_v62  ;;  %7507 = vmatmul.bf16.gmra.mxu3 %v17399_v22 }
 0x4b2   :  { %7532 = vmatpush.bf16.msra.mxu1 %v13168_v35  ;;  %7574 = vmatpush.bf16.msrb.mxu3 %v13552_v20  ;;  %v15314_v10 = vld [vmem:[#allocation8 + $0x1394] sm:$0xf]  ;;  %v12880_v23 = vor.u32 %v15250_v44, %v12877_v55  ;;  %v5512_v13 = vadd.f32 %v17592_v60, %v5493_v5 }
 0x4b3   :  { %v13133_v25 = vld [vmem:[#allocation8 + $0x13b0] sm:$0xf0] }
 0x4b4   :  { %v15346_v34 = vld [vmem:[#allocation8 + $0x1494] sm:$0xf]  ;;  %v13136_v15 = vor.u32 %v15314_v10, %v13133_v25  ;;  %7514 = vmatpush.bf16.msrb.mxu0 %v12880_v23  ;;  %v17608_v43 = vadd.f32 %v17594_v9, %v5512_v13  ;;  %v7180_v7 = vpop.f32.mrf.mxu2  ;;  %v7199_v55 = vpop.f32.mrf.mxu3 }
 0x4b5   :  { %v13261_v12 = vld [vmem:[#allocation8 + $0x14b0] sm:$0xf0]  ;;  %v5475_v10 = vpop.f32.mrf.mxu0  ;;  %v5494_v25 = vpop.f32.mrf.mxu1 }
 0x4b6   :  { %v13264_v58 = vor.u32 %v15346_v34, %v13261_v12  ;;  %v15410_v57 = vld [vmem:[#allocation8 + $0x1694] sm:$0xf]  ;;  %7533 = vmatpush.bf16.msra.mxu1 %v13136_v15  ;;  %18034 = vst [vmem:[#allocation27_spill] sm:$0xff] %v17608_v43  ;;  %v5476_v23 = vadd.f32 %v5475_v10, %v17277_v56  ;;  %v13555_v43 = vld [vmem:[#allocation8 + $0x16d8] sm:$0xf] }
 0x4b7   :  { %v13517_v46 = vld [vmem:[#allocation8 + $0x16b0] sm:$0xf0] }
 0x4b8   :  { %v15242_v51 = vld [vmem:[#allocation8 + $0x1154] sm:$0xf]  ;;  %v13520_v35 = vor.u32 %v15410_v57, %v13517_v46  ;;  %7556 = vmatpush.bf16.msrb.mxu2 %v13264_v58  ;;  %v5495_v34 = vadd.f32 %v5494_v25, %v5476_v23  ;;  %v13427_v25 = vld [vmem:[#allocation8 + $0x15d8] sm:$0xf] }
 0x4b9   :  { %v12845_v2 = vld [vmem:[#allocation8 + $0x1170] sm:$0xf0] }
 0x4ba   :  { %v15306_v52 = vld [vmem:[#allocation8 + $0x1354] sm:$0xf]  ;;  %v12848_v24 = vor.u32 %v15242_v51, %v12845_v2  ;;  %7575 = vmatpush.bf16.msrb.mxu3 %v13520_v35  ;;  %v5514_v12 = vadd.f32 %v5513_v27, %v5495_v34  ;;  %v15391_v34 = vld [vmem:[#allocation8 + $0x15f4] sm:$0xf0] }
 0x4bb   :  { %v13101_v17 = vld [vmem:[#allocation8 + $0x1370] sm:$0xf0] }
 0x4bc   :  { %v13104_v36 = vor.u32 %v15306_v52, %v13101_v17  ;;  %v15338_v50 = vld [vmem:[#allocation8 + $0x1454] sm:$0xf]  ;;  %7515 = vmatpush.bf16.msrb.mxu0 %v12848_v24  ;;  %v17611_v15 = vadd.f32 %v5532_v19, %v5514_v12  ;;  %v7182_v9 = vpop.f32.mrf.mxu2  ;;  %v17613_v58 = vpop.f32.mrf.mxu3  ;;  %v13683_v12 = vld [vmem:[#allocation8 + $0x17d8] sm:$0xf] }
 0x4bd   :  { %v13229_v20 = vld [vmem:[#allocation8 + $0x1470] sm:$0xf0]  ;;  %v7142_v57 = vpop.f32.mrf.mxu0  ;;  %v7161_v46 = vpop.f32.mrf.mxu1 }
 0x4be   :  { %v15402_v61 = vld [vmem:[#allocation8 + $0x1654] sm:$0xf]  ;;  %v13232_v60 = vor.u32 %v15338_v50, %v13229_v20  ;;  %7534 = vmatpush.bf16.msra.mxu1 %v13104_v36  ;;  %18035 = vst [vmem:[#allocation41_spill] sm:$0xff] %v17611_v15  ;;  %v7162_v2 = vadd.f32 %v7161_v46, %v7142_v57  ;;  %v13299_v15 = vld [vmem:[#allocation8 + $0x14d8] sm:$0xf] }
 0x4bf   :  { %v13485_v44 = vld [vmem:[#allocation8 + $0x1670] sm:$0xf0]  ;;  %7450 = vmatmul.bf16.gmra.mxu0 %v17432_v0 }
 0x4c0   :  { %v13488_v5 = vor.u32 %v15402_v61, %v13485_v44  ;;  %7557 = vmatpush.bf16.msrb.mxu2 %v13232_v60  ;;  %v15234_v51 = vld [vmem:[#allocation8 + $0x1114] sm:$0xf]  ;;  %v7181_v61 = vadd.f32 %v7180_v7, %v7162_v2  ;;  %v13428_v7 = vor.u32 %v15391_v34, %v13427_v25 }
 0x4c1   :  { %v12813_v13 = vld [vmem:[#allocation8 + $0x1130] sm:$0xf0]  ;;  %7469 = vmatmul.bf16.gmra.mxu1 %v17434_v38 }
 0x4c2   :  { %7576 = vmatpush.bf16.msrb.mxu3 %v13488_v5  ;;  %v15298_v35 = vld [vmem:[#allocation8 + $0x1314] sm:$0xf]  ;;  %v12816_v52 = vor.u32 %v15234_v51, %v12813_v13  ;;  %v7200_v57 = vadd.f32 %v7199_v55, %v7181_v61  ;;  %v15455_v51 = vld [vmem:[#allocation8 + $0x17f4] sm:$0xf0] }
 0x4c3   :  { %v13069_v56 = vld [vmem:[#allocation8 + $0x1330] sm:$0xf0]  ;;  %v15383_v61 = vld [vmem:[#allocation8 + $0x15b4] sm:$0xf0] }
 0x4c4   :  { %v15330_v17 = vld [vmem:[#allocation8 + $0x1414] sm:$0xf]  ;;  %v13072_v36 = vor.u32 %v15298_v35, %v13069_v56  ;;  %7516 = vmatpush.bf16.msrb.mxu0 %v12816_v52  ;;  %v17619_v13 = vpop.f32.mrf.mxu2  ;;  %v13684_v35 = vor.u32 %v15455_v51, %v13683_v12  ;;  %v17622_v2 = vadd.f32 %v7200_v57, %v17250_v54  ;;  %v17624_v56 = vpop.f32.mrf.mxu3  ;;  %v13651_v54 = vld [vmem:[#allocation8 + $0x1798] sm:$0xf] }
 0x4c5   :  { %v13197_v24 = vld [vmem:[#allocation8 + $0x1430] sm:$0xf0]  ;;  %v7144_v52 = vpop.f32.mrf.mxu0  ;;  %v13363_v51 = vld [vmem:[#allocation8 + $0x1558] sm:$0xf] }
 0x4c6   :  { %v13200_v50 = vor.u32 %v15330_v17, %v13197_v24  ;;  %v15394_v27 = vld [vmem:[#allocation8 + $0x1614] sm:$0xf]  ;;  %7535 = vmatpush.bf16.msra.mxu1 %v13072_v36  ;;  %v7163_v17 = vpop.f32.mrf.mxu1 }
 0x4c7   :  { %v13453_v19 = vld [vmem:[#allocation8 + $0x1630] sm:$0xf0] }
 0x4c8   :  { %v15226_v20 = vld [vmem:[#allocation8 + $0x10d4] sm:$0xf]  ;;  %v13456_v60 = vor.u32 %v15394_v27, %v13453_v19  ;;  %7558 = vmatpush.bf16.msrb.mxu2 %v13200_v50  ;;  %v7164_v50 = vadd.f32 %v7163_v17, %v7144_v52 }
 0x4c9   :  { %v12781_v44 = vld [vmem:[#allocation8 + $0x10f0] sm:$0xf0] }
 0x4ca   :  { %v15290_v10 = vld [vmem:[#allocation8 + $0x12d4] sm:$0xf]  ;;  %v12784_v23 = vor.u32 %v15226_v20, %v12781_v44  ;;  %7577 = vmatpush.bf16.msrb.mxu3 %v13456_v60  ;;  %v13395_v20 = vld [vmem:[#allocation8 + $0x1598] sm:$0xf]  ;;  %v7183_v25 = vadd.f32 %v7182_v9, %v7164_v50 }
 0x4cb   :  { %v13037_v5 = vld [vmem:[#allocation8 + $0x12f0] sm:$0xf0]  ;;  %v13396_v44 = vor.u32 %v15383_v61, %v13395_v20  ;;  %7559 = vmatmul.bf16.vlgmr.msrb.gmra.mxu2 %v17412_v53 }
 0x4cc   :  { %v13040_v46 = vor.u32 %v15290_v10, %v13037_v5  ;;  %7627 = vmatpush.bf16.msra.mxu2 %v13428_v7  ;;  %7517 = vmatpush.bf16.msrb.mxu0 %v12784_v23  ;;  %v15218_v55 = vld [vmem:[#allocation8 + $0x1094] sm:$0xf]  ;;  %v15447_v10 = vld [vmem:[#allocation8 + $0x17b4] sm:$0xf0]  ;;  %v7202_v52 = vadd.f32 %v17613_v58, %v7183_v25  ;;  %v17627_v9 = vpop.f32.mrf.mxu2 }
 0x4cd   :  { %v12749_v24 = vld [vmem:[#allocation8 + $0x10b0] sm:$0xf0]  ;;  %v13652_v34 = vor.u32 %v15447_v10, %v13651_v54  ;;  %v17632_v54 = vpop.f32.mrf.mxu3  ;;  %v7147_v10 = vpop.f32.mrf.mxu0  ;;  %v15367_v58 = vld [vmem:[#allocation8 + $0x1534] sm:$0xf0]  ;;  %7578 = vmatmul.bf16.vlgmr.msrb.gmra.mxu3 %v17419_v48 }
 0x4ce   :  { %7646 = vmatpush.bf16.msra.mxu3 %v13684_v35  ;;  %v15282_v36 = vld [vmem:[#allocation8 + $0x1294] sm:$0xf]  ;;  %7536 = vmatpush.bf16.msra.mxu1 %v13040_v46  ;;  %v12752_v27 = vor.u32 %v15218_v55, %v12749_v24  ;;  %v15375_v35 = vld [vmem:[#allocation8 + $0x1574] sm:$0xf0]  ;;  %v7166_v25 = vpop.f32.mrf.mxu1 }
 0x4cf   :  { %v13005_v19 = vld [vmem:[#allocation8 + $0x12b0] sm:$0xf0]  ;;  %v13619_v46 = vld [vmem:[#allocation8 + $0x1758] sm:$0xf]  ;;  %v13364_v55 = vor.u32 %v15375_v35, %v13363_v51  ;;  %v7167_v51 = vadd.f32 %v7166_v25, %v7147_v10 }
 0x4d0   :  { %v13008_v60 = vor.u32 %v15282_v36, %v13005_v19  ;;  %v15210_v5 = vld [vmem:[#allocation8 + $0x1054] sm:$0xf]  ;;  %7518 = vmatpush.bf16.msrb.mxu0 %v12752_v27  ;;  %7628 = vmatpush.bf16.msra.mxu2 %v13396_v44  ;;  %v15439_v24 = vld [vmem:[#allocation8 + $0x1774] sm:$0xf0]  ;;  %v17630_v44 = vadd.f32 %v7202_v52, %v17263_v11 }
 0x4d1   :  { %v12717_v12 = vld [vmem:[#allocation8 + $0x1070] sm:$0xf0]  ;;  %v13620_v50 = vor.u32 %v15439_v24, %v13619_v46  ;;  %v13331_v27 = vld [vmem:[#allocation8 + $0x1518] sm:$0xf] }
 0x4d2   :  { %v15274_v57 = vld [vmem:[#allocation8 + $0x1254] sm:$0xf]  ;;  %v12720_v7 = vor.u32 %v15210_v5, %v12717_v12  ;;  %7537 = vmatpush.bf16.msra.mxu1 %v13008_v60  ;;  %7647 = vmatpush.bf16.msra.mxu3 %v13652_v34  ;;  %v13587_v60 = vld [vmem:[#allocation8 + $0x1718] sm:$0xf]  ;;  %v13332_v46 = vor.u32 %v15367_v58, %v13331_v27  ;;  %v13300_v27 = vor.u32 %v15359_v30, %v13299_v15 }
 0x4d3   :  { %v12973_v23 = vld [vmem:[#allocation8 + $0x1270] sm:$0xf0]  ;;  %v15431_v5 = vld [vmem:[#allocation8 + $0x1734] sm:$0xf0] }
 0x4d4   :  { %v12976_v17 = vor.u32 %v15274_v57, %v12973_v23  ;;  %v15202_v36 = vld [vmem:[#allocation8 + $0x1014] sm:$0xf]  ;;  %7519 = vmatpush.bf16.msrb.mxu0 %v12720_v7  ;;  %7629 = vmatpush.bf16.msra.mxu2 %v13364_v55  ;;  %v12915_v12 = vld [vmem:[#allocation8 + $0x11d8] sm:$0xf]  ;;  %v13588_v52 = vor.u32 %v15431_v5, %v13587_v60  ;;  %v7186_v7 = vadd.f32 %v17619_v13, %v7167_v51  ;;  %v17640_v10 = vpop.f32.mrf.mxu2 }
 0x4d5   :  { %v12685_v19 = vld [vmem:[#allocation8 + $0x1030] sm:$0xf0]  ;;  %v15263_v57 = vld [vmem:[#allocation8 + $0x11f4] sm:$0xf0] }
 0x4d6   :  { %v15266_v20 = vld [vmem:[#allocation8 + $0x1214] sm:$0xf]  ;;  %v12688_v34 = vor.u32 %v15202_v36, %v12685_v19  ;;  %v13171_v23 = vld [vmem:[#allocation8 + $0x13d8] sm:$0xf]  ;;  %7538 = vmatpush.bf16.msra.mxu1 %v12976_v17  ;;  %7648 = vmatpush.bf16.msra.mxu3 %v13620_v50  ;;  %v12916_v24 = vor.u32 %v15263_v57, %v12915_v12  ;;  %v17643_v57 = vpop.f32.mrf.mxu3  ;;  %v7168_v30 = vpop.f32.mrf.mxu1 }
 0x4d7   :  { %v12941_v61 = vld [vmem:[#allocation8 + $0x1230] sm:$0xf0]  ;;  %v15327_v11 = vld [vmem:[#allocation8 + $0x13f4] sm:$0xf0] }
 0x4d8   :  { %v12944_v35 = vor.u32 %v15266_v20, %v12941_v61  ;;  %v13172_v55 = vor.u32 %v15327_v11, %v13171_v23  ;;  %v15423_v36 = vld [vmem:[#allocation8 + $0x16f4] sm:$0xf0]  ;;  %7520 = vmatpush.bf16.msrb.mxu0 %v12688_v34  ;;  %v7205_v61 = vadd.f32 %v17624_v56, %v7186_v7  ;;  %7630 = vmatpush.bf16.msra.mxu2 %v13332_v46  ;;  %v7149_v34 = vpop.f32.mrf.mxu0 }
 0x4d9   :  { %v12883_v17 = vld [vmem:[#allocation8 + $0x1198] sm:$0xf]  ;;  %v13556_v13 = vor.u32 %v15423_v36, %v13555_v43  ;;  %v7798_v43 = vrot.slane %v17630_v44, 6 }
 0x4da   :  { %v15255_v19 = vld [vmem:[#allocation8 + $0x11b4] sm:$0xf0]  ;;  %7539 = vmatpush.bf16.msra.mxu1 %v12944_v35  ;;  %7649 = vmatpush.bf16.msra.mxu3 %v13588_v52  ;;  %v7757_v12 = vadd.f32 %v7205_v61, %v17280_v16  ;;  %v7169_v52 = vadd.f32 %v7168_v30, %v7149_v34 }
 0x4db   :  { %v13139_v50 = vld [vmem:[#allocation8 + $0x1398] sm:$0xf]  ;;  %v12884_v58 = vor.u32 %v15255_v19, %v12883_v17  ;;  %7521 = vmatmul.bf16.vlgmr.msrb.gmra.mxu0 %v17446_v3  ;;  %7564 = vmatmul.bf16.gmra.mxu2 %v17397_v26 }
 0x4dc   :  { %v15319_v20 = vld [vmem:[#allocation8 + $0x13b4] sm:$0xf0]  ;;  %7589 = vmatpush.bf16.msra.mxu0 %v12916_v24  ;;  %v7799_v11 = vrot.slane %v7757_v12, 6  ;;  %7631 = vmatpush.bf16.msra.mxu2 %v13300_v27  ;;  %v7188_v19 = vadd.f32 %v17627_v9, %v7169_v52  ;;  %v15419_v12 = vld [vmem:[#allocation8 + $0x16dc] sm:$0xf] }
 0x4dd   :  { %v13267_v60 = vld [vmem:[#allocation8 + $0x1498] sm:$0xf]  ;;  %v13140_v23 = vor.u32 %v15319_v20, %v13139_v50  ;;  %7540 = vmatmul.bf16.vlgmr.msra.gmra.mxu1 %v17450_v62  ;;  %7583 = vmatmul.bf16.gmra.mxu3 %v17399_v22 }
 0x4de   :  { %v15351_v5 = vld [vmem:[#allocation8 + $0x14b4] sm:$0xf0]  ;;  %7608 = vmatpush.bf16.msrb.mxu1 %v13172_v55  ;;  %7650 = vmatpush.bf16.msra.mxu3 %v13556_v13  ;;  %v17647_v17 = vsel %vm7797_vm3, %v7798_v43, %v7799_v11  ;;  %v7207_v27 = vadd.f32 %v17632_v54, %v7188_v19 }
 0x4df   :  { %v13523_v25 = vld [vmem:[#allocation8 + $0x1698] sm:$0xf]  ;;  %v13268_v24 = vor.u32 %v15351_v5, %v13267_v60  ;;  %v17655_v60 = vpop.f32.mrf.mxu2 }
 0x4e0   :  { %v15415_v56 = vld [vmem:[#allocation8 + $0x16b4] sm:$0xf0]  ;;  %7590 = vmatpush.bf16.msra.mxu0 %v12884_v58  ;;  %v17653_v58 = vld [vmem:[#allocation9] sm:$0xff]  ;;  %v7765_v9 = vadd.f32 %v7207_v27, %v17289_v6  ;;  %v7218_v34 = vpop.f32.mrf.mxu0 }
 0x4e1   :  { %v12851_v51 = vld [vmem:[#allocation8 + $0x1158] sm:$0xf]  ;;  %v13524_v16 = vor.u32 %v15415_v56, %v13523_v25  ;;  %7632 = vmatpush.bf16.msra.mxu2 %v13268_v24  ;;  %v17658_v25 = vpop.f32.mrf.mxu3  ;;  %v17933_v54 = vperm.slane %v17653_v58, 0 }
 0x4e2   :  { %v15247_v35 = vld [vmem:[#allocation8 + $0x1174] sm:$0xf0]  ;;  %7609 = vmatpush.bf16.msrb.mxu1 %v13140_v23  ;;  %v7237_v23 = vpop.f32.mrf.mxu1 }
 0x4e3   :  { %v13107_v15 = vld [vmem:[#allocation8 + $0x1358] sm:$0xf]  ;;  %v12852_v7 = vor.u32 %v15247_v35, %v12851_v51  ;;  %7651 = vmatpush.bf16.msra.mxu3 %v13524_v16  ;;  %v7822_v35 = vrot.slane %v7765_v9, 6  ;;  %v7238_v30 = vadd.f32 %v7237_v23, %v7218_v34  ;;  %v13429_v23 = vld [vmem:[#allocation8 + $0x15f8] sm:$0xf0] }
 0x4e4   :  { %v15311_v46 = vld [vmem:[#allocation8 + $0x1374] sm:$0xf0] }
 0x4e5   :  { %v13235_v36 = vld [vmem:[#allocation8 + $0x1458] sm:$0xf]  ;;  %v13108_v50 = vor.u32 %v15311_v46, %v13107_v15  ;;  %7591 = vmatpush.bf16.msra.mxu0 %v12852_v7  ;;  %v7823_v7 = vsel %vm7797_vm3, %v7799_v11, %v7822_v35  ;;  %v15387_v11 = vld [vmem:[#allocation8 + $0x15dc] sm:$0xf] }
 0x4e6   :  { %v15343_v55 = vld [vmem:[#allocation8 + $0x1474] sm:$0xf0] }
 0x4e7   :  { %v13491_v20 = vld [vmem:[#allocation8 + $0x1658] sm:$0xf]  ;;  %v13236_v13 = vor.u32 %v15343_v55, %v13235_v36  ;;  %7610 = vmatpush.bf16.msrb.mxu1 %v13108_v50  ;;  %v7257_v36 = vadd.f32 %v17640_v10, %v7238_v30  ;;  %v13432_v30 = vor.u32 %v15387_v11, %v13429_v23 }
 0x4e8   :  { %v15407_v61 = vld [vmem:[#allocation8 + $0x1674] sm:$0xf0] }
 0x4e9   :  { %v13492_v5 = vor.u32 %v15407_v61, %v13491_v20  ;;  %v12819_v56 = vld [vmem:[#allocation8 + $0x1118] sm:$0xf]  ;;  %7633 = vmatpush.bf16.msra.mxu2 %v13236_v13  ;;  %v7862_v61 = vmax.f32 %v17630_v44, %v7823_v7  ;;  %v7276_v10 = vadd.f32 %v17643_v57, %v7257_v36  ;;  %v17673_v44 = vpop.f32.mrf.mxu2  ;;  %v7220_v57 = vpop.f32.mrf.mxu0 }
 0x4ea   :  { %v15239_v51 = vld [vmem:[#allocation8 + $0x1134] sm:$0xf0] }
 0x4eb   :  { %v12820_v15 = vor.u32 %v15239_v51, %v12819_v56  ;;  %v13075_v46 = vld [vmem:[#allocation8 + $0x1318] sm:$0xf]  ;;  %7652 = vmatpush.bf16.msra.mxu3 %v13492_v5  ;;  %v15451_v56 = vld [vmem:[#allocation8 + $0x17dc] sm:$0xf]  ;;  %v17671_v35 = vadd.f32 %v17933_v54, %v7862_v61  ;;  %7526 = vmatmul.bf16.gmra.mxu0 %v17432_v0 }
 0x4ec   :  { %v15303_v43 = vld [vmem:[#allocation8 + $0x1334] sm:$0xf0]  ;;  %v13685_v51 = vld [vmem:[#allocation8 + $0x17f8] sm:$0xf0] }
 0x4ed   :  { %v13076_v52 = vor.u32 %v15303_v43, %v13075_v46  ;;  %v13203_v6 = vld [vmem:[#allocation8 + $0x1418] sm:$0xf]  ;;  %7592 = vmatpush.bf16.msra.mxu0 %v12820_v15  ;;  %v13688_v15 = vor.u32 %v15451_v56, %v13685_v51  ;;  %v17676_v46 = vadd.f32 %v7276_v10, %v17302_v40  ;;  %v17678_v43 = vpop.f32.mrf.mxu3  ;;  %v15443_v61 = vld [vmem:[#allocation8 + $0x179c] sm:$0xf]  ;;  %7545 = vmatmul.bf16.gmra.mxu1 %v17434_v38 }
 0x4ee   :  { %v15335_v24 = vld [vmem:[#allocation8 + $0x1434] sm:$0xf0]  ;;  %v13653_v40 = vld [vmem:[#allocation8 + $0x17b8] sm:$0xf0] }
 0x4ef   :  { %v13459_v16 = vld [vmem:[#allocation8 + $0x1618] sm:$0xf]  ;;  %v13204_v55 = vor.u32 %v15335_v24, %v13203_v6  ;;  %7611 = vmatpush.bf16.msrb.mxu1 %v13076_v52  ;;  %v7239_v52 = vpop.f32.mrf.mxu1  ;;  %v13365_v51 = vld [vmem:[#allocation8 + $0x1578] sm:$0xf0] }
 0x4f0   :  { %v15399_v19 = vld [vmem:[#allocation8 + $0x1634] sm:$0xf0]  ;;  %v13301_v54 = vld [vmem:[#allocation8 + $0x14f8] sm:$0xf0] }
 0x4f1   :  { %v12787_v50 = vld [vmem:[#allocation8 + $0x10d8] sm:$0xf]  ;;  %v13460_v27 = vor.u32 %v15399_v19, %v13459_v16  ;;  %7634 = vmatpush.bf16.msra.mxu2 %v13204_v55  ;;  %v7240_v16 = vadd.f32 %v7239_v52, %v7220_v57  ;;  %v15379_v19 = vld [vmem:[#allocation8 + $0x159c] sm:$0xf] }
 0x4f2   :  { %v15231_v20 = vld [vmem:[#allocation8 + $0x10f4] sm:$0xf0]  ;;  %v15435_v52 = vld [vmem:[#allocation8 + $0x175c] sm:$0xf] }
 0x4f3   :  { %v12788_v13 = vor.u32 %v15231_v20, %v12787_v50  ;;  %v13043_v5 = vld [vmem:[#allocation8 + $0x12d8] sm:$0xf]  ;;  %7653 = vmatpush.bf16.msra.mxu3 %v13460_v27  ;;  %v13397_v20 = vld [vmem:[#allocation8 + $0x15b8] sm:$0xf0]  ;;  %v7259_v27 = vadd.f32 %v17655_v60, %v7240_v16  ;;  %v17682_v60 = vpop.f32.mrf.mxu2 }
 0x4f4   :  { %v15295_v9 = vld [vmem:[#allocation8 + $0x12f4] sm:$0xf0]  ;;  %7635 = vmatmul.bf16.vlgmr.msra.gmra.mxu2 %v17412_v53 }
 0x4f5   :  { %v13044_v34 = vor.u32 %v15295_v9, %v13043_v5  ;;  %7593 = vmatpush.bf16.msra.mxu0 %v12788_v13  ;;  %7703 = vmatpush.bf16.msrb.mxu2 %v13432_v30  ;;  %v12755_v6 = vld [vmem:[#allocation8 + $0x1098] sm:$0xf]  ;;  %v13400_v5 = vor.u32 %v15379_v19, %v13397_v20  ;;  %v13656_v9 = vor.u32 %v15443_v61, %v13653_v40  ;;  %v17687_v20 = vpop.f32.mrf.mxu3  ;;  %v13333_v61 = vld [vmem:[#allocation8 + $0x1538] sm:$0xf0] }
 0x4f6   :  { %v15223_v24 = vld [vmem:[#allocation8 + $0x10b4] sm:$0xf0]  ;;  %v7278_v30 = vadd.f32 %v17658_v25, %v7259_v27  ;;  %v7223_v25 = vpop.f32.mrf.mxu0  ;;  %v15427_v40 = vld [vmem:[#allocation8 + $0x171c] sm:$0xf]  ;;  %7654 = vmatmul.bf16.vlgmr.msra.gmra.mxu3 %v17419_v48 }
 0x4f7   :  { %7612 = vmatpush.bf16.msrb.mxu1 %v13044_v34  ;;  %7722 = vmatpush.bf16.msrb.mxu3 %v13688_v15  ;;  %v12756_v7 = vor.u32 %v15223_v24, %v12755_v6  ;;  %v13011_v36 = vld [vmem:[#allocation8 + $0x1298] sm:$0xf]  ;;  %v15371_v34 = vld [vmem:[#allocation8 + $0x155c] sm:$0xf]  ;;  %v7242_v27 = vpop.f32.mrf.mxu1 }
 0x4f8   :  { %v15287_v55 = vld [vmem:[#allocation8 + $0x12b4] sm:$0xf0]  ;;  %v13368_v57 = vor.u32 %v15371_v34, %v13365_v51  ;;  %v13621_v6 = vld [vmem:[#allocation8 + $0x1778] sm:$0xf0]  ;;  %v17685_v19 = vadd.f32 %v7278_v30, %v17311_v59 }
 0x4f9   :  { %v13012_v50 = vor.u32 %v15287_v55, %v13011_v36  ;;  %v12723_v11 = vld [vmem:[#allocation8 + $0x1058] sm:$0xf]  ;;  %7594 = vmatpush.bf16.msra.mxu0 %v12756_v7  ;;  %7704 = vmatpush.bf16.msrb.mxu2 %v13400_v5  ;;  %v13624_v16 = vor.u32 %v15435_v52, %v13621_v6  ;;  %v15323_v51 = vld [vmem:[#allocation8 + $0x13dc] sm:$0xf] }
 0x4fa   :  { %v15215_v13 = vld [vmem:[#allocation8 + $0x1074] sm:$0xf0]  ;;  %v13173_v59 = vld [vmem:[#allocation8 + $0x13f8] sm:$0xf0] }
 0x4fb   :  { %v12979_v10 = vld [vmem:[#allocation8 + $0x1258] sm:$0xf]  ;;  %v12724_v23 = vor.u32 %v15215_v13, %v12723_v11  ;;  %7613 = vmatpush.bf16.msrb.mxu1 %v13012_v50  ;;  %7723 = vmatpush.bf16.msrb.mxu3 %v13656_v9  ;;  %v15363_v50 = vld [vmem:[#allocation8 + $0x151c] sm:$0xf]  ;;  %v7243_v9 = vadd.f32 %v7242_v27, %v7223_v25 }
 0x4fc   :  { %v15279_v56 = vld [vmem:[#allocation8 + $0x1274] sm:$0xf0]  ;;  %v13589_v11 = vld [vmem:[#allocation8 + $0x1738] sm:$0xf0]  ;;  %v13336_v34 = vor.u32 %v15363_v50, %v13333_v61  ;;  %v17695_v50 = vpop.f32.mrf.mxu2 }
 0x4fd   :  { %v12980_v15 = vor.u32 %v15279_v56, %v12979_v10  ;;  %v12691_v24 = vld [vmem:[#allocation8 + $0x1018] sm:$0xf]  ;;  %7595 = vmatpush.bf16.msra.mxu0 %v12724_v23  ;;  %v15259_v13 = vld [vmem:[#allocation8 + $0x11dc] sm:$0xf]  ;;  %7705 = vmatpush.bf16.msrb.mxu2 %v13368_v57  ;;  %v13592_v30 = vor.u32 %v15427_v40, %v13589_v11  ;;  %v7262_v23 = vadd.f32 %v17673_v44, %v7243_v9 }
 0x4fe   :  { %v15207_v36 = vld [vmem:[#allocation8 + $0x1034] sm:$0xf0]  ;;  %v12917_v10 = vld [vmem:[#allocation8 + $0x11f8] sm:$0xf0] }
 0x4ff   :  { %v12947_v55 = vld [vmem:[#allocation8 + $0x1218] sm:$0xf]  ;;  %v12692_v5 = vor.u32 %v15207_v36, %v12691_v24  ;;  %7614 = vmatpush.bf16.msrb.mxu1 %v12980_v15  ;;  %7724 = vmatpush.bf16.msrb.mxu3 %v13624_v16  ;;  %v12920_v52 = vor.u32 %v15259_v13, %v12917_v10  ;;  %v15355_v6 = vld [vmem:[#allocation8 + $0x14dc] sm:$0xf]  ;;  %v13176_v15 = vor.u32 %v15323_v51, %v13173_v59  ;;  %v17698_v10 = vpop.f32.mrf.mxu3 }
 0x500   :  { %v15271_v7 = vld [vmem:[#allocation8 + $0x1234] sm:$0xf0]  ;;  %v13557_v57 = vld [vmem:[#allocation8 + $0x16f8] sm:$0xf0]  ;;  %v13304_v25 = vor.u32 %v15355_v6, %v13301_v54  ;;  %v7244_v54 = vpop.f32.mrf.mxu1 }
 0x501   :  { %v12948_v56 = vor.u32 %v15271_v7, %v12947_v55  ;;  %v15251_v24 = vld [vmem:[#allocation8 + $0x119c] sm:$0xf]  ;;  %7596 = vmatpush.bf16.msra.mxu0 %v12692_v5  ;;  %v7281_v7 = vadd.f32 %v17678_v43, %v7262_v23  ;;  %7706 = vmatpush.bf16.msrb.mxu2 %v13336_v34  ;;  %v13560_v44 = vor.u32 %v15419_v12, %v13557_v57  ;;  %v7225_v5 = vpop.f32.mrf.mxu0 }
 0x502   :  { %v12885_v36 = vld [vmem:[#allocation8 + $0x11b8] sm:$0xf0] }
 0x503   :  { %v15315_v55 = vld [vmem:[#allocation8 + $0x139c] sm:$0xf]  ;;  %7615 = vmatpush.bf16.msrb.mxu1 %v12948_v56  ;;  %7725 = vmatpush.bf16.msrb.mxu3 %v13592_v30  ;;  %v12888_v61 = vor.u32 %v15251_v24, %v12885_v36  ;;  %v7758_v13 = vadd.f32 %v7281_v7, %v17324_v28  ;;  %v7801_v30 = vrot.slane %v17685_v19, 6 }
 0x504   :  { %v13141_v16 = vld [vmem:[#allocation8 + $0x13b8] sm:$0xf0]  ;;  %7597 = vmatmul.bf16.vlgmr.msra.gmra.mxu0 %v17446_v3  ;;  %7640 = vmatmul.bf16.gmra.mxu2 %v17397_v26 }
 0x505   :  { %7665 = vmatpush.bf16.msrb.mxu0 %v12920_v52  ;;  %v15347_v40 = vld [vmem:[#allocation8 + $0x149c] sm:$0xf]  ;;  %v13144_v9 = vor.u32 %v15315_v55, %v13141_v16  ;;  %v7802_v12 = vrot.slane %v7758_v13, 6  ;;  %v7245_v52 = vadd.f32 %v7244_v54, %v7225_v5  ;;  %7707 = vmatpush.bf16.msrb.mxu2 %v13304_v25 }
 0x506   :  { %v13269_v27 = vld [vmem:[#allocation8 + $0x14b8] sm:$0xf0]  ;;  %7616 = vmatmul.bf16.vlgmr.msrb.gmra.mxu1 %v17450_v62  ;;  %7659 = vmatmul.bf16.gmra.mxu3 %v17399_v22 }
 0x507   :  { %v15411_v11 = vld [vmem:[#allocation8 + $0x169c] sm:$0xf]  ;;  %7684 = vmatpush.bf16.msra.mxu1 %v13176_v15  ;;  %v13272_v6 = vor.u32 %v15347_v40, %v13269_v27  ;;  %7726 = vmatpush.bf16.msrb.mxu3 %v13560_v44  ;;  %v17702_v15 = vsel %vm7797_vm3, %v7801_v30, %v7802_v12  ;;  %v7264_v36 = vadd.f32 %v17682_v60, %v7245_v52 }
 0x508   :  { %v13525_v43 = vld [vmem:[#allocation8 + $0x16b8] sm:$0xf0]  ;;  %v7855_v13 = vmax.f32 %v17676_v46, %v17702_v15  ;;  %v7313_v5 = vpop.f32.mrf.mxu1 }
 0x509   :  { %v15243_v56 = vld [vmem:[#allocation8 + $0x115c] sm:$0xf]  ;;  %7666 = vmatpush.bf16.msrb.mxu0 %v12888_v61  ;;  %v13528_v28 = vor.u32 %v15411_v11, %v13525_v43  ;;  %v7283_v25 = vadd.f32 %v17687_v20, %v7264_v36  ;;  %7708 = vmatpush.bf16.msrb.mxu2 %v13272_v6  ;;  %v17708_v61 = vpop.f32.mrf.mxu2  ;;  %v17711_v11 = vpop.f32.mrf.mxu3 }
 0x50a   :  { %v12853_v34 = vld [vmem:[#allocation8 + $0x1178] sm:$0xf0]  ;;  %v7294_v60 = vpop.f32.mrf.mxu0 }
 0x50b   :  { %v15307_v51 = vld [vmem:[#allocation8 + $0x135c] sm:$0xf]  ;;  %v12856_v23 = vor.u32 %v15243_v56, %v12853_v34  ;;  %7685 = vmatpush.bf16.msra.mxu1 %v13144_v9  ;;  %7727 = vmatpush.bf16.msrb.mxu3 %v13528_v28  ;;  %v7766_v27 = vadd.f32 %v7283_v25, %v17333_v8  ;;  %v7314_v34 = vadd.f32 %v7313_v5, %v7294_v60 }
 0x50c   :  { %v13109_v59 = vld [vmem:[#allocation8 + $0x1378] sm:$0xf0] }
 0x50d   :  { %v15339_v57 = vld [vmem:[#allocation8 + $0x145c] sm:$0xf]  ;;  %v13112_v55 = vor.u32 %v15307_v51, %v13109_v59  ;;  %7667 = vmatpush.bf16.msrb.mxu0 %v12856_v23  ;;  %v7824_v56 = vrot.slane %v7766_v27, 6  ;;  %v7333_v28 = vadd.f32 %v17695_v50, %v7314_v34 }
 0x50e   :  { %v13237_v24 = vld [vmem:[#allocation8 + $0x1478] sm:$0xf0] }
 0x50f   :  { %v15403_v16 = vld [vmem:[#allocation8 + $0x165c] sm:$0xf]  ;;  %v13240_v44 = vor.u32 %v15339_v57, %v13237_v24  ;;  %7686 = vmatpush.bf16.msra.mxu1 %v13112_v55  ;;  %v7825_v6 = vsel %vm7797_vm3, %v7802_v12, %v7824_v56  ;;  %v7873_v55 = vperm.slane %v17653_v58, 1  ;;  %v7352_v50 = vadd.f32 %v17698_v10, %v7333_v28 }
 0x510   :  { %v13493_v7 = vld [vmem:[#allocation8 + $0x1678] sm:$0xf0] }
 0x511   :  { %v13496_v40 = vor.u32 %v15403_v16, %v13493_v7  ;;  %v15235_v9 = vld [vmem:[#allocation8 + $0x111c] sm:$0xf]  ;;  %7709 = vmatpush.bf16.msrb.mxu2 %v13240_v44  ;;  %v7863_v16 = vmax.f32 %v17685_v19, %v7825_v6  ;;  %v7337_v60 = vpop.f32.mrf.mxu2  ;;  %v7743_v19 = vadd.f32 %v7352_v50, %v17346_v45  ;;  %v7356_v5 = vpop.f32.mrf.mxu3 }
 0x512   :  { %v12821_v43 = vld [vmem:[#allocation8 + $0x1138] sm:$0xf0] }
 0x513   :  { %v12824_v20 = vor.u32 %v15235_v9, %v12821_v43  ;;  %v15299_v54 = vld [vmem:[#allocation8 + $0x131c] sm:$0xf]  ;;  %7728 = vmatpush.bf16.msrb.mxu3 %v13496_v40  ;;  %v17724_v27 = vadd.f32 %v7873_v55, %v7863_v16  ;;  %v7296_v9 = vpop.f32.mrf.mxu0  ;;  %v7315_v43 = vpop.f32.mrf.mxu1 }
 0x514   :  { %v13077_v51 = vld [vmem:[#allocation8 + $0x1338] sm:$0xf0]  ;;  %7602 = vmatmul.bf16.gmra.mxu0 %v17432_v0 }
 0x515   :  { %v13080_v59 = vor.u32 %v15299_v54, %v13077_v51  ;;  %v15331_v30 = vld [vmem:[#allocation8 + $0x141c] sm:$0xf]  ;;  %7668 = vmatpush.bf16.msrb.mxu0 %v12824_v20  ;;  %v7316_v20 = vadd.f32 %v7315_v43, %v7296_v9 }
 0x516   :  { %v13205_v52 = vld [vmem:[#allocation8 + $0x1438] sm:$0xf0]  ;;  %7621 = vmatmul.bf16.gmra.mxu1 %v17434_v38 }
 0x517   :  { %v15395_v8 = vld [vmem:[#allocation8 + $0x161c] sm:$0xf]  ;;  %v13208_v23 = vor.u32 %v15331_v30, %v13205_v52  ;;  %7687 = vmatpush.bf16.msra.mxu1 %v13080_v59  ;;  %v7335_v45 = vadd.f32 %v17708_v61, %v7316_v20 }
 0x518   :  { %v13461_v57 = vld [vmem:[#allocation8 + $0x1638] sm:$0xf0] }
 0x519   :  { %v15227_v24 = vld [vmem:[#allocation8 + $0x10dc] sm:$0xf]  ;;  %v13464_v7 = vor.u32 %v15395_v8, %v13461_v57  ;;  %7710 = vmatpush.bf16.msrb.mxu2 %v13208_v23 }
 0x51a   :  { %v12789_v36 = vld [vmem:[#allocation8 + $0x10f8] sm:$0xf0] }
 0x51b   :  { %v12792_v25 = vor.u32 %v15227_v24, %v12789_v36  ;;  %v15291_v12 = vld [vmem:[#allocation8 + $0x12dc] sm:$0xf]  ;;  %7729 = vmatpush.bf16.msrb.mxu3 %v13464_v7  ;;  %v7339_v36 = vpop.f32.mrf.mxu2 }
 0x51c   :  { %v13045_v44 = vld [vmem:[#allocation8 + $0x12f8] sm:$0xf0]  ;;  %7711 = vmatmul.bf16.vlgmr.msrb.gmra.mxu2 %v17412_v53 }
 0x51d   :  { %v13048_v40 = vor.u32 %v15291_v12, %v13045_v44  ;;  %7669 = vmatpush.bf16.msrb.mxu0 %v12792_v25  ;;  %v15219_v56 = vld [vmem:[#allocation8 + $0x109c] sm:$0xf]  ;;  %v7358_v25 = vpop.f32.mrf.mxu3  ;;  %v7299_v12 = vpop.f32.mrf.mxu0 }
 0x51e   :  { %v12757_v34 = vld [vmem:[#allocation8 + $0x10b8] sm:$0xf0]  ;;  %v7318_v44 = vpop.f32.mrf.mxu1  ;;  %7730 = vmatmul.bf16.vlgmr.msrb.gmra.mxu3 %v17419_v48 }
 0x51f   :  { %7688 = vmatpush.bf16.msra.mxu1 %v13048_v40  ;;  %v12760_v10 = vor.u32 %v15219_v56, %v12757_v34  ;;  %v15283_v54 = vld [vmem:[#allocation8 + $0x129c] sm:$0xf]  ;;  %v7354_v40 = vadd.f32 %v17711_v11, %v7335_v45  ;;  %v7319_v9 = vadd.f32 %v7318_v44, %v7299_v12 }
 0x520   :  { %v13013_v51 = vld [vmem:[#allocation8 + $0x12b8] sm:$0xf0] }
 0x521   :  { %v15211_v59 = vld [vmem:[#allocation8 + $0x105c] sm:$0xf]  ;;  %v13016_v30 = vor.u32 %v15283_v54, %v13013_v51  ;;  %7670 = vmatpush.bf16.msrb.mxu0 %v12760_v10  ;;  %v7338_v61 = vadd.f32 %v7337_v60, %v7319_v9  ;;  %v7751_v56 = vadd.f32 %v7354_v40, %v17355_v1 }
 0x522   :  { %v12725_v52 = vld [vmem:[#allocation8 + $0x1078] sm:$0xf0] }
 0x523   :  { %v15275_v8 = vld [vmem:[#allocation8 + $0x125c] sm:$0xf]  ;;  %v12728_v28 = vor.u32 %v15211_v59, %v12725_v52  ;;  %7689 = vmatpush.bf16.msra.mxu1 %v13016_v30  ;;  %v7357_v34 = vadd.f32 %v7356_v5, %v7338_v61  ;;  %v7408_v20 = vpop.f32.mrf.mxu2  ;;  %v7804_v59 = vrot.slane %v7751_v56, 6  ;;  %v7874_v52 = vperm.slane %v17653_v58, 2 }
 0x524   :  { %v12981_v6 = vld [vmem:[#allocation8 + $0x1278] sm:$0xf0] }
 0x525   :  { %v12984_v23 = vor.u32 %v15275_v8, %v12981_v6  ;;  %v15203_v57 = vld [vmem:[#allocation8 + $0x101c] sm:$0xf]  ;;  %7671 = vmatpush.bf16.msrb.mxu0 %v12728_v28  ;;  %v7759_v11 = vadd.f32 %v7357_v34, %v17368_v29  ;;  %v7427_v10 = vpop.f32.mrf.mxu3  ;;  %v7301_v54 = vpop.f32.mrf.mxu0 }
 0x526   :  { %v12693_v24 = vld [vmem:[#allocation8 + $0x1038] sm:$0xf0]  ;;  %v7320_v51 = vpop.f32.mrf.mxu1 }
 0x527   :  { %v15267_v16 = vld [vmem:[#allocation8 + $0x121c] sm:$0xf]  ;;  %v12696_v50 = vor.u32 %v15203_v57, %v12693_v24  ;;  %7690 = vmatpush.bf16.msra.mxu1 %v12984_v23  ;;  %v7805_v30 = vrot.slane %v7759_v11, 6  ;;  %v7321_v60 = vadd.f32 %v7320_v51, %v7301_v54 }
 0x528   :  { %v12949_v7 = vld [vmem:[#allocation8 + $0x1238] sm:$0xf0] }
 0x529   :  { %v12952_v43 = vor.u32 %v15267_v16, %v12949_v7  ;;  %7672 = vmatpush.bf16.msrb.mxu0 %v12696_v50  ;;  %v7806_v53 = vsel %vm7797_vm3, %v7804_v59, %v7805_v30  ;;  %v7340_v8 = vadd.f32 %v7339_v36, %v7321_v60 }
 0x52a   :  { %v7856_v48 = vmax.f32 %v7743_v19, %v7806_v53  ;;  %v7875_v53 = vperm.slane %v17653_v58, 3 }
 0x52b   :  { %7691 = vmatpush.bf16.msra.mxu1 %v12952_v43  ;;  %v7359_v6 = vadd.f32 %v7358_v25, %v7340_v8  ;;  %v7410_v1 = vpop.f32.mrf.mxu2 }
 0x52c   :  { %v17737_v28 = vadd.f32 %v7874_v52, %v7856_v48  ;;  %7673 = vmatmul.bf16.vlgmr.msrb.gmra.mxu0 %v17446_v3  ;;  %7716 = vmatmul.bf16.gmra.mxu2 %v17397_v26 }
 0x52d   :  { %v7767_v5 = vadd.f32 %v7359_v6, %v17377_v37  ;;  %v7429_v45 = vpop.f32.mrf.mxu3  ;;  %v7370_v29 = vpop.f32.mrf.mxu0 }
 0x52e   :  { %v7389_v23 = vpop.f32.mrf.mxu1  ;;  %7692 = vmatmul.bf16.vlgmr.msra.gmra.mxu1 %v17450_v62  ;;  %7735 = vmatmul.bf16.gmra.mxu3 %v17399_v22 }
 0x52f   :  { %v7826_v57 = vrot.slane %v7767_v5, 6  ;;  %v7390_v24 = vadd.f32 %v7389_v23, %v7370_v29  ;;  %v15495_v23 = vld [vmem:[#allocation11 + $0x138] sm:$0xff] }
 0x530   :  { %8271 = vmatpush.bf16.msra.mxu0 %v15495_v23 }
 0x531   :  { %v7827_v16 = vsel %vm7797_vm3, %v7805_v30, %v7826_v57  ;;  %v7409_v7 = vadd.f32 %v7408_v20, %v7390_v24  ;;  %v15503_v57 = vld [vmem:[#allocation11 + $0x178] sm:$0xff] }
 0x532   :  { %v7864_v19 = vmax.f32 %v7751_v56, %v7827_v16  ;;  %8284 = vmatpush.bf16.msrb.mxu1 %v15503_v57 }
 0x533   :  { %v7428_v36 = vadd.f32 %v7427_v10, %v7409_v7  ;;  %v7413_v37 = vpop.f32.mrf.mxu2  ;;  %v15494_v7 = vld [vmem:[#allocation11 + $0x130] sm:$0xff] }
 0x534   :  { %v17745_v25 = vadd.f32 %v7874_v52, %v7864_v19  ;;  %v15502_v19 = vld [vmem:[#allocation11 + $0x170] sm:$0xff]  ;;  %8272 = vmatpush.bf16.msra.mxu0 %v15494_v7 }
 0x535   :  { %v7744_v12 = vadd.f32 %v7428_v36, %v17390_v14  ;;  %v7432_v44 = vpop.f32.mrf.mxu3  ;;  %v7372_v50 = vpop.f32.mrf.mxu0 }
 0x536   :  { %v7391_v40 = vpop.f32.mrf.mxu1  ;;  %8285 = vmatpush.bf16.msrb.mxu1 %v15502_v19 }
 0x537   :  { %v7392_v3 = vadd.f32 %v7391_v40, %v7372_v50  ;;  %v15501_v40 = vld [vmem:[#allocation11 + $0x168] sm:$0xff] }
 0x539   :  { %v7411_v9 = vadd.f32 %v7410_v1, %v7392_v3 }
 0x53a   :  { %8286 = vmatpush.bf16.msrb.mxu1 %v15501_v40 }
 0x53b   :  { %v7415_v43 = vpop.f32.mrf.mxu2  ;;  %v7430_v20 = vadd.f32 %v7429_v45, %v7411_v9  ;;  %v15492_v9 = vld [vmem:[#allocation11 + $0x120] sm:$0xff] }
 0x53c   :  { %7678 = vmatmul.bf16.gmra.mxu0 %v17432_v0 }
 0x53d   :  { %v7434_v61 = vpop.f32.mrf.mxu3  ;;  %v7375_v34 = vpop.f32.mrf.mxu0  ;;  %v7752_v56 = vadd.f32 %v7430_v20, %v17403_v63 }
 0x53e   :  { %v7394_v62 = vpop.f32.mrf.mxu1  ;;  %7697 = vmatmul.bf16.gmra.mxu1 %v17434_v38 }
 0x53f   :  { %v7395_v26 = vadd.f32 %v7394_v62, %v7375_v34  ;;  %v7807_v30 = vrot.slane %v7752_v56, 6 }
 0x541   :  { %v7414_v22 = vadd.f32 %v7413_v37, %v7395_v26 }
 0x543   :  { %v7433_v11 = vadd.f32 %v7432_v44, %v7414_v22  ;;  %v7484_v14 = vpop.f32.mrf.mxu2 }
 0x545   :  { %v7760_v10 = vadd.f32 %v7433_v11, %v17424_v41  ;;  %v7503_v54 = vpop.f32.mrf.mxu3  ;;  %v7377_v51 = vpop.f32.mrf.mxu0  ;;  %v15499_v11 = vld [vmem:[#allocation11 + $0x158] sm:$0xff] }
 0x546   :  { %v7396_v59 = vpop.f32.mrf.mxu1 }
 0x547   :  { %v7808_v60 = vrot.slane %v7760_v10, 6  ;;  %v7397_v52 = vadd.f32 %v7396_v59, %v7377_v51 }
 0x549   :  { %v7809_v8 = vsel %vm7797_vm3, %v7807_v30, %v7808_v60  ;;  %v7416_v0 = vadd.f32 %v7415_v43, %v7397_v52  ;;  %v15500_v43 = vld [vmem:[#allocation11 + $0x160] sm:$0xff]  ;;  %v15498_v52 = vld [vmem:[#allocation11 + $0x150] sm:$0xff] }
 0x54a   :  { %v7857_v48 = vmax.f32 %v7744_v12, %v7809_v8  ;;  %8287 = vmatpush.bf16.msrb.mxu1 %v15500_v43 }
 0x54b   :  { %v7435_v6 = vadd.f32 %v7434_v61, %v7416_v0  ;;  %v7486_v63 = vpop.f32.mrf.mxu2 }
 0x54c   :  { %v17754_v38 = vadd.f32 %v7875_v53, %v7857_v48 }
 0x54d   :  { %v7768_v1 = vadd.f32 %v7435_v6, %v17437_v33  ;;  %v7505_v5 = vpop.f32.mrf.mxu3  ;;  %v7446_v41 = vpop.f32.mrf.mxu0  ;;  %v15493_v33 = vld [vmem:[#allocation11 + $0x128] sm:$0xff] }
 0x54e   :  { %v7465_v45 = vpop.f32.mrf.mxu1  ;;  %8273 = vmatpush.bf16.msra.mxu0 %v15493_v33  ;;  %8288 = vmatpush.bf16.msrb.mxu1 %v15499_v11  ;;  %v15471_v33 = vld [vmem:[#allocation11 + $0x78] sm:$0xff] }
 0x54f   :  { %v7828_v29 = vrot.slane %v7768_v1, 6  ;;  %v7466_v34 = vadd.f32 %v7465_v45, %v7446_v41 }
 0x551   :  { %v7829_v24 = vsel %vm7797_vm3, %v7808_v60, %v7828_v29  ;;  %v7485_v59 = vadd.f32 %v7484_v14, %v7466_v34  ;;  %v15490_v60 = vld [vmem:[#allocation11 + $0x110] sm:$0xff]  ;;  %v15489_v14 = vld [vmem:[#allocation11 + $0x108] sm:$0xff] }
 0x552   :  { %v7865_v16 = vmax.f32 %v7752_v56, %v7829_v24  ;;  %8274 = vmatpush.bf16.msra.mxu0 %v15492_v9  ;;  %v15491_v56 = vld [vmem:[#allocation11 + $0x118] sm:$0xff]  ;;  %8289 = vmatpush.bf16.msrb.mxu1 %v15498_v52 }
 0x553   :  { %v7489_v37 = vpop.f32.mrf.mxu2  ;;  %v7504_v0 = vadd.f32 %v7503_v54, %v7485_v59 }
 0x554   :  { %v17758_v36 = vadd.f32 %v7875_v53, %v7865_v16  ;;  %v18037_v16 = vperm.slane %v17653_v58, 0 }
 0x555   :  { %v7508_v12 = vpop.f32.mrf.mxu3  ;;  %v7448_v44 = vpop.f32.mrf.mxu0  ;;  %v7745_v57 = vadd.f32 %v7504_v0, %v17458_v42  ;;  %v15468_v0 = vld [vmem:[#allocation11 + $0x60] sm:$0xff] }
 0x556   :  { %v7467_v50 = vpop.f32.mrf.mxu1  ;;  %8275 = vmatpush.bf16.msra.mxu0 %v15491_v56  ;;  %v15470_v56 = vld [vmem:[#allocation11 + $0x70] sm:$0xff] }
 0x557   :  { %v7468_v3 = vadd.f32 %v7467_v50, %v7448_v44  ;;  %v15463_v50 = vld [vmem:[#allocation11 + $0x38] sm:$0xff] }
 0x559   :  { %v7487_v61 = vadd.f32 %v7486_v63, %v7468_v3 }
 0x55a   :  { %8276 = vmatpush.bf16.msra.mxu0 %v15490_v60 }
 0x55b   :  { %v7491_v62 = vpop.f32.mrf.mxu2  ;;  %v7506_v10 = vadd.f32 %v7505_v5, %v7487_v61  ;;  %v15497_v5 = vld [vmem:[#allocation11 + $0x148] sm:$0xff] }
 0x55c   :  { %8290 = vmatpush.bf16.msrb.mxu1 %v15497_v5 }
 0x55d   :  { %v7510_v20 = vpop.f32.mrf.mxu3  ;;  %v7451_v26 = vpop.f32.mrf.mxu0  ;;  %v7753_v53 = vadd.f32 %v7506_v10, %v17467_v21  ;;  %v7876_v21 = vperm.slane %v17653_v58, 4  ;;  %v15461_v10 = vld [vmem:[#allocation11 + $0x28] sm:$0xff] }
 0x55e   :  { %v7470_v22 = vpop.f32.mrf.mxu1  ;;  %8277 = vmatpush.bf16.msra.mxu0 %v15489_v14  ;;  %v15467_v14 = vld [vmem:[#allocation11 + $0x58] sm:$0xff] }
 0x55f   :  { %v7471_v51 = vadd.f32 %v7470_v22, %v7451_v26  ;;  %v7810_v45 = vrot.slane %v7753_v53, 6  ;;  %v15462_v22 = vld [vmem:[#allocation11 + $0x30] sm:$0xff] }
 0x561   :  { %v7490_v30 = vadd.f32 %v7489_v37, %v7471_v51  ;;  %v15488_v37 = vld [vmem:[#allocation11 + $0x100] sm:$0xff]  ;;  %v15469_v51 = vld [vmem:[#allocation11 + $0x68] sm:$0xff] }
 0x562   :  { %8278 = vmatpush.bf16.msra.mxu0 %v15488_v37 }
 0x563   :  { %v7509_v8 = vadd.f32 %v7508_v12, %v7490_v30  ;;  %v17761_v48 = vpop.f32.mrf.mxu2  ;;  %v15496_v12 = vld [vmem:[#allocation11 + $0x140] sm:$0xff] }
 0x564   :  { %8291 = vmatpush.bf16.msrb.mxu1 %v15496_v12  ;;  %v15457_v12 = vld [vmem:[#allocation11 + $0x8] sm:$0xff] }
 0x565   :  { %v7761_v6 = vadd.f32 %v7509_v8, %v17480_v39  ;;  %v17764_v63 = vpop.f32.mrf.mxu3  ;;  %v7453_v1 = vpop.f32.mrf.mxu0  ;;  %v18036_v39 = vmax.f32 %v17622_v2, %v17647_v17  ;;  %v15460_v8 = vld [vmem:[#allocation11 + $0x20] sm:$0xff] }
 0x566   :  { %v7472_v41 = vpop.f32.mrf.mxu1  ;;  %8519 = vmatpush.bf16.msrb.mxu0 %v15463_v50 }
 0x567   :  { %v7811_v29 = vrot.slane %v7761_v6, 6  ;;  %v7473_v23 = vadd.f32 %v7472_v41, %v7453_v1  ;;  %v7888_v7 = vadd.f32 %v18037_v16, %v18036_v39  ;;  %v15459_v41 = vld [vmem:[#allocation11 + $0x18] sm:$0xff] }
 0x568   :  { %8532 = vmatpush.bf16.msra.mxu1 %v15471_v33 }
 0x569   :  { %v7812_v54 = vsel %vm7797_vm3, %v7810_v45, %v7811_v29  ;;  %v7492_v24 = vadd.f32 %v7491_v62, %v7473_v23  ;;  %v7904_v61 = vmax.f32 %v7888_v7, 0.0 }
 0x56a   :  { %v7858_v19 = vmax.f32 %v7745_v57, %v7812_v54  ;;  %8520 = vmatpush.bf16.msrb.mxu0 %v15462_v22  ;;  %v15458_v54 = vld [vmem:[#allocation11 + $0x10] sm:$0xff] }
 0x56b   :  { %v7511_v44 = vadd.f32 %v7510_v20, %v7492_v24  ;;  %v7562_v40 = vpop.f32.mrf.mxu2  ;;  %v15466_v24 = vld [vmem:[#allocation11 + $0x50] sm:$0xff] }
 0x56c   :  { %v7892_v42 = vadd.f32 %v7876_v21, %v7858_v19  ;;  %8533 = vmatpush.bf16.msra.mxu1 %v15470_v56  ;;  %v18038_v56 = vld [vmem:[#allocation39_spill] sm:$0xff] }
 0x56d   :  { %v7769_v3 = vadd.f32 %v7511_v44, %v17489_v47  ;;  %v7581_v9 = vpop.f32.mrf.mxu3  ;;  %v7522_v43 = vpop.f32.mrf.mxu0  ;;  %v15465_v44 = vld [vmem:[#allocation11 + $0x48] sm:$0xff] }
 0x56e   :  { %v7908_v34 = vmax.f32 %v7892_v42, 0.0  ;;  %v7541_v2 = vpop.f32.mrf.mxu1  ;;  %8521 = vmatpush.bf16.msrb.mxu0 %v15461_v10 }
 0x56f   :  { %v7830_v17 = vrot.slane %v7769_v3, 6  ;;  %v7542_v1 = vadd.f32 %v7541_v2, %v7522_v43  ;;  %v7877_v43 = vperm.slane %v17653_v58, 5 }
 0x570   :  { %v17775_v62 = vmax.f32 %v7904_v61, %v7908_v34  ;;  %8534 = vmatpush.bf16.msra.mxu1 %v15469_v51  ;;  %v15464_v61 = vld [vmem:[#allocation11 + $0x40] sm:$0xff]  ;;  %v7912_v51 = vmax.f32 %v17671_v35, 0.0 }
 0x571   :  { %v7831_v20 = vsel %vm7797_vm3, %v7811_v29, %v7830_v17 }
 0x572   :  { %v7866_v26 = vmax.f32 %v7753_v53, %v7831_v20  ;;  %8522 = vmatpush.bf16.msrb.mxu0 %v15460_v8 }
 0x573   :  { %v7565_v47 = vpop.f32.mrf.mxu2 }
 0x574   :  { %v17778_v11 = vadd.f32 %v7876_v21, %v7866_v26  ;;  %8535 = vmatpush.bf16.msra.mxu1 %v15468_v0  ;;  %v7561_v21 = vadd.f32 %v17761_v48, %v7542_v1  ;;  %v15518_v1 = vld [vmem:[#allocation11 + $0x1f0] sm:$0xff] }
 0x575   :  { %v7584_v59 = vpop.f32.mrf.mxu3  ;;  %v7524_v30 = vpop.f32.mrf.mxu0 }
 0x576   :  { %v7543_v60 = vpop.f32.mrf.mxu1  ;;  %8523 = vmatpush.bf16.msrb.mxu0 %v15459_v41  ;;  %v7580_v19 = vadd.f32 %v17764_v63, %v7561_v21  ;;  %v15456_v63 = vld [vmem:[#allocation11] sm:$0xff]  ;;  %v7916_v26 = vmax.f32 %v17778_v11, 0.0  ;;  %v15527_v21 = vld [vmem:[#allocation11 + $0x238] sm:$0xff] }
 0x577   :  { %v7544_v52 = vadd.f32 %v7543_v60, %v7524_v30 }
 0x578   :  { %8536 = vmatpush.bf16.msra.mxu1 %v15467_v14 }
 0x579   :  { %v7563_v6 = vadd.f32 %v7562_v40, %v7544_v52  ;;  %v15519_v52 = vld [vmem:[#allocation11 + $0x1f8] sm:$0xff] }
 0x57a   :  { %8524 = vmatpush.bf16.msrb.mxu0 %v15458_v54  ;;  %8310 = vmatpush.bf16.msra.mxu3 %v15519_v52  ;;  %v15531_v52 = vld [vmem:[#allocation11 + $0x258] sm:$0xff] }
 0x57b   :  { %v7567_v53 = vpop.f32.mrf.mxu2  ;;  %v7582_v23 = vadd.f32 %v7581_v9, %v7563_v6  ;;  %v15510_v6 = vld [vmem:[#allocation11 + $0x1b0] sm:$0xff] }
 0x57c   :  { %8537 = vmatpush.bf16.msra.mxu1 %v15466_v24 }
 0x57d   :  { %v7586_v5 = vpop.f32.mrf.mxu3  ;;  %v7527_v45 = vpop.f32.mrf.mxu0  ;;  %v7754_v16 = vadd.f32 %v7582_v23, %v17511_v32  ;;  %v7746_v32 = vadd.f32 %v7580_v19, %v17502_v49 }
 0x57e   :  { %v7546_v29 = vpop.f32.mrf.mxu1  ;;  %8525 = vmatpush.bf16.msrb.mxu0 %v15457_v12  ;;  %8311 = vmatpush.bf16.msra.mxu3 %v15518_v1  ;;  %v15526_v12 = vld [vmem:[#allocation11 + $0x230] sm:$0xff]  ;;  %v15505_v1 = vld [vmem:[#allocation11 + $0x188] sm:$0xff] }
 0x57f   :  { %v7547_v57 = vadd.f32 %v7546_v29, %v7527_v45  ;;  %v7813_v40 = vrot.slane %v7754_v16, 6 }
 0x580   :  { %8538 = vmatpush.bf16.msra.mxu1 %v15465_v44  ;;  %v15534_v44 = vld [vmem:[#allocation11 + $0x270] sm:$0xff] }
 0x581   :  { %v7566_v39 = vadd.f32 %v7565_v47, %v7547_v57 }
 0x582   :  { %8526 = vmatpush.bf16.msrb.mxu0 %v15456_v63  ;;  %v15533_v63 = vld [vmem:[#allocation11 + $0x268] sm:$0xff] }
 0x583   :  { %v7585_v7 = vadd.f32 %v7584_v59, %v7566_v39  ;;  %v17783_v37 = vpop.f32.mrf.mxu2 }
 0x584   :  { %8539 = vmatpush.bf16.msra.mxu1 %v15464_v61 }
 0x585   :  { %v7762_v50 = vadd.f32 %v7585_v7, %v17524_v4  ;;  %v17786_v33 = vpop.f32.mrf.mxu3  ;;  %v7529_v48 = vpop.f32.mrf.mxu0  ;;  %v7889_v4 = vadd.f32 %v7873_v55, %v7855_v13  ;;  %v15511_v13 = vld [vmem:[#allocation11 + $0x1b8] sm:$0xff]  ;;  %v17799_v55 = vmax.f32 %v7912_v51, %v7916_v26  ;;  %v15517_v7 = vld [vmem:[#allocation11 + $0x1e8] sm:$0xff]  ;;  %v15514_v51 = vld [vmem:[#allocation11 + $0x1d0] sm:$0xff] }
 0x586   :  { %v7548_v42 = vpop.f32.mrf.mxu1  ;;  %8297 = vmatpush.bf16.msra.mxu2 %v15511_v13  ;;  %8312 = vmatpush.bf16.msra.mxu3 %v15517_v7  ;;  %v18039_v26 = vld [vmem:[#allocation31_spill] sm:$0xff] }
 0x587   :  { %v7814_v3 = vrot.slane %v7762_v50, 6  ;;  %v7549_v9 = vadd.f32 %v7548_v42, %v7529_v48  ;;  %v7905_v59 = vmax.f32 %v7889_v4, 0.0  ;;  %v15508_v48 = vld [vmem:[#allocation11 + $0x1a0] sm:$0xff]  ;;  %v15515_v4 = vld [vmem:[#allocation11 + $0x1d8] sm:$0xff] }
 0x588   :  { %v15516_v42 = vld [vmem:[#allocation11 + $0x1e0] sm:$0xff] }
 0x589   :  { %v7815_v34 = vsel %vm7797_vm3, %v7813_v40, %v7814_v3  ;;  %v7568_v2 = vadd.f32 %v7567_v53, %v7549_v9  ;;  %v15512_v7 = vld [vmem:[#allocation11 + $0x1c0] sm:$0xff] }
 0x58a   :  { %v7859_v17 = vmax.f32 %v7746_v32, %v7815_v34  ;;  %8298 = vmatpush.bf16.msra.mxu2 %v15510_v6  ;;  %8313 = vmatpush.bf16.msra.mxu3 %v15516_v42  ;;  %v17819_v6 = vld [vmem:[#allocation9] sm:$0xff]  ;;  %v7906_v42 = vmax.f32 %v17737_v28, 0.0 }
 0x58b   :  { %v7587_v20 = vadd.f32 %v7586_v5, %v7568_v2  ;;  %v7638_v22 = vpop.f32.mrf.mxu2  ;;  %v15507_v2 = vld [vmem:[#allocation11 + $0x198] sm:$0xff] }
 0x58c   :  { %v7893_v49 = vadd.f32 %v7877_v43, %v7859_v17 }
 0x58d   :  { %v7770_v47 = vadd.f32 %v7587_v20, %v18038_v56  ;;  %v7598_v10 = vpop.f32.mrf.mxu0  ;;  %v7657_v60 = vpop.f32.mrf.mxu3  ;;  %v15524_v56 = vld [vmem:[#allocation11 + $0x220] sm:$0xff] }
 0x58e   :  { %v7909_v30 = vmax.f32 %v7893_v49, 0.0  ;;  %v7617_v46 = vpop.f32.mrf.mxu1  ;;  %8314 = vmatpush.bf16.msra.mxu3 %v15515_v4  ;;  %v15486_v4 = vld [vmem:[#allocation11 + $0xf0] sm:$0xff] }
 0x58f   :  { %v7832_v15 = vrot.slane %v7770_v47, 6  ;;  %v7618_v50 = vadd.f32 %v7617_v46, %v7598_v10  ;;  %v15532_v47 = vld [vmem:[#allocation11 + $0x260] sm:$0xff] }
 0x590   :  { %v7921_v58 = vmax.f32 %v7905_v59, %v7909_v30  ;;  %v18040_v59 = vld [vmem:[#allocation26_spill] sm:$0xff] }
 0x591   :  { %v7833_v11 = vsel %vm7797_vm3, %v7814_v3, %v7832_v15  ;;  %v7637_v61 = vadd.f32 %v17783_v37, %v7618_v50  ;;  %v15506_v37 = vld [vmem:[#allocation11 + $0x190] sm:$0xff]  ;;  %v15487_v50 = vld [vmem:[#allocation11 + $0xf8] sm:$0xff] }
 0x592   :  { %v7928_v8 = vpack.c.bf16 %v7921_v58, %v17775_v62  ;;  %v7867_v0 = vmax.f32 %v7754_v16, %v7833_v11  ;;  %v15535_v62 = vld [vmem:[#allocation11 + $0x278] sm:$0xff]  ;;  %v15509_v16 = vld [vmem:[#allocation11 + $0x1a8] sm:$0xff]  ;;  %8315 = vmatpush.bf16.msra.mxu3 %v15514_v51 }
 0x593   :  { %v7641_v5 = vpop.f32.mrf.mxu2  ;;  %8299 = vmatpush.bf16.msra.mxu2 %v15509_v16  ;;  %v7656_v10 = vadd.f32 %v17786_v33, %v7637_v61  ;;  %v15523_v11 = vld [vmem:[#allocation11 + $0x218] sm:$0xff]  ;;  %v7878_v33 = vperm.slane %v17819_v6, 6  ;;  %v15504_v16 = vld [vmem:[#allocation11 + $0x180] sm:$0xff]  ;;  %v15478_v61 = vld [vmem:[#allocation11 + $0xb0] sm:$0xff] }
 0x594   :  { %v17803_v35 = vadd.f32 %v7877_v43, %v7867_v0  ;;  %v8063_v53 = vunpack.c.l.b16 %v7928_v8  ;;  %v8064_v41 = vunpack.c.h.b16 %v7928_v8  ;;  %v15525_v43 = vld [vmem:[#allocation11 + $0x228] sm:$0xff] }
 0x595   :  { %v7600_v14 = vpop.f32.mrf.mxu0  ;;  %v7660_v54 = vpop.f32.mrf.mxu3  ;;  %v18041_v8 = vld [vmem:[#allocation32_spill] sm:$0xff] }
 0x596   :  { %v7619_v45 = vpop.f32.mrf.mxu1  ;;  %v17805_v29 = vpack.c.b16 %v8063_v53, %v8063_v53  ;;  %v17807_v23 = vpack.c.b16 %v8064_v41, %v8064_v41  ;;  %v7747_v0 = vadd.f32 %v7656_v10, %v18041_v8  ;;  %v15513_v53 = vld [vmem:[#allocation11 + $0x1c8] sm:$0xff] }
 0x597   :  { %v7620_v57 = vadd.f32 %v7619_v45, %v7600_v14  ;;  %8300 = vmatpush.bf16.msra.mxu2 %v15508_v48  ;;  %8316 = vmatpush.bf16.msra.mxu3 %v15513_v53  ;;  %v7913_v48 = vmax.f32 %v17724_v27, 0.0  ;;  %v15485_v10 = vld [vmem:[#allocation11 + $0xe8] sm:$0xff] }
 0x598   :  { %v8071_v24 = vrot.slane %v17805_v29, 1  ;;  %v8072_v39 = vrot.slane %v17807_v23, 1 }
 0x599   :  { %v7639_v19 = vadd.f32 %v7638_v22, %v7620_v57 }
 0x59a   :  { %8279 = vmatmul.bf16.vlgmr.msra.gmra.mxu0 %v8071_v24  ;;  %8292 = vmatmul.bf16.vlgmr.msrb.gmra.mxu1 %v8072_v39 }
 0x59b   :  { %8836 = vmatpush.bf16.msra.mxu0 %v15527_v21  ;;  %8849 = vmatpush.bf16.msrb.mxu1 %v15535_v62  ;;  %v7658_v9 = vadd.f32 %v7657_v60, %v7639_v19  ;;  %v7643_v34 = vpop.f32.mrf.mxu2  ;;  %v15522_v21 = vld [vmem:[#allocation11 + $0x210] sm:$0xff] }
 0x59c   :  { %8301 = vmatpush.bf16.msra.mxu2 %v15507_v2  ;;  %v15530_v62 = vld [vmem:[#allocation11 + $0x250] sm:$0xff]  ;;  %8317 = vmatpush.bf16.msra.mxu3 %v15512_v7  ;;  %v15528_v2 = vld [vmem:[#allocation11 + $0x240] sm:$0xff] }
 0x59d   :  { %v7603_v40 = vpop.f32.mrf.mxu0  ;;  %v7662_v20 = vpop.f32.mrf.mxu3  ;;  %v17813_v49 = vadd.f32 %v7658_v9, %v18039_v26  ;;  %v15559_v26 = vld [vmem:[#allocation11 + $0x338] sm:$0xff] }
 0x59e   :  { %v7622_v3 = vpop.f32.mrf.mxu1 }
 0x59f   :  { %v7623_v32 = vadd.f32 %v7622_v3, %v7603_v40  ;;  %8837 = vmatpush.bf16.msra.mxu0 %v15526_v12  ;;  %8850 = vmatpush.bf16.msrb.mxu1 %v15534_v44  ;;  %v7816_v15 = vrot.slane %v17813_v49, 6  ;;  %v15479_v44 = vld [vmem:[#allocation11 + $0xb8] sm:$0xff] }
 0x5a0   :  { %8302 = vmatpush.bf16.msra.mxu2 %v15506_v37  ;;  %8558 = vmatpush.bf16.msrb.mxu3 %v15487_v50  ;;  %v15563_v50 = vld [vmem:[#allocation11 + $0x358] sm:$0xff] }
 0x5a1   :  { %v7642_v17 = vadd.f32 %v7641_v5, %v7623_v32  ;;  %v15529_v32 = vld [vmem:[#allocation11 + $0x248] sm:$0xff] }
 0x5a3   :  { %v7661_v22 = vadd.f32 %v7660_v54, %v7642_v17  ;;  %8838 = vmatpush.bf16.msra.mxu0 %v15525_v43  ;;  %8851 = vmatpush.bf16.msrb.mxu1 %v15533_v63  ;;  %v17823_v45 = vpop.f32.mrf.mxu2  ;;  %v7917_v54 = vmax.f32 %v17803_v35, 0.0  ;;  %v15521_v35 = vld [vmem:[#allocation11 + $0x208] sm:$0xff] }
 0x5a4   :  { %8303 = vmatpush.bf16.msra.mxu2 %v15505_v1  ;;  %8559 = vmatpush.bf16.msrb.mxu3 %v15486_v4 }
 0x5a5   :  { %v7763_v30 = vadd.f32 %v7661_v22, %v18040_v59  ;;  %v7605_v60 = vpop.f32.mrf.mxu0  ;;  %v17828_v39 = vpop.f32.mrf.mxu3  ;;  %v7925_v63 = vmax.f32 %v7913_v48, %v7917_v54  ;;  %v15567_v22 = vld [vmem:[#allocation11 + $0x378] sm:$0xff]  ;;  %v8637_v59 = vrot.slane %v17807_v23, 2 }
 0x5a6   :  { %v7624_v46 = vpop.f32.mrf.mxu1 }
 0x5a7   :  { %v7817_v58 = vrot.slane %v7763_v30, 6  ;;  %v7625_v13 = vadd.f32 %v7624_v46, %v7605_v60  ;;  %8839 = vmatpush.bf16.msra.mxu0 %v15524_v56  ;;  %8852 = vmatpush.bf16.msrb.mxu1 %v15532_v47  ;;  %v17838_v28 = vpack.c.bf16 %v7925_v63, %v17799_v55  ;;  %v15477_v47 = vld [vmem:[#allocation11 + $0xa8] sm:$0xff]  ;;  %v8636_v55 = vrot.slane %v17805_v29, 2  ;;  %v15558_v30 = vld [vmem:[#allocation11 + $0x330] sm:$0xff]  ;;  %v15476_v46 = vld [vmem:[#allocation11 + $0xa0] sm:$0xff] }
 0x5a8   :  { %8304 = vmatpush.bf16.msra.mxu2 %v15504_v16  ;;  %v15566_v60 = vld [vmem:[#allocation11 + $0x370] sm:$0xff]  ;;  %8560 = vmatpush.bf16.msrb.mxu3 %v15485_v10 }
 0x5a9   :  { %v7818_v41 = vsel %vm7797_vm3, %v7816_v15, %v7817_v58  ;;  %v7644_v14 = vadd.f32 %v7643_v34, %v7625_v13  ;;  %v15520_v34 = vld [vmem:[#allocation11 + $0x200] sm:$0xff]  ;;  %v15482_v16 = vld [vmem:[#allocation11 + $0xd0] sm:$0xff] }
 0x5aa   :  { %v7860_v5 = vmax.f32 %v7747_v0, %v7818_v41  ;;  %8527 = vmatmul.bf16.vlgmr.msrb.gmra.mxu0 %v17805_v29  ;;  %8540 = vmatmul.bf16.vlgmr.msra.gmra.mxu1 %v17807_v23  ;;  %v15484_v15 = vld [vmem:[#allocation11 + $0xe0] sm:$0xff]  ;;  %v15475_v0 = vld [vmem:[#allocation11 + $0x98] sm:$0xff] }
 0x5ab   :  { %v7663_v57 = vadd.f32 %v7662_v20, %v7644_v14  ;;  %8840 = vmatpush.bf16.msra.mxu0 %v15523_v11  ;;  %8853 = vmatpush.bf16.msrb.mxu1 %v15531_v52  ;;  %v7714_v20 = vpop.f32.mrf.mxu2  ;;  %v15557_v11 = vld [vmem:[#allocation11 + $0x328] sm:$0xff] }
 0x5ac   :  { %v7894_v24 = vadd.f32 %v7878_v33, %v7860_v5  ;;  %8545 = vmatpush.bf16.msrb.mxu2 %v15479_v44  ;;  %v15565_v52 = vld [vmem:[#allocation11 + $0x368] sm:$0xff]  ;;  %8561 = vmatpush.bf16.msrb.mxu3 %v15484_v15  ;;  %v15555_v44 = vld [vmem:[#allocation11 + $0x318] sm:$0xff] }
 0x5ad   :  { %v7771_v19 = vadd.f32 %v7663_v57, %v17577_v18  ;;  %v7674_v12 = vpop.f32.mrf.mxu0 }
 0x5ae   :  { %v7910_v40 = vmax.f32 %v7894_v24, 0.0  ;;  %v7693_v3 = vpop.f32.mrf.mxu1  ;;  %v15474_v24 = vld [vmem:[#allocation11 + $0x90] sm:$0xff] }
 0x5af   :  { %v7834_v9 = vrot.slane %v7771_v19, 6  ;;  %8841 = vmatpush.bf16.msra.mxu0 %v15522_v21  ;;  %8854 = vmatpush.bf16.msrb.mxu1 %v15530_v62  ;;  %v7694_v13 = vadd.f32 %v7693_v3, %v7674_v12  ;;  %v15556_v21 = vld [vmem:[#allocation11 + $0x320] sm:$0xff]  ;;  %v15481_v3 = vld [vmem:[#allocation11 + $0xc8] sm:$0xff] }
 0x5b0   :  { %v17833_v43 = vmax.f32 %v7906_v42, %v7910_v40  ;;  %8546 = vmatpush.bf16.msrb.mxu2 %v15478_v61  ;;  %v15564_v62 = vld [vmem:[#allocation11 + $0x360] sm:$0xff]  ;;  %v15473_v40 = vld [vmem:[#allocation11 + $0x88] sm:$0xff]  ;;  %v15554_v61 = vld [vmem:[#allocation11 + $0x310] sm:$0xff] }
 0x5b1   :  { %v7835_v18 = vsel %vm7797_vm3, %v7817_v58, %v7834_v9  ;;  %v7713_v5 = vadd.f32 %v17823_v45, %v7694_v13  ;;  %v18042_v45 = vld [vmem:[#allocation27_spill] sm:$0xff] }
 0x5b2   :  { %v7868_v27 = vmax.f32 %v17813_v49, %v7835_v18  ;;  %v7733_v49 = vpop.f32.mrf.mxu3  ;;  %v18043_v18 = vld [vmem:[#allocation33_spill] sm:$0xff] }
 0x5b3   :  { %8842 = vmatpush.bf16.msra.mxu0 %v15521_v35  ;;  %8855 = vmatpush.bf16.msrb.mxu1 %v15529_v32  ;;  %v7717_v1 = vpop.f32.mrf.mxu2  ;;  %v7732_v12 = vadd.f32 %v17828_v39, %v7713_v5  ;;  %v7879_v39 = vperm.slane %v17819_v6, 7  ;;  %v15553_v6 = vld [vmem:[#allocation11 + $0x308] sm:$0xff]  ;;  %v15598_v5 = vld [vmem:[#allocation11 + $0x470] sm:$0xff] }
 0x5b4   :  { %v17840_v17 = vadd.f32 %v7878_v33, %v7868_v27  ;;  %8547 = vmatpush.bf16.msrb.mxu2 %v15477_v47  ;;  %v15483_v33 = vld [vmem:[#allocation11 + $0xd8] sm:$0xff] }
 0x5b5   :  { %v7676_v56 = vpop.f32.mrf.mxu0  ;;  %8562 = vmatpush.bf16.msrb.mxu3 %v15483_v33 }
 0x5b6   :  { %v7695_v37 = vpop.f32.mrf.mxu1  ;;  %v7918_v10 = vmax.f32 %v17840_v17, 0.0  ;;  %v15560_v17 = vld [vmem:[#allocation11 + $0x340] sm:$0xff] }
 0x5b7   :  { %v7696_v51 = vadd.f32 %v7695_v37, %v7676_v56  ;;  %8843 = vmatpush.bf16.msra.mxu0 %v15520_v34  ;;  %8856 = vmatpush.bf16.msrb.mxu1 %v15528_v2  ;;  %v15562_v34 = vld [vmem:[#allocation11 + $0x350] sm:$0xff]  ;;  %v15561_v37 = vld [vmem:[#allocation11 + $0x348] sm:$0xff] }
 0x5b8   :  { %8548 = vmatpush.bf16.msrb.mxu2 %v15476_v46 }
 0x5b9   :  { %v7715_v58 = vadd.f32 %v7714_v20, %v7696_v51  ;;  %8563 = vmatpush.bf16.msrb.mxu3 %v15482_v16  ;;  %v15472_v20 = vld [vmem:[#allocation11 + $0x80] sm:$0xff]  ;;  %v18044_v51 = vld [vmem:[#allocation41_spill] sm:$0xff] }
 0x5ba   :  { %8844 = vmatmul.bf16.vlgmr.msra.gmra.mxu0 %v8636_v55  ;;  %8857 = vmatmul.bf16.vlgmr.msrb.gmra.mxu1 %v8637_v59  ;;  %v7736_v57 = vpop.f32.mrf.mxu3  ;;  %v7914_v59 = vmax.f32 %v17745_v25, 0.0  ;;  %v15589_v16 = vld [vmem:[#allocation11 + $0x428] sm:$0xff] }
 0x5bb   :  { %9154 = vmatpush.bf16.msrb.mxu0 %v15559_v26  ;;  %9167 = vmatpush.bf16.msra.mxu1 %v15567_v22  ;;  %v7734_v41 = vadd.f32 %v7733_v49, %v7715_v58  ;;  %v7719_v27 = vpop.f32.mrf.mxu2  ;;  %v15480_v26 = vld [vmem:[#allocation11 + $0xc0] sm:$0xff] }
 0x5bc   :  { %8549 = vmatpush.bf16.msrb.mxu2 %v15475_v0  ;;  %v15552_v58 = vld [vmem:[#allocation11 + $0x300] sm:$0xff]  ;;  %v17855_v13 = vmax.f32 %v7914_v59, %v7918_v10  ;;  %v15575_v59 = vld [vmem:[#allocation11 + $0x3b8] sm:$0xff] }
 0x5bd   :  { %v7679_v8 = vpop.f32.mrf.mxu0  ;;  %v7756_v7 = vadd.f32 %v7734_v41, %v17599_v31  ;;  %v7748_v31 = vadd.f32 %v7732_v12, %v18043_v18  ;;  %8564 = vmatpush.bf16.msrb.mxu3 %v15481_v3  ;;  %v8955_v41 = vrot.slane %v17807_v23, 3  ;;  %v15542_v23 = vld [vmem:[#allocation11 + $0x2b0] sm:$0xff]  ;;  %v15596_v12 = vld [vmem:[#allocation11 + $0x460] sm:$0xff]  ;;  %v15593_v18 = vld [vmem:[#allocation11 + $0x448] sm:$0xff] }
 0x5be   :  { %v7698_v53 = vpop.f32.mrf.mxu1  ;;  %v15586_v3 = vld [vmem:[#allocation11 + $0x410] sm:$0xff] }
 0x5bf   :  { %9155 = vmatpush.bf16.msrb.mxu0 %v15558_v30  ;;  %9168 = vmatpush.bf16.msra.mxu1 %v15566_v60  ;;  %v7699_v14 = vadd.f32 %v7698_v53, %v7679_v8  ;;  %v7819_v35 = vrot.slane %v7756_v7, 6  ;;  %v7907_v30 = vmax.f32 %v17754_v38, 0.0  ;;  %v15599_v8 = vld [vmem:[#allocation11 + $0x478] sm:$0xff]  ;;  %v8954_v53 = vrot.slane %v17805_v29, 3  ;;  %v15597_v29 = vld [vmem:[#allocation11 + $0x468] sm:$0xff] }
 0x5c0   :  { %8550 = vmatpush.bf16.msrb.mxu2 %v15474_v24 }
 0x5c1   :  { %v7718_v54 = vadd.f32 %v7717_v1, %v7699_v14  ;;  %8565 = vmatpush.bf16.msrb.mxu3 %v15480_v26  ;;  %v15590_v14 = vld [vmem:[#allocation11 + $0x430] sm:$0xff]  ;;  %v9274_v26 = vunpack.c.l.b16 %v17838_v28 }
 0x5c2   :  { %v7738_v22 = vpop.f32.mrf.mxu3 }
 0x5c3   :  { %9156 = vmatpush.bf16.msrb.mxu0 %v15557_v11  ;;  %9169 = vmatpush.bf16.msra.mxu1 %v15565_v52  ;;  %v7737_v19 = vadd.f32 %v7736_v57, %v7718_v54  ;;  %v15591_v52 = vld [vmem:[#allocation11 + $0x438] sm:$0xff] }
 0x5c4   :  { %8551 = vmatpush.bf16.msrb.mxu2 %v15473_v40  ;;  %v15548_v40 = vld [vmem:[#allocation11 + $0x2e0] sm:$0xff] }
 0x5c5   :  { %v7764_v48 = vadd.f32 %v7737_v19, %v18042_v45  ;;  %v7681_v42 = vpop.f32.mrf.mxu0  ;;  %v15588_v19 = vld [vmem:[#allocation11 + $0x420] sm:$0xff]  ;;  %v15587_v45 = vld [vmem:[#allocation11 + $0x418] sm:$0xff] }
 0x5c6   :  { %v7700_v9 = vpop.f32.mrf.mxu1 }
 0x5c7   :  { %9157 = vmatpush.bf16.msrb.mxu0 %v15556_v21  ;;  %9170 = vmatpush.bf16.msra.mxu1 %v15564_v62  ;;  %v7820_v32 = vrot.slane %v7764_v48, 6  ;;  %v7701_v63 = vadd.f32 %v7700_v9, %v7681_v42  ;;  %v15551_v62 = vld [vmem:[#allocation11 + $0x2f8] sm:$0xff]  ;;  %v15540_v42 = vld [vmem:[#allocation11 + $0x2a0] sm:$0xff]  ;;  %v15594_v9 = vld [vmem:[#allocation11 + $0x450] sm:$0xff] }
 0x5c8   :  { %8552 = vmatpush.bf16.msrb.mxu2 %v15472_v20  ;;  %v15595_v48 = vld [vmem:[#allocation11 + $0x458] sm:$0xff] }
 0x5c9   :  { %v7821_v2 = vsel %vm7797_vm3, %v7819_v35, %v7820_v32  ;;  %v7720_v4 = vadd.f32 %v7719_v27, %v7701_v63  ;;  %v15539_v35 = vld [vmem:[#allocation11 + $0x298] sm:$0xff]  ;;  %v15585_v63 = vld [vmem:[#allocation11 + $0x408] sm:$0xff]  ;;  %v15546_v27 = vld [vmem:[#allocation11 + $0x2d0] sm:$0xff] }
 0x5ca   :  { %v7861_v56 = vmax.f32 %v7748_v31, %v7821_v2  ;;  %v15538_v31 = vld [vmem:[#allocation11 + $0x290] sm:$0xff]  ;;  %v7915_v2 = vmax.f32 %v17758_v36, 0.0  ;;  %v15631_v20 = vld [vmem:[#allocation11 + $0x578] sm:$0xff] }
 0x5cb   :  { %9158 = vmatpush.bf16.msrb.mxu0 %v15555_v44  ;;  %9171 = vmatpush.bf16.msra.mxu1 %v15563_v50  ;;  %v7739_v47 = vadd.f32 %v7738_v22, %v7720_v4  ;;  %v15541_v44 = vld [vmem:[#allocation11 + $0x2a8] sm:$0xff]  ;;  %v15623_v4 = vld [vmem:[#allocation11 + $0x538] sm:$0xff]  ;;  %v9275_v22 = vunpack.c.h.b16 %v17838_v28  ;;  %v15622_v36 = vld [vmem:[#allocation11 + $0x530] sm:$0xff] }
 0x5cc   :  { %v7895_v49 = vadd.f32 %v7879_v39, %v7861_v56  ;;  %v15549_v50 = vld [vmem:[#allocation11 + $0x2e8] sm:$0xff]  ;;  %v15536_v28 = vld [vmem:[#allocation11 + $0x280] sm:$0xff] }
 0x5cd   :  { %v7772_v55 = vadd.f32 %v7739_v47, %v18044_v51  ;;  %v15537_v56 = vld [vmem:[#allocation11 + $0x288] sm:$0xff] }
 0x5ce   :  { %v7911_v60 = vmax.f32 %v7895_v49, 0.0  ;;  %v15545_v47 = vld [vmem:[#allocation11 + $0x2c8] sm:$0xff]  ;;  %v17875_v49 = vpack.c.b16 %v9274_v26, %v9274_v26 }
 0x5cf   :  { %9159 = vmatpush.bf16.msrb.mxu0 %v15554_v61  ;;  %9172 = vmatpush.bf16.msra.mxu1 %v15562_v34  ;;  %v7836_v46 = vrot.slane %v7772_v55, 6  ;;  %v15584_v61 = vld [vmem:[#allocation11 + $0x400] sm:$0xff]  ;;  %v15613_v26 = vld [vmem:[#allocation11 + $0x4e8] sm:$0xff] }
 0x5d0   :  { %v7923_v15 = vmax.f32 %v7907_v30, %v7911_v60  ;;  %v15592_v34 = vld [vmem:[#allocation11 + $0x440] sm:$0xff]  ;;  %v15583_v30 = vld [vmem:[#allocation11 + $0x3f8] sm:$0xff]  ;;  %v15621_v60 = vld [vmem:[#allocation11 + $0x528] sm:$0xff] }
 0x5d1   :  { %v7837_v11 = vsel %vm7797_vm3, %v7820_v32, %v7836_v46  ;;  %v15547_v32 = vld [vmem:[#allocation11 + $0x2d8] sm:$0xff]  ;;  %v15544_v55 = vld [vmem:[#allocation11 + $0x2c0] sm:$0xff]  ;;  %v15629_v46 = vld [vmem:[#allocation11 + $0x568] sm:$0xff] }
 0x5d2   :  { %v7929_v0 = vpack.c.bf16 %v7923_v15, %v17833_v43  ;;  %v7869_v33 = vmax.f32 %v7756_v7, %v7837_v11  ;;  %v15543_v43 = vld [vmem:[#allocation11 + $0x2b8] sm:$0xff]  ;;  %v15550_v7 = vld [vmem:[#allocation11 + $0x2f0] sm:$0xff]  ;;  %v15620_v11 = vld [vmem:[#allocation11 + $0x520] sm:$0xff] }
 0x5d3   :  { %9160 = vmatpush.bf16.msrb.mxu0 %v15553_v6  ;;  %9173 = vmatpush.bf16.msra.mxu1 %v15561_v37  ;;  %v17877_v6 = vpack.c.b16 %v9275_v22, %v9275_v22  ;;  %v15630_v37 = vld [vmem:[#allocation11 + $0x570] sm:$0xff]  ;;  %v15604_v22 = vld [vmem:[#allocation11 + $0x4a0] sm:$0xff] }
 0x5d4   :  { %v17859_v1 = vadd.f32 %v7879_v39, %v7869_v33  ;;  %v8065_v25 = vunpack.c.l.b16 %v7929_v0  ;;  %v8066_v38 = vunpack.c.h.b16 %v7929_v0  ;;  %v15574_v15 = vld [vmem:[#allocation11 + $0x3b0] sm:$0xff]  ;;  %v15581_v0 = vld [vmem:[#allocation11 + $0x3e8] sm:$0xff]  ;;  %v15619_v33 = vld [vmem:[#allocation11 + $0x518] sm:$0xff] }
 0x5d6   :  { %v17863_v57 = vpack.c.b16 %v8065_v25, %v8065_v25  ;;  %v17865_v21 = vpack.c.b16 %v8066_v38, %v8066_v38  ;;  %v7919_v39 = vmax.f32 %v17859_v1, 0.0  ;;  %v15627_v1 = vld [vmem:[#allocation11 + $0x558] sm:$0xff]  ;;  %v15572_v25 = vld [vmem:[#allocation11 + $0x3a0] sm:$0xff] }
 0x5d7   :  { %9161 = vmatpush.bf16.msrb.mxu0 %v15552_v58  ;;  %9174 = vmatpush.bf16.msra.mxu1 %v15560_v17  ;;  %v15582_v58 = vld [vmem:[#allocation11 + $0x3f0] sm:$0xff]  ;;  %v15580_v38 = vld [vmem:[#allocation11 + $0x3e0] sm:$0xff] }
 0x5d8   :  { %v8073_v54 = vrot.slane %v17863_v57, 1  ;;  %v8074_v24 = vrot.slane %v17865_v21, 1  ;;  %v7927_v10 = vmax.f32 %v7915_v2, %v7919_v39  ;;  %v8638_v17 = vrot.slane %v17863_v57, 2  ;;  %v15652_v2 = vld [vmem:[#allocation11 + $0x620] sm:$0xff] }
 0x5da   :  { %9162 = vmatmul.bf16.vlgmr.msrb.gmra.mxu0 %v8954_v53  ;;  %9175 = vmatmul.bf16.vlgmr.msra.gmra.mxu1 %v8955_v41  ;;  %v17880_v51 = vpack.c.bf16 %v7927_v10, %v17855_v13  ;;  %v8639_v13 = vrot.slane %v17865_v21, 2  ;;  %v15618_v53 = vld [vmem:[#allocation11 + $0x510] sm:$0xff] }
 0x5db   :  { %9478 = vmatpush.bf16.msra.mxu0 %v15591_v52  ;;  %9491 = vmatpush.bf16.msrb.mxu1 %v15599_v8  ;;  %v15628_v52 = vld [vmem:[#allocation11 + $0x560] sm:$0xff]  ;;  %v15573_v8 = vld [vmem:[#allocation11 + $0x3a8] sm:$0xff]  ;;  %v15626_v41 = vld [vmem:[#allocation11 + $0x550] sm:$0xff] }
 0x5dc   :  { %8305 = vmatmul.bf16.vlgmr.msra.gmra.mxu2 %v8073_v54  ;;  %8318 = vmatmul.bf16.vlgmr.msra.gmra.mxu3 %v8074_v24  ;;  %v15570_v54 = vld [vmem:[#allocation11 + $0x390] sm:$0xff] }
 0x5dd   :  { %8862 = vmatpush.bf16.msra.mxu2 %v15543_v43  ;;  %8875 = vmatpush.bf16.msra.mxu3 %v15551_v62  ;;  %v15617_v43 = vld [vmem:[#allocation11 + $0x508] sm:$0xff]  ;;  %v15578_v24 = vld [vmem:[#allocation11 + $0x3d0] sm:$0xff] }
 0x5de   :  { %v15625_v62 = vld [vmem:[#allocation11 + $0x548] sm:$0xff] }
 0x5df   :  { %9479 = vmatpush.bf16.msra.mxu0 %v15590_v14  ;;  %9492 = vmatpush.bf16.msrb.mxu1 %v15598_v5  ;;  %v15571_v14 = vld [vmem:[#allocation11 + $0x398] sm:$0xff] }
 0x5e0   :  { %v15579_v5 = vld [vmem:[#allocation11 + $0x3d8] sm:$0xff] }
 0x5e1   :  { %8863 = vmatpush.bf16.msra.mxu2 %v15542_v23  ;;  %8876 = vmatpush.bf16.msra.mxu3 %v15550_v7  ;;  %v15655_v23 = vld [vmem:[#allocation11 + $0x638] sm:$0xff] }
 0x5e2   :  { %v15663_v7 = vld [vmem:[#allocation11 + $0x678] sm:$0xff] }
 0x5e3   :  { %9480 = vmatpush.bf16.msra.mxu0 %v15589_v16  ;;  %9493 = vmatpush.bf16.msrb.mxu1 %v15597_v29  ;;  %v15616_v16 = vld [vmem:[#allocation11 + $0x500] sm:$0xff] }
 0x5e4   :  { %v15624_v29 = vld [vmem:[#allocation11 + $0x540] sm:$0xff] }
 0x5e5   :  { %8864 = vmatpush.bf16.msra.mxu2 %v15541_v44  ;;  %8877 = vmatpush.bf16.msra.mxu3 %v15549_v50  ;;  %v9596_v44 = vrot.slane %v17875_v49, 1  ;;  %v9597_v50 = vrot.slane %v17877_v6, 1 }
 0x5e7   :  { %9481 = vmatpush.bf16.msra.mxu0 %v15588_v19  ;;  %9494 = vmatpush.bf16.msrb.mxu1 %v15596_v12  ;;  %v15569_v19 = vld [vmem:[#allocation11 + $0x388] sm:$0xff] }
 0x5e8   :  { %v15577_v12 = vld [vmem:[#allocation11 + $0x3c8] sm:$0xff] }
 0x5e9   :  { %8865 = vmatpush.bf16.msra.mxu2 %v15540_v42  ;;  %8878 = vmatpush.bf16.msra.mxu3 %v15548_v40  ;;  %v15568_v42 = vld [vmem:[#allocation11 + $0x380] sm:$0xff] }
 0x5ea   :  { %v15576_v40 = vld [vmem:[#allocation11 + $0x3c0] sm:$0xff] }
 0x5eb   :  { %9482 = vmatpush.bf16.msra.mxu0 %v15587_v45  ;;  %9495 = vmatpush.bf16.msrb.mxu1 %v15595_v48  ;;  %v15654_v45 = vld [vmem:[#allocation11 + $0x630] sm:$0xff] }
 0x5ec   :  { %8553 = vmatmul.bf16.vlgmr.msrb.gmra.mxu2 %v17863_v57  ;;  %8566 = vmatmul.bf16.vlgmr.msrb.gmra.mxu3 %v17865_v21  ;;  %v15662_v48 = vld [vmem:[#allocation11 + $0x670] sm:$0xff] }
 0x5ed   :  { %8866 = vmatpush.bf16.msra.mxu2 %v15539_v35  ;;  %8879 = vmatpush.bf16.msra.mxu3 %v15547_v32  ;;  %v15653_v35 = vld [vmem:[#allocation11 + $0x628] sm:$0xff] }
 0x5ee   :  { %v15661_v32 = vld [vmem:[#allocation11 + $0x668] sm:$0xff] }
 0x5ef   :  { %9483 = vmatpush.bf16.msra.mxu0 %v15586_v3  ;;  %9496 = vmatpush.bf16.msrb.mxu1 %v15594_v9  ;;  %v15607_v3 = vld [vmem:[#allocation11 + $0x4b8] sm:$0xff] }
 0x5f0   :  { %v15615_v9 = vld [vmem:[#allocation11 + $0x4f8] sm:$0xff] }
 0x5f1   :  { %8867 = vmatpush.bf16.msra.mxu2 %v15538_v31  ;;  %8880 = vmatpush.bf16.msra.mxu3 %v15546_v27  ;;  %v15606_v31 = vld [vmem:[#allocation11 + $0x4b0] sm:$0xff] }
 0x5f2   :  { %v15614_v27 = vld [vmem:[#allocation11 + $0x4f0] sm:$0xff] }
 0x5f3   :  { %9484 = vmatpush.bf16.msra.mxu0 %v15585_v63  ;;  %9497 = vmatpush.bf16.msrb.mxu1 %v15593_v18  ;;  %v8956_v63 = vrot.slane %v17863_v57, 3  ;;  %v8957_v18 = vrot.slane %v17865_v21, 3  ;;  %v15651_v57 = vld [vmem:[#allocation11 + $0x618] sm:$0xff] }
 0x5f4   :  { %v15659_v21 = vld [vmem:[#allocation11 + $0x658] sm:$0xff] }
 0x5f5   :  { %8868 = vmatpush.bf16.msra.mxu2 %v15537_v56  ;;  %8881 = vmatpush.bf16.msra.mxu3 %v15545_v47  ;;  %v15612_v56 = vld [vmem:[#allocation11 + $0x4e0] sm:$0xff] }
 0x5f7   :  { %9485 = vmatpush.bf16.msra.mxu0 %v15584_v61  ;;  %9498 = vmatpush.bf16.msrb.mxu1 %v15592_v34 }
 0x5f9   :  { %8869 = vmatpush.bf16.msra.mxu2 %v15536_v28  ;;  %8882 = vmatpush.bf16.msra.mxu3 %v15544_v55  ;;  %v15603_v28 = vld [vmem:[#allocation11 + $0x498] sm:$0xff] }
 0x5fa   :  { %9486 = vmatmul.bf16.vlgmr.msra.gmra.mxu0 %v17875_v49  ;;  %9499 = vmatmul.bf16.vlgmr.msrb.gmra.mxu1 %v17877_v6  ;;  %v15611_v55 = vld [vmem:[#allocation11 + $0x4d8] sm:$0xff] }
 0x5fb   :  { %9796 = vmatpush.bf16.msrb.mxu0 %v15623_v4  ;;  %9809 = vmatpush.bf16.msra.mxu1 %v15631_v20  ;;  %v15660_v4 = vld [vmem:[#allocation11 + $0x660] sm:$0xff]  ;;  %v15605_v20 = vld [vmem:[#allocation11 + $0x4a8] sm:$0xff] }
 0x5fc   :  { %8870 = vmatmul.bf16.vlgmr.msra.gmra.mxu2 %v8638_v17  ;;  %8883 = vmatmul.bf16.vlgmr.msra.gmra.mxu3 %v8639_v13  ;;  %v15648_v17 = vld [vmem:[#allocation11 + $0x600] sm:$0xff] }
 0x5fd   :  { %9180 = vmatpush.bf16.msrb.mxu2 %v15575_v59  ;;  %9193 = vmatpush.bf16.msrb.mxu3 %v15583_v30  ;;  %v15649_v59 = vld [vmem:[#allocation11 + $0x608] sm:$0xff]  ;;  %v15656_v13 = vld [vmem:[#allocation11 + $0x640] sm:$0xff] }
 0x5fe   :  { %v15657_v30 = vld [vmem:[#allocation11 + $0x648] sm:$0xff] }
 0x5ff   :  { %9797 = vmatpush.bf16.msrb.mxu0 %v15622_v36  ;;  %9810 = vmatpush.bf16.msra.mxu1 %v15630_v37  ;;  %v15650_v36 = vld [vmem:[#allocation11 + $0x610] sm:$0xff] }
 0x600   :  { %v15658_v37 = vld [vmem:[#allocation11 + $0x650] sm:$0xff] }
 0x601   :  { %9181 = vmatpush.bf16.msrb.mxu2 %v15574_v15  ;;  %9194 = vmatpush.bf16.msrb.mxu3 %v15582_v58 }
 0x603   :  { %9798 = vmatpush.bf16.msrb.mxu0 %v15621_v60  ;;  %9811 = vmatpush.bf16.msra.mxu1 %v15629_v46  ;;  %v15602_v60 = vld [vmem:[#allocation11 + $0x490] sm:$0xff] }
 0x604   :  { %v15610_v46 = vld [vmem:[#allocation11 + $0x4d0] sm:$0xff] }
 0x605   :  { %9182 = vmatpush.bf16.msrb.mxu2 %v15573_v8  ;;  %9195 = vmatpush.bf16.msrb.mxu3 %v15581_v0  ;;  %v9914_v8 = vrot.slane %v17875_v49, 2  ;;  %v9915_v0 = vrot.slane %v17877_v6, 2  ;;  %v15638_v6 = vld [vmem:[#allocation11 + $0x5b0] sm:$0xff] }
 0x607   :  { %9799 = vmatpush.bf16.msrb.mxu0 %v15620_v11  ;;  %9812 = vmatpush.bf16.msra.mxu1 %v15628_v52  ;;  %v15601_v11 = vld [vmem:[#allocation11 + $0x488] sm:$0xff] }
 0x608   :  { %v15609_v52 = vld [vmem:[#allocation11 + $0x4c8] sm:$0xff] }
 0x609   :  { %9183 = vmatpush.bf16.msrb.mxu2 %v15572_v25  ;;  %9196 = vmatpush.bf16.msrb.mxu3 %v15580_v38  ;;  %v15639_v25 = vld [vmem:[#allocation11 + $0x5b8] sm:$0xff] }
 0x60a   :  { %v15647_v38 = vld [vmem:[#allocation11 + $0x5f8] sm:$0xff] }
 0x60b   :  { %9800 = vmatpush.bf16.msrb.mxu0 %v15619_v33  ;;  %9813 = vmatpush.bf16.msra.mxu1 %v15627_v1  ;;  %v15600_v33 = vld [vmem:[#allocation11 + $0x480] sm:$0xff] }
 0x60c   :  { %v15608_v1 = vld [vmem:[#allocation11 + $0x4c0] sm:$0xff] }
 0x60d   :  { %9184 = vmatpush.bf16.msrb.mxu2 %v15571_v14  ;;  %9197 = vmatpush.bf16.msrb.mxu3 %v15579_v5 }
 0x60f   :  { %9801 = vmatpush.bf16.msrb.mxu0 %v15618_v53  ;;  %9814 = vmatpush.bf16.msra.mxu1 %v15626_v41  ;;  %v9276_v53 = vunpack.c.l.b16 %v17880_v51  ;;  %v9277_v41 = vunpack.c.h.b16 %v17880_v51  ;;  %v15637_v51 = vld [vmem:[#allocation11 + $0x5a8] sm:$0xff] }
 0x611   :  { %9185 = vmatpush.bf16.msrb.mxu2 %v15570_v54  ;;  %9198 = vmatpush.bf16.msrb.mxu3 %v15578_v24  ;;  %v17902_v49 = vpack.c.b16 %v9277_v41, %v9277_v41  ;;  %v15645_v54 = vld [vmem:[#allocation11 + $0x5e8] sm:$0xff] }
 0x613   :  { %9802 = vmatpush.bf16.msrb.mxu0 %v15617_v43  ;;  %9815 = vmatpush.bf16.msra.mxu1 %v15625_v62  ;;  %v17900_v43 = vpack.c.b16 %v9276_v53, %v9276_v53  ;;  %v15646_v62 = vld [vmem:[#allocation11 + $0x5f0] sm:$0xff] }
 0x615   :  { %9186 = vmatpush.bf16.msrb.mxu2 %v15569_v19  ;;  %9199 = vmatpush.bf16.msrb.mxu3 %v15577_v12  ;;  %v15635_v19 = vld [vmem:[#allocation11 + $0x598] sm:$0xff] }
 0x616   :  { %v15643_v12 = vld [vmem:[#allocation11 + $0x5d8] sm:$0xff] }
 0x617   :  { %9803 = vmatpush.bf16.msrb.mxu0 %v15616_v16  ;;  %9816 = vmatpush.bf16.msra.mxu1 %v15624_v29  ;;  %v8280_v39 = vpop.f32.mrf.mxu0  ;;  %v8293_v61 = vpop.f32.mrf.mxu1 }
 0x618   :  { %v17890_v34 = vadd.f32 %v8293_v61, %v8280_v39  ;;  %v15669_v39 = vld [vmem:[#allocation11 + $0x6a8] sm:$0xff] }
 0x619   :  { %9187 = vmatpush.bf16.msrb.mxu2 %v15568_v42  ;;  %9200 = vmatpush.bf16.msrb.mxu3 %v15576_v40  ;;  %v15633_v42 = vld [vmem:[#allocation11 + $0x588] sm:$0xff] }
 0x61a   :  { %9804 = vmatmul.bf16.vlgmr.msrb.gmra.mxu0 %v9596_v44  ;;  %9817 = vmatmul.bf16.vlgmr.msra.gmra.mxu1 %v9597_v50  ;;  %v15641_v40 = vld [vmem:[#allocation11 + $0x5c8] sm:$0xff] }
 0x61b   :  { %10114 = vmatpush.bf16.msra.mxu0 %v15655_v23  ;;  %10127 = vmatpush.bf16.msrb.mxu1 %v15663_v7  ;;  %v15636_v23 = vld [vmem:[#allocation11 + $0x5a0] sm:$0xff]  ;;  %v15677_v61 = vld [vmem:[#allocation11 + $0x6e8] sm:$0xff] }
 0x61c   :  { %9188 = vmatmul.bf16.vlgmr.msrb.gmra.mxu2 %v8956_v63  ;;  %9201 = vmatmul.bf16.vlgmr.msrb.gmra.mxu3 %v8957_v18  ;;  %v15644_v7 = vld [vmem:[#allocation11 + $0x5e0] sm:$0xff]  ;;  %v9598_v63 = vrot.slane %v17900_v43, 1  ;;  %v9599_v18 = vrot.slane %v17902_v49, 1 }
 0x61d   :  { %9504 = vmatpush.bf16.msra.mxu2 %v15607_v3  ;;  %9517 = vmatpush.bf16.msra.mxu3 %v15615_v9  ;;  %v15632_v3 = vld [vmem:[#allocation11 + $0x580] sm:$0xff] }
 0x61e   :  { %v15640_v9 = vld [vmem:[#allocation11 + $0x5c0] sm:$0xff] }
 0x61f   :  { %10115 = vmatpush.bf16.msra.mxu0 %v15654_v45  ;;  %10128 = vmatpush.bf16.msrb.mxu1 %v15662_v48  ;;  %v8282_v47 = vpop.f32.mrf.mxu0  ;;  %v8295_v10 = vpop.f32.mrf.mxu1  ;;  %v15634_v45 = vld [vmem:[#allocation11 + $0x590] sm:$0xff] }
 0x620   :  { %v15642_v48 = vld [vmem:[#allocation11 + $0x5d0] sm:$0xff] }
 0x621   :  { %9505 = vmatpush.bf16.msra.mxu2 %v15606_v31  ;;  %9518 = vmatpush.bf16.msra.mxu3 %v15614_v27  ;;  %v15670_v31 = vld [vmem:[#allocation11 + $0x6b0] sm:$0xff] }
 0x622   :  { %v15678_v27 = vld [vmem:[#allocation11 + $0x6f0] sm:$0xff] }
 0x623   :  { %10116 = vmatpush.bf16.msra.mxu0 %v15653_v35  ;;  %10129 = vmatpush.bf16.msrb.mxu1 %v15661_v32  ;;  %v15671_v35 = vld [vmem:[#allocation11 + $0x6b8] sm:$0xff] }
 0x624   :  { %v15679_v32 = vld [vmem:[#allocation11 + $0x6f8] sm:$0xff] }
 0x625   :  { %9506 = vmatpush.bf16.msra.mxu2 %v15605_v20  ;;  %9519 = vmatpush.bf16.msra.mxu3 %v15613_v26  ;;  %v15668_v26 = vld [vmem:[#allocation11 + $0x6a0] sm:$0xff] }
 0x627   :  { %10117 = vmatpush.bf16.msra.mxu0 %v15652_v2  ;;  %10130 = vmatpush.bf16.msrb.mxu1 %v15660_v4  ;;  %v17892_v15 = vpop.f32.mrf.mxu0  ;;  %v17894_v58 = vpop.f32.mrf.mxu1 }
 0x629   :  { %9507 = vmatpush.bf16.msra.mxu2 %v15604_v22  ;;  %9520 = vmatpush.bf16.msra.mxu3 %v15612_v56  ;;  %v15675_v22 = vld [vmem:[#allocation11 + $0x6d8] sm:$0xff] }
 0x62b   :  { %10118 = vmatpush.bf16.msra.mxu0 %v15651_v57  ;;  %10131 = vmatpush.bf16.msrb.mxu1 %v15659_v21  ;;  %v15676_v57 = vld [vmem:[#allocation11 + $0x6e0] sm:$0xff]  ;;  %v15667_v21 = vld [vmem:[#allocation11 + $0x698] sm:$0xff] }
 0x62d   :  { %9508 = vmatpush.bf16.msra.mxu2 %v15603_v28  ;;  %9521 = vmatpush.bf16.msra.mxu3 %v15611_v55  ;;  %v15666_v28 = vld [vmem:[#allocation11 + $0x690] sm:$0xff] }
 0x62e   :  { %v15674_v55 = vld [vmem:[#allocation11 + $0x6d0] sm:$0xff] }
 0x62f   :  { %10119 = vmatpush.bf16.msra.mxu0 %v15650_v36  ;;  %10132 = vmatpush.bf16.msrb.mxu1 %v15658_v37  ;;  %v8530_v14 = vpop.f32.mrf.mxu0  ;;  %v8543_v5 = vpop.f32.mrf.mxu1 }
 0x631   :  { %9509 = vmatpush.bf16.msra.mxu2 %v15602_v60  ;;  %9522 = vmatpush.bf16.msra.mxu3 %v15610_v46  ;;  %v15665_v60 = vld [vmem:[#allocation11 + $0x688] sm:$0xff] }
 0x632   :  { %v15673_v46 = vld [vmem:[#allocation11 + $0x6c8] sm:$0xff] }
 0x633   :  { %10120 = vmatpush.bf16.msra.mxu0 %v15649_v59  ;;  %10133 = vmatpush.bf16.msrb.mxu1 %v15657_v30 }
 0x635   :  { %9510 = vmatpush.bf16.msra.mxu2 %v15601_v11  ;;  %9523 = vmatpush.bf16.msra.mxu3 %v15609_v52  ;;  %v15664_v52 = vld [vmem:[#allocation11 + $0x680] sm:$0xff] }
 0x637   :  { %10121 = vmatpush.bf16.msra.mxu0 %v15648_v17  ;;  %10134 = vmatpush.bf16.msrb.mxu1 %v15656_v13  ;;  %v8845_v24 = vpop.f32.mrf.mxu0  ;;  %v8858_v16 = vpop.f32.mrf.mxu1 }
 0x638   :  { %v17906_v29 = vadd.f32 %v8858_v16, %v8845_v24 }
 0x639   :  { %9511 = vmatpush.bf16.msra.mxu2 %v15600_v33  ;;  %9524 = vmatpush.bf16.msra.mxu3 %v15608_v1 }
 0x63a   :  { %10122 = vmatmul.bf16.vlgmr.msra.gmra.mxu0 %v9914_v8  ;;  %10135 = vmatmul.bf16.vlgmr.msrb.gmra.mxu1 %v9915_v0  ;;  %v15672_v8 = vld [vmem:[#allocation11 + $0x6c0] sm:$0xff]  ;;  %v9917_v0 = vrot.slane %v17902_v49, 2 }
 0x63c   :  { %9512 = vmatmul.bf16.vlgmr.msra.gmra.mxu2 %v17900_v43  ;;  %9525 = vmatmul.bf16.vlgmr.msra.gmra.mxu3 %v17902_v49 }
 0x63d   :  { %9822 = vmatpush.bf16.msrb.mxu2 %v15639_v25  ;;  %9835 = vmatpush.bf16.msrb.mxu3 %v15647_v38 }
 0x63f   :  { %v8847_v44 = vpop.f32.mrf.mxu0  ;;  %v8860_v50 = vpop.f32.mrf.mxu1 }
 0x641   :  { %9823 = vmatpush.bf16.msrb.mxu2 %v15638_v6  ;;  %9836 = vmatpush.bf16.msrb.mxu3 %v15646_v62 }
 0x645   :  { %9824 = vmatpush.bf16.msrb.mxu2 %v15637_v51  ;;  %9837 = vmatpush.bf16.msrb.mxu3 %v15645_v54 }
 0x649   :  { %9825 = vmatpush.bf16.msrb.mxu2 %v15636_v23  ;;  %9838 = vmatpush.bf16.msrb.mxu3 %v15644_v7 }
 0x64d   :  { %9826 = vmatpush.bf16.msrb.mxu2 %v15635_v19  ;;  %9839 = vmatpush.bf16.msrb.mxu3 %v15643_v12 }
 0x651   :  { %9827 = vmatpush.bf16.msrb.mxu2 %v15634_v45  ;;  %9840 = vmatpush.bf16.msrb.mxu3 %v15642_v48 }
 0x655   :  { %9828 = vmatpush.bf16.msrb.mxu2 %v15633_v42  ;;  %9841 = vmatpush.bf16.msrb.mxu3 %v15641_v40 }
 0x657   :  { %v9163_v2 = vpop.f32.mrf.mxu0  ;;  %v9176_v4 = vpop.f32.mrf.mxu1 }
 0x658   :  { %v9177_v20 = vadd.f32 %v9176_v4, %v9163_v2  ;;  %v15687_v4 = vld [vmem:[#allocation14 + $0x38] sm:$0xff] }
 0x659   :  { %9829 = vmatpush.bf16.msrb.mxu2 %v15632_v3  ;;  %9842 = vmatpush.bf16.msrb.mxu3 %v15640_v9 }
 0x65a   :  { %10242 = vmatpush.bf16.msrb.mxu0 %v15687_v4 }
 0x65c   :  { %9830 = vmatmul.bf16.vlgmr.msrb.gmra.mxu2 %v9598_v63  ;;  %9843 = vmatmul.bf16.vlgmr.msrb.gmra.mxu3 %v9599_v18 }
 0x65d   :  { %10140 = vmatpush.bf16.msra.mxu2 %v15671_v35  ;;  %10153 = vmatpush.bf16.msra.mxu3 %v15679_v32 }
 0x65f   :  { %v9165_v56 = vpop.f32.mrf.mxu0  ;;  %v9178_v47 = vpop.f32.mrf.mxu1 }
 0x660   :  { %v8306_v10 = vpop.f32.mrf.mxu2  ;;  %v8319_v36 = vpop.f32.mrf.mxu3  ;;  %v15683_v56 = vld [vmem:[#allocation14 + $0x18] sm:$0xff] }
 0x661   :  { %10141 = vmatpush.bf16.msra.mxu2 %v15670_v31  ;;  %10154 = vmatpush.bf16.msra.mxu3 %v15678_v27  ;;  %v8307_v37 = vadd.f32 %v8306_v10, %v17890_v34  ;;  %v9916_v34 = vrot.slane %v17900_v43, 2 }
 0x663   :  { %v8320_v59 = vadd.f32 %v8319_v36, %v8307_v37 }
 0x665   :  { %10142 = vmatpush.bf16.msra.mxu2 %v15669_v39  ;;  %10155 = vmatpush.bf16.msra.mxu3 %v15677_v61  ;;  %v8529_v30 = vadd.f32 %v17892_v15, %v8320_v59 }
 0x667   :  { %v8542_v17 = vadd.f32 %v17894_v58, %v8529_v30  ;;  %v15682_v30 = vld [vmem:[#allocation14 + $0x10] sm:$0xff] }
 0x668   :  { %v8308_v13 = vpop.f32.mrf.mxu2  ;;  %v8321_v11 = vpop.f32.mrf.mxu3 }
 0x669   :  { %10143 = vmatpush.bf16.msra.mxu2 %v15668_v26  ;;  %10156 = vmatpush.bf16.msra.mxu3 %v15676_v57  ;;  %v15686_v26 = vld [vmem:[#allocation14 + $0x30] sm:$0xff] }
 0x66a   :  { %10243 = vmatpush.bf16.msrb.mxu0 %v15686_v26 }
 0x66d   :  { %10144 = vmatpush.bf16.msra.mxu2 %v15667_v21  ;;  %10157 = vmatpush.bf16.msra.mxu3 %v15675_v22  ;;  %v15684_v22 = vld [vmem:[#allocation14 + $0x20] sm:$0xff] }
 0x670   :  { %v8554_v33 = vpop.f32.mrf.mxu2  ;;  %v8567_v15 = vpop.f32.mrf.mxu3 }
 0x671   :  { %10145 = vmatpush.bf16.msra.mxu2 %v15666_v28  ;;  %10158 = vmatpush.bf16.msra.mxu3 %v15674_v55  ;;  %v8555_v1 = vadd.f32 %v8554_v33, %v8542_v17 }
 0x673   :  { %v8568_v25 = vadd.f32 %v8567_v15, %v8555_v1 }
 0x675   :  { %10146 = vmatpush.bf16.msra.mxu2 %v15665_v60  ;;  %10159 = vmatpush.bf16.msra.mxu3 %v15673_v46  ;;  %v15681_v60 = vld [vmem:[#allocation14 + $0x8] sm:$0xff]  ;;  %v15680_v46 = vld [vmem:[#allocation14] sm:$0xff] }
 0x677   :  { %v9487_v38 = vpop.f32.mrf.mxu0  ;;  %v9500_v58 = vpop.f32.mrf.mxu1 }
 0x678   :  { %v9501_v53 = vadd.f32 %v9500_v58, %v9487_v38  ;;  %v8556_v41 = vpop.f32.mrf.mxu2  ;;  %v8569_v14 = vpop.f32.mrf.mxu3  ;;  %v15709_v38 = vld [vmem:[#allocation15] ss:$0 sm:$0xff] }
 0x679   :  { %10147 = vmatpush.bf16.msra.mxu2 %v15664_v52  ;;  %10160 = vmatpush.bf16.msra.mxu3 %v15672_v8  ;;  %v15708_v8 = vld [vmem:[#allocation12] ss:$0 sm:$0xff] }
 0x67c   :  { %10148 = vmatmul.bf16.vlgmr.msra.gmra.mxu2 %v9916_v34  ;;  %10161 = vmatmul.bf16.vlgmr.msra.gmra.mxu3 %v9917_v0 }
 0x67f   :  { %v9489_v5 = vpop.f32.mrf.mxu0  ;;  %v9502_v6 = vpop.f32.mrf.mxu1 }
 0x680   :  { %v8871_v62 = vpop.f32.mrf.mxu2  ;;  %v8884_v51 = vpop.f32.mrf.mxu3 }
 0x681   :  { %v8872_v54 = vadd.f32 %v8871_v62, %v17906_v29 }
 0x683   :  { %v8885_v43 = vadd.f32 %v8884_v51, %v8872_v54 }
 0x685   :  { %v8888_v24 = vadd.f32 %v8885_v43, %v8568_v25 }
 0x688   :  { %v8873_v49 = vpop.f32.mrf.mxu2  ;;  %v8886_v16 = vpop.f32.mrf.mxu3 }
 0x697   :  { %v9805_v23 = vpop.f32.mrf.mxu0  ;;  %v9818_v7 = vpop.f32.mrf.mxu1 }
 0x698   :  { %v9819_v19 = vadd.f32 %v9818_v7, %v9805_v23 }
 0x69f   :  { %v9807_v12 = vpop.f32.mrf.mxu0  ;;  %v9820_v44 = vpop.f32.mrf.mxu1 }
 0x6a0   :  { %v9189_v50 = vpop.f32.mrf.mxu2  ;;  %v9202_v45 = vpop.f32.mrf.mxu3 }
 0x6a1   :  { %v9190_v48 = vadd.f32 %v9189_v50, %v9177_v20  ;;  %v15685_v20 = vld [vmem:[#allocation14 + $0x28] sm:$0xff] }
 0x6a2   :  { %10244 = vmatpush.bf16.msrb.mxu0 %v15685_v20 }
 0x6a3   :  { %v9203_v42 = vadd.f32 %v9202_v45, %v9190_v48 }
 0x6a5   :  { %v9206_v40 = vadd.f32 %v9203_v42, %v8888_v24 }
 0x6a6   :  { %10245 = vmatpush.bf16.msrb.mxu0 %v15684_v22 }
 0x6a8   :  { %v9191_v3 = vpop.f32.mrf.mxu2  ;;  %v9204_v9 = vpop.f32.mrf.mxu3 }
 0x6aa   :  { %10246 = vmatpush.bf16.msrb.mxu0 %v15683_v56 }
 0x6ae   :  { %10247 = vmatpush.bf16.msrb.mxu0 %v15682_v30 }
 0x6b2   :  { %10248 = vmatpush.bf16.msrb.mxu0 %v15681_v60 }
 0x6b6   :  { %10249 = vmatpush.bf16.msrb.mxu0 %v15680_v46 }
 0x6b7   :  { %v10123_v35 = vpop.f32.mrf.mxu0  ;;  %v10136_v32 = vpop.f32.mrf.mxu1 }
 0x6b8   :  { %v10137_v63 = vadd.f32 %v10136_v32, %v10123_v35 }
 0x6bf   :  { %v10125_v29 = vpop.f32.mrf.mxu0  ;;  %v10138_v18 = vpop.f32.mrf.mxu1 }
 0x6c0   :  { %v9513_v31 = vpop.f32.mrf.mxu2  ;;  %v9526_v27 = vpop.f32.mrf.mxu3 }
 0x6c1   :  { %v9514_v39 = vadd.f32 %v9513_v31, %v9501_v53 }
 0x6c3   :  { %v9527_v61 = vadd.f32 %v9526_v27, %v9514_v39 }
 0x6c5   :  { %v9530_v2 = vadd.f32 %v9527_v61, %v9206_v40 }
 0x6c8   :  { %v9515_v57 = vpop.f32.mrf.mxu2  ;;  %v9528_v21 = vpop.f32.mrf.mxu3 }
 0x6df   :  { %v9831_v47 = vpop.f32.mrf.mxu2  ;;  %v9844_v10 = vpop.f32.mrf.mxu3 }
 0x6e0   :  { %v9832_v36 = vadd.f32 %v9831_v47, %v9819_v19 }
 0x6e2   :  { %v9845_v37 = vadd.f32 %v9844_v10, %v9832_v36 }
 0x6e4   :  { %v9848_v28 = vadd.f32 %v9845_v37, %v9530_v2 }
 0x6e7   :  { %v9833_v55 = vpop.f32.mrf.mxu2  ;;  %v9846_v59 = vpop.f32.mrf.mxu3 }
 0x6ff   :  { %v10149_v17 = vpop.f32.mrf.mxu2  ;;  %v10162_v13 = vpop.f32.mrf.mxu3 }
 0x700   :  { %v10150_v11 = vadd.f32 %v10149_v17, %v10137_v63 }
 0x702   :  { %v10163_v52 = vadd.f32 %v10162_v13, %v10150_v11 }
 0x704   :  { %v10166_v34 = vadd.f32 %v10163_v52, %v9848_v28 }
 0x706   :  { %v10171_v0 = vadd.f32 %v15708_v8, %v10166_v34 }
 0x707   :  { %v10151_v33 = vpop.f32.mrf.mxu2  ;;  %v10164_v15 = vpop.f32.mrf.mxu3 }
 0x708   :  { %v10172_v1 = vmax.f32 %v10171_v0, 0.0 }
 0x70a   :  { %v10173_v25 = vpack.c.bf16 %v10172_v1, %v10172_v1 }
 0x70c   :  { %10250 = vmatmul.bf16.vlgmr.msrb.gmra.mxu0 %v10173_v25 }
 0x789   :  { %v10251_v58 = vpop.f32.mrf.mxu0 }
 0x78a   :  { %v10252_v53 = vadd.f32 %v15709_v38, %v10251_v58 }
 0x78c   :  { %10255 = vst [vmem:[#allocation17] sm:$0x3] %v10252_v53 }
 0x78d   :  { %10266 = dma.vmem_to_hbm [thread:$0]  %s10262_s13, 32, %s10264_s16, [#allocation5]  }
 0x791   :  { %v10253_v41 = vpop.f32.mrf.mxu0 }
 0x792   :  { %15937 = dma.done.wait [#allocation5], 32  }
 0x793   :  { %15938 = vsyncadd [#allocation5], 4294967264 }
 0x794   :  { %10271 = vsyncpa [#allocation4], 1 }
 0x795   :  { %10272 = vsyncpa [#allocation7], 1 }
 0x796   :  { %10273 = vsyncpa [#allocation10], 1 }
 0x797   :  { %10274 = vsyncpa [#allocation13], 1 }
 0x798   :  { %10275 = vsyncpa [#allocation16], 1 }
 0x799   :  { %10276 = vsyncpa [#allocation5], 1 }

</bundles_post_ra>
